<compile_context>
chip_gen: v6e
topology: v6e:2x2x1
jax: 0.10.0
libtpu: 0.0.40
codegen_flags: <defaults>
</compile_context>

<pallas_src>
import jax
import jax.numpy as jnp
from jax.experimental import pallas as pl
from jax.experimental.pallas import tpu as pltpu

DEGREE = 3                # NET_Simple default degree -> 9 polynomial features
HIDDEN = 32               # hidden_layer_size kwarg (module default is 10; we use 32)
N_EPS = 6                 # number of NET_Simple correctors
FUSED = N_EPS * HIDDEN    # 192 fused hidden width
NFEAT = 3 * DEGREE        # 9 polynomial features
BLOCK_N = 2048            # points per grid step (amortizes per-step pipeline overhead)
MIN_BLOCK_N = 512         # smallest block worth the pipeline overhead


def corrector_kernel(scale_ref, k_ref, w0_ref, w1_ref, w2_ref, w3_ref, out_ref):
    # k block with points on the lane axis: [3, BLOCK_N] f32
    kT = k_ref[...]
    k1 = kT[0:1, :]
    k2 = kT[1:2, :]
    k3 = kT[2:3, :]
    kk = k1 * k1 + k2 * k2 + k3 * k3                         # [1, BN]

    # global exp(-||k||_{-1}) scale (precomputed in wrapper), folded with 1/kk.
    # approx reciprocal = single EUP op, ~2^-12 rel err; k is bounded away from 0.
    scale = scale_ref[0, 0]
    factor = scale * pl.reciprocal(kk, approx=True)          # [1, BN]

    # polynomial features, power-major rows: [k1,k2,k3, k1^2,k2^2,k3^2, k1^3,...]
    k_sq = kT * kT
    k_cu = k_sq * kT
    x = jnp.concatenate([kT, k_sq, k_cu], axis=0)            # [9, BN] f32

    # fused 6-MLP chain; every tanh sees a lane-dense [192, BN] activation.
    # Activations are cast to each weight's dtype right before the dot (bf16
    # MXU fast path when the packed weights are bf16); accumulation stays f32.
    # tanh stays f32 (v5e has no bf16 EUP).
    # TODO(synk): on v6e/v7x, tanh on bf16 activations ~halves the EUP critical
    #             path; gate on chip generation before enabling.
    h = jnp.tanh(jnp.dot(w0_ref[...], x.astype(w0_ref.dtype),
                         preferred_element_type=jnp.float32))   # [192, BN]
    h = jnp.tanh(jnp.dot(w1_ref[...], h.astype(w1_ref.dtype),
                         preferred_element_type=jnp.float32))   # [192, BN]
    h = jnp.tanh(jnp.dot(w2_ref[...], h.astype(w2_ref.dtype),
                         preferred_element_type=jnp.float32))   # [192, BN]
    e = jnp.tanh(jnp.dot(w3_ref[...], h.astype(w3_ref.dtype),
                         preferred_element_type=jnp.float32))   # [6, BN]

    eps21 = e[0:1, :]
    eps31 = e[1:2, :]
    eps12 = e[2:3, :]
    eps32 = e[3:4, :]
    eps13 = e[4:5, :]
    eps23 = e[5:6, :]

    # 3x3 tensor field.  Epilogue is a handful of [1, BN] VPU ops, hidden under
    # the MXU/EUP critical path -- restructure to full-sublane tiles only if a
    # bundle dump shows VALU/XLU saturation.
    E11 = k2 * eps21 + k3 * eps31
    E12 = -k2 * eps12
    E13 = -k3 * eps13
    E21 = -k1 * eps21
    E22 = k1 * eps12 + k3 * eps32
    E23 = -k3 * eps23
    E31 = -k1 * eps31
    E32 = -k2 * eps32
    E33 = k1 * eps13 + k2 * eps23

    # row-major 3x3 -> rows of the [9, BN] output block (lane-dense store)
    mat = jnp.concatenate([E11, E12, E13, E21, E22, E23, E31, E32, E33], axis=0)
    out_ref[...] = mat * factor


def _choose_block_n(n):
    """Big blocks amortize per-step overhead; for small N keep >= 2 blocks when
    possible so both v7x TensorCores get work via the 'parallel' grid axis."""
    if n > BLOCK_N:
        return BLOCK_N
    half = (n + 1) // 2
    bn = ((half + 127) // 128) * 128          # lane-aligned
    return max(MIN_BLOCK_N, min(bn, BLOCK_N))


def _corrector_lanes(scale, kT_pad, w0f, w1f, w2f, w3f, block_n):
    """Slab-level entry: kT_pad [3, n_pad] (n_pad % block_n == 0) -> [9, n_pad]."""
    n_pad = kT_pad.shape[1]
    n_blocks = n_pad // block_n
    const = lambda i: (0, 0)
    return pl.pallas_call(
        corrector_kernel,
        out_shape=jax.ShapeDtypeStruct((9, n_pad), jnp.float32),
        grid_spec=pltpu.PrefetchScalarGridSpec(
            num_scalar_prefetch=0,
            grid=(n_blocks,),
            in_specs=[
                pl.BlockSpec(memory_space=pltpu.MemorySpace.SMEM),  # scale (1, 1)
                pl.BlockSpec((3, block_n), lambda i: (0, i)),       # k^T block
                pl.BlockSpec((FUSED, NFEAT), const),                # W0f (VMEM-resident)
                pl.BlockSpec((FUSED, FUSED), const),                # W1f (VMEM-resident)
                pl.BlockSpec((FUSED, FUSED), const),                # W2f (VMEM-resident)
                pl.BlockSpec((N_EPS, FUSED), const),                # W3f (VMEM-resident)
            ],
            out_specs=pl.BlockSpec((9, block_n), lambda i: (0, i)),
        ),
        compiler_params=pltpu.CompilerParams(
            dimension_semantics=("parallel",),
            vmem_limit_bytes=32 * 1024 * 1024,
        ),
    )(scale, kT_pad, w0f, w1f, w2f, w3f)


@jax.jit
def net_corrector(k, w0f, w1f, w2f, w3f):
    """k: [N, 3] f32; packed weights: w0f [192, 9] (keep f32), w1f/w2f [192, 192],
    w3f [6, 192] (f32 or bf16 -- bf16 selects the MXU fast path)."""
    n = k.shape[0]
    k = k.astype(jnp.float32)

    # global p=-1 norm of the FULL k array (torch `k.norm(-1)`), hoisted out of the kernel
    kk_p = 1.0 / jnp.sum(1.0 / jnp.abs(k))
    scale = jnp.exp(-kk_p).reshape(1, 1).astype(jnp.float32)

    block_n = _choose_block_n(n)
    n_pad = pl.cdiv(n, block_n) * block_n
    # pad with 1.0 so kk stays nonzero in the (discarded) padded region
    kT = jnp.pad(k.T, ((0, 0), (0, n_pad - n)), constant_values=1.0)    # [3, n_pad]

    out_flat = _corrector_lanes(scale, kT, w0f, w1f, w2f, w3f, block_n)
    return out_flat[:, :n].T.reshape(n, 3, 3)


def pack_weights(w0, w1, w2, w3, hidden_dtype=jnp.float32):
    """Pack per-module torch-layout weights (fc.weight) into the fused kernel layout.

    w0: [6, H, 9], w1/w2: [6, H, H], w3: [6, 1, H].
    Returns: w0f [6H, 9] f32 (power-major feature columns), block-diagonal
             w1f/w2f [6H, 6H] and w3f [6, 6H] cast to `hidden_dtype`.
    Use hidden_dtype=jnp.bfloat16 for the bf16 MXU fast path: W0 (wide-dynamic-
    range polynomial features, K=9) stays f32, the big hidden matmuls go bf16.
    """
    n_eps, h, nfeat = w0.shape
    # torch feature index 3*j + (p-1)  ->  kernel power-major index 3*(p-1) + j
    perm = jnp.array([3 * j + p for p in range(DEGREE) for j in range(3)], dtype=jnp.int32)
    w0f = w0.reshape(n_eps * h, nfeat)[:, perm].astype(jnp.float32)

    def bdiag(ws):
        out = jnp.zeros((n_eps * h, n_eps * h), ws.dtype)
        for i in range(n_eps):
            out = out.at[i * h:(i + 1) * h, i * h:(i + 1) * h].set(ws[i])
        return out

    w1f = bdiag(w1).astype(hidden_dtype)
    w2f = bdiag(w2).astype(hidden_dtype)

    w3f = jnp.zeros((n_eps, n_eps * h), w3.dtype)
    for i in range(n_eps):
        w3f = w3f.at[i, i * h:(i + 1) * h].set(w3[i, 0])
    w3f = w3f.astype(hidden_dtype)
    return w0f, w1f, w2f, w3f


def reference(k, w0, w1, w2, w3):
    """Pure-JAX reproduction of the PyTorch forward (per-module torch-layout weights)."""
    n = k.shape[0]
    k1, k2, k3 = k[:, 0], k[:, 1], k[:, 2]
    kk = k1 ** 2 + k2 ** 2 + k3 ** 2
    power = jnp.arange(1, DEGREE + 1, dtype=k.dtype)
    x = (k[:, :, None] ** power).reshape(n, 3 * DEGREE)
    kk_p = jnp.sum(jnp.abs(k) ** (-1.0)) ** (-1.0)       # torch k.norm(-1): scalar p=-1 norm
    scale = jnp.exp(-kk_p)
    eps = []
    for i in range(N_EPS):
        hdn = jnp.tanh(x @ w0[i].T)
        hdn = jnp.tanh(hdn @ w1[i].T)
        hdn = jnp.tanh(hdn @ w2[i].T)
        o = jnp.tanh(hdn @ w3[i].T)[:, 0]
        eps.append(o * scale)
    eps21, eps31, eps12, eps32, eps13, eps23 = eps
    E11 = k2 * eps21 + k3 * eps31
    E21 = -k1 * eps21
    E31 = -k1 * eps31
    E12 = -k2 * eps12
    E22 = k1 * eps12 + k3 * eps32
    E32 = -k2 * eps32
    E13 = -k3 * eps13
    E23 = -k3 * eps23
    E33 = k1 * eps13 + k2 * eps23
    col1 = jnp.stack([E11, E21, E31], axis=-1)
    col2 = jnp.stack([E12, E22, E32], axis=-1)
    col3 = jnp.stack([E13, E23, E33], axis=-1)
    out = jnp.stack([col1, col2, col3], axis=-1)
    return out / kk[:, None, None]


if __name__ == "__main__":
    key = jax.random.PRNGKey(0)
    keys = jax.random.split(key, 2 + 4 * N_EPS)
    k_mag, k_sign, wkeys = keys[0], keys[1], keys[2:]

    # N > BLOCK_N and not a multiple -> exercises a 2-step "parallel" grid
    # (one block per v7x TensorCore) and the padded tail.
    N = 3000
    # deterministic wavevectors, kept away from 0 so 1/|k| and 1/kk are well-behaved
    k = jax.random.uniform(k_mag, (N, 3), jnp.float32, 0.3, 2.0)
    sign = jnp.where(jax.random.bernoulli(k_sign, 0.5, (N, 3)), 1.0, -1.0)
    k = k * sign

    def init_linear(kk_, fan_in, shape):
        # torch.nn.Linear default init: U(-1/sqrt(fan_in), 1/sqrt(fan_in)); torch layout [out, in]
        bound = 1.0 / float(fan_in) ** 0.5
        return jax.random.uniform(kk_, shape, jnp.float32, -bound, bound)

    w0 = jnp.stack([init_linear(wkeys[4 * i + 0], 3 * DEGREE, (HIDDEN, 3 * DEGREE))
                    for i in range(N_EPS)])                   # fc0.weight per module
    w1 = jnp.stack([init_linear(wkeys[4 * i + 1], HIDDEN, (HIDDEN, HIDDEN))
                    for i in range(N_EPS)])                   # fc1.weight
    w2 = jnp.stack([init_linear(wkeys[4 * i + 2], HIDDEN, (HIDDEN, HIDDEN))
                    for i in range(N_EPS)])                   # fc2.weight
    w3 = jnp.stack([init_linear(wkeys[4 * i + 3], HIDDEN, (1, HIDDEN))
                    for i in range(N_EPS)])                   # fc3.weight

    ref = reference(k, w0, w1, w2, w3)

    # 1) all-f32 packing: validates the fused kernel structure tightly.
    w_f32 = pack_weights(w0, w1, w2, w3, hidden_dtype=jnp.float32)
    out_f32 = jax.block_until_ready(net_corrector(k, *w_f32))
    assert out_f32.shape == (N, 3, 3), out_f32.shape
    err_f32 = float(jnp.max(jnp.abs(out_f32 - ref)))
    assert jnp.allclose(out_f32, ref, rtol=1e-3, atol=1e-3), err_f32

    # 2) bf16 hidden-layer packing (recommended perf path, MXU bf16 fast path);
    #    tolerance reflects bf16 operand precision (~2^-9 rounding per operand
    #    over three 32-wide contractions, accumulation still f32).
    w_bf16 = pack_weights(w0, w1, w2, w3, hidden_dtype=jnp.bfloat16)
    out_bf16 = jax.block_until_ready(net_corrector(k, *w_bf16))
    err_bf16 = float(jnp.max(jnp.abs(out_bf16 - ref)))
    assert jnp.allclose(out_bf16, ref, rtol=3e-2, atol=3e-2), err_bf16

    print("KERNEL_OK")
</pallas_src>

<mosaic_0001>
module attributes {stable_mosaic.version = 11 : i64} {
  func.func @corrector_kernel(%arg0: i32, %arg1: memref<1x1xf32, #tpu.memory_space<smem>>, %arg2: memref<3x2048xf32, #tpu.memory_space<vmem>>, %arg3: memref<192x9xf32, #tpu.memory_space<vmem>>, %arg4: memref<192x192xf32, #tpu.memory_space<vmem>>, %arg5: memref<192x192xf32, #tpu.memory_space<vmem>>, %arg6: memref<6x192xf32, #tpu.memory_space<vmem>>, %arg7: memref<9x2048xf32, #tpu.memory_space<vmem>>) attributes {dimension_semantics = [#tpu.dimension_semantics<parallel>], iteration_bounds = array<i64: 2>, scalar_prefetch = 0 : i64, scratch_operands = 0 : i64, tpu.core_type = #tpu.core_type<tc>, window_params = [{transform_indices = @transform_0, window_bounds = array<i64: 1, 1>}, {transform_indices = @transform_1, window_bounds = array<i64: 3, 2048>}, {pipeline_mode = #tpu.pipeline_mode<synchronous>, transform_indices = @transform_2, window_bounds = array<i64: 192, 9>}, {pipeline_mode = #tpu.pipeline_mode<synchronous>, transform_indices = @transform_3, window_bounds = array<i64: 192, 192>}, {pipeline_mode = #tpu.pipeline_mode<synchronous>, transform_indices = @transform_4, window_bounds = array<i64: 192, 192>}, {pipeline_mode = #tpu.pipeline_mode<synchronous>, transform_indices = @transform_5, window_bounds = array<i64: 6, 192>}, {transform_indices = @transform_6, window_bounds = array<i64: 9, 2048>}]} {
    %c0 = arith.constant 0 : index
    %c0_0 = arith.constant 0 : index
    %0 = vector.load %arg2[%c0, %c0_0] : memref<3x2048xf32, #tpu.memory_space<vmem>>, vector<3x2048xf32>
    %1 = vector.extract_strided_slice %0 {offsets = [0, 0], sizes = [1, 2048], strides = [1, 1]} : vector<3x2048xf32> to vector<1x2048xf32>
    %2 = vector.extract_strided_slice %0 {offsets = [1, 0], sizes = [1, 2048], strides = [1, 1]} : vector<3x2048xf32> to vector<1x2048xf32>
    %3 = vector.extract_strided_slice %0 {offsets = [2, 0], sizes = [1, 2048], strides = [1, 1]} : vector<3x2048xf32> to vector<1x2048xf32>
    %4 = arith.mulf %1, %1 : vector<1x2048xf32>
    %5 = arith.mulf %2, %2 : vector<1x2048xf32>
    %6 = arith.addf %4, %5 : vector<1x2048xf32>
    %7 = arith.mulf %3, %3 : vector<1x2048xf32>
    %8 = arith.addf %6, %7 : vector<1x2048xf32>
    %c0_1 = arith.constant 0 : index
    %c0_2 = arith.constant 0 : index
    %9 = memref.load %arg1[%c0_1, %c0_2] : memref<1x1xf32, #tpu.memory_space<smem>>
    %10 = tpu.reciprocal %8 {approx = true} : vector<1x2048xf32> -> vector<1x2048xf32>
    %11 = vector.broadcast %9 : f32 to vector<1x2048xf32>
    %12 = arith.mulf %11, %10 : vector<1x2048xf32>
    %13 = arith.mulf %0, %0 : vector<3x2048xf32>
    %14 = arith.mulf %13, %0 : vector<3x2048xf32>
    %15 = tpu.concatenate %0, %13, %14 in 0 : vector<3x2048xf32>, vector<3x2048xf32>, vector<3x2048xf32> -> vector<9x2048xf32>
    %c0_3 = arith.constant 0 : index
    %c0_4 = arith.constant 0 : index
    %16 = vector.load %arg3[%c0_3, %c0_4] : memref<192x9xf32, #tpu.memory_space<vmem>>, vector<192x9xf32>
    %cst = arith.constant dense<0.000000e+00> : vector<192x2048xf32>
    %17 = tpu.matmul %16, %15, %cst {dimension_numbers = #tpu.dot_dimension_numbers<[1], [0], [0], [1], [0, 0, 1, 1], [], []>} : vector<192x9xf32>, vector<9x2048xf32>, vector<192x2048xf32> -> vector<192x2048xf32>
    %18 = math.tanh %17 : vector<192x2048xf32>
    %c0_5 = arith.constant 0 : index
    %c0_6 = arith.constant 0 : index
    %19 = vector.load %arg4[%c0_5, %c0_6] : memref<192x192xf32, #tpu.memory_space<vmem>>, vector<192x192xf32>
    %cst_7 = arith.constant dense<0.000000e+00> : vector<192x2048xf32>
    %20 = tpu.matmul %19, %18, %cst_7 {dimension_numbers = #tpu.dot_dimension_numbers<[1], [0], [0], [1], [0, 0, 1, 1], [], []>} : vector<192x192xf32>, vector<192x2048xf32>, vector<192x2048xf32> -> vector<192x2048xf32>
    %21 = math.tanh %20 : vector<192x2048xf32>
    %c0_8 = arith.constant 0 : index
    %c0_9 = arith.constant 0 : index
    %22 = vector.load %arg5[%c0_8, %c0_9] : memref<192x192xf32, #tpu.memory_space<vmem>>, vector<192x192xf32>
    %cst_10 = arith.constant dense<0.000000e+00> : vector<192x2048xf32>
    %23 = tpu.matmul %22, %21, %cst_10 {dimension_numbers = #tpu.dot_dimension_numbers<[1], [0], [0], [1], [0, 0, 1, 1], [], []>} : vector<192x192xf32>, vector<192x2048xf32>, vector<192x2048xf32> -> vector<192x2048xf32>
    %24 = math.tanh %23 : vector<192x2048xf32>
    %c0_11 = arith.constant 0 : index
    %c0_12 = arith.constant 0 : index
    %25 = vector.load %arg6[%c0_11, %c0_12] : memref<6x192xf32, #tpu.memory_space<vmem>>, vector<6x192xf32>
    %cst_13 = arith.constant dense<0.000000e+00> : vector<6x2048xf32>
    %26 = tpu.matmul %25, %24, %cst_13 {dimension_numbers = #tpu.dot_dimension_numbers<[1], [0], [0], [1], [0, 0, 1, 1], [], []>} : vector<6x192xf32>, vector<192x2048xf32>, vector<6x2048xf32> -> vector<6x2048xf32>
    %27 = math.tanh %26 : vector<6x2048xf32>
    %28 = vector.extract_strided_slice %27 {offsets = [0, 0], sizes = [1, 2048], strides = [1, 1]} : vector<6x2048xf32> to vector<1x2048xf32>
    %29 = vector.extract_strided_slice %27 {offsets = [1, 0], sizes = [1, 2048], strides = [1, 1]} : vector<6x2048xf32> to vector<1x2048xf32>
    %30 = vector.extract_strided_slice %27 {offsets = [2, 0], sizes = [1, 2048], strides = [1, 1]} : vector<6x2048xf32> to vector<1x2048xf32>
    %31 = vector.extract_strided_slice %27 {offsets = [3, 0], sizes = [1, 2048], strides = [1, 1]} : vector<6x2048xf32> to vector<1x2048xf32>
    %32 = vector.extract_strided_slice %27 {offsets = [4, 0], sizes = [1, 2048], strides = [1, 1]} : vector<6x2048xf32> to vector<1x2048xf32>
    %33 = vector.extract_strided_slice %27 {offsets = [5, 0], sizes = [1, 2048], strides = [1, 1]} : vector<6x2048xf32> to vector<1x2048xf32>
    %34 = arith.mulf %2, %28 : vector<1x2048xf32>
    %35 = arith.mulf %3, %29 : vector<1x2048xf32>
    %36 = arith.addf %34, %35 : vector<1x2048xf32>
    %cst_14 = arith.constant 0.000000e+00 : f32
    %37 = vector.broadcast %cst_14 : f32 to vector<1x2048xf32>
    %38 = arith.subf %37, %2 : vector<1x2048xf32>
    %39 = arith.mulf %38, %30 : vector<1x2048xf32>
    %cst_15 = arith.constant 0.000000e+00 : f32
    %40 = vector.broadcast %cst_15 : f32 to vector<1x2048xf32>
    %41 = arith.subf %40, %3 : vector<1x2048xf32>
    %42 = arith.mulf %41, %32 : vector<1x2048xf32>
    %cst_16 = arith.constant 0.000000e+00 : f32
    %43 = vector.broadcast %cst_16 : f32 to vector<1x2048xf32>
    %44 = arith.subf %43, %1 : vector<1x2048xf32>
    %45 = arith.mulf %44, %28 : vector<1x2048xf32>
    %46 = arith.mulf %1, %30 : vector<1x2048xf32>
    %47 = arith.mulf %3, %31 : vector<1x2048xf32>
    %48 = arith.addf %46, %47 : vector<1x2048xf32>
    %cst_17 = arith.constant 0.000000e+00 : f32
    %49 = vector.broadcast %cst_17 : f32 to vector<1x2048xf32>
    %50 = arith.subf %49, %3 : vector<1x2048xf32>
    %51 = arith.mulf %50, %33 : vector<1x2048xf32>
    %cst_18 = arith.constant 0.000000e+00 : f32
    %52 = vector.broadcast %cst_18 : f32 to vector<1x2048xf32>
    %53 = arith.subf %52, %1 : vector<1x2048xf32>
    %54 = arith.mulf %53, %29 : vector<1x2048xf32>
    %cst_19 = arith.constant 0.000000e+00 : f32
    %55 = vector.broadcast %cst_19 : f32 to vector<1x2048xf32>
    %56 = arith.subf %55, %2 : vector<1x2048xf32>
    %57 = arith.mulf %56, %31 : vector<1x2048xf32>
    %58 = arith.mulf %1, %32 : vector<1x2048xf32>
    %59 = arith.mulf %2, %33 : vector<1x2048xf32>
    %60 = arith.addf %58, %59 : vector<1x2048xf32>
    %61 = tpu.concatenate %36, %39, %42, %45, %48, %51, %54, %57, %60 in 0 : vector<1x2048xf32>, vector<1x2048xf32>, vector<1x2048xf32>, vector<1x2048xf32>, vector<1x2048xf32>, vector<1x2048xf32>, vector<1x2048xf32>, vector<1x2048xf32>, vector<1x2048xf32> -> vector<9x2048xf32>
    %62 = vector.broadcast %12 : vector<1x2048xf32> to vector<9x2048xf32>
    %63 = arith.mulf %61, %62 : vector<9x2048xf32>
    %c0_20 = arith.constant 0 : index
    %c0_21 = arith.constant 0 : index
    %64 = vector.load %arg7[%c0_20, %c0_21] : memref<9x2048xf32, #tpu.memory_space<vmem>>, vector<9x2048xf32>
    tpu.vector_store %arg7[%c0_20, %c0_21], %63 {strides = array<i32>} : memref<9x2048xf32, #tpu.memory_space<vmem>>, vector<9x2048xf32>,
    return
  }
  func.func @transform_0(%arg0: i32) -> (i32, i32) {
    %c0_i32 = arith.constant 0 : i32
    %c0_i32_0 = arith.constant 0 : i32
    %c0_i32_1 = arith.constant 0 : i32
    return %c0_i32, %c0_i32_0 : i32, i32
  }
  func.func @transform_1(%arg0: i32) -> (i32, i32) {
    %c0_i32 = arith.constant 0 : i32
    %c0_i32_0 = arith.constant 0 : i32
    return %c0_i32, %arg0 : i32, i32
  }
  func.func @transform_2(%arg0: i32) -> (i32, i32) {
    %c0_i32 = arith.constant 0 : i32
    %c0_i32_0 = arith.constant 0 : i32
    %c0_i32_1 = arith.constant 0 : i32
    return %c0_i32, %c0_i32_0 : i32, i32
  }
  func.func @transform_3(%arg0: i32) -> (i32, i32) {
    %c0_i32 = arith.constant 0 : i32
    %c0_i32_0 = arith.constant 0 : i32
    %c0_i32_1 = arith.constant 0 : i32
    return %c0_i32, %c0_i32_0 : i32, i32
  }
  func.func @transform_4(%arg0: i32) -> (i32, i32) {
    %c0_i32 = arith.constant 0 : i32
    %c0_i32_0 = arith.constant 0 : i32
    %c0_i32_1 = arith.constant 0 : i32
    return %c0_i32, %c0_i32_0 : i32, i32
  }
  func.func @transform_5(%arg0: i32) -> (i32, i32) {
    %c0_i32 = arith.constant 0 : i32
    %c0_i32_0 = arith.constant 0 : i32
    %c0_i32_1 = arith.constant 0 : i32
    return %c0_i32, %c0_i32_0 : i32, i32
  }
  func.func @transform_6(%arg0: i32) -> (i32, i32) {
    %c0_i32 = arith.constant 0 : i32
    %c0_i32_0 = arith.constant 0 : i32
    return %c0_i32, %arg0 : i32, i32
  }
}

</mosaic_0001>

<bundles_post_ra>
// kernel: net_corrector.1
= control target key start
LH: loop header
LB: loop body
LE: loop exit
PB: predicated region body
PF: predicated region fallthrough
CT: control target
= control target key end

     0   :  { %s20295_s0 = inlined_call_operand.<no memory space> [shape: f32[1,1], index: 0, kind: input, shape index: {}]   ;;  %s20296_s1 = inlined_call_operand.vmem [shape: f32[3,4096], index: 1, kind: input, shape index: {}]   ;;  %s20297_s2 = inlined_call_operand.vmem [shape: f32[192,9], index: 2, kind: input, shape index: {}]   ;;  %s20298_s3 = inlined_call_operand.vmem [shape: f32[192,192], index: 3, kind: input, shape index: {}]   ;;  %s20299_s4 = inlined_call_operand.hbm [shape: f32[192,192], index: 4, kind: input, shape index: {}]   ;;  %s20300_s5 = inlined_call_operand.vmem [shape: f32[6,192], index: 5, kind: input, shape index: {}]   ;;  %s20301_s6 = inlined_call_operand.vmem [shape: f32[9,4096], index: 6, kind: output, shape index: {}]  }
   0x1   :  { %11 = sst [smem:[#allocation2]] %s20295_s0 }
   0x2   :  { %12 = vsyncpa [#allocation4], 0  ;;  %s12650_s23 = smov 0   ;;  %s12652_s24 = smov 0  }
   0x3   :  { %s12654_s25 = smov 0  }
   0x4 LB: > { %s12663_s0 = sadd.s32 4294967295, %s12606_s25   ;;  %s12665_s26 = sadd.s32 1, %s12606_s25   ;;  %s12606_s25 = sphi %s12654_s25, %s21595_s25   ;;  %s12602_s24 = sphi %s12652_s24, %s21594_s24   ;;  %s12598_s23 = sphi %s12650_s23, %s21593_s23  }
   0x5   : > { %s153_s27 = ssub.s32 %s12606_s25, %s12665_s26  ;;  %s156_s28 = sadd.s32 1, %s12602_s24 }
   0x6   : > { %p154_p0 = scmp.eq.s32.totalorder %s153_s27, 0  ;;  %p166_p1 = scmp.ne.s32.totalorder %s12602_s24, %s12598_s23 }
   0x7   : > { %p167_p2 = scmp.eq.s32.totalorder %s12663_s0, 1  ;;  %p9258_p3 = scmp.ge.s32.totalorder %s12606_s25, 1 }
   0x8   : > { %s12673_s29 = scalar_select %p154_p0, %s12602_s24, %s156_s28  }
   0x9   : > { %p12675_p4 = por %p167_p2, %p166_p1  ;;  %p180_p5 = scmp.lt.s32.totalorder %s12606_s25, 3 }
   0xa   : > { %p9912_p6 = scmp.eq.s32.totalorder %s12663_s0, 0  ;;  %s12608_s8 = smov [#allocation3]  }
   0xb   : > { %p12680_p7 = pnand %p9258_p3, %p180_p5  ;;  %s201_s9 = sshll.u32 %s12608_s8, 4  ;;  %s202_s9 = int_to_ptr.vmem [resolvable:$true] %s201_s9 }
   0xc   : > { %s12565_s10 = scalar_lea.vmem %s202_s9, 6144  ;;  %p12573_p0 = scmp.lt.s32.totalorder %s202_s9, %s202_s9 }
   0xd   : > { %p9908_p8 = pneg %p12680_p7  ;;  %p12566_p11 = scmp.ne.s32.totalorder %s202_s9, %s12565_s10 }
   0xe   : > { %p12574_p1 = scmp.lt.s32.totalorder %s12565_s10, %s12565_s10 }
   0xf   : > { %p9909_p9 = pnand %p9912_p6, %p9908_p8 }
  0x10   : > { %p12575_p2 = por %p12574_p1, %p12573_p0 }
  0x11   : > { %p12556_p10 = pneg %p9909_p9 }
  0x13   : > { %p12568_p12 = pnand %p12566_p11, %p12556_p10 }
  0x15   : > { %p12569_p13 = pneg %p12568_p12 }
  0x17   : > { %p12576_p3 = pnand %p12575_p2, %p12569_p13 }
  0x19   : > { %12579 = shalt.err (!%p12576_p3)
}
  0x1a   : > { %s12609_s11 = smov 256   ;;  %s12610_s12 = smov 16  }
  0x1b   : > { %9911 = dma.hbm_to_vmem [thread:$0]  (!%p9909_p9), %s20299_s4, 6144, %s202_s9, [#allocation4], %s12609_s11, %s12609_s11, %s12610_s12  }
  0x1c   : > { %229 = sbr.rel (%p12680_p7) target bundleno = 1890 (0x762), region = 44 }
  0x21   : > { %12593 = dma.done.wait (%p9912_p6), [#allocation4], 6144  }
  0x22   : > { %12595 = vsyncadd (%p9912_p6), [#allocation4], 4294961152  ;;  %s9264_s15 = sshll.u32 %s12663_s0, 4  ;;  %v20302_v0 = vmov 0.0   ;;  %vm614_vm0 = vcmask 1040384   ;;  %vm483_vm1 = vcmask 1042432  }
  0x23   : > { %p259_p5 = scmp.lt.s32.totalorder %s9264_s15, 31  ;;  %711 = vmatprep.mubr.f32.mxu0 %v20302_v0  ;;  %920 = vmatprep.mubr.f32.mxu1 %v20302_v0  ;;  %vm500_vm2 = vcmask 1045504   ;;  %v12741_v42 = vld [vmem:[%s20297_s2] sm:$0xff]  ;;  %vm541_vm3 = vcmask 72704   ;;  %v12769_v61 = vld [vmem:[%s20297_s2 + $0x8] sm:$0xff]  ;;  %vm2751_vm4 = vcmask 523264  }
  0x24   : > { %s19547_s27 = sld [smem:[#allocation2]]  ;;  %vm8789_vm5 = vcmask 1041408   ;;  %vm8822_vm6 = vcmask 1043456   ;;  %vm8839_vm7 = vcmask 1044480   ;;  %s255_s28 = sand.u32 1, %s12598_s23   ;;  %vm8872_vm8 = vcmask 1046528  }
  0x25   : > { %s21597_s15 = smov (!%p259_p5, %s9264_s15), 31  ;;  %s19711_s23 = sshll.u32 %s255_s28, 8 }
  0x26   : > { %s9265_s16 = sshll.u32 %s21597_s15, 2  ;;  %s19754_s9 = scalar_lea.vmem [#allocation5], %s19711_s23 }
  0x27   : > { %s12703_s19 = scalar_lea.vmem %s20296_s1, %s9265_s16 }
  0x28   : > { %v265_v1 = vld [vmem:[%s12703_s19] sm:$0x77]  ;;  %v266_v2 = vld [vmem:[%s12703_s19 + $0x8] sm:$0x77]  ;;  %v12708_v6 = vld [vmem:[%s12703_s19 + $0x10] sm:$0x77] }
  0x29   : > { %v273_v3 = vmul.f32 %v265_v1, %v265_v1  ;;  %v274_v4 = vmul.f32 %v266_v2, %v266_v2  ;;  %v387_v5 = vcombine.high %v265_v1, %v265_v1  ;;  %v12711_v7 = vld [vmem:[%s12703_s19 + $0x18] sm:$0x77]  ;;  %v388_v8 = vcombine.high %v266_v2, %v266_v2  ;;  %v12764_v59 = vld [vmem:[%s12703_s19 + $0x20] sm:$0x77] }
  0x2a   : > { %v12715_v9 = vmul.f32 %v12708_v6, %v12708_v6  ;;  %v12719_v10 = vmul.f32 %v12711_v7, %v12711_v7  ;;  %v389_v11 = vcombine.high %v12708_v6, %v12708_v6  ;;  %v390_v49 = vcombine.high %v12711_v7, %v12711_v7 }
  0x2b   : > { %v371_v12 = vmul.f32 %v273_v3, %v265_v1  ;;  %v372_v13 = vmul.f32 %v274_v4, %v266_v2  ;;  %v403_v14 = vcombine.high %v273_v3, %v273_v3  ;;  %v404_v15 = vcombine.high %v274_v4, %v274_v4 }
  0x2c   : > { %v289_v16 = vrot.slane %v273_v3, 5  ;;  %v9266_v17 = vrot.slane %v273_v3, 10  ;;  %v291_v18 = vrot.slane %v274_v4, 5  ;;  %v9267_v19 = vrot.slane %v274_v4, 10 }
  0x2d   : > { %v443_v20 = vcombine.high %v371_v12, %v371_v12  ;;  %v444_v21 = vcombine.high %v372_v13, %v372_v13  ;;  %v451_v22 = vrot.slane %v371_v12, 2  ;;  %v453_v23 = vrot.slane %v372_v13, 2 }
  0x2e   : > { %v411_v24 = vrot.slane %v403_v14, 5  ;;  %v412_v25 = vrot.slane %v404_v15, 5  ;;  %v290_v26 = vrot.slane %v289_v16, 4  ;;  %v484_v27 = vsel %vm483_vm1, %v265_v1, %v289_v16 }
  0x2f   : > { %v452_v28 = vrot.slane %v443_v20, 2  ;;  %v454_v29 = vrot.slane %v444_v21, 2  ;;  %v501_v30 = vsel %vm500_vm2, %v484_v27, %v451_v22  ;;  %v292_v31 = vrot.slane %v291_v18, 4  ;;  %v12837_v21 = vld [vmem:[%s20297_s2 + $0x18] sm:$0xff] }
  0x30   : > { %v485_v32 = vsel %vm483_vm1, %v387_v5, %v411_v24  ;;  %v487_v33 = vsel %vm483_vm1, %v388_v8, %v412_v25  ;;  %v313_v34 = vadd.f32 %v290_v26, %v273_v3  ;;  %v486_v35 = vsel %vm483_vm1, %v266_v2, %v291_v18  ;;  %v12779_v2 = vld [vmem:[%s12703_s19 + $0x28] sm:$0x77]  ;;  %v12850_v24 = vld [vmem:[%s20297_s2 + $0x20] sm:$0xff] }
  0x31   : > { %9274 = vmatprep.subr.msk.mxu0 %vm614_vm0, %v452_v28  ;;  %9300 = vmatprep.subr.msk.mxu1 %vm614_vm0, %v454_v29  ;;  %v502_v36 = vsel %vm500_vm2, %v485_v32, %v452_v28  ;;  %v504_v37 = vsel %vm500_vm2, %v487_v33, %v454_v29  ;;  %v314_v38 = vadd.f32 %v292_v31, %v274_v4  ;;  %v293_v39 = vrot.slane %v12715_v9, 5  ;;  %v12862_v26 = vld [vmem:[%s20297_s2 + $0x28] sm:$0xff] }
  0x32   : > { %9275 = vmatpush1.msk.msra.mxu0 %vm614_vm0, %v451_v22  ;;  %9301 = vmatpush1.msk.msra.mxu1 %vm614_vm0, %v453_v23  ;;  %v12735_v40 = vadd.f32 %v9266_v17, %v313_v34  ;;  %v503_v41 = vsel %vm500_vm2, %v486_v35, %v453_v23  ;;  %v373_v43 = vmul.f32 %v12715_v9, %v12708_v6  ;;  %v9268_v51 = vrot.slane %v12715_v9, 10 }
  0x33   : > { %677 = vmatprep.subr.mxu0 %v502_v36  ;;  %886 = vmatprep.subr.mxu1 %v504_v37  ;;  %v12745_v44 = vadd.f32 %v9267_v19, %v314_v38  ;;  %v374_v45 = vmul.f32 %v12719_v10, %v12711_v7  ;;  %v405_v46 = vcombine.high %v12715_v9, %v12715_v9  ;;  %v294_v47 = vrot.slane %v293_v39, 4 }
  0x34   : > { %20429 = vst [vmem:[#allocation7_spill] sm:$0xff] %v12735_v40  ;;  %678 = vmatpush1.msra.mxu0 %v501_v30  ;;  %887 = vmatpush1.msra.mxu1 %v503_v41  ;;  %v445_v48 = vcombine.high %v373_v43, %v373_v43  ;;  %v406_v50 = vcombine.high %v12719_v10, %v12719_v10  ;;  %v455_v53 = vrot.slane %v373_v43, 2  ;;  %v295_v1 = vrot.slane %v12719_v10, 5 }
  0x35   : > { %20430 = vst [vmem:[#allocation8_spill] sm:$0xff] %v12745_v44  ;;  %9276 = vmatmul.mubr.msk.f32.vlgmr.msra.gmra.mxu0 %vm541_vm3, %v12741_v42  ;;  %9302 = vmatmul.mubr.msk.f32.vlgmr.msra.gmra.mxu1 %vm541_vm3, %v12741_v42  ;;  %v446_v52 = vcombine.high %v374_v45, %v374_v45  ;;  %v413_v54 = vrot.slane %v405_v46, 5  ;;  %v457_v56 = vrot.slane %v374_v45, 2  ;;  %v315_v58 = vadd.f32 %v294_v47, %v12715_v9  ;;  %v12895_v46 = vld [vmem:[%s20297_s2 + $0x30] sm:$0xff] }
  0x36   : > { %v456_v55 = vrot.slane %v445_v48, 2  ;;  %717 = vmatprep.mubr.f32.mxu0 %v20302_v0  ;;  %926 = vmatprep.mubr.f32.mxu1 %v20302_v0  ;;  %v414_v57 = vrot.slane %v406_v50, 5  ;;  %v488_v63 = vsel %vm483_vm1, %v12708_v6, %v293_v39  ;;  %v296_v8 = vrot.slane %v295_v1, 4 }
  0x37   : > { %v458_v60 = vrot.slane %v446_v52, 2  ;;  %v489_v62 = vsel %vm483_vm1, %v389_v11, %v413_v54  ;;  %v12784_v5 = vadd.f32 %v9268_v51, %v315_v58  ;;  %v9269_v9 = vrot.slane %v12719_v10, 10  ;;  %v12947_v58 = vld [vmem:[%s20297_s2 + $0x48] sm:$0xff] }
  0x38   : > { %9326 = vmatprep.subr.msk.mxu0 %vm614_vm0, %v456_v55  ;;  %v506_v3 = vsel %vm500_vm2, %v489_v62, %v456_v55  ;;  %v491_v4 = vsel %vm483_vm1, %v390_v49, %v414_v57  ;;  %v490_v6 = vsel %vm483_vm1, %v12711_v7, %v295_v1  ;;  %v12793_v11 = vmul.f32 %v12764_v59, %v12764_v59  ;;  %v12810_v7 = vld [vmem:[%s20297_s2 + $0x10] sm:$0xff]  ;;  %v12936_v57 = vld [vmem:[%s20297_s2 + $0x40] sm:$0xff] }
  0x39   : > { %20431 = vst [vmem:[#allocation9_spill] sm:$0xff] %v12784_v5  ;;  %9352 = vmatprep.subr.msk.mxu1 %vm614_vm0, %v458_v60  ;;  %9327 = vmatpush1.msk.msra.mxu0 %vm614_vm0, %v455_v53  ;;  %v508_v12 = vsel %vm500_vm2, %v491_v4, %v458_v60  ;;  %v505_v13 = vsel %vm500_vm2, %v488_v63, %v455_v53  ;;  %v12969_v60 = vld [vmem:[%s20297_s2 + $0x58] sm:$0xff]  ;;  %v12980_v62 = vld [vmem:[%s20297_s2 + $0x60] sm:$0xff]  ;;  %v12991_v63 = vld [vmem:[%s20297_s2 + $0x68] sm:$0xff] }
  0x3a   : > { %9353 = vmatpush1.msk.msra.mxu1 %vm614_vm0, %v457_v56  ;;  %9277 = vmatmul.mubr.msk.f32.gmra.mxu0 %vm541_vm3, %v12769_v61  ;;  %v12802_v14 = vmul.f32 %v12779_v2, %v12779_v2  ;;  %v316_v15 = vadd.f32 %v296_v8, %v12719_v10  ;;  %v507_v16 = vsel %vm500_vm2, %v490_v6, %v457_v56  ;;  %v297_v30 = vrot.slane %v12793_v11, 5  ;;  %v12925_v56 = vld [vmem:[%s20297_s2 + $0x38] sm:$0xff]  ;;  %v13002_v1 = vld [vmem:[%s20297_s2 + $0x70] sm:$0xff]  ;;  %v13035_v4 = vld [vmem:[%s20297_s2 + $0x88] sm:$0xff] }
  0x3b   : > { %9303 = vmatmul.mubr.msk.f32.gmra.mxu1 %vm541_vm3, %v12769_v61  ;;  %723 = vmatprep.mubr.f32.mxu0 %v20302_v0  ;;  %v12816_v17 = vmul.f32 %v12793_v11, %v12764_v59  ;;  %v391_v28 = vcombine.high %v12764_v59, %v12764_v59  ;;  %v407_v29 = vcombine.high %v12793_v11, %v12793_v11  ;;  %v9270_v33 = vrot.slane %v12793_v11, 10  ;;  %v13046_v8 = vld [vmem:[%s20297_s2 + $0x90] sm:$0xff]  ;;  %v13068_v6 = vld [vmem:[%s20297_s2 + $0xa0] sm:$0xff] }
  0x3c   : > { %932 = vmatprep.mubr.f32.mxu1 %v20302_v0  ;;  %1095 = vmatprep.subr.mxu0 %v506_v3  ;;  %v12821_v18 = vmul.f32 %v12802_v14, %v12779_v2  ;;  %v12823_v19 = vadd.f32 %v9269_v9, %v316_v15  ;;  %v392_v31 = vcombine.high %v12779_v2, %v12779_v2  ;;  %v299_v34 = vrot.slane %v12802_v14, 5  ;;  %v13024_v3 = vld [vmem:[%s20297_s2 + $0x80] sm:$0xff]  ;;  %v13057_v9 = vld [vmem:[%s20297_s2 + $0x98] sm:$0xff] }
  0x3d   : > { %1304 = vmatprep.subr.mxu1 %v508_v12  ;;  %1096 = vmatpush1.msra.mxu0 %v505_v13  ;;  %v447_v10 = vcombine.high %v12816_v17, %v12816_v17  ;;  %v459_v25 = vrot.slane %v12816_v17, 2  ;;  %v408_v32 = vcombine.high %v12802_v14, %v12802_v14  ;;  %v415_v35 = vrot.slane %v407_v29, 5  ;;  %v13085_v12 = vld [vmem:[%s12703_s19 + $0x30] sm:$0x77] }
  0x3e   : > { %20432 = vst [vmem:[#allocation10_spill] sm:$0xff] %v12823_v19  ;;  %9278 = vmatmul.mubr.msk.f32.gmra.mxu0 %vm541_vm3, %v12810_v7  ;;  %1305 = vmatpush1.msra.mxu1 %v507_v16  ;;  %v448_v20 = vcombine.high %v12821_v18, %v12821_v18  ;;  %v461_v27 = vrot.slane %v12821_v18, 2  ;;  %v298_v36 = vrot.slane %v297_v30, 4  ;;  %v492_v37 = vsel %vm483_vm1, %v12764_v59, %v297_v30  ;;  %v12958_v59 = vld [vmem:[%s20297_s2 + $0x50] sm:$0xff] }
  0x3f   : > { %9304 = vmatmul.mubr.msk.f32.gmra.mxu1 %vm541_vm3, %v12810_v7  ;;  %729 = vmatprep.mubr.f32.mxu0 %v20302_v0  ;;  %v460_v22 = vrot.slane %v447_v10, 2  ;;  %v9271_v38 = vrot.slane %v12802_v14, 10  ;;  %v416_v39 = vrot.slane %v408_v32, 5  ;;  %v12885_v41 = vsel %vm500_vm2, %v492_v37, %v459_v25  ;;  %v13093_v13 = vld [vmem:[%s20297_s2 + $0xb0] sm:$0xff]  ;;  %v13115_v10 = vld [vmem:[%s20297_s2 + $0xb8] sm:$0xff] }
  0x40   : > { %938 = vmatprep.mubr.f32.mxu1 %v20302_v0  ;;  %v462_v23 = vrot.slane %v448_v20, 2  ;;  %v300_v43 = vrot.slane %v299_v34, 4  ;;  %v494_v45 = vsel %vm483_vm1, %v12779_v2, %v299_v34  ;;  %v493_v47 = vsel %vm483_vm1, %v391_v28, %v415_v35  ;;  %v13013_v2 = vld [vmem:[%s20297_s2 + $0x78] sm:$0xff] }
  0x41   : > { %9378 = vmatprep.subr.msk.mxu0 %vm614_vm0, %v460_v22  ;;  %v317_v48 = vadd.f32 %v298_v36, %v12793_v11  ;;  %v12902_v49 = vsel %vm500_vm2, %v494_v45, %v461_v27  ;;  %v12906_v50 = vsel %vm500_vm2, %v493_v47, %v460_v22  ;;  %v495_v51 = vsel %vm483_vm1, %v392_v31, %v416_v39  ;;  %v13079_v11 = vld [vmem:[%s20297_s2 + $0xa8] sm:$0xff] }
  0x42   : > { %9279 = vmatmul.mubr.msk.f32.gmra.mxu0 %vm541_vm3, %v12837_v21  ;;  %9404 = vmatprep.subr.msk.mxu1 %vm614_vm0, %v462_v23  ;;  %v318_v52 = vadd.f32 %v300_v43, %v12802_v14  ;;  %v12911_v53 = vsel %vm500_vm2, %v495_v51, %v462_v23  ;;  %v13096_v14 = vld [vmem:[%s12703_s19 + $0x38] sm:$0x77]  ;;  %v13101_v15 = vmul.f32 %v13085_v12, %v13085_v12 }
  0x43   : > { %9305 = vmatmul.mubr.msk.f32.gmra.mxu1 %vm541_vm3, %v12837_v21  ;;  %735 = vmatprep.mubr.f32.mxu0 %v20302_v0  ;;  %v12913_v54 = vadd.f32 %v9270_v33, %v317_v48  ;;  %v13107_v16 = vmul.f32 %v13096_v14, %v13096_v14  ;;  %v394_v31 = vcombine.high %v13096_v14, %v13096_v14 }
  0x44   : > { %944 = vmatprep.mubr.f32.mxu1 %v20302_v0  ;;  %v12917_v55 = vadd.f32 %v9271_v38, %v318_v52  ;;  %v13120_v20 = vmul.f32 %v13101_v15, %v13085_v12  ;;  %v301_v33 = vrot.slane %v13101_v15, 5  ;;  %v9272_v37 = vrot.slane %v13101_v15, 10 }
  0x45   : > { %20433 = vst [vmem:[#allocation11_spill] sm:$0xff] %v12913_v54  ;;  %v13126_v22 = vmul.f32 %v13107_v16, %v13096_v14  ;;  %v410_v32 = vcombine.high %v13107_v16, %v13107_v16  ;;  %v303_v34 = vrot.slane %v13107_v16, 5  ;;  %v9273_v38 = vrot.slane %v13107_v16, 10 }
  0x46   : > { %9280 = vmatmul.mubr.msk.f32.gmra.mxu0 %vm541_vm3, %v12850_v24  ;;  %20434 = vst [vmem:[#allocation12_spill] sm:$0xff] %v12917_v55  ;;  %v449_v23 = vcombine.high %v13120_v20, %v13120_v20  ;;  %v463_v17 = vrot.slane %v13120_v20, 2  ;;  %v302_v39 = vrot.slane %v301_v33, 4 }
  0x47   : > { %9306 = vmatmul.mubr.msk.f32.gmra.mxu1 %vm541_vm3, %v12850_v24  ;;  %741 = vmatprep.mubr.f32.mxu0 %v20302_v0  ;;  %v450_v28 = vcombine.high %v13126_v22, %v13126_v22  ;;  %v465_v18 = vrot.slane %v13126_v22, 2  ;;  %v418_v36 = vrot.slane %v410_v32, 5  ;;  %v304_v43 = vrot.slane %v303_v34, 4 }
  0x48   : > { %950 = vmatprep.mubr.f32.mxu1 %v20302_v0  ;;  %v464_v29 = vrot.slane %v449_v23, 2  ;;  %v498_v45 = vsel %vm483_vm1, %v13096_v14, %v303_v34 }
  0x49   : > { %v466_v30 = vrot.slane %v450_v28, 2  ;;  %v499_v48 = vsel %vm483_vm1, %v394_v31, %v418_v36 }
  0x4a   : > { %9281 = vmatmul.mubr.msk.f32.gmra.mxu0 %vm541_vm3, %v12862_v26 }
  0x4b   : > { %9307 = vmatmul.mubr.msk.f32.gmra.mxu1 %vm541_vm3, %v12862_v26  ;;  %747 = vmatprep.mubr.f32.mxu0 %v20302_v0  ;;  %v13218_v52 = vsel %vm500_vm2, %v499_v48, %v466_v30 }
  0x4c   : > { %956 = vmatprep.mubr.f32.mxu1 %v20302_v0 }
  0x4e   : > { %9282 = vmatmul.mubr.msk.f32.gmra.mxu0 %vm541_vm3, %v12895_v46 }
  0x4f   : > { %9308 = vmatmul.mubr.msk.f32.gmra.mxu1 %vm541_vm3, %v12895_v46  ;;  %753 = vmatprep.mubr.f32.mxu0 %v20302_v0 }
  0x50   : > { %962 = vmatprep.mubr.f32.mxu1 %v20302_v0 }
  0x52   : > { %9283 = vmatmul.mubr.msk.f32.gmra.mxu0 %vm541_vm3, %v12925_v56 }
  0x53   : > { %9309 = vmatmul.mubr.msk.f32.gmra.mxu1 %vm541_vm3, %v12925_v56  ;;  %759 = vmatprep.mubr.f32.mxu0 %v20302_v0 }
  0x54   : > { %968 = vmatprep.mubr.f32.mxu1 %v20302_v0 }
  0x56   : > { %9284 = vmatmul.mubr.msk.f32.gmra.mxu0 %vm541_vm3, %v12936_v57 }
  0x57   : > { %9310 = vmatmul.mubr.msk.f32.gmra.mxu1 %vm541_vm3, %v12936_v57  ;;  %765 = vmatprep.mubr.f32.mxu0 %v20302_v0 }
  0x58   : > { %974 = vmatprep.mubr.f32.mxu1 %v20302_v0 }
  0x5a   : > { %9285 = vmatmul.mubr.msk.f32.gmra.mxu0 %vm541_vm3, %v12947_v58 }
  0x5b   : > { %9311 = vmatmul.mubr.msk.f32.gmra.mxu1 %vm541_vm3, %v12947_v58  ;;  %771 = vmatprep.mubr.f32.mxu0 %v20302_v0 }
  0x5c   : > { %980 = vmatprep.mubr.f32.mxu1 %v20302_v0 }
  0x5e   : > { %9286 = vmatmul.mubr.msk.f32.gmra.mxu0 %vm541_vm3, %v12958_v59 }
  0x5f   : > { %9312 = vmatmul.mubr.msk.f32.gmra.mxu1 %vm541_vm3, %v12958_v59  ;;  %777 = vmatprep.mubr.f32.mxu0 %v20302_v0 }
  0x60   : > { %986 = vmatprep.mubr.f32.mxu1 %v20302_v0 }
  0x62   : > { %9287 = vmatmul.mubr.msk.f32.gmra.mxu0 %vm541_vm3, %v12969_v60 }
  0x63   : > { %9313 = vmatmul.mubr.msk.f32.gmra.mxu1 %vm541_vm3, %v12969_v60  ;;  %783 = vmatprep.mubr.f32.mxu0 %v20302_v0 }
  0x64   : > { %992 = vmatprep.mubr.f32.mxu1 %v20302_v0 }
  0x66   : > { %9288 = vmatmul.mubr.msk.f32.gmra.mxu0 %vm541_vm3, %v12980_v62 }
  0x67   : > { %9314 = vmatmul.mubr.msk.f32.gmra.mxu1 %vm541_vm3, %v12980_v62  ;;  %789 = vmatprep.mubr.f32.mxu0 %v20302_v0 }
  0x68   : > { %998 = vmatprep.mubr.f32.mxu1 %v20302_v0 }
  0x6a   : > { %9289 = vmatmul.mubr.msk.f32.gmra.mxu0 %vm541_vm3, %v12991_v63 }
  0x6b   : > { %9315 = vmatmul.mubr.msk.f32.gmra.mxu1 %vm541_vm3, %v12991_v63  ;;  %795 = vmatprep.mubr.f32.mxu0 %v20302_v0 }
  0x6c   : > { %1004 = vmatprep.mubr.f32.mxu1 %v20302_v0 }
  0x6e   : > { %9290 = vmatmul.mubr.msk.f32.gmra.mxu0 %vm541_vm3, %v13002_v1 }
  0x6f   : > { %9316 = vmatmul.mubr.msk.f32.gmra.mxu1 %vm541_vm3, %v13002_v1  ;;  %801 = vmatprep.mubr.f32.mxu0 %v20302_v0 }
  0x70   : > { %1010 = vmatprep.mubr.f32.mxu1 %v20302_v0 }
  0x72   : > { %9291 = vmatmul.mubr.msk.f32.gmra.mxu0 %vm541_vm3, %v13013_v2 }
  0x73   : > { %9317 = vmatmul.mubr.msk.f32.gmra.mxu1 %vm541_vm3, %v13013_v2  ;;  %807 = vmatprep.mubr.f32.mxu0 %v20302_v0 }
  0x74   : > { %1016 = vmatprep.mubr.f32.mxu1 %v20302_v0 }
  0x76   : > { %9292 = vmatmul.mubr.msk.f32.gmra.mxu0 %vm541_vm3, %v13024_v3 }
  0x77   : > { %9318 = vmatmul.mubr.msk.f32.gmra.mxu1 %vm541_vm3, %v13024_v3  ;;  %813 = vmatprep.mubr.f32.mxu0 %v20302_v0 }
  0x78   : > { %1022 = vmatprep.mubr.f32.mxu1 %v20302_v0 }
  0x7a   : > { %9293 = vmatmul.mubr.msk.f32.gmra.mxu0 %vm541_vm3, %v13035_v4 }
  0x7b   : > { %9319 = vmatmul.mubr.msk.f32.gmra.mxu1 %vm541_vm3, %v13035_v4  ;;  %819 = vmatprep.mubr.f32.mxu0 %v20302_v0 }
  0x7c   : > { %1028 = vmatprep.mubr.f32.mxu1 %v20302_v0 }
  0x7e   : > { %9294 = vmatmul.mubr.msk.f32.gmra.mxu0 %vm541_vm3, %v13046_v8 }
  0x7f   : > { %9320 = vmatmul.mubr.msk.f32.gmra.mxu1 %vm541_vm3, %v13046_v8  ;;  %825 = vmatprep.mubr.f32.mxu0 %v20302_v0 }
  0x80   : > { %1034 = vmatprep.mubr.f32.mxu1 %v20302_v0 }
  0x82   : > { %9295 = vmatmul.mubr.msk.f32.gmra.mxu0 %vm541_vm3, %v13057_v9 }
  0x83   : > { %9321 = vmatmul.mubr.msk.f32.gmra.mxu1 %vm541_vm3, %v13057_v9  ;;  %831 = vmatprep.mubr.f32.mxu0 %v20302_v0 }
  0x84   : > { %1040 = vmatprep.mubr.f32.mxu1 %v20302_v0 }
  0x86   : > { %9296 = vmatmul.mubr.msk.f32.gmra.mxu0 %vm541_vm3, %v13068_v6 }
  0x87   : > { %9322 = vmatmul.mubr.msk.f32.gmra.mxu1 %vm541_vm3, %v13068_v6  ;;  %837 = vmatprep.mubr.f32.mxu0 %v20302_v0 }
  0x88   : > { %1046 = vmatprep.mubr.f32.mxu1 %v20302_v0 }
  0x8a   : > { %9297 = vmatmul.mubr.msk.f32.gmra.mxu0 %vm541_vm3, %v13079_v11 }
  0x8b   : > { %9323 = vmatmul.mubr.msk.f32.gmra.mxu1 %vm541_vm3, %v13079_v11  ;;  %843 = vmatprep.mubr.f32.mxu0 %v20302_v0 }
  0x8c   : > { %1052 = vmatprep.mubr.f32.mxu1 %v20302_v0 }
  0x8e   : > { %9298 = vmatmul.mubr.msk.f32.gmra.mxu0 %vm541_vm3, %v13093_v13 }
  0x8f   : > { %9324 = vmatmul.mubr.msk.f32.gmra.mxu1 %vm541_vm3, %v13093_v13  ;;  %849 = vmatprep.mubr.f32.mxu0 %v20302_v0 }
  0x90   : > { %1058 = vmatprep.mubr.f32.mxu1 %v20302_v0 }
  0x92   : > { %9299 = vmatmul.mubr.msk.f32.gmra.mxu0 %vm541_vm3, %v13115_v10 }
  0x93   : > { %9325 = vmatmul.mubr.msk.f32.gmra.mxu1 %vm541_vm3, %v13115_v10  ;;  %1129 = vmatprep.mubr.f32.mxu0 %v20302_v0 }
  0x94   : > { %1338 = vmatprep.mubr.f32.mxu1 %v20302_v0 }
  0x96   : > { %9328 = vmatmul.mubr.msk.f32.vlgmr.msra.gmra.mxu0 %vm541_vm3, %v12741_v42 }
  0x97   : > { %9354 = vmatmul.mubr.msk.f32.vlgmr.msra.gmra.mxu1 %vm541_vm3, %v12741_v42  ;;  %9379 = vmatpush1.msk.msra.mxu0 %vm614_vm0, %v459_v25  ;;  %v393_v25 = vcombine.high %v13085_v12, %v13085_v12 }
  0x98   : > { %9405 = vmatpush1.msk.msra.mxu1 %vm614_vm0, %v461_v27  ;;  %1135 = vmatprep.mubr.f32.mxu0 %v20302_v0  ;;  %v409_v27 = vcombine.high %v13101_v15, %v13101_v15 }
  0x99   : > { %1344 = vmatprep.mubr.f32.mxu1 %v20302_v0  ;;  %1513 = vmatprep.subr.mxu0 %v12906_v50  ;;  %v13212_v50 = vsel %vm500_vm2, %v498_v45, %v465_v18 }
  0x9a   : > { %9329 = vmatmul.mubr.msk.f32.gmra.mxu0 %vm541_vm3, %v12769_v61  ;;  %1722 = vmatprep.subr.mxu1 %v12911_v53  ;;  %v417_v35 = vrot.slane %v409_v27, 5  ;;  %v319_v53 = vadd.f32 %v302_v39, %v13101_v15 }
  0x9b   : > { %9355 = vmatmul.mubr.msk.f32.gmra.mxu1 %vm541_vm3, %v12769_v61  ;;  %1141 = vmatprep.mubr.f32.mxu0 %v20302_v0 }
  0x9c   : > { %1350 = vmatprep.mubr.f32.mxu1 %v20302_v0  ;;  %1514 = vmatpush1.msra.mxu0 %v12885_v41  ;;  %v496_v41 = vsel %vm483_vm1, %v13085_v12, %v301_v33  ;;  %v497_v47 = vsel %vm483_vm1, %v393_v25, %v417_v35  ;;  %v320_v12 = vadd.f32 %v304_v43, %v13107_v16 }
  0x9d   : > { %1723 = vmatpush1.msra.mxu1 %v12902_v49  ;;  %9430 = vmatprep.subr.msk.mxu0 %vm614_vm0, %v464_v29  ;;  %v13207_v49 = vsel %vm500_vm2, %v496_v41, %v463_v17  ;;  %v13215_v51 = vsel %vm500_vm2, %v497_v47, %v464_v29  ;;  %v13227_v14 = vadd.f32 %v9272_v37, %v319_v53 }
  0x9e   : > { %9330 = vmatmul.mubr.msk.f32.gmra.mxu0 %vm541_vm3, %v12810_v7  ;;  %9456 = vmatprep.subr.msk.mxu1 %vm614_vm0, %v466_v30  ;;  %v13229_v23 = vadd.f32 %v9273_v38, %v320_v12 }
  0x9f   : > { %9356 = vmatmul.mubr.msk.f32.gmra.mxu1 %vm541_vm3, %v12810_v7  ;;  %1147 = vmatprep.mubr.f32.mxu0 %v20302_v0  ;;  %20435 = vst [vmem:[#allocation13_spill] sm:$0xff] %v13227_v14 }
  0xa0   : > { %1356 = vmatprep.mubr.f32.mxu1 %v20302_v0  ;;  %20436 = vst [vmem:[#allocation14_spill] sm:$0xff] %v13229_v23 }
  0xa2   : > { %9331 = vmatmul.mubr.msk.f32.gmra.mxu0 %vm541_vm3, %v12837_v21 }
  0xa3   : > { %9357 = vmatmul.mubr.msk.f32.gmra.mxu1 %vm541_vm3, %v12837_v21  ;;  %1153 = vmatprep.mubr.f32.mxu0 %v20302_v0 }
  0xa4   : > { %1362 = vmatprep.mubr.f32.mxu1 %v20302_v0 }
  0xa6   : > { %9332 = vmatmul.mubr.msk.f32.gmra.mxu0 %vm541_vm3, %v12850_v24 }
  0xa7   : > { %9358 = vmatmul.mubr.msk.f32.gmra.mxu1 %vm541_vm3, %v12850_v24  ;;  %1159 = vmatprep.mubr.f32.mxu0 %v20302_v0 }
  0xa8   : > { %1368 = vmatprep.mubr.f32.mxu1 %v20302_v0 }
  0xaa   : > { %9333 = vmatmul.mubr.msk.f32.gmra.mxu0 %vm541_vm3, %v12862_v26 }
  0xab   : > { %9359 = vmatmul.mubr.msk.f32.gmra.mxu1 %vm541_vm3, %v12862_v26  ;;  %1165 = vmatprep.mubr.f32.mxu0 %v20302_v0 }
  0xac   : > { %1374 = vmatprep.mubr.f32.mxu1 %v20302_v0 }
  0xae   : > { %9334 = vmatmul.mubr.msk.f32.gmra.mxu0 %vm541_vm3, %v12895_v46 }
  0xaf   : > { %9360 = vmatmul.mubr.msk.f32.gmra.mxu1 %vm541_vm3, %v12895_v46  ;;  %1171 = vmatprep.mubr.f32.mxu0 %v20302_v0 }
  0xb0   : > { %1380 = vmatprep.mubr.f32.mxu1 %v20302_v0 }
  0xb2   : > { %9335 = vmatmul.mubr.msk.f32.gmra.mxu0 %vm541_vm3, %v12925_v56 }
  0xb3   : > { %9361 = vmatmul.mubr.msk.f32.gmra.mxu1 %vm541_vm3, %v12925_v56  ;;  %1177 = vmatprep.mubr.f32.mxu0 %v20302_v0 }
  0xb4   : > { %1386 = vmatprep.mubr.f32.mxu1 %v20302_v0 }
  0xb6   : > { %9336 = vmatmul.mubr.msk.f32.gmra.mxu0 %vm541_vm3, %v12936_v57 }
  0xb7   : > { %9362 = vmatmul.mubr.msk.f32.gmra.mxu1 %vm541_vm3, %v12936_v57  ;;  %1183 = vmatprep.mubr.f32.mxu0 %v20302_v0 }
  0xb8   : > { %1392 = vmatprep.mubr.f32.mxu1 %v20302_v0 }
  0xba   : > { %9337 = vmatmul.mubr.msk.f32.gmra.mxu0 %vm541_vm3, %v12947_v58 }
  0xbb   : > { %9363 = vmatmul.mubr.msk.f32.gmra.mxu1 %vm541_vm3, %v12947_v58  ;;  %1189 = vmatprep.mubr.f32.mxu0 %v20302_v0 }
  0xbc   : > { %1398 = vmatprep.mubr.f32.mxu1 %v20302_v0 }
  0xbe   : > { %9338 = vmatmul.mubr.msk.f32.gmra.mxu0 %vm541_vm3, %v12958_v59 }
  0xbf   : > { %9364 = vmatmul.mubr.msk.f32.gmra.mxu1 %vm541_vm3, %v12958_v59  ;;  %1195 = vmatprep.mubr.f32.mxu0 %v20302_v0 }
  0xc0   : > { %1404 = vmatprep.mubr.f32.mxu1 %v20302_v0 }
  0xc2   : > { %9339 = vmatmul.mubr.msk.f32.gmra.mxu0 %vm541_vm3, %v12969_v60 }
  0xc3   : > { %9365 = vmatmul.mubr.msk.f32.gmra.mxu1 %vm541_vm3, %v12969_v60  ;;  %1201 = vmatprep.mubr.f32.mxu0 %v20302_v0 }
  0xc4   : > { %1410 = vmatprep.mubr.f32.mxu1 %v20302_v0 }
  0xc6   : > { %9340 = vmatmul.mubr.msk.f32.gmra.mxu0 %vm541_vm3, %v12980_v62 }
  0xc7   : > { %9366 = vmatmul.mubr.msk.f32.gmra.mxu1 %vm541_vm3, %v12980_v62  ;;  %1207 = vmatprep.mubr.f32.mxu0 %v20302_v0 }
  0xc8   : > { %1416 = vmatprep.mubr.f32.mxu1 %v20302_v0 }
  0xca   : > { %9341 = vmatmul.mubr.msk.f32.gmra.mxu0 %vm541_vm3, %v12991_v63 }
  0xcb   : > { %9367 = vmatmul.mubr.msk.f32.gmra.mxu1 %vm541_vm3, %v12991_v63  ;;  %1213 = vmatprep.mubr.f32.mxu0 %v20302_v0 }
  0xcc   : > { %1422 = vmatprep.mubr.f32.mxu1 %v20302_v0 }
  0xce   : > { %9342 = vmatmul.mubr.msk.f32.gmra.mxu0 %vm541_vm3, %v13002_v1 }
  0xcf   : > { %9368 = vmatmul.mubr.msk.f32.gmra.mxu1 %vm541_vm3, %v13002_v1  ;;  %1219 = vmatprep.mubr.f32.mxu0 %v20302_v0 }
  0xd0   : > { %1428 = vmatprep.mubr.f32.mxu1 %v20302_v0 }
  0xd2   : > { %9343 = vmatmul.mubr.msk.f32.gmra.mxu0 %vm541_vm3, %v13013_v2 }
  0xd3   : > { %9369 = vmatmul.mubr.msk.f32.gmra.mxu1 %vm541_vm3, %v13013_v2  ;;  %1225 = vmatprep.mubr.f32.mxu0 %v20302_v0 }
  0xd4   : > { %1434 = vmatprep.mubr.f32.mxu1 %v20302_v0 }
  0xd6   : > { %9344 = vmatmul.mubr.msk.f32.gmra.mxu0 %vm541_vm3, %v13024_v3 }
  0xd7   : > { %9370 = vmatmul.mubr.msk.f32.gmra.mxu1 %vm541_vm3, %v13024_v3  ;;  %1231 = vmatprep.mubr.f32.mxu0 %v20302_v0 }
  0xd8   : > { %1440 = vmatprep.mubr.f32.mxu1 %v20302_v0 }
  0xda   : > { %9345 = vmatmul.mubr.msk.f32.gmra.mxu0 %vm541_vm3, %v13035_v4 }
  0xdb   : > { %9371 = vmatmul.mubr.msk.f32.gmra.mxu1 %vm541_vm3, %v13035_v4  ;;  %1237 = vmatprep.mubr.f32.mxu0 %v20302_v0 }
  0xdc   : > { %1446 = vmatprep.mubr.f32.mxu1 %v20302_v0 }
  0xde   : > { %9346 = vmatmul.mubr.msk.f32.gmra.mxu0 %vm541_vm3, %v13046_v8 }
  0xdf   : > { %9372 = vmatmul.mubr.msk.f32.gmra.mxu1 %vm541_vm3, %v13046_v8  ;;  %1243 = vmatprep.mubr.f32.mxu0 %v20302_v0 }
  0xe0   : > { %1452 = vmatprep.mubr.f32.mxu1 %v20302_v0 }
  0xe2   : > { %9347 = vmatmul.mubr.msk.f32.gmra.mxu0 %vm541_vm3, %v13057_v9 }
  0xe3   : > { %9373 = vmatmul.mubr.msk.f32.gmra.mxu1 %vm541_vm3, %v13057_v9  ;;  %1249 = vmatprep.mubr.f32.mxu0 %v20302_v0 }
  0xe4   : > { %1458 = vmatprep.mubr.f32.mxu1 %v20302_v0 }
  0xe6   : > { %9348 = vmatmul.mubr.msk.f32.gmra.mxu0 %vm541_vm3, %v13068_v6 }
  0xe7   : > { %9374 = vmatmul.mubr.msk.f32.gmra.mxu1 %vm541_vm3, %v13068_v6  ;;  %1255 = vmatprep.mubr.f32.mxu0 %v20302_v0 }
  0xe8   : > { %1464 = vmatprep.mubr.f32.mxu1 %v20302_v0 }
  0xea   : > { %9349 = vmatmul.mubr.msk.f32.gmra.mxu0 %vm541_vm3, %v13079_v11 }
  0xeb   : > { %9375 = vmatmul.mubr.msk.f32.gmra.mxu1 %vm541_vm3, %v13079_v11  ;;  %1261 = vmatprep.mubr.f32.mxu0 %v20302_v0 }
  0xec   : > { %1470 = vmatprep.mubr.f32.mxu1 %v20302_v0 }
  0xee   : > { %9350 = vmatmul.mubr.msk.f32.gmra.mxu0 %vm541_vm3, %v13093_v13 }
  0xef   : > { %9376 = vmatmul.mubr.msk.f32.gmra.mxu1 %vm541_vm3, %v13093_v13  ;;  %1267 = vmatprep.mubr.f32.mxu0 %v20302_v0 }
  0xf0   : > { %1476 = vmatprep.mubr.f32.mxu1 %v20302_v0 }
  0xf2   : > { %9351 = vmatmul.mubr.msk.f32.gmra.mxu0 %vm541_vm3, %v13115_v10 }
  0xf3   : > { %9377 = vmatmul.mubr.msk.f32.gmra.mxu1 %vm541_vm3, %v13115_v10  ;;  %1547 = vmatprep.mubr.f32.mxu0 %v20302_v0 }
  0xf4   : > { %1756 = vmatprep.mubr.f32.mxu1 %v20302_v0 }
  0xf5   : > { %v13334_v15 = vpop.f32.mrf.mxu0  ;;  %v13336_v16 = vpop.f32.mrf.mxu1 }
  0xf6   : > { %9380 = vmatmul.mubr.msk.f32.vlgmr.msra.gmra.mxu0 %vm541_vm3, %v12741_v42  ;;  %9950 = vtanh.f32 %v13334_v15 }
  0xf7   : > { %9406 = vmatmul.mubr.msk.f32.vlgmr.msra.gmra.mxu1 %vm541_vm3, %v12741_v42  ;;  %9431 = vmatpush1.msk.msra.mxu0 %vm614_vm0, %v463_v17  ;;  %v13345_v28 = vpop.f32.mrf.mxu0  ;;  %v13347_v29 = vpop.f32.mrf.mxu1  ;;  %9952 = vtanh.f32 %v13336_v16 }
  0xf8   : > { %9457 = vmatpush1.msk.msra.mxu1 %vm614_vm0, %v465_v18  ;;  %1553 = vmatprep.mubr.f32.mxu0 %v20302_v0  ;;  %9954 = vtanh.f32 %v13345_v28 }
  0xf9   : > { %1762 = vmatprep.mubr.f32.mxu1 %v20302_v0  ;;  %1931 = vmatprep.subr.mxu0 %v13215_v51  ;;  %9956 = vtanh.f32 %v13347_v29 }
  0xfa   : > { %v13355_v30 = vpop.f32.mrf.mxu0  ;;  %9381 = vmatmul.mubr.msk.f32.gmra.mxu0 %vm541_vm3, %v12769_v61  ;;  %2140 = vmatprep.subr.mxu1 %v13218_v52 }
  0xfb   : > { %v13360_v42 = vpop.f32.mrf.mxu1  ;;  %9407 = vmatmul.mubr.msk.f32.gmra.mxu1 %vm541_vm3, %v12769_v61  ;;  %1559 = vmatprep.mubr.f32.mxu0 %v20302_v0  ;;  %9958 = vtanh.f32 %v13355_v30 }
  0xfc   : > { %v13365_v20 = vpop.f32.mrf.mxu0  ;;  %1768 = vmatprep.mubr.f32.mxu1 %v20302_v0  ;;  %1932 = vmatpush1.msra.mxu0 %v13207_v49  ;;  %9960 = vtanh.f32 %v13360_v42 }
  0xfd   : > { %v13369_v22 = vpop.f32.mrf.mxu1  ;;  %2141 = vmatpush1.msra.mxu1 %v13212_v50 }
  0xfe   : > { %v13372_v17 = vpop.f32.mrf.mxu0  ;;  %9382 = vmatmul.mubr.msk.f32.gmra.mxu0 %vm541_vm3, %v12810_v7 }
  0xff   : > { %v13376_v18 = vpop.f32.mrf.mxu1  ;;  %9408 = vmatmul.mubr.msk.f32.gmra.mxu1 %vm541_vm3, %v12810_v7  ;;  %1565 = vmatprep.mubr.f32.mxu0 %v20302_v0 }
 0x100   : > { %v13381_v61 = vpop.f32.mrf.mxu0  ;;  %1774 = vmatprep.mubr.f32.mxu1 %v20302_v0 }
 0x101   : > { %v13384_v25 = vpop.f32.mrf.mxu1 }
 0x102   : > { %v13386_v27 = vpop.f32.mrf.mxu0  ;;  %9383 = vmatmul.mubr.msk.f32.gmra.mxu0 %vm541_vm3, %v12837_v21 }
 0x103   : > { %20437 = vst [vmem:[#allocation15_spill] sm:$0xff] %v13386_v27  ;;  %v13390_v31 = vpop.f32.mrf.mxu1  ;;  %9409 = vmatmul.mubr.msk.f32.gmra.mxu1 %vm541_vm3, %v12837_v21  ;;  %1571 = vmatprep.mubr.f32.mxu0 %v20302_v0 }
 0x104   : > { %20438 = vst [vmem:[#allocation16_spill] sm:$0xff] %v13390_v31  ;;  %v13395_v7 = vpop.f32.mrf.mxu0  ;;  %1780 = vmatprep.mubr.f32.mxu1 %v20302_v0 }
 0x105   : > { %20439 = vst [vmem:[#allocation17_spill] sm:$0xff] %v13395_v7  ;;  %v13398_v32 = vpop.f32.mrf.mxu1 }
 0x106   : > { %20440 = vst [vmem:[#allocation18_spill] sm:$0xff] %v13398_v32  ;;  %v13400_v33 = vpop.f32.mrf.mxu0  ;;  %9384 = vmatmul.mubr.msk.f32.gmra.mxu0 %vm541_vm3, %v12850_v24 }
 0x107   : > { %v13404_v34 = vpop.f32.mrf.mxu1  ;;  %9410 = vmatmul.mubr.msk.f32.gmra.mxu1 %vm541_vm3, %v12850_v24  ;;  %1577 = vmatprep.mubr.f32.mxu0 %v20302_v0 }
 0x108   : > { %20441 = vst [vmem:[#allocation19_spill] sm:$0xff] %v13404_v34  ;;  %v13409_v21 = vpop.f32.mrf.mxu0  ;;  %1786 = vmatprep.mubr.f32.mxu1 %v20302_v0 }
 0x109   : > { %v13412_v35 = vpop.f32.mrf.mxu1 }
 0x10a   : > { %20442 = vst [vmem:[#allocation20_spill] sm:$0xff] %v13412_v35  ;;  %v13414_v36 = vpop.f32.mrf.mxu0  ;;  %9385 = vmatmul.mubr.msk.f32.gmra.mxu0 %vm541_vm3, %v12862_v26 }
 0x10b   : > { %v13418_v37 = vpop.f32.mrf.mxu1  ;;  %9411 = vmatmul.mubr.msk.f32.gmra.mxu1 %vm541_vm3, %v12862_v26  ;;  %1583 = vmatprep.mubr.f32.mxu0 %v20302_v0 }
 0x10c   : > { %20443 = vst [vmem:[#allocation21_spill] sm:$0xff] %v13418_v37  ;;  %v13423_v24 = vpop.f32.mrf.mxu0  ;;  %1792 = vmatprep.mubr.f32.mxu1 %v20302_v0 }
 0x10d   : > { %v13426_v38 = vpop.f32.mrf.mxu1 }
 0x10e   : > { %v13428_v39 = vpop.f32.mrf.mxu0  ;;  %9386 = vmatmul.mubr.msk.f32.gmra.mxu0 %vm541_vm3, %v12895_v46 }
 0x10f   : > { %v13432_v41 = vpop.f32.mrf.mxu1  ;;  %9412 = vmatmul.mubr.msk.f32.gmra.mxu1 %vm541_vm3, %v12895_v46  ;;  %1589 = vmatprep.mubr.f32.mxu0 %v20302_v0 }
 0x110   : > { %v13437_v26 = vpop.f32.mrf.mxu0  ;;  %1798 = vmatprep.mubr.f32.mxu1 %v20302_v0 }
 0x111   : > { %v13440_v43 = vpop.f32.mrf.mxu1 }
 0x112   : > { %v13442_v45 = vpop.f32.mrf.mxu0  ;;  %9387 = vmatmul.mubr.msk.f32.gmra.mxu0 %vm541_vm3, %v12925_v56 }
 0x113   : > { %v13446_v47 = vpop.f32.mrf.mxu1  ;;  %9413 = vmatmul.mubr.msk.f32.gmra.mxu1 %vm541_vm3, %v12925_v56  ;;  %1595 = vmatprep.mubr.f32.mxu0 %v20302_v0 }
 0x114   : > { %v13451_v46 = vpop.f32.mrf.mxu0  ;;  %1804 = vmatprep.mubr.f32.mxu1 %v20302_v0 }
 0x115   : > { %v13454_v48 = vpop.f32.mrf.mxu1 }
 0x116   : > { %v13456_v49 = vpop.f32.mrf.mxu0  ;;  %9388 = vmatmul.mubr.msk.f32.gmra.mxu0 %vm541_vm3, %v12936_v57 }
 0x117   : > { %v13460_v50 = vpop.f32.mrf.mxu1  ;;  %9414 = vmatmul.mubr.msk.f32.gmra.mxu1 %vm541_vm3, %v12936_v57  ;;  %1601 = vmatprep.mubr.f32.mxu0 %v20302_v0 }
 0x118   : > { %v13465_v56 = vpop.f32.mrf.mxu0  ;;  %1810 = vmatprep.mubr.f32.mxu1 %v20302_v0 }
 0x119   : > { %v13468_v51 = vpop.f32.mrf.mxu1 }
 0x11a   : > { %v13470_v52 = vpop.f32.mrf.mxu0  ;;  %9389 = vmatmul.mubr.msk.f32.gmra.mxu0 %vm541_vm3, %v12947_v58 }
 0x11b   : > { %v13474_v53 = vpop.f32.mrf.mxu1  ;;  %9415 = vmatmul.mubr.msk.f32.gmra.mxu1 %vm541_vm3, %v12947_v58  ;;  %1607 = vmatprep.mubr.f32.mxu0 %v20302_v0 }
 0x11c   : > { %v13479_v57 = vpop.f32.mrf.mxu0  ;;  %1816 = vmatprep.mubr.f32.mxu1 %v20302_v0 }
 0x11d   : > { %v13482_v12 = vpop.f32.mrf.mxu1 }
 0x11e   : > { %v13484_v23 = vpop.f32.mrf.mxu0  ;;  %9390 = vmatmul.mubr.msk.f32.gmra.mxu0 %vm541_vm3, %v12958_v59 }
 0x11f   : > { %v13488_v14 = vpop.f32.mrf.mxu1  ;;  %9416 = vmatmul.mubr.msk.f32.gmra.mxu1 %vm541_vm3, %v12958_v59  ;;  %1613 = vmatprep.mubr.f32.mxu0 %v20302_v0 }
 0x120   : > { %v13493_v58 = vpop.f32.mrf.mxu0  ;;  %1822 = vmatprep.mubr.f32.mxu1 %v20302_v0 }
 0x121   : > { %v13496_v55 = vpop.f32.mrf.mxu1 }
 0x122   : > { %v13498_v54 = vpop.f32.mrf.mxu0  ;;  %9391 = vmatmul.mubr.msk.f32.gmra.mxu0 %vm541_vm3, %v12969_v60 }
 0x123   : > { %v13502_v19 = vpop.f32.mrf.mxu1  ;;  %9417 = vmatmul.mubr.msk.f32.gmra.mxu1 %vm541_vm3, %v12969_v60  ;;  %1619 = vmatprep.mubr.f32.mxu0 %v20302_v0 }
 0x124   : > { %v13507_v59 = vpop.f32.mrf.mxu0  ;;  %1828 = vmatprep.mubr.f32.mxu1 %v20302_v0 }
 0x125   : > { %v13510_v5 = vpop.f32.mrf.mxu1 }
 0x126   : > { %v13512_v44 = vpop.f32.mrf.mxu0  ;;  %9392 = vmatmul.mubr.msk.f32.gmra.mxu0 %vm541_vm3, %v12980_v62 }
 0x127   : > { %v13516_v40 = vpop.f32.mrf.mxu1  ;;  %9418 = vmatmul.mubr.msk.f32.gmra.mxu1 %vm541_vm3, %v12980_v62  ;;  %1625 = vmatprep.mubr.f32.mxu0 %v20302_v0 }
 0x128   : > { %v13521_v60 = vpop.f32.mrf.mxu0  ;;  %1834 = vmatprep.mubr.f32.mxu1 %v20302_v0 }
 0x129   : > { %v13524_v31 = vpop.f32.mrf.mxu1 }
 0x12a   : > { %v13526_v27 = vpop.f32.mrf.mxu0  ;;  %9393 = vmatmul.mubr.msk.f32.gmra.mxu0 %vm541_vm3, %v12991_v63 }
 0x12b   : > { %v13530_v32 = vpop.f32.mrf.mxu1  ;;  %9419 = vmatmul.mubr.msk.f32.gmra.mxu1 %vm541_vm3, %v12991_v63  ;;  %1631 = vmatprep.mubr.f32.mxu0 %v20302_v0 }
 0x12c   : > { %v13535_v62 = vpop.f32.mrf.mxu0  ;;  %1840 = vmatprep.mubr.f32.mxu1 %v20302_v0 }
 0x12d   : > { %v13538_v7 = vpop.f32.mrf.mxu1 }
 0x12e   : > { %v13540_v34 = vpop.f32.mrf.mxu0  ;;  %9394 = vmatmul.mubr.msk.f32.gmra.mxu0 %vm541_vm3, %v13002_v1 }
 0x12f   : > { %v13545_v35 = vpop.f32.mrf.mxu1  ;;  %9420 = vmatmul.mubr.msk.f32.gmra.mxu1 %vm541_vm3, %v13002_v1  ;;  %1637 = vmatprep.mubr.f32.mxu0 %v20302_v0 }
 0x130   : > { %v13551_v63 = vpop.f32.mrf.mxu0  ;;  %1846 = vmatprep.mubr.f32.mxu1 %v20302_v0 }
 0x131   : > { %v13555_v37 = vpop.f32.mrf.mxu1 }
 0x132   : > { %v13558_v15 = vpop.f32.mrf.mxu0  ;;  %9395 = vmatmul.mubr.msk.f32.gmra.mxu0 %vm541_vm3, %v13013_v2 }
 0x133   : > { %v13563_v1 = vpop.f32.mrf.mxu1  ;;  %9421 = vmatmul.mubr.msk.f32.gmra.mxu1 %vm541_vm3, %v13013_v2  ;;  %1643 = vmatprep.mubr.f32.mxu0 %v20302_v0 }
 0x134   : > { %v805_v16 = vpop.f32.mrf.mxu0  ;;  %1852 = vmatprep.mubr.f32.mxu1 %v20302_v0 }
 0x135   : > { %9962 = vtanh.f32 %v805_v16  ;;  %v1014_v28 = vpop.f32.mrf.mxu1 }
 0x136   : > { %9964 = vtanh.f32 %v1014_v28  ;;  %v13570_v29 = vpop.f32.mrf.mxu0  ;;  %9396 = vmatmul.mubr.msk.f32.gmra.mxu0 %vm541_vm3, %v13024_v3 }
 0x137   : > { %9966 = vtanh.f32 %v13365_v20  ;;  %v13575_v30 = vpop.f32.mrf.mxu1  ;;  %9422 = vmatmul.mubr.msk.f32.gmra.mxu1 %vm541_vm3, %v13024_v3  ;;  %1649 = vmatprep.mubr.f32.mxu0 %v20302_v0 }
 0x138   : > { %20444 = vst [vmem:[#allocation22_spill] sm:$0xff] %v13575_v30  ;;  %9968 = vtanh.f32 %v13369_v22  ;;  %v13581_v2 = vpop.f32.mrf.mxu0  ;;  %1858 = vmatprep.mubr.f32.mxu1 %v20302_v0  ;;  %v13598_v22 = vpop.eup %9950 }
 0x139   : > { %9970 = vtanh.f32 %v13372_v17  ;;  %v13585_v42 = vpop.f32.mrf.mxu1  ;;  %20448 = vst [vmem:[#allocation26_spill] sm:$0xff] %v13598_v22 }
 0x13a   : > { %20445 = vst [vmem:[#allocation23_spill] sm:$0xff] %v13585_v42  ;;  %9972 = vtanh.f32 %v13376_v18  ;;  %v13588_v20 = vpop.f32.mrf.mxu0  ;;  %9397 = vmatmul.mubr.msk.f32.gmra.mxu0 %vm541_vm3, %v13035_v4  ;;  %v13604_v18 = vpop.eup %9952 }
 0x13b   : > { %20446 = vst [vmem:[#allocation24_spill] sm:$0xff] %v13588_v20  ;;  %9974 = vtanh.f32 %v13381_v61  ;;  %v13593_v3 = vpop.f32.mrf.mxu1  ;;  %9423 = vmatmul.mubr.msk.f32.gmra.mxu1 %vm541_vm3, %v13035_v4  ;;  %1655 = vmatprep.mubr.f32.mxu0 %v20302_v0  ;;  %20450 = vst [vmem:[#allocation28_spill] sm:$0xff] %v13604_v18  ;;  %v13609_v16 = vpop.eup %9954 }
 0x13c   : > { %20447 = vst [vmem:[#allocation25_spill] sm:$0xff] %v13593_v3  ;;  %9976 = vtanh.f32 %v13384_v25  ;;  %v13601_v17 = vpop.f32.mrf.mxu0  ;;  %1864 = vmatprep.mubr.f32.mxu1 %v20302_v0  ;;  %20452 = vst [vmem:[#allocation30_spill] sm:$0xff] %v13609_v16  ;;  %v13616_v25 = vpop.eup %9956 }
 0x13d   : > { %20449 = vst [vmem:[#allocation27_spill] sm:$0xff] %v13601_v17  ;;  %9978 = vtanh.f32 %v13400_v33  ;;  %v13607_v61 = vpop.f32.mrf.mxu1  ;;  %20453 = vst [vmem:[#allocation31_spill] sm:$0xff] %v13616_v25  ;;  %v13624_v33 = vpop.eup %9958 }
 0x13e   : > { %20451 = vst [vmem:[#allocation29_spill] sm:$0xff] %v13607_v61  ;;  %9980 = vtanh.f32 %v13409_v21  ;;  %v13612_v4 = vpop.f32.mrf.mxu0  ;;  %9398 = vmatmul.mubr.msk.f32.gmra.mxu0 %vm541_vm3, %v13046_v8  ;;  %v13630_v30 = vpop.eup %9960 }
 0x13f   : > { %9982 = vtanh.f32 %v13428_v39  ;;  %v13619_v28 = vpop.f32.mrf.mxu1  ;;  %9424 = vmatmul.mubr.msk.f32.gmra.mxu1 %vm541_vm3, %v13046_v8  ;;  %1661 = vmatprep.mubr.f32.mxu0 %v20302_v0  ;;  %20455 = vst [vmem:[#allocation33_spill] sm:$0xff] %v13630_v30 }
 0x140   : > { %20454 = vst [vmem:[#allocation32_spill] sm:$0xff] %v13619_v28  ;;  %9984 = vtanh.f32 %v13437_v26  ;;  %v13627_v21 = vpop.f32.mrf.mxu0  ;;  %1870 = vmatprep.mubr.f32.mxu1 %v20302_v0 }
 0x141   : > { %9986 = vtanh.f32 %v13456_v49  ;;  %v13633_v39 = vpop.f32.mrf.mxu1 }
 0x142   : > { %20456 = vst [vmem:[#allocation34_spill] sm:$0xff] %v13633_v39  ;;  %v9963_v42 = vpop.eup %9962  ;;  %9988 = vtanh.f32 %v13465_v56  ;;  %v13636_v8 = vpop.f32.mrf.mxu0  ;;  %9399 = vmatmul.mubr.msk.f32.gmra.mxu0 %vm541_vm3, %v13057_v9 }
 0x143   : > { %20457 = vst [vmem:[#allocation35_spill] sm:$0xff] %v13636_v8  ;;  %v9965_v3 = vpop.eup %9964  ;;  %9990 = vtanh.f32 %v13484_v23  ;;  %v13641_v26 = vpop.f32.mrf.mxu1  ;;  %9425 = vmatmul.mubr.msk.f32.gmra.mxu1 %vm541_vm3, %v13057_v9  ;;  %2824 = vmatprep.subr.mxu0 %v9963_v42 }
 0x144   : > { %20458 = vst [vmem:[#allocation36_spill] sm:$0xff] %v13641_v26  ;;  %v13645_v49 = vpop.eup %9966  ;;  %9992 = vtanh.f32 %v13493_v58  ;;  %3033 = vmatprep.subr.mxu1 %v9965_v3  ;;  %v13648_v56 = vpop.f32.mrf.mxu0  ;;  %1667 = vmatprep.mubr.f32.mxu0 %v20302_v0 }
 0x145   : > { %20459 = vst [vmem:[#allocation37_spill] sm:$0xff] %v13648_v56  ;;  %v13651_v20 = vpop.eup %9968  ;;  %9994 = vtanh.f32 %v13512_v44  ;;  %v13654_v23 = vpop.f32.mrf.mxu1  ;;  %1876 = vmatprep.mubr.f32.mxu1 %v20302_v0 }
 0x146   : > { %20460 = vst [vmem:[#allocation38_spill] sm:$0xff] %v13654_v23  ;;  %v13657_v61 = vpop.eup %9970  ;;  %9996 = vtanh.f32 %v13521_v60  ;;  %v13660_v9 = vpop.f32.mrf.mxu0  ;;  %9400 = vmatmul.mubr.msk.f32.gmra.mxu0 %vm541_vm3, %v13068_v6 }
 0x147   : > { %v13664_v58 = vpop.eup %9972  ;;  %9998 = vtanh.f32 %v13540_v34  ;;  %v13667_v42 = vpop.f32.mrf.mxu1  ;;  %9426 = vmatmul.mubr.msk.f32.gmra.mxu1 %vm541_vm3, %v13068_v6  ;;  %1673 = vmatprep.mubr.f32.mxu0 %v20302_v0 }
 0x148   : > { %20461 = vst [vmem:[#allocation39_spill] sm:$0xff] %v13667_v42  ;;  %v13672_v44 = vpop.eup %9974  ;;  %10000 = vtanh.f32 %v13551_v63  ;;  %v13675_v60 = vpop.f32.mrf.mxu0  ;;  %1882 = vmatprep.mubr.f32.mxu1 %v20302_v0 }
 0x149   : > { %v13678_v3 = vpop.eup %9976  ;;  %10002 = vtanh.f32 %v13558_v15  ;;  %v13681_v34 = vpop.f32.mrf.mxu1  ;;  %v20462_v15 = vmov 0.0  }
 0x14a   : > { %v13683_v17 = vpop.eup %9978  ;;  %10004 = vtanh.f32 %v13563_v1  ;;  %v13686_v6 = vpop.f32.mrf.mxu0  ;;  %9401 = vmatmul.mubr.msk.f32.gmra.mxu0 %vm541_vm3, %v13079_v11 }
 0x14b   : > { %v13690_v63 = vpop.eup %9980  ;;  %10006 = vtanh.f32 %v13555_v37  ;;  %v13693_v0 = vpop.f32.mrf.mxu1  ;;  %9427 = vmatmul.mubr.msk.f32.gmra.mxu1 %vm541_vm3, %v13079_v11  ;;  %1679 = vmatprep.mubr.f32.mxu0 %v20462_v15 }
 0x14c   : > { %v13698_v28 = vpop.eup %9982  ;;  %10008 = vtanh.f32 %v13545_v35  ;;  %v13701_v1 = vpop.f32.mrf.mxu0  ;;  %1888 = vmatprep.mubr.f32.mxu1 %v20462_v15 }
 0x14d   : > { %v13704_v39 = vpop.eup %9984  ;;  %10010 = vtanh.f32 %v13535_v62  ;;  %v13707_v37 = vpop.f32.mrf.mxu1 }
 0x14e   : > { %v13709_v26 = vpop.eup %9986  ;;  %10012 = vtanh.f32 %v13538_v7  ;;  %v13712_v11 = vpop.f32.mrf.mxu0  ;;  %9402 = vmatmul.mubr.msk.f32.gmra.mxu0 %vm541_vm3, %v13093_v13 }
 0x14f   : > { %v13716_v35 = vpop.eup %9988  ;;  %10014 = vtanh.f32 %v13526_v27  ;;  %v13719_v8 = vpop.f32.mrf.mxu1  ;;  %9428 = vmatmul.mubr.msk.f32.gmra.mxu1 %vm541_vm3, %v13093_v13  ;;  %1685 = vmatprep.mubr.f32.mxu0 %v20462_v15 }
 0x150   : > { %v13724_v62 = vpop.eup %9990  ;;  %10016 = vtanh.f32 %v13530_v32  ;;  %v13727_v7 = vpop.f32.mrf.mxu0  ;;  %1894 = vmatprep.mubr.f32.mxu1 %v20462_v15 }
 0x151   : > { %v13730_v18 = vpop.eup %9992  ;;  %10018 = vtanh.f32 %v13524_v31  ;;  %v13733_v27 = vpop.f32.mrf.mxu1 }
 0x152   : > { %v13735_v23 = vpop.eup %9994  ;;  %10020 = vtanh.f32 %v13516_v40  ;;  %v13738_v13 = vpop.f32.mrf.mxu0  ;;  %9403 = vmatmul.mubr.msk.f32.gmra.mxu0 %vm541_vm3, %v13115_v10 }
 0x153   : > { %v9997_v32 = vpop.eup %9996  ;;  %10022 = vtanh.f32 %v13507_v59  ;;  %v13743_v22 = vpop.f32.mrf.mxu1  ;;  %9429 = vmatmul.mubr.msk.f32.gmra.mxu1 %vm541_vm3, %v13115_v10  ;;  %1965 = vmatprep.mubr.f32.mxu0 %v20462_v15  ;;  %v12302_v10 = vld [vmem:[%s20297_s2] sm:$0xff] }
 0x154   : > { %v9999_v31 = vpop.eup %9998  ;;  %10024 = vtanh.f32 %v13510_v5  ;;  %v13749_v25 = vpop.f32.mrf.mxu0  ;;  %2174 = vmatprep.mubr.f32.mxu1 %v20462_v15 }
 0x155   : > { %v10001_v40 = vpop.eup %10000  ;;  %10026 = vtanh.f32 %v13498_v54  ;;  %v13753_v56 = vpop.f32.mrf.mxu1 }
 0x156   : > { %v10003_v59 = vpop.eup %10002  ;;  %10028 = vtanh.f32 %v13502_v19  ;;  %v13756_v16 = vpop.f32.mrf.mxu0  ;;  %9432 = vmatmul.mubr.msk.f32.vlgmr.msra.gmra.mxu0 %vm541_vm3, %v12302_v10 }
 0x157   : > { %20463 = vst [vmem:[#allocation40_spill] sm:$0xff] %v13756_v16  ;;  %v10005_v5 = vpop.eup %10004  ;;  %10030 = vtanh.f32 %v13496_v55  ;;  %v13763_v30 = vpop.f32.mrf.mxu1  ;;  %9458 = vmatmul.mubr.msk.f32.vlgmr.msra.gmra.mxu1 %vm541_vm3, %v12302_v10  ;;  %2825 = vmatpush1.msra.mxu0 %v10003_v59 }
 0x158   : > { %v10007_v54 = vpop.eup %10006  ;;  %10032 = vtanh.f32 %v13488_v14  ;;  %3034 = vmatpush1.msra.mxu1 %v10005_v5  ;;  %2826 = vmatprep.subr.mxu0 %v10001_v40  ;;  %v13767_v19 = vpop.f32.mrf.mxu0 }
 0x159   : > { %v10009_v16 = vpop.eup %10008  ;;  %10034 = vtanh.f32 %v13479_v57  ;;  %3035 = vmatprep.subr.mxu1 %v10007_v54  ;;  %v13770_v42 = vpop.f32.mrf.mxu1  ;;  %2827 = vmatpush1.msra.mxu0 %v9999_v31 }
 0x15a   : > { %v10011_v55 = vpop.eup %10010  ;;  %10036 = vtanh.f32 %v13482_v12  ;;  %3036 = vmatpush1.msra.mxu1 %v10009_v16  ;;  %1971 = vmatprep.mubr.f32.mxu0 %v20462_v15  ;;  %v13774_v59 = vpop.f32.mrf.mxu0  ;;  %v12303_v12 = vld [vmem:[%s20297_s2 + $0x8] sm:$0xff] }
 0x15b   : > { %v10013_v14 = vpop.eup %10012  ;;  %10038 = vtanh.f32 %v13470_v52  ;;  %2180 = vmatprep.mubr.f32.mxu1 %v20462_v15  ;;  %2828 = vmatprep.subr.mxu0 %v10011_v55  ;;  %v13778_v40 = vpop.f32.mrf.mxu1 }
 0x15c   : > { %v10015_v57 = vpop.eup %10014  ;;  %10040 = vtanh.f32 %v13474_v53  ;;  %3037 = vmatprep.subr.mxu1 %v10013_v14  ;;  %9433 = vmatmul.mubr.msk.f32.gmra.mxu0 %vm541_vm3, %v12303_v12  ;;  %v13785_v16 = vpop.f32.mrf.mxu0 }
 0x15d   : > { %v10017_v31 = vpop.eup %10016  ;;  %10042 = vtanh.f32 %v13468_v51  ;;  %9459 = vmatmul.mubr.msk.f32.gmra.mxu1 %vm541_vm3, %v12303_v12  ;;  %2829 = vmatpush1.msra.mxu0 %v10015_v57  ;;  %v13789_v52 = vpop.f32.mrf.mxu1 }
 0x15e   : > { %v10019_v10 = vpop.eup %10018  ;;  %10044 = vtanh.f32 %v13460_v50  ;;  %3038 = vmatpush1.msra.mxu1 %v10017_v31  ;;  %2830 = vmatprep.subr.mxu0 %v9997_v32  ;;  %v13792_v53 = vpop.f32.mrf.mxu0 }
 0x15f   : > { %v10021_v5 = vpop.eup %10020  ;;  %10046 = vtanh.f32 %v13451_v46  ;;  %3039 = vmatprep.subr.mxu1 %v10019_v10  ;;  %2831 = vmatpush1.msra.mxu0 %v13735_v23  ;;  %v13796_v54 = vpop.f32.mrf.mxu1 }
 0x160   : > { %v10023_v51 = vpop.eup %10022  ;;  %10048 = vtanh.f32 %v13454_v48  ;;  %3040 = vmatpush1.msra.mxu1 %v10021_v5  ;;  %1977 = vmatprep.mubr.f32.mxu0 %v20462_v15  ;;  %v13800_v55 = vpop.f32.mrf.mxu0  ;;  %v12304_v48 = vld [vmem:[%s20297_s2 + $0x10] sm:$0xff] }
 0x161   : > { %v10025_v50 = vpop.eup %10024  ;;  %10050 = vtanh.f32 %v13442_v45  ;;  %2186 = vmatprep.mubr.f32.mxu1 %v20462_v15  ;;  %2832 = vmatprep.subr.mxu0 %v10023_v51  ;;  %v13804_v46 = vpop.f32.mrf.mxu1 }
 0x162   : > { %v10027_v32 = vpop.eup %10026  ;;  %10052 = vtanh.f32 %v13446_v47  ;;  %3041 = vmatprep.subr.mxu1 %v10025_v50  ;;  %9434 = vmatmul.mubr.msk.f32.gmra.mxu0 %vm541_vm3, %v12304_v48  ;;  %v13811_v23 = vpop.f32.mrf.mxu0  ;;  %v20470_v50 = vld [vmem:[#allocation20_spill] sm:$0xff] }
 0x163   : > { %20464 = vst [vmem:[#allocation41_spill] sm:$0xff] %v13811_v23  ;;  %v10029_v14 = vpop.eup %10028  ;;  %10054 = vtanh.f32 %v13440_v43  ;;  %9460 = vmatmul.mubr.msk.f32.gmra.mxu1 %vm541_vm3, %v12304_v48  ;;  %2833 = vmatpush1.msra.mxu0 %v10027_v32  ;;  %v13815_v45 = vpop.f32.mrf.mxu1  ;;  %v20472_v48 = vld [vmem:[#allocation19_spill] sm:$0xff]  ;;  %v20492_v23 = vld [vmem:[#allocation32_spill] sm:$0xff] }
 0x164   : > { %20465 = vst [vmem:[#allocation42_spill] sm:$0xff] %v13815_v45  ;;  %v10031_v57 = vpop.eup %10030  ;;  %10056 = vtanh.f32 %v13432_v41  ;;  %3042 = vmatpush1.msra.mxu1 %v10029_v14  ;;  %2834 = vmatprep.subr.mxu0 %v13730_v18  ;;  %v13819_v47 = vpop.f32.mrf.mxu0  ;;  %v20491_v45 = vld [vmem:[#allocation34_spill] sm:$0xff] }
 0x165   : > { %20466 = vst [vmem:[#allocation43_spill] sm:$0xff] %v13819_v47  ;;  %v10033_v12 = vpop.eup %10032  ;;  %10058 = vtanh.f32 %v13423_v24  ;;  %3043 = vmatprep.subr.mxu1 %v10031_v57  ;;  %2835 = vmatpush1.msra.mxu0 %v13724_v62  ;;  %v13823_v43 = vpop.f32.mrf.mxu1  ;;  %v20469_v62 = vld [vmem:[#allocation21_spill] sm:$0xff] }
 0x166   : > { %20467 = vst [vmem:[#allocation44_spill] sm:$0xff] %v13823_v43  ;;  %v10035_v31 = vpop.eup %10034  ;;  %10060 = vtanh.f32 %v13426_v38  ;;  %3044 = vmatpush1.msra.mxu1 %v10033_v12  ;;  %1983 = vmatprep.mubr.f32.mxu0 %v20462_v15  ;;  %v13827_v41 = vpop.f32.mrf.mxu0  ;;  %v12305_v38 = vld [vmem:[%s20297_s2 + $0x18] sm:$0xff]  ;;  %v20474_v12 = vld [vmem:[#allocation17_spill] sm:$0xff]  ;;  %v20493_v43 = vld [vmem:[#allocation27_spill] sm:$0xff] }
 0x167   : > { %v10037_v10 = vpop.eup %10036  ;;  %10062 = vtanh.f32 %v13414_v36  ;;  %2192 = vmatprep.mubr.f32.mxu1 %v20462_v15  ;;  %2836 = vmatprep.subr.mxu0 %v10035_v31  ;;  %v13831_v24 = vpop.f32.mrf.mxu1 }
 0x168   : > { %20468 = vst [vmem:[#allocation45_spill] sm:$0xff] %v13831_v24  ;;  %v10039_v18 = vpop.eup %10038  ;;  %10064 = vtanh.f32 %v20469_v62  ;;  %3045 = vmatprep.subr.mxu1 %v10037_v10  ;;  %9435 = vmatmul.mubr.msk.f32.gmra.mxu0 %vm541_vm3, %v12305_v38  ;;  %v13838_v5 = vpop.f32.mrf.mxu0  ;;  %v20494_v24 = vld [vmem:[#allocation29_spill] sm:$0xff] }
 0x169   : > { %v10041_v51 = vpop.eup %10040  ;;  %10066 = vtanh.f32 %v20470_v50  ;;  %9461 = vmatmul.mubr.msk.f32.gmra.mxu1 %vm541_vm3, %v12305_v38  ;;  %2837 = vmatpush1.msra.mxu0 %v10039_v18  ;;  %v13842_v36 = vpop.f32.mrf.mxu1  ;;  %v20476_v18 = vld [vmem:[#allocation18_spill] sm:$0xff] }
 0x16a   : > { %20471 = vst [vmem:[#allocation21_spill] sm:$0xff] %v13842_v36  ;;  %v10043_v32 = vpop.eup %10042  ;;  %10068 = vtanh.f32 %v20472_v48  ;;  %3046 = vmatpush1.msra.mxu1 %v10041_v51  ;;  %2838 = vmatprep.subr.mxu0 %v13716_v35  ;;  %v13846_v14 = vpop.f32.mrf.mxu0  ;;  %v20478_v35 = vld [vmem:[#allocation15_spill] sm:$0xff]  ;;  %v20498_v36 = vld [vmem:[#allocation22_spill] sm:$0xff] }
 0x16b   : > { %20473 = vst [vmem:[#allocation20_spill] sm:$0xff] %v13846_v14  ;;  %v10045_v57 = vpop.eup %10044  ;;  %10070 = vtanh.f32 %v20474_v12  ;;  %3047 = vmatprep.subr.mxu1 %v10043_v32  ;;  %2839 = vmatpush1.msra.mxu0 %v13709_v26  ;;  %v13850_v31 = vpop.f32.mrf.mxu1  ;;  %v20480_v26 = vld [vmem:[#allocation16_spill] sm:$0xff]  ;;  %v12306_v32 = vld [vmem:[%s20297_s2 + $0x20] sm:$0xff] }
 0x16c   : > { %20475 = vst [vmem:[#allocation19_spill] sm:$0xff] %v13850_v31  ;;  %v10047_v10 = vpop.eup %10046  ;;  %10072 = vtanh.f32 %v20476_v18  ;;  %3048 = vmatpush1.msra.mxu1 %v10045_v57  ;;  %1989 = vmatprep.mubr.f32.mxu0 %v20462_v15  ;;  %v13854_v62 = vpop.f32.mrf.mxu0 }
 0x16d   : > { %20477 = vst [vmem:[#allocation17_spill] sm:$0xff] %v13854_v62  ;;  %v10049_v38 = vpop.eup %10048  ;;  %10074 = vtanh.f32 %v20478_v35  ;;  %2198 = vmatprep.mubr.f32.mxu1 %v20462_v15  ;;  %2840 = vmatprep.subr.mxu0 %v10047_v10  ;;  %v13858_v51 = vpop.f32.mrf.mxu1 }
 0x16e   : > { %20479 = vst [vmem:[#allocation18_spill] sm:$0xff] %v13858_v51  ;;  %v10051_v50 = vpop.eup %10050  ;;  %10076 = vtanh.f32 %v20480_v26  ;;  %3049 = vmatprep.subr.mxu1 %v10049_v38  ;;  %9436 = vmatmul.mubr.msk.f32.gmra.mxu0 %vm541_vm3, %v12306_v32  ;;  %v13865_v48 = vpop.f32.mrf.mxu0 }
 0x16f   : > { %v10053_v57 = vpop.eup %10052  ;;  %10078 = vtanh.f32 %v13570_v29  ;;  %9462 = vmatmul.mubr.msk.f32.gmra.mxu1 %vm541_vm3, %v12306_v32  ;;  %2841 = vmatpush1.msra.mxu0 %v10051_v50  ;;  %v13869_v12 = vpop.f32.mrf.mxu1 }
 0x170   : > { %v10055_v10 = vpop.eup %10054  ;;  %10080 = vtanh.f32 %v13581_v2  ;;  %3050 = vmatpush1.msra.mxu1 %v10053_v57  ;;  %2842 = vmatprep.subr.mxu0 %v13704_v39  ;;  %v13873_v18 = vpop.f32.mrf.mxu0 }
 0x171   : > { %v10057_v38 = vpop.eup %10056  ;;  %10082 = vtanh.f32 %v13612_v4  ;;  %3051 = vmatprep.subr.mxu1 %v10055_v10  ;;  %2843 = vmatpush1.msra.mxu0 %v13698_v28  ;;  %v13877_v29 = vpop.f32.mrf.mxu1  ;;  %v12307_v28 = vld [vmem:[%s20297_s2 + $0x28] sm:$0xff] }
 0x172   : > { %v10059_v35 = vpop.eup %10058  ;;  %10084 = vtanh.f32 %v13627_v21  ;;  %3052 = vmatpush1.msra.mxu1 %v10057_v38  ;;  %1995 = vmatprep.mubr.f32.mxu0 %v20462_v15  ;;  %v13881_v2 = vpop.f32.mrf.mxu0 }
 0x173   : > { %v10061_v50 = vpop.eup %10060  ;;  %10086 = vtanh.f32 %v13660_v9  ;;  %2204 = vmatprep.mubr.f32.mxu1 %v20462_v15  ;;  %2844 = vmatprep.subr.mxu0 %v10059_v35  ;;  %v13885_v4 = vpop.f32.mrf.mxu1 }
 0x174   : > { %v10063_v39 = vpop.eup %10062  ;;  %10088 = vtanh.f32 %v13675_v60  ;;  %3053 = vmatprep.subr.mxu1 %v10061_v50  ;;  %9437 = vmatmul.mubr.msk.f32.gmra.mxu0 %vm541_vm3, %v12307_v28  ;;  %v13892_v21 = vpop.f32.mrf.mxu0 }
 0x175   : > { %v10065_v26 = vpop.eup %10064  ;;  %10090 = vtanh.f32 %v13712_v11  ;;  %9463 = vmatmul.mubr.msk.f32.gmra.mxu1 %vm541_vm3, %v12307_v28  ;;  %2845 = vmatpush1.msra.mxu0 %v10063_v39  ;;  %v13896_v9 = vpop.f32.mrf.mxu1 }
 0x176   : > { %v10067_v32 = vpop.eup %10066  ;;  %10092 = vtanh.f32 %v13727_v7  ;;  %3054 = vmatpush1.msra.mxu1 %v10065_v26  ;;  %2846 = vmatprep.subr.mxu0 %v13690_v63  ;;  %v13900_v60 = vpop.f32.mrf.mxu0  ;;  %v20483_v26 = vld [vmem:[#allocation30_spill] sm:$0xff] }
 0x177   : > { %v10069_v57 = vpop.eup %10068  ;;  %10094 = vtanh.f32 %v13749_v25  ;;  %3055 = vmatprep.subr.mxu1 %v10067_v32  ;;  %2847 = vmatpush1.msra.mxu0 %v13683_v17  ;;  %v13904_v11 = vpop.f32.mrf.mxu1  ;;  %v12308_v17 = vld [vmem:[%s20297_s2 + $0x30] sm:$0xff] }
 0x178   : > { %v10071_v10 = vpop.eup %10070  ;;  %10096 = vtanh.f32 %v13753_v56  ;;  %3056 = vmatpush1.msra.mxu1 %v10069_v57  ;;  %2001 = vmatprep.mubr.f32.mxu0 %v20462_v15  ;;  %v13908_v7 = vpop.f32.mrf.mxu0 }
 0x179   : > { %v10073_v38 = vpop.eup %10072  ;;  %10098 = vtanh.f32 %v13738_v13  ;;  %2210 = vmatprep.mubr.f32.mxu1 %v20462_v15  ;;  %2848 = vmatprep.subr.mxu0 %v10071_v10  ;;  %v13912_v25 = vpop.f32.mrf.mxu1  ;;  %v20484_v10 = vld [vmem:[#allocation37_spill] sm:$0xff] }
 0x17a   : > { %v10075_v63 = vpop.eup %10074  ;;  %10100 = vtanh.f32 %v13743_v22  ;;  %3057 = vmatprep.subr.mxu1 %v10073_v38  ;;  %9438 = vmatmul.mubr.msk.f32.gmra.mxu0 %vm541_vm3, %v12308_v17  ;;  %v13919_v56 = vpop.f32.mrf.mxu0  ;;  %v20485_v38 = vld [vmem:[#allocation31_spill] sm:$0xff] }
 0x17b   : > { %v10077_v35 = vpop.eup %10076  ;;  %10102 = vtanh.f32 %v13733_v27  ;;  %9464 = vmatmul.mubr.msk.f32.gmra.mxu1 %vm541_vm3, %v12308_v17  ;;  %2849 = vmatpush1.msra.mxu0 %v10075_v63  ;;  %v13923_v13 = vpop.f32.mrf.mxu1  ;;  %v20487_v17 = vld [vmem:[#allocation38_spill] sm:$0xff] }
 0x17c   : > { %v13925_v50 = vpop.eup %10078  ;;  %10104 = vtanh.f32 %v13719_v8  ;;  %3058 = vmatpush1.msra.mxu1 %v10077_v35  ;;  %2850 = vmatprep.subr.mxu0 %v13672_v44  ;;  %v13929_v22 = vpop.f32.mrf.mxu0  ;;  %v20488_v35 = vld [vmem:[#allocation28_spill] sm:$0xff] }
 0x17d   : > { %v13931_v39 = vpop.eup %10080  ;;  %10106 = vtanh.f32 %v13701_v1  ;;  %3059 = vmatprep.subr.mxu1 %v13678_v3  ;;  %2851 = vmatpush1.msra.mxu0 %v13657_v61  ;;  %v13936_v27 = vpop.f32.mrf.mxu1 }
 0x17e   : > { %v13938_v28 = vpop.eup %10082  ;;  %10108 = vtanh.f32 %v13707_v37  ;;  %3060 = vmatpush1.msra.mxu1 %v13664_v58  ;;  %2007 = vmatprep.mubr.f32.mxu0 %v20462_v15  ;;  %v13943_v8 = vpop.f32.mrf.mxu0  ;;  %v12309_v58 = vld [vmem:[%s20297_s2 + $0x38] sm:$0xff]  ;;  %v20482_v37 = vld [vmem:[#allocation33_spill] sm:$0xff] }
 0x17f   : > { %v13945_v44 = vpop.eup %10084  ;;  %10110 = vtanh.f32 %v13686_v6  ;;  %2216 = vmatprep.mubr.f32.mxu1 %v20462_v15  ;;  %2852 = vmatprep.subr.mxu0 %v13645_v49  ;;  %v13950_v61 = vpop.f32.mrf.mxu1 }
 0x180   : > { %v13952_v3 = vpop.eup %10086  ;;  %10112 = vtanh.f32 %v13693_v0  ;;  %3061 = vmatprep.subr.mxu1 %v13651_v20  ;;  %9439 = vmatmul.mubr.msk.f32.gmra.mxu0 %vm541_vm3, %v12309_v58  ;;  %v13960_v1 = vpop.f32.mrf.mxu0  ;;  %v20481_v20 = vld [vmem:[#allocation39_spill] sm:$0xff] }
 0x181   : > { %v13962_v6 = vpop.eup %10088  ;;  %10114 = vtanh.f32 %v13681_v34  ;;  %9465 = vmatmul.mubr.msk.f32.gmra.mxu1 %vm541_vm3, %v12309_v58  ;;  %2853 = vmatpush1.msra.mxu0 %v13624_v33  ;;  %v13967_v49 = vpop.f32.mrf.mxu1  ;;  %v20486_v34 = vld [vmem:[#allocation26_spill] sm:$0xff] }
 0x182   : > { %v10091_v0 = vpop.eup %10090  ;;  %10116 = vtanh.f32 %v20481_v20  ;;  %3062 = vmatpush1.msra.mxu1 %v20482_v37  ;;  %2854 = vmatprep.subr.mxu0 %v20483_v26  ;;  %v13972_v32 = vpop.f32.mrf.mxu0  ;;  %v20489_v37 = vld [vmem:[#allocation35_spill] sm:$0xff] }
 0x183   : > { %v10093_v57 = vpop.eup %10092  ;;  %10118 = vtanh.f32 %v20484_v10  ;;  %3063 = vmatprep.subr.mxu1 %v20485_v38  ;;  %2855 = vmatpush1.msra.mxu0 %v20486_v34  ;;  %v13977_v63 = vpop.f32.mrf.mxu1  ;;  %v20490_v38 = vld [vmem:[#allocation36_spill] sm:$0xff]  ;;  %v12310_v34 = vld [vmem:[%s20297_s2 + $0x40] sm:$0xff] }
 0x184   : > { %v10095_v33 = vpop.eup %10094  ;;  %10120 = vtanh.f32 %v20487_v17  ;;  %3064 = vmatpush1.msra.mxu1 %v20488_v35  ;;  %2013 = vmatprep.mubr.f32.mxu0 %v20462_v15  ;;  %v13982_v58 = vpop.f32.mrf.mxu0 }
 0x185   : > { %v10097_v20 = vpop.eup %10096  ;;  %10122 = vtanh.f32 %v20489_v37  ;;  %2222 = vmatprep.mubr.f32.mxu1 %v20462_v15  ;;  %2872 = vmatprep.subr.mxu0 %v10095_v33  ;;  %v13986_v26 = vpop.f32.mrf.mxu1 }
 0x186   : > { %v10099_v10 = vpop.eup %10098  ;;  %10124 = vtanh.f32 %v20490_v38  ;;  %3081 = vmatprep.subr.mxu1 %v10097_v20  ;;  %9440 = vmatmul.mubr.msk.f32.gmra.mxu0 %vm541_vm3, %v12310_v34  ;;  %v13993_v17 = vpop.f32.mrf.mxu0 }
 0x187   : > { %v10101_v35 = vpop.eup %10100  ;;  %10126 = vtanh.f32 %v20491_v45  ;;  %9466 = vmatmul.mubr.msk.f32.gmra.mxu1 %vm541_vm3, %v12310_v34  ;;  %2873 = vmatpush2.msra.mxu0 %v10099_v10  ;;  %v13997_v33 = vpop.f32.mrf.mxu1  ;;  %v20495_v34 = vld [vmem:[#allocation24_spill] sm:$0xff] }
 0x188   : > { %v10103_v37 = vpop.eup %10102  ;;  %10128 = vtanh.f32 %v20492_v23  ;;  %3082 = vmatpush2.msra.mxu1 %v10101_v35  ;;  %2874 = vmatprep.subr.mxu0 %v10093_v57  ;;  %v14000_v20 = vpop.f32.mrf.mxu0 }
 0x189   : > { %v10105_v38 = vpop.eup %10104  ;;  %10130 = vtanh.f32 %v20493_v43  ;;  %3083 = vmatprep.subr.mxu1 %v10103_v37  ;;  %2875 = vmatpush2.msra.mxu0 %v10091_v0  ;;  %v14003_v47 = vpop.f32.mrf.mxu1  ;;  %v20496_v0 = vld [vmem:[#allocation25_spill] sm:$0xff] }
 0x18a   : > { %v10107_v45 = vpop.eup %10106  ;;  %10132 = vtanh.f32 %v20494_v24  ;;  %3084 = vmatpush2.msra.mxu1 %v10105_v38  ;;  %2019 = vmatprep.mubr.f32.mxu0 %v20462_v15  ;;  %v14007_v10 = vpop.f32.mrf.mxu0  ;;  %v12311_v24 = vld [vmem:[%s20297_s2 + $0x48] sm:$0xff]  ;;  %v20497_v38 = vld [vmem:[#allocation23_spill] sm:$0xff] }
 0x18b   : > { %v10109_v23 = vpop.eup %10108  ;;  %10134 = vtanh.f32 %v20495_v34  ;;  %2228 = vmatprep.mubr.f32.mxu1 %v20462_v15  ;;  %2876 = vmatprep.subr.mxu0 %v10107_v45  ;;  %v14011_v57 = vpop.f32.mrf.mxu1 }
 0x18c   : > { %v10111_v43 = vpop.eup %10110  ;;  %10136 = vtanh.f32 %v20496_v0  ;;  %3085 = vmatprep.subr.mxu1 %v10109_v23  ;;  %9441 = vmatmul.mubr.msk.f32.gmra.mxu0 %vm541_vm3, %v12311_v24  ;;  %v14018_v35 = vpop.f32.mrf.mxu0 }
 0x18d   : > { %v10113_v37 = vpop.eup %10112  ;;  %10138 = vtanh.f32 %v20497_v38  ;;  %9467 = vmatmul.mubr.msk.f32.gmra.mxu1 %vm541_vm3, %v12311_v24  ;;  %2877 = vmatpush2.msra.mxu0 %v10111_v43  ;;  %v14022_v45 = vpop.f32.mrf.mxu1 }
 0x18e   : > { %v10115_v34 = vpop.eup %10114  ;;  %10140 = vtanh.f32 %v20498_v36  ;;  %3086 = vmatpush2.msra.mxu1 %v10113_v37  ;;  %2878 = vmatprep.subr.mxu0 %v13962_v6  ;;  %v14026_v23 = vpop.f32.mrf.mxu0 }
 0x18f   : > { %v10117_v0 = vpop.eup %10116  ;;  %3087 = vmatprep.subr.mxu1 %v10115_v34  ;;  %2879 = vmatpush2.msra.mxu0 %v13952_v3  ;;  %v14029_v31 = vpop.f32.mrf.mxu1  ;;  %v12312_v3 = vld [vmem:[%s20297_s2 + $0x50] sm:$0xff] }
 0x190   : > { %v10119_v38 = vpop.eup %10118  ;;  %3088 = vmatpush2.msra.mxu1 %v10117_v0  ;;  %2025 = vmatprep.mubr.f32.mxu0 %v20462_v15  ;;  %v14032_v43 = vpop.f32.mrf.mxu0 }
 0x191   : > { %v10121_v24 = vpop.eup %10120  ;;  %2234 = vmatprep.mubr.f32.mxu1 %v20462_v15  ;;  %2880 = vmatprep.subr.mxu0 %v10119_v38  ;;  %v14035_v36 = vpop.f32.mrf.mxu1 }
 0x192   : > { %v10123_v6 = vpop.eup %10122  ;;  %3089 = vmatprep.subr.mxu1 %v10121_v24  ;;  %9442 = vmatmul.mubr.msk.f32.gmra.mxu0 %vm541_vm3, %v12312_v3  ;;  %v14041_v37 = vpop.f32.mrf.mxu0 }
 0x193   : > { %v10125_v34 = vpop.eup %10124  ;;  %9468 = vmatmul.mubr.msk.f32.gmra.mxu1 %vm541_vm3, %v12312_v3  ;;  %2881 = vmatpush2.msra.mxu0 %v10123_v6  ;;  %v14044_v0 = vpop.f32.mrf.mxu1 }
 0x194   : > { %v10127_v14 = vpop.eup %10126  ;;  %3090 = vmatpush2.msra.mxu1 %v10125_v34  ;;  %2882 = vmatprep.subr.mxu0 %v13945_v44  ;;  %v1223_v38 = vpop.f32.mrf.mxu0 }
 0x195   : > { %v10129_v24 = vpop.eup %10128  ;;  %3091 = vmatprep.subr.mxu1 %v10127_v14  ;;  %2883 = vmatpush2.msra.mxu0 %v13938_v28  ;;  %10142 = vtanh.f32 %v1223_v38  ;;  %v1432_v51 = vpop.f32.mrf.mxu1  ;;  %v12313_v14 = vld [vmem:[%s20297_s2 + $0x58] sm:$0xff] }
 0x196   : > { %v10131_v62 = vpop.eup %10130  ;;  %3092 = vmatpush2.msra.mxu1 %v10129_v24  ;;  %2031 = vmatprep.mubr.f32.mxu0 %v20462_v15  ;;  %10144 = vtanh.f32 %v1432_v51  ;;  %v14049_v3 = vpop.f32.mrf.mxu0 }
 0x197   : > { %v10133_v6 = vpop.eup %10132  ;;  %2240 = vmatprep.mubr.f32.mxu1 %v20462_v15  ;;  %2884 = vmatprep.subr.mxu0 %v10131_v62  ;;  %v14052_v34 = vpop.f32.mrf.mxu1 }
 0x198   : > { %20499 = vst [vmem:[#allocation15_spill] sm:$0xff] %v14052_v34  ;;  %v10135_v44 = vpop.eup %10134  ;;  %3093 = vmatprep.subr.mxu1 %v10133_v6  ;;  %9443 = vmatmul.mubr.msk.f32.gmra.mxu0 %vm541_vm3, %v12313_v14  ;;  %v14058_v28 = vpop.f32.mrf.mxu0 }
 0x199   : > { %20500 = vst [vmem:[#allocation16_spill] sm:$0xff] %v14058_v28  ;;  %v10137_v38 = vpop.eup %10136  ;;  %9469 = vmatmul.mubr.msk.f32.gmra.mxu1 %vm541_vm3, %v12313_v14  ;;  %2885 = vmatpush2.msra.mxu0 %v10135_v44  ;;  %v14061_v51 = vpop.f32.mrf.mxu1  ;;  %v12314_v44 = vld [vmem:[%s20297_s2 + $0x60] sm:$0xff] }
 0x19a   : > { %20501 = vst [vmem:[#allocation39_spill] sm:$0xff] %v14061_v51  ;;  %v10139_v24 = vpop.eup %10138  ;;  %3094 = vmatpush2.msra.mxu1 %v10137_v38  ;;  %2886 = vmatprep.subr.mxu0 %v13931_v39  ;;  %v14064_v62 = vpop.f32.mrf.mxu0 }
 0x19b   : > { %20502 = vst [vmem:[#allocation33_spill] sm:$0xff] %v14064_v62  ;;  %v10141_v6 = vpop.eup %10140  ;;  %3095 = vmatprep.subr.mxu1 %v10139_v24  ;;  %2887 = vmatpush2.msra.mxu0 %v13925_v50  ;;  %v14067_v34 = vpop.f32.mrf.mxu1  ;;  %v12315_v24 = vld [vmem:[%s20297_s2 + $0x68] sm:$0xff] }
 0x19c   : > { %20503 = vst [vmem:[#allocation30_spill] sm:$0xff] %v14067_v34  ;;  %3096 = vmatpush2.msra.mxu1 %v10141_v6  ;;  %2037 = vmatprep.mubr.f32.mxu0 %v20462_v15  ;;  %v14070_v28 = vpop.f32.mrf.mxu0 }
 0x19d   : > { %20504 = vst [vmem:[#allocation37_spill] sm:$0xff] %v14070_v28  ;;  %2246 = vmatprep.mubr.f32.mxu1 %v20462_v15  ;;  %9444 = vmatmul.mubr.msk.f32.gmra.mxu0 %vm541_vm3, %v12314_v44  ;;  %v14077_v39 = vpop.f32.mrf.mxu1  ;;  %v12316_v28 = vld [vmem:[%s20297_s2 + $0x70] sm:$0xff] }
 0x19e   : > { %20505 = vst [vmem:[#allocation31_spill] sm:$0xff] %v14077_v39  ;;  %9470 = vmatmul.mubr.msk.f32.gmra.mxu1 %vm541_vm3, %v12314_v44  ;;  %2043 = vmatprep.mubr.f32.mxu0 %v20462_v15  ;;  %v14081_v50 = vpop.f32.mrf.mxu0 }
 0x19f   : > { %2252 = vmatprep.mubr.f32.mxu1 %v20462_v15  ;;  %v14084_v14 = vpop.f32.mrf.mxu1 }
 0x1a0   : > { %20506 = vst [vmem:[#allocation26_spill] sm:$0xff] %v14084_v14  ;;  %v14086_v38 = vpop.f32.mrf.mxu0 }
 0x1a1   : > { %9445 = vmatmul.mubr.msk.f32.gmra.mxu0 %vm541_vm3, %v12315_v24  ;;  %v14092_v6 = vpop.f32.mrf.mxu1 }
 0x1a2   : > { %20507 = vst [vmem:[#allocation38_spill] sm:$0xff] %v14092_v6  ;;  %v10143_v51 = vpop.eup %10142  ;;  %9471 = vmatmul.mubr.msk.f32.gmra.mxu1 %vm541_vm3, %v12315_v24  ;;  %2049 = vmatprep.mubr.f32.mxu0 %v20462_v15  ;;  %v14096_v44 = vpop.f32.mrf.mxu0 }
 0x1a3   : > { %20508 = vst [vmem:[#allocation28_spill] sm:$0xff] %v14096_v44  ;;  %v10145_v34 = vpop.eup %10144  ;;  %2258 = vmatprep.mubr.f32.mxu1 %v20462_v15  ;;  %v14099_v62 = vpop.f32.mrf.mxu1  ;;  %3242 = vmatprep.subr.mxu0 %v10143_v51 }
 0x1a4   : > { %20509 = vst [vmem:[#allocation35_spill] sm:$0xff] %v14099_v62  ;;  %3451 = vmatprep.subr.mxu1 %v10145_v34  ;;  %v14101_v39 = vpop.f32.mrf.mxu0  ;;  %v20512_v34 = vld [vmem:[#allocation40_spill] sm:$0xff]  ;;  %v12317_v62 = vld [vmem:[%s20297_s2 + $0x78] sm:$0xff] }
 0x1a5   : > { %20510 = vst [vmem:[#allocation36_spill] sm:$0xff] %v14101_v39  ;;  %9446 = vmatmul.mubr.msk.f32.gmra.mxu0 %vm541_vm3, %v12316_v28  ;;  %v14107_v24 = vpop.f32.mrf.mxu1  ;;  %10146 = vtanh.f32 %v20512_v34 }
 0x1a6   : > { %20511 = vst [vmem:[#allocation34_spill] sm:$0xff] %v14107_v24  ;;  %9472 = vmatmul.mubr.msk.f32.gmra.mxu1 %vm541_vm3, %v12316_v28  ;;  %2055 = vmatprep.mubr.f32.mxu0 %v20462_v15  ;;  %v14111_v14 = vpop.f32.mrf.mxu0  ;;  %10148 = vtanh.f32 %v13763_v30 }
 0x1a7   : > { %2264 = vmatprep.mubr.f32.mxu1 %v20462_v15  ;;  %v14114_v51 = vpop.f32.mrf.mxu1  ;;  %10150 = vtanh.f32 %v13767_v19  ;;  %v12318_v19 = vld [vmem:[%s20297_s2 + $0x80] sm:$0xff] }
 0x1a8   : > { %v14117_v6 = vpop.f32.mrf.mxu0  ;;  %10152 = vtanh.f32 %v13770_v42 }
 0x1a9   : > { %9447 = vmatmul.mubr.msk.f32.gmra.mxu0 %vm541_vm3, %v12317_v62  ;;  %v14124_v28 = vpop.f32.mrf.mxu1  ;;  %10154 = vtanh.f32 %v13774_v59 }
 0x1aa   : > { %9473 = vmatmul.mubr.msk.f32.gmra.mxu1 %vm541_vm3, %v12317_v62  ;;  %2061 = vmatprep.mubr.f32.mxu0 %v20462_v15  ;;  %v14129_v44 = vpop.f32.mrf.mxu0  ;;  %10156 = vtanh.f32 %v13778_v40 }
 0x1ab   : > { %2270 = vmatprep.mubr.f32.mxu1 %v20462_v15  ;;  %v14133_v30 = vpop.f32.mrf.mxu1  ;;  %10158 = vtanh.f32 %v13785_v16  ;;  %v12319_v16 = vld [vmem:[%s20297_s2 + $0x88] sm:$0xff] }
 0x1ac   : > { %v14136_v34 = vpop.f32.mrf.mxu0  ;;  %10160 = vtanh.f32 %v13789_v52 }
 0x1ad   : > { %9448 = vmatmul.mubr.msk.f32.gmra.mxu0 %vm541_vm3, %v12318_v19  ;;  %v14143_v62 = vpop.f32.mrf.mxu1  ;;  %10162 = vtanh.f32 %v13792_v53 }
 0x1ae   : > { %9474 = vmatmul.mubr.msk.f32.gmra.mxu1 %vm541_vm3, %v12318_v19  ;;  %2067 = vmatprep.mubr.f32.mxu0 %v20462_v15  ;;  %v14148_v42 = vpop.f32.mrf.mxu0  ;;  %10164 = vtanh.f32 %v13796_v54 }
 0x1af   : > { %2276 = vmatprep.mubr.f32.mxu1 %v20462_v15  ;;  %v14152_v59 = vpop.f32.mrf.mxu1  ;;  %10166 = vtanh.f32 %v13800_v55  ;;  %v12320_v55 = vld [vmem:[%s20297_s2 + $0x90] sm:$0xff] }
 0x1b0   : > { %v14155_v40 = vpop.f32.mrf.mxu0  ;;  %10168 = vtanh.f32 %v13804_v46 }
 0x1b1   : > { %9449 = vmatmul.mubr.msk.f32.gmra.mxu0 %vm541_vm3, %v12319_v16  ;;  %v14162_v19 = vpop.f32.mrf.mxu1  ;;  %10170 = vtanh.f32 %v13827_v41 }
 0x1b2   : > { %9475 = vmatmul.mubr.msk.f32.gmra.mxu1 %vm541_vm3, %v12319_v16  ;;  %2073 = vmatprep.mubr.f32.mxu0 %v20462_v15  ;;  %v14167_v52 = vpop.f32.mrf.mxu0  ;;  %v14176_v24 = vpop.eup %10146  ;;  %10172 = vtanh.f32 %v13838_v5 }
 0x1b3   : > { %2282 = vmatprep.mubr.f32.mxu1 %v20462_v15  ;;  %v14171_v53 = vpop.f32.mrf.mxu1  ;;  %20513 = vst [vmem:[#allocation32_spill] sm:$0xff] %v14176_v24  ;;  %v14185_v46 = vpop.eup %10148  ;;  %10174 = vtanh.f32 %v13865_v48 }
 0x1b4   : > { %v14174_v54 = vpop.f32.mrf.mxu0  ;;  %20514 = vst [vmem:[#allocation27_spill] sm:$0xff] %v14185_v46  ;;  %v14192_v24 = vpop.eup %10150  ;;  %10176 = vtanh.f32 %v13873_v18 }
 0x1b5   : > { %9450 = vmatmul.mubr.msk.f32.gmra.mxu0 %vm541_vm3, %v12320_v55  ;;  %v14183_v16 = vpop.f32.mrf.mxu1  ;;  %20516 = vst [vmem:[#allocation24_spill] sm:$0xff] %v14192_v24  ;;  %v14198_v39 = vpop.eup %10152  ;;  %10178 = vtanh.f32 %v13900_v60 }
 0x1b6   : > { %9476 = vmatmul.mubr.msk.f32.gmra.mxu1 %vm541_vm3, %v12320_v55  ;;  %2079 = vmatprep.mubr.f32.mxu0 %v20462_v15  ;;  %v14190_v41 = vpop.f32.mrf.mxu0  ;;  %20518 = vst [vmem:[#allocation23_spill] sm:$0xff] %v14198_v39  ;;  %v14203_v48 = vpop.eup %10154  ;;  %10180 = vtanh.f32 %v13908_v7  ;;  %v12321_v55 = vld [vmem:[%s20297_s2 + $0x98] sm:$0xff] }
 0x1b7   : > { %20515 = vst [vmem:[#allocation29_spill] sm:$0xff] %v14190_v41  ;;  %2288 = vmatprep.mubr.f32.mxu1 %v20462_v15  ;;  %v14196_v5 = vpop.f32.mrf.mxu1  ;;  %v14212_v41 = vpop.eup %10156  ;;  %10182 = vtanh.f32 %v13943_v8 }
 0x1b8   : > { %20517 = vst [vmem:[#allocation25_spill] sm:$0xff] %v14196_v5  ;;  %v14201_v46 = vpop.f32.mrf.mxu0  ;;  %10184 = vtanh.f32 %v13960_v1 }
 0x1b9   : > { %20519 = vst [vmem:[#allocation22_spill] sm:$0xff] %v14201_v46  ;;  %9451 = vmatmul.mubr.msk.f32.gmra.mxu0 %vm541_vm3, %v12321_v55  ;;  %v14210_v18 = vpop.f32.mrf.mxu1  ;;  %v14219_v46 = vpop.eup %10158  ;;  %10186 = vtanh.f32 %v13993_v17 }
 0x1ba   : > { %20520 = vst [vmem:[#allocation40_spill] sm:$0xff] %v14210_v18  ;;  %9477 = vmatmul.mubr.msk.f32.gmra.mxu1 %vm541_vm3, %v12321_v55  ;;  %2085 = vmatprep.mubr.f32.mxu0 %v20462_v15  ;;  %v14217_v60 = vpop.f32.mrf.mxu0  ;;  %v14225_v5 = vpop.eup %10160  ;;  %10188 = vtanh.f32 %v14000_v20  ;;  %v12322_v55 = vld [vmem:[%s20297_s2 + $0xa0] sm:$0xff] }
 0x1bb   : > { %20521 = vst [vmem:[#allocation46_spill] sm:$0xff] %v14217_v60  ;;  %2294 = vmatprep.mubr.f32.mxu1 %v20462_v15  ;;  %v14223_v7 = vpop.f32.mrf.mxu1  ;;  %v14230_v8 = vpop.eup %10162  ;;  %10190 = vtanh.f32 %v14026_v23 }
 0x1bc   : > { %20522 = vst [vmem:[#allocation47_spill] sm:$0xff] %v14223_v7  ;;  %v14228_v18 = vpop.f32.mrf.mxu0  ;;  %v14239_v60 = vpop.eup %10164  ;;  %10192 = vtanh.f32 %v14032_v43 }
 0x1bd   : > { %20523 = vst [vmem:[#allocation48_spill] sm:$0xff] %v14228_v18  ;;  %9452 = vmatmul.mubr.msk.f32.gmra.mxu0 %vm541_vm3, %v12322_v55  ;;  %v14237_v1 = vpop.f32.mrf.mxu1  ;;  %v14246_v18 = vpop.eup %10166  ;;  %10194 = vtanh.f32 %v14041_v37 }
 0x1be   : > { %20524 = vst [vmem:[#allocation49_spill] sm:$0xff] %v14237_v1  ;;  %9478 = vmatmul.mubr.msk.f32.gmra.mxu1 %vm541_vm3, %v12322_v55  ;;  %2091 = vmatprep.mubr.f32.mxu0 %v20462_v15  ;;  %v14244_v17 = vpop.f32.mrf.mxu0  ;;  %v14252_v7 = vpop.eup %10168  ;;  %10196 = vtanh.f32 %v14044_v0  ;;  %v12323_v55 = vld [vmem:[%s20297_s2 + $0xa8] sm:$0xff] }
 0x1bf   : > { %20525 = vst [vmem:[#allocation50_spill] sm:$0xff] %v14244_v17  ;;  %2300 = vmatprep.mubr.f32.mxu1 %v20462_v15  ;;  %v14250_v20 = vpop.f32.mrf.mxu1  ;;  %v14257_v23 = vpop.eup %10170  ;;  %10198 = vtanh.f32 %v14035_v36 }
 0x1c0   : > { %20526 = vst [vmem:[#allocation51_spill] sm:$0xff] %v14250_v20  ;;  %v14255_v1 = vpop.f32.mrf.mxu0  ;;  %v14266_v17 = vpop.eup %10172  ;;  %10200 = vtanh.f32 %v14029_v31 }
 0x1c1   : > { %20527 = vst [vmem:[#allocation52_spill] sm:$0xff] %v14255_v1  ;;  %9453 = vmatmul.mubr.msk.f32.gmra.mxu0 %vm541_vm3, %v12323_v55  ;;  %v14264_v43 = vpop.f32.mrf.mxu1  ;;  %v14273_v1 = vpop.eup %10174  ;;  %10202 = vtanh.f32 %v14018_v35 }
 0x1c2   : > { %20528 = vst [vmem:[#allocation53_spill] sm:$0xff] %v14264_v43  ;;  %9479 = vmatmul.mubr.msk.f32.gmra.mxu1 %vm541_vm3, %v12323_v55  ;;  %2097 = vmatprep.mubr.f32.mxu0 %v20462_v15  ;;  %v14271_v37 = vpop.f32.mrf.mxu0  ;;  %v14279_v20 = vpop.eup %10176  ;;  %10204 = vtanh.f32 %v14022_v45  ;;  %v12324_v55 = vld [vmem:[%s20297_s2 + $0xb0] sm:$0xff]  ;;  %v2704_v45 = vld [vmem:[%s20298_s3 + $0x8] sm:$0xff] }
 0x1c3   : > { %20529 = vst [vmem:[#allocation54_spill] sm:$0xff] %v14271_v37  ;;  %2306 = vmatprep.mubr.f32.mxu1 %v20462_v15  ;;  %v14277_v0 = vpop.f32.mrf.mxu1  ;;  %v14284_v36 = vpop.eup %10178  ;;  %10206 = vtanh.f32 %v14007_v10 }
 0x1c4   : > { %20530 = vst [vmem:[#allocation55_spill] sm:$0xff] %v14277_v0  ;;  %v14282_v43 = vpop.f32.mrf.mxu0  ;;  %v14293_v37 = vpop.eup %10180  ;;  %10208 = vtanh.f32 %v14011_v57 }
 0x1c5   : > { %20531 = vst [vmem:[#allocation56_spill] sm:$0xff] %v14282_v43  ;;  %9454 = vmatmul.mubr.msk.f32.gmra.mxu0 %vm541_vm3, %v12324_v55  ;;  %v14291_v31 = vpop.f32.mrf.mxu1  ;;  %v14300_v0 = vpop.eup %10182  ;;  %10210 = vtanh.f32 %v14003_v47  ;;  %v2703_v47 = vld [vmem:[%s20298_s3] sm:$0xff] }
 0x1c6   : > { %20532 = vst [vmem:[#allocation57_spill] sm:$0xff] %v14291_v31  ;;  %9480 = vmatmul.mubr.msk.f32.gmra.mxu1 %vm541_vm3, %v12324_v55  ;;  %2103 = vmatprep.mubr.f32.mxu0 %v20462_v15  ;;  %v14298_v35 = vpop.f32.mrf.mxu0  ;;  %v14309_v10 = vpop.eup %10184  ;;  %10212 = vtanh.f32 %v13997_v33 }
 0x1c7   : > { %20533 = vst [vmem:[#allocation58_spill] sm:$0xff] %v14298_v35  ;;  %2312 = vmatprep.mubr.f32.mxu1 %v20462_v15  ;;  %v14307_v31 = vpop.f32.mrf.mxu1  ;;  %v14314_v43 = vpop.eup %10186  ;;  %v12325_v15 = vld [vmem:[%s20297_s2 + $0xb8] sm:$0xff]  ;;  %10214 = vtanh.f32 %v13982_v58 }
 0x1c8   : > { %20534 = vst [vmem:[#allocation59_spill] sm:$0xff] %v14307_v31  ;;  %v14312_v55 = vpop.f32.mrf.mxu0  ;;  %v10189_v35 = vpop.eup %10188  ;;  %10216 = vtanh.f32 %v13986_v26  ;;  %v2706_v26 = vld [vmem:[%s20298_s3 + $0x18] sm:$0xff] }
 0x1c9   : > { %20535 = vst [vmem:[#allocation60_spill] sm:$0xff] %v14312_v55  ;;  %9455 = vmatmul.mubr.msk.f32.gmra.mxu0 %vm541_vm3, %v12325_v15  ;;  %v14321_v57 = vpop.f32.mrf.mxu1  ;;  %v10191_v31 = vpop.eup %10190  ;;  %10218 = vtanh.f32 %v13972_v32 }
 0x1ca   : > { %20536 = vst [vmem:[#allocation61_spill] sm:$0xff] %v14321_v57  ;;  %9481 = vmatmul.mubr.msk.f32.gmra.mxu1 %vm541_vm3, %v12325_v15  ;;  %9482 = vmatprep.mubr.msk.f32.mxu0 %vm2751_vm4, %v2704_v45  ;;  %v14329_v33 = vpop.f32.mrf.mxu0  ;;  %v10193_v57 = vpop.eup %10192  ;;  %10220 = vtanh.f32 %v13977_v63 }
 0x1cb   : > { %20537 = vst [vmem:[#allocation62_spill] sm:$0xff] %v14329_v33  ;;  %9506 = vmatprep.mubr.msk.f32.mxu1 %vm2751_vm4, %v2704_v45  ;;  %v14333_v55 = vpop.f32.mrf.mxu1  ;;  %v10195_v15 = vpop.eup %10194  ;;  %10222 = vtanh.f32 %v13967_v49  ;;  %v2705_v49 = vld [vmem:[%s20298_s3 + $0x10] sm:$0xff]  ;;  %v20547_v33 = vld [vmem:[#allocation43_spill] sm:$0xff] }
 0x1cc   : > { %20538 = vst [vmem:[#allocation63_spill] sm:$0xff] %v14333_v55  ;;  %v14336_v58 = vpop.f32.mrf.mxu0  ;;  %v10197_v24 = vpop.eup %10196  ;;  %10224 = vtanh.f32 %v13950_v61 }
 0x1cd   : > { %20539 = vst [vmem:[#allocation64_spill] sm:$0xff] %v14336_v58  ;;  %2889 = vmatmul.mubr.f32.vlgmr.msra.gmra.mxu0 %v2703_v47  ;;  %v14339_v39 = vpop.f32.mrf.mxu1  ;;  %v10199_v32 = vpop.eup %10198  ;;  %10226 = vtanh.f32 %v13929_v22 }
 0x1ce   : > { %20540 = vst [vmem:[#allocation65_spill] sm:$0xff] %v14339_v39  ;;  %3098 = vmatmul.mubr.f32.vlgmr.msra.gmra.mxu1 %v2703_v47  ;;  %3243 = vmatpush1.msra.mxu0 %v10195_v15  ;;  %v14345_v45 = vpop.f32.mrf.mxu0  ;;  %v10201_v55 = vpop.eup %10200  ;;  %10228 = vtanh.f32 %v13936_v27  ;;  %v20548_v39 = vld [vmem:[#allocation44_spill] sm:$0xff] }
 0x1cf   : > { %3452 = vmatpush1.msra.mxu1 %v10197_v24  ;;  %3244 = vmatprep.subr.mxu0 %v10193_v57  ;;  %v14348_v63 = vpop.f32.mrf.mxu1  ;;  %v10203_v15 = vpop.eup %10202  ;;  %10230 = vtanh.f32 %v13919_v56  ;;  %v2708_v56 = vld [vmem:[%s20298_s3 + $0x28] sm:$0xff] }
 0x1d0   : > { %3453 = vmatprep.subr.mxu1 %v10199_v32  ;;  %3245 = vmatpush1.msra.mxu0 %v10191_v31  ;;  %v14354_v47 = vpop.f32.mrf.mxu0  ;;  %v10205_v24 = vpop.eup %10204  ;;  %10232 = vtanh.f32 %v13923_v13 }
 0x1d1   : > { %3454 = vmatpush1.msra.mxu1 %v10201_v55  ;;  %9483 = vmatprep.mubr.msk.f32.mxu0 %vm2751_vm4, %v2706_v26  ;;  %v14358_v61 = vpop.f32.mrf.mxu1  ;;  %v10207_v31 = vpop.eup %10206  ;;  %10234 = vtanh.f32 %v13912_v25  ;;  %v2707_v25 = vld [vmem:[%s20298_s3 + $0x20] sm:$0xff] }
 0x1d2   : > { %9507 = vmatprep.mubr.msk.f32.mxu1 %vm2751_vm4, %v2706_v26  ;;  %3246 = vmatprep.subr.mxu0 %v10203_v15  ;;  %v14362_v22 = vpop.f32.mrf.mxu0  ;;  %v10209_v27 = vpop.eup %10208  ;;  %10236 = vtanh.f32 %v13904_v11 }
 0x1d3   : > { %3455 = vmatprep.subr.mxu1 %v10205_v24  ;;  %2895 = vmatmul.mubr.f32.gmra.mxu0 %v2705_v49  ;;  %v14365_v57 = vpop.f32.mrf.mxu1  ;;  %v10211_v26 = vpop.eup %10210  ;;  %10238 = vtanh.f32 %v13892_v21 }
 0x1d4   : > { %3104 = vmatmul.mubr.f32.gmra.mxu1 %v2705_v49  ;;  %3247 = vmatpush1.msra.mxu0 %v10207_v31  ;;  %v14371_v55 = vpop.f32.mrf.mxu0  ;;  %v10213_v32 = vpop.eup %10212  ;;  %10240 = vtanh.f32 %v13896_v9 }
 0x1d5   : > { %3456 = vmatpush1.msra.mxu1 %v10209_v27  ;;  %3248 = vmatprep.subr.mxu0 %v10189_v35  ;;  %v14374_v13 = vpop.f32.mrf.mxu1  ;;  %v10215_v15 = vpop.eup %10214  ;;  %10242 = vtanh.f32 %v13881_v2  ;;  %v2710_v2 = vld [vmem:[%s20298_s3 + $0x38] sm:$0xff] }
 0x1d6   : > { %3457 = vmatprep.subr.mxu1 %v10211_v26  ;;  %3249 = vmatpush1.msra.mxu0 %v14314_v43  ;;  %v14381_v49 = vpop.f32.mrf.mxu0  ;;  %v10217_v35 = vpop.eup %10216  ;;  %10244 = vtanh.f32 %v13885_v4  ;;  %v20541_v26 = vld [vmem:[#allocation17_spill] sm:$0xff] }
 0x1d7   : > { %3458 = vmatpush1.msra.mxu1 %v10213_v32  ;;  %9484 = vmatprep.mubr.msk.f32.mxu0 %vm2751_vm4, %v2708_v56  ;;  %v14385_v11 = vpop.f32.mrf.mxu1  ;;  %v10219_v43 = vpop.eup %10218  ;;  %10246 = vtanh.f32 %v13877_v29  ;;  %v2709_v29 = vld [vmem:[%s20298_s3 + $0x30] sm:$0xff] }
 0x1d8   : > { %9508 = vmatprep.mubr.msk.f32.mxu1 %vm2751_vm4, %v2708_v56  ;;  %3250 = vmatprep.subr.mxu0 %v10215_v15  ;;  %v14389_v21 = vpop.f32.mrf.mxu0  ;;  %v10221_v9 = vpop.eup %10220  ;;  %10248 = vtanh.f32 %v13869_v12  ;;  %v20542_v15 = vld [vmem:[#allocation18_spill] sm:$0xff] }
 0x1d9   : > { %3459 = vmatprep.subr.mxu1 %v10217_v35  ;;  %2901 = vmatmul.mubr.f32.gmra.mxu0 %v2707_v25  ;;  %v14392_v24 = vpop.f32.mrf.mxu1  ;;  %v10223_v27 = vpop.eup %10222  ;;  %10250 = vtanh.f32 %v20541_v26  ;;  %v20543_v35 = vld [vmem:[#allocation20_spill] sm:$0xff]  ;;  %v20545_v26 = vld [vmem:[#allocation21_spill] sm:$0xff] }
 0x1da   : > { %3110 = vmatmul.mubr.f32.gmra.mxu1 %v2707_v25  ;;  %3251 = vmatpush1.msra.mxu0 %v10219_v43  ;;  %v14398_v31 = vpop.f32.mrf.mxu0  ;;  %v10225_v56 = vpop.eup %10224  ;;  %10252 = vtanh.f32 %v20542_v15  ;;  %v2712_v15 = vld [vmem:[%s20298_s3 + $0x48] sm:$0xff] }
 0x1db   : > { %3460 = vmatpush1.msra.mxu1 %v10221_v9  ;;  %3252 = vmatprep.subr.mxu0 %v14309_v10  ;;  %v14402_v4 = vpop.f32.mrf.mxu1  ;;  %v10227_v25 = vpop.eup %10226  ;;  %10254 = vtanh.f32 %v20543_v35  ;;  %v20544_v9 = vld [vmem:[#allocation19_spill] sm:$0xff]  ;;  %v20546_v35 = vld [vmem:[#allocation45_spill] sm:$0xff] }
 0x1dc   : > { %3461 = vmatprep.subr.mxu1 %v10223_v27  ;;  %3253 = vmatpush1.msra.mxu0 %v14300_v0  ;;  %v14409_v32 = vpop.f32.mrf.mxu0  ;;  %v10229_v10 = vpop.eup %10228  ;;  %10256 = vtanh.f32 %v20544_v9 }
 0x1dd   : > { %3462 = vmatpush1.msra.mxu1 %v10225_v56  ;;  %9485 = vmatprep.mubr.msk.f32.mxu0 %vm2751_vm4, %v2710_v2  ;;  %v14413_v12 = vpop.f32.mrf.mxu1  ;;  %v10231_v43 = vpop.eup %10230  ;;  %10258 = vtanh.f32 %v20545_v26 }
 0x1de   : > { %9509 = vmatprep.mubr.msk.f32.mxu1 %vm2751_vm4, %v2710_v2  ;;  %3254 = vmatprep.subr.mxu0 %v10227_v25  ;;  %v14417_v0 = vpop.f32.mrf.mxu0  ;;  %v10233_v56 = vpop.eup %10232  ;;  %10260 = vtanh.f32 %v20546_v35  ;;  %v20549_v35 = vld [vmem:[#allocation41_spill] sm:$0xff] }
 0x1df   : > { %3463 = vmatprep.subr.mxu1 %v10229_v10  ;;  %2907 = vmatmul.mubr.f32.gmra.mxu0 %v2709_v29  ;;  %v14420_v27 = vpop.f32.mrf.mxu1  ;;  %v10235_v25 = vpop.eup %10234  ;;  %10262 = vtanh.f32 %v20547_v33 }
 0x1e0   : > { %3116 = vmatmul.mubr.f32.gmra.mxu1 %v2709_v29  ;;  %3255 = vmatpush1.msra.mxu0 %v10231_v43  ;;  %v14426_v2 = vpop.f32.mrf.mxu0  ;;  %v10237_v9 = vpop.eup %10236  ;;  %v2711_v29 = vld [vmem:[%s20298_s3 + $0x40] sm:$0xff]  ;;  %10264 = vtanh.f32 %v20548_v39 }
 0x1e1   : > { %3464 = vmatpush1.msra.mxu1 %v10233_v56  ;;  %3256 = vmatprep.subr.mxu0 %v14293_v37  ;;  %v14430_v10 = vpop.f32.mrf.mxu1  ;;  %v10239_v26 = vpop.eup %10238  ;;  %10266 = vtanh.f32 %v20549_v35  ;;  %v20551_v35 = vld [vmem:[#allocation16_spill] sm:$0xff] }
 0x1e2   : > { %3465 = vmatprep.subr.mxu1 %v10235_v25  ;;  %3257 = vmatpush1.msra.mxu0 %v14284_v36  ;;  %v14437_v43 = vpop.f32.mrf.mxu0  ;;  %v10241_v56 = vpop.eup %10240  ;;  %v20550_v25 = vld [vmem:[#allocation42_spill] sm:$0xff] }
 0x1e3   : > { %3466 = vmatpush1.msra.mxu1 %v10237_v9  ;;  %9486 = vmatprep.mubr.msk.f32.mxu0 %vm2751_vm4, %v2712_v15  ;;  %v14441_v37 = vpop.f32.mrf.mxu1  ;;  %v10243_v33 = vpop.eup %10242  ;;  %10268 = vtanh.f32 %v20550_v25  ;;  %v2714_v9 = vld [vmem:[%s20298_s3 + $0x58] sm:$0xff] }
 0x1e4   : > { %9510 = vmatprep.mubr.msk.f32.mxu1 %vm2751_vm4, %v2712_v15  ;;  %3258 = vmatprep.subr.mxu0 %v10239_v26  ;;  %v14445_v36 = vpop.f32.mrf.mxu0  ;;  %v10245_v39 = vpop.eup %10244  ;;  %10270 = vtanh.f32 %v14049_v3  ;;  %v2713_v3 = vld [vmem:[%s20298_s3 + $0x50] sm:$0xff] }
 0x1e5   : > { %3467 = vmatprep.subr.mxu1 %v10241_v56  ;;  %2913 = vmatmul.mubr.f32.gmra.mxu0 %v2711_v29  ;;  %v14448_v58 = vpop.f32.mrf.mxu1  ;;  %v10247_v26 = vpop.eup %10246  ;;  %10272 = vtanh.f32 %v20551_v35 }
 0x1e6   : > { %3122 = vmatmul.mubr.f32.gmra.mxu1 %v2711_v29  ;;  %3259 = vmatpush1.msra.mxu0 %v10243_v33  ;;  %v14454_v15 = vpop.f32.mrf.mxu0  ;;  %v10249_v25 = vpop.eup %10248  ;;  %10274 = vtanh.f32 %v14081_v50 }
 0x1e7   : > { %3468 = vmatpush1.msra.mxu1 %v10245_v39  ;;  %3260 = vmatprep.subr.mxu0 %v14279_v20  ;;  %v14458_v56 = vpop.f32.mrf.mxu1  ;;  %v10251_v33 = vpop.eup %10250  ;;  %10276 = vtanh.f32 %v14086_v38 }
 0x1e8   : > { %3469 = vmatprep.subr.mxu1 %v10247_v26  ;;  %3261 = vmatpush1.msra.mxu0 %v14273_v1  ;;  %v14465_v29 = vpop.f32.mrf.mxu0  ;;  %v10253_v39 = vpop.eup %10252  ;;  %10278 = vtanh.f32 %v14111_v14  ;;  %v2716_v14 = vld [vmem:[%s20298_s3 + $0x68] sm:$0xff] }
 0x1e9   : > { %3470 = vmatpush1.msra.mxu1 %v10249_v25  ;;  %9487 = vmatprep.mubr.msk.f32.mxu0 %vm2751_vm4, %v2714_v9  ;;  %v14469_v20 = vpop.f32.mrf.mxu1  ;;  %v10255_v1 = vpop.eup %10254  ;;  %10280 = vtanh.f32 %v14117_v6 }
 0x1ea   : > { %9511 = vmatprep.mubr.msk.f32.mxu1 %vm2751_vm4, %v2714_v9  ;;  %3262 = vmatprep.subr.mxu0 %v10251_v33  ;;  %v14473_v50 = vpop.f32.mrf.mxu0  ;;  %v10257_v38 = vpop.eup %10256  ;;  %10282 = vtanh.f32 %v14148_v42  ;;  %v2715_v42 = vld [vmem:[%s20298_s3 + $0x60] sm:$0xff] }
 0x1eb   : > { %3471 = vmatprep.subr.mxu1 %v10253_v39  ;;  %2919 = vmatmul.mubr.f32.gmra.mxu0 %v2713_v3  ;;  %v14476_v26 = vpop.f32.mrf.mxu1  ;;  %v10259_v35 = vpop.eup %10258  ;;  %10284 = vtanh.f32 %v14155_v40 }
 0x1ec   : > { %3128 = vmatmul.mubr.f32.gmra.mxu1 %v2713_v3  ;;  %3263 = vmatpush1.msra.mxu0 %v10255_v1  ;;  %v14482_v9 = vpop.f32.mrf.mxu0  ;;  %v10261_v25 = vpop.eup %10260  ;;  %10286 = vtanh.f32 %v14174_v54 }
 0x1ed   : > { %3472 = vmatpush1.msra.mxu1 %v10257_v38  ;;  %3264 = vmatprep.subr.mxu0 %v14266_v17  ;;  %v14486_v6 = vpop.f32.mrf.mxu1  ;;  %v10263_v33 = vpop.eup %10262  ;;  %10288 = vtanh.f32 %v14183_v16 }
 0x1ee   : > { %3473 = vmatprep.subr.mxu1 %v10259_v35  ;;  %3265 = vmatpush1.msra.mxu0 %v14257_v23  ;;  %v14493_v3 = vpop.f32.mrf.mxu0  ;;  %v10265_v17 = vpop.eup %10264  ;;  %10290 = vtanh.f32 %v14167_v52  ;;  %v2718_v52 = vld [vmem:[%s20298_s3 + $0x78] sm:$0xff] }
 0x1ef   : > { %3474 = vmatpush1.msra.mxu1 %v10261_v25  ;;  %9488 = vmatprep.mubr.msk.f32.mxu0 %vm2751_vm4, %v2716_v14  ;;  %v14497_v40 = vpop.f32.mrf.mxu1  ;;  %v10267_v23 = vpop.eup %10266  ;;  %10292 = vtanh.f32 %v14171_v53 }
 0x1f0   : > { %9512 = vmatprep.mubr.msk.f32.mxu1 %vm2751_vm4, %v2716_v14  ;;  %3266 = vmatprep.subr.mxu0 %v10263_v33  ;;  %v14501_v54 = vpop.f32.mrf.mxu0  ;;  %v10269_v16 = vpop.eup %10268  ;;  %10294 = vtanh.f32 %v14162_v19  ;;  %v2717_v19 = vld [vmem:[%s20298_s3 + $0x70] sm:$0xff]  ;;  %v20556_v33 = vld [vmem:[#allocation23_spill] sm:$0xff] }
 0x1f1   : > { %3475 = vmatprep.subr.mxu1 %v10265_v17  ;;  %2925 = vmatmul.mubr.f32.gmra.mxu0 %v2715_v42  ;;  %v14504_v39 = vpop.f32.mrf.mxu1  ;;  %v14512_v38 = vpop.eup %10270  ;;  %10296 = vtanh.f32 %v14152_v59  ;;  %v2719_v17 = vld [vmem:[%s20298_s3 + $0x80] sm:$0xff] }
 0x1f2   : > { %3134 = vmatmul.mubr.f32.gmra.mxu1 %v2715_v42  ;;  %3267 = vmatpush1.msra.mxu0 %v10267_v23  ;;  %v14510_v1 = vpop.f32.mrf.mxu0  ;;  %v14518_v14 = vpop.eup %10272  ;;  %10298 = vtanh.f32 %v14136_v34 }
 0x1f3   : > { %3476 = vmatpush1.msra.mxu1 %v10269_v16  ;;  %3268 = vmatprep.subr.mxu0 %v14246_v18  ;;  %v14516_v53 = vpop.f32.mrf.mxu1  ;;  %v14528_v59 = vpop.eup %10274  ;;  %10300 = vtanh.f32 %v14143_v62  ;;  %v20559_v16 = vld [vmem:[#allocation34_spill] sm:$0xff] }
 0x1f4   : > { %3477 = vmatprep.subr.mxu1 %v14252_v7  ;;  %3269 = vmatpush1.msra.mxu0 %v14230_v8  ;;  %v14526_v35 = vpop.f32.mrf.mxu0  ;;  %v14535_v34 = vpop.eup %10276  ;;  %10302 = vtanh.f32 %v14129_v44  ;;  %v2720_v44 = vld [vmem:[%s20298_s3 + $0x88] sm:$0xff] }
 0x1f5   : > { %3478 = vmatpush1.msra.mxu1 %v14239_v60  ;;  %9489 = vmatprep.mubr.msk.f32.mxu0 %vm2751_vm4, %v2718_v52  ;;  %v14533_v18 = vpop.f32.mrf.mxu1  ;;  %v14542_v8 = vpop.eup %10278  ;;  %10304 = vtanh.f32 %v14133_v30  ;;  %v20553_v30 = vld [vmem:[#allocation24_spill] sm:$0xff] }
 0x1f6   : > { %9513 = vmatprep.mubr.msk.f32.mxu1 %vm2751_vm4, %v2718_v52  ;;  %3270 = vmatprep.subr.mxu0 %v14219_v46  ;;  %v14540_v7 = vpop.f32.mrf.mxu0  ;;  %v14548_v60 = vpop.eup %10280  ;;  %10306 = vtanh.f32 %v14124_v28  ;;  %v20555_v28 = vld [vmem:[#allocation36_spill] sm:$0xff] }
 0x1f7   : > { %3479 = vmatprep.subr.mxu1 %v14225_v5  ;;  %2931 = vmatmul.mubr.f32.gmra.mxu0 %v2717_v19  ;;  %v14546_v62 = vpop.f32.mrf.mxu1  ;;  %v10283_v25 = vpop.eup %10282  ;;  %10308 = vtanh.f32 %v14114_v51 }
 0x1f8   : > { %20552 = vst [vmem:[#allocation17_spill] sm:$0xff] %v14546_v62  ;;  %3140 = vmatmul.mubr.f32.gmra.mxu1 %v2717_v19  ;;  %3271 = vmatpush1.msra.mxu0 %v14203_v48  ;;  %v14555_v46 = vpop.f32.mrf.mxu0  ;;  %v10285_v42 = vpop.eup %10284  ;;  %10310 = vtanh.f32 %v20555_v28  ;;  %v20557_v48 = vld [vmem:[#allocation32_spill] sm:$0xff]  ;;  %v20566_v62 = vld [vmem:[#allocation38_spill] sm:$0xff] }
 0x1f9   : > { %3480 = vmatpush1.msra.mxu1 %v14212_v41  ;;  %3272 = vmatprep.subr.mxu0 %v20553_v30  ;;  %v14560_v5 = vpop.f32.mrf.mxu1  ;;  %v10287_v51 = vpop.eup %10286  ;;  %10312 = vtanh.f32 %v20559_v16  ;;  %v20560_v41 = vld [vmem:[#allocation27_spill] sm:$0xff]  ;;  %v20562_v30 = vld [vmem:[#allocation28_spill] sm:$0xff] }
 0x1fa   : > { %20554 = vst [vmem:[#allocation18_spill] sm:$0xff] %v14560_v5  ;;  %3481 = vmatprep.subr.mxu1 %v20556_v33  ;;  %3273 = vmatpush1.msra.mxu0 %v20557_v48  ;;  %v14568_v23 = vpop.f32.mrf.mxu0  ;;  %v10289_v19 = vpop.eup %10288  ;;  %10314 = vtanh.f32 %v20562_v30  ;;  %v20564_v48 = vld [vmem:[#allocation35_spill] sm:$0xff]  ;;  %v2722_v30 = vld [vmem:[%s20298_s3 + $0x98] sm:$0xff] }
 0x1fb   : > { %20558 = vst [vmem:[#allocation20_spill] sm:$0xff] %v14568_v23  ;;  %3482 = vmatpush1.msra.mxu1 %v20560_v41  ;;  %9490 = vmatprep.mubr.msk.f32.mxu0 %vm2751_vm4, %v2720_v44  ;;  %v14573_v52 = vpop.f32.mrf.mxu1  ;;  %v10291_v33 = vpop.eup %10290  ;;  %10316 = vtanh.f32 %v20564_v48  ;;  %v20567_v5 = vld [vmem:[#allocation26_spill] sm:$0xff]  ;;  %v20570_v23 = vld [vmem:[#allocation31_spill] sm:$0xff] }
 0x1fc   : > { %20561 = vst [vmem:[#allocation19_spill] sm:$0xff] %v14573_v52  ;;  %9514 = vmatprep.mubr.msk.f32.mxu1 %vm2751_vm4, %v2720_v44  ;;  %3290 = vmatprep.subr.mxu0 %v10287_v51  ;;  %v14577_v28 = vpop.f32.mrf.mxu0  ;;  %v10293_v41 = vpop.eup %10292  ;;  %10318 = vtanh.f32 %v20566_v62  ;;  %v20569_v52 = vld [vmem:[#allocation37_spill] sm:$0xff] }
 0x1fd   : > { %20563 = vst [vmem:[#allocation21_spill] sm:$0xff] %v14577_v28  ;;  %3499 = vmatprep.subr.mxu1 %v10289_v19  ;;  %2937 = vmatmul.mubr.f32.gmra.mxu0 %v2719_v17  ;;  %v14580_v16 = vpop.f32.mrf.mxu1  ;;  %v10295_v51 = vpop.eup %10294  ;;  %10320 = vtanh.f32 %v20567_v5  ;;  %v2721_v62 = vld [vmem:[%s20298_s3 + $0x90] sm:$0xff]  ;;  %v20578_v28 = vld [vmem:[#allocation15_spill] sm:$0xff] }
 0x1fe   : > { %20565 = vst [vmem:[#allocation45_spill] sm:$0xff] %v14580_v16  ;;  %3146 = vmatmul.mubr.f32.gmra.mxu1 %v2719_v17  ;;  %3291 = vmatpush2.msra.mxu0 %v10291_v33  ;;  %v14586_v44 = vpop.f32.mrf.mxu0  ;;  %v10297_v48 = vpop.eup %10296  ;;  %10322 = vtanh.f32 %v20569_v52 }
 0x1ff   : > { %3500 = vmatpush2.msra.mxu1 %v10293_v41  ;;  %3292 = vmatprep.subr.mxu0 %v10285_v42  ;;  %v14589_v19 = vpop.f32.mrf.mxu1  ;;  %v10299_v33 = vpop.eup %10298  ;;  %10324 = vtanh.f32 %v20570_v23  ;;  %v20572_v41 = vld [vmem:[#allocation33_spill] sm:$0xff] }
 0x200   : > { %20568 = vst [vmem:[#allocation43_spill] sm:$0xff] %v14589_v19  ;;  %3501 = vmatprep.subr.mxu1 %v10295_v51  ;;  %3293 = vmatpush2.msra.mxu0 %v10283_v25  ;;  %v14595_v17 = vpop.f32.mrf.mxu0  ;;  %v10301_v42 = vpop.eup %10300  ;;  %10326 = vtanh.f32 %v20572_v41  ;;  %v20574_v51 = vld [vmem:[#allocation30_spill] sm:$0xff]  ;;  %v2724_v41 = vld [vmem:[%s20298_s3 + $0xa8] sm:$0xff] }
 0x201   : > { %3502 = vmatpush2.msra.mxu1 %v10297_v48  ;;  %9491 = vmatprep.mubr.msk.f32.mxu0 %vm2751_vm4, %v2722_v30  ;;  %v14599_v5 = vpop.f32.mrf.mxu1  ;;  %v10303_v52 = vpop.eup %10302  ;;  %10328 = vtanh.f32 %v20574_v51  ;;  %v20576_v48 = vld [vmem:[#allocation39_spill] sm:$0xff] }
 0x202   : > { %20571 = vst [vmem:[#allocation44_spill] sm:$0xff] %v14599_v5  ;;  %9515 = vmatprep.mubr.msk.f32.mxu1 %vm2751_vm4, %v2722_v30  ;;  %3294 = vmatprep.subr.mxu0 %v10299_v33  ;;  %v14603_v25 = vpop.f32.mrf.mxu0  ;;  %v10305_v23 = vpop.eup %10304  ;;  %10330 = vtanh.f32 %v20576_v48 }
 0x203   : > { %20573 = vst [vmem:[#allocation41_spill] sm:$0xff] %v14603_v25  ;;  %3503 = vmatprep.subr.mxu1 %v10301_v42  ;;  %2943 = vmatmul.mubr.f32.gmra.mxu0 %v2721_v62  ;;  %v14606_v16 = vpop.f32.mrf.mxu1  ;;  %v10307_v33 = vpop.eup %10306  ;;  %10332 = vtanh.f32 %v20578_v28 }
 0x204   : > { %20575 = vst [vmem:[#allocation42_spill] sm:$0xff] %v14606_v16  ;;  %3152 = vmatmul.mubr.f32.gmra.mxu1 %v2721_v62  ;;  %3295 = vmatpush2.msra.mxu0 %v10303_v52  ;;  %v14612_v30 = vpop.f32.mrf.mxu0  ;;  %v10309_v51 = vpop.eup %10308  ;;  %v2723_v62 = vld [vmem:[%s20298_s3 + $0xa0] sm:$0xff]  ;;  %10334 = vtanh.f32 %v14526_v35 }
 0x205   : > { %20577 = vst [vmem:[#allocation16_spill] sm:$0xff] %v14612_v30  ;;  %3504 = vmatpush2.msra.mxu1 %v10305_v23  ;;  %3296 = vmatprep.subr.mxu0 %v14548_v60  ;;  %v14616_v42 = vpop.f32.mrf.mxu1  ;;  %v10311_v48 = vpop.eup %10310  ;;  %10336 = vtanh.f32 %v14533_v18  ;;  %v2726_v18 = vld [vmem:[%s20298_s3 + $0xb8] sm:$0xff] }
 0x206   : > { %20579 = vst [vmem:[#allocation24_spill] sm:$0xff] %v14616_v42  ;;  %3505 = vmatprep.subr.mxu1 %v10307_v33  ;;  %3297 = vmatpush2.msra.mxu0 %v14542_v8  ;;  %v14623_v52 = vpop.f32.mrf.mxu0  ;;  %v10313_v28 = vpop.eup %10312 }
 0x207   : > { %3506 = vmatpush2.msra.mxu1 %v10309_v51  ;;  %9492 = vmatprep.mubr.msk.f32.mxu0 %vm2751_vm4, %v2724_v41  ;;  %v14627_v60 = vpop.f32.mrf.mxu1  ;;  %v10315_v23 = vpop.eup %10314 }
 0x208   : > { %20580 = vst [vmem:[#allocation36_spill] sm:$0xff] %v14627_v60  ;;  %9516 = vmatprep.mubr.msk.f32.mxu1 %vm2751_vm4, %v2724_v41  ;;  %3298 = vmatprep.subr.mxu0 %v10311_v48  ;;  %v14630_v8 = vpop.f32.mrf.mxu0  ;;  %v10317_v33 = vpop.eup %10316 }
 0x209   : > { %3507 = vmatprep.subr.mxu1 %v10313_v28  ;;  %2949 = vmatmul.mubr.f32.gmra.mxu0 %v2723_v62  ;;  %v14632_v35 = vpop.f32.mrf.mxu1  ;;  %v10319_v19 = vpop.eup %10318 }
 0x20a   : > { %20581 = vst [vmem:[#allocation23_spill] sm:$0xff] %v14632_v35  ;;  %3158 = vmatmul.mubr.f32.gmra.mxu1 %v2723_v62  ;;  %3299 = vmatpush2.msra.mxu0 %v10315_v23  ;;  %v14637_v51 = vpop.f32.mrf.mxu0  ;;  %v10321_v48 = vpop.eup %10320  ;;  %v2725_v62 = vld [vmem:[%s20298_s3 + $0xb0] sm:$0xff] }
 0x20b   : > { %20582 = vst [vmem:[#allocation32_spill] sm:$0xff] %v14637_v51  ;;  %3508 = vmatpush2.msra.mxu1 %v10317_v33  ;;  %3300 = vmatprep.subr.mxu0 %v14535_v34  ;;  %v14640_v41 = vpop.f32.mrf.mxu1  ;;  %v10323_v23 = vpop.eup %10322  ;;  %v20624_v51 = vld [vmem:[#allocation60_spill] sm:$0xff] }
 0x20c   : > { %20583 = vst [vmem:[#allocation34_spill] sm:$0xff] %v14640_v41  ;;  %3509 = vmatprep.subr.mxu1 %v10319_v19  ;;  %3301 = vmatpush2.msra.mxu0 %v14528_v59  ;;  %v14646_v28 = vpop.f32.mrf.mxu0  ;;  %v10325_v33 = vpop.eup %10324  ;;  %v20600_v41 = vld [vmem:[#allocation22_spill] sm:$0xff] }
 0x20d   : > { %3510 = vmatpush2.msra.mxu1 %v10321_v48  ;;  %9493 = vmatprep.mubr.msk.f32.mxu0 %vm2751_vm4, %v2726_v18  ;;  %v14649_v5 = vpop.f32.mrf.mxu1  ;;  %v10327_v19 = vpop.eup %10326  ;;  %v2728_v48 = vld [vmem:[%s20298_s3 + $0xc8] sm:$0xff] }
 0x20e   : > { %9517 = vmatprep.mubr.msk.f32.mxu1 %vm2751_vm4, %v2726_v18  ;;  %3302 = vmatprep.subr.mxu0 %v10323_v23  ;;  %v14652_v34 = vpop.f32.mrf.mxu0  ;;  %v10329_v16 = vpop.eup %10328  ;;  %v2727_v18 = vld [vmem:[%s20298_s3 + $0xc0] sm:$0xff] }
 0x20f   : > { %3511 = vmatprep.subr.mxu1 %v10325_v33  ;;  %2955 = vmatmul.mubr.f32.gmra.mxu0 %v2725_v62  ;;  %v14654_v59 = vpop.f32.mrf.mxu1  ;;  %v10331_v42 = vpop.eup %10330 }
 0x210   : > { %3164 = vmatmul.mubr.f32.gmra.mxu1 %v2725_v62  ;;  %3303 = vmatpush2.msra.mxu0 %v10327_v19  ;;  %v14659_v25 = vpop.f32.mrf.mxu0  ;;  %v10333_v33 = vpop.eup %10332  ;;  %v2730_v62 = vld [vmem:[%s20298_s3 + $0xd8] sm:$0xff] }
 0x211   : > { %3512 = vmatpush2.msra.mxu1 %v10329_v16  ;;  %3304 = vmatprep.subr.mxu0 %v14518_v14  ;;  %v14665_v23 = vpop.f32.mrf.mxu1  ;;  %v10335_v30 = vpop.eup %10334 }
 0x212   : > { %3513 = vmatprep.subr.mxu1 %v10331_v42  ;;  %3305 = vmatpush2.msra.mxu0 %v14512_v38  ;;  %v14671_v19 = vpop.f32.mrf.mxu0  ;;  %v10337_v16 = vpop.eup %10336  ;;  %v14683_v38 = vld [vmem:[%s20298_s3 + $0xd0] sm:$0xff] }
 0x213   : > { %3514 = vmatpush2.msra.mxu1 %v10333_v33  ;;  %9494 = vmatprep.mubr.msk.f32.mxu0 %vm2751_vm4, %v2728_v48  ;;  %v14674_v14 = vpop.f32.mrf.mxu1  ;;  %20584 = vst [vmem:[#allocation27_spill] sm:$0xff] %v14683_v38  ;;  %v14691_v33 = vld [vmem:[%s20298_s3 + $0xe8] sm:$0xff] }
 0x214   : > { %9518 = vmatprep.mubr.msk.f32.mxu1 %vm2751_vm4, %v2728_v48  ;;  %2961 = vmatmul.mubr.f32.gmra.mxu0 %v2727_v18  ;;  %v14677_v60 = vpop.f32.mrf.mxu0  ;;  %20585 = vst [vmem:[#allocation28_spill] sm:$0xff] %v14691_v33 }
 0x215   : > { %3170 = vmatmul.mubr.f32.gmra.mxu1 %v2727_v18  ;;  %9495 = vmatprep.mubr.msk.f32.mxu0 %vm2751_vm4, %v2730_v62  ;;  %v14685_v42 = vpop.f32.mrf.mxu1 }
 0x216   : > { %9519 = vmatprep.mubr.msk.f32.mxu1 %vm2751_vm4, %v2730_v62  ;;  %3660 = vmatprep.subr.mxu0 %v10335_v30  ;;  %v14693_v48 = vpop.f32.mrf.mxu0  ;;  %v14706_v62 = vld [vmem:[%s20298_s3 + $0xe0] sm:$0xff] }
 0x217   : > { %20586 = vst [vmem:[#allocation35_spill] sm:$0xff] %v14693_v48  ;;  %3869 = vmatprep.subr.mxu1 %v10337_v16  ;;  %v14695_v18 = vpop.f32.mrf.mxu1  ;;  %20589 = vst [vmem:[#allocation37_spill] sm:$0xff] %v14706_v62  ;;  %v14715_v16 = vld [vmem:[%s20298_s3 + $0xf8] sm:$0xff]  ;;  %v14735_v48 = vld [vmem:[%s20298_s3 + $0x108] sm:$0xff] }
 0x218   : > { %20587 = vst [vmem:[#allocation38_spill] sm:$0xff] %v14695_v18  ;;  %2967 = vmatmul.mubr.f32.gmra.mxu0 %v14683_v38  ;;  %v14698_v35 = vpop.f32.mrf.mxu0  ;;  %20591 = vst [vmem:[#allocation33_spill] sm:$0xff] %v14715_v16 }
 0x219   : > { %20588 = vst [vmem:[#allocation26_spill] sm:$0xff] %v14698_v35  ;;  %3176 = vmatmul.mubr.f32.gmra.mxu1 %v14683_v38  ;;  %9496 = vmatprep.mubr.msk.f32.mxu0 %vm2751_vm4, %v14691_v33  ;;  %v14708_v30 = vpop.f32.mrf.mxu1  ;;  %20595 = vst [vmem:[#allocation66_spill] sm:$0xff] %v14735_v48  ;;  %v20599_v38 = vld [vmem:[#allocation25_spill] sm:$0xff] }
 0x21a   : > { %20590 = vst [vmem:[#allocation31_spill] sm:$0xff] %v14708_v30  ;;  %9520 = vmatprep.mubr.msk.f32.mxu1 %vm2751_vm4, %v14691_v33  ;;  %v14726_v30 = vld [vmem:[%s20298_s3 + $0xf0] sm:$0xff] }
 0x21b   : > { %20593 = vst [vmem:[#allocation39_spill] sm:$0xff] %v14726_v30 }
 0x21c   : > { %2973 = vmatmul.mubr.f32.gmra.mxu0 %v14706_v62  ;;  %v14718_v35 = vpop.f32.mrf.mxu0 }
 0x21d   : > { %20592 = vst [vmem:[#allocation30_spill] sm:$0xff] %v14718_v35  ;;  %3182 = vmatmul.mubr.f32.gmra.mxu1 %v14706_v62  ;;  %9497 = vmatprep.mubr.msk.f32.mxu0 %vm2751_vm4, %v14715_v16  ;;  %v14728_v18 = vpop.f32.mrf.mxu1  ;;  %v20597_v62 = vld [vmem:[#allocation29_spill] sm:$0xff] }
 0x21e   : > { %20594 = vst [vmem:[#allocation15_spill] sm:$0xff] %v14728_v18  ;;  %9521 = vmatprep.mubr.msk.f32.mxu1 %vm2751_vm4, %v14715_v16  ;;  %v14737_v35 = vpop.f32.mrf.mxu0  ;;  %10338 = vtanh.f32 %v20597_v62  ;;  %v14751_v18 = vld [vmem:[%s20298_s3 + $0x100] sm:$0xff]  ;;  %v20605_v62 = vld [vmem:[#allocation46_spill] sm:$0xff] }
 0x21f   : > { %20596 = vst [vmem:[#allocation67_spill] sm:$0xff] %v14737_v35  ;;  %v14740_v33 = vpop.f32.mrf.mxu1  ;;  %10340 = vtanh.f32 %v20599_v38  ;;  %20601 = vst [vmem:[#allocation25_spill] sm:$0xff] %v14751_v18  ;;  %v20602_v35 = vld [vmem:[#allocation40_spill] sm:$0xff]  ;;  %v14759_v38 = vld [vmem:[%s20298_s3 + $0x118] sm:$0xff] }
 0x220   : > { %20598 = vst [vmem:[#allocation29_spill] sm:$0xff] %v14740_v33  ;;  %2979 = vmatmul.mubr.f32.gmra.mxu0 %v14726_v30  ;;  %10342 = vtanh.f32 %v20600_v41  ;;  %20603 = vst [vmem:[#allocation22_spill] sm:$0xff] %v14759_v38 }
 0x221   : > { %3188 = vmatmul.mubr.f32.gmra.mxu1 %v14726_v30  ;;  %9498 = vmatprep.mubr.msk.f32.mxu0 %vm2751_vm4, %v14735_v48  ;;  %10344 = vtanh.f32 %v20602_v35  ;;  %v20607_v30 = vld [vmem:[#allocation47_spill] sm:$0xff]  ;;  %v20609_v35 = vld [vmem:[#allocation48_spill] sm:$0xff] }
 0x222   : > { %9522 = vmatprep.mubr.msk.f32.mxu1 %vm2751_vm4, %v14735_v48  ;;  %v14761_v41 = vpop.f32.mrf.mxu0  ;;  %10346 = vtanh.f32 %v20605_v62  ;;  %v20616_v48 = vld [vmem:[#allocation52_spill] sm:$0xff] }
 0x223   : > { %20604 = vst [vmem:[#allocation40_spill] sm:$0xff] %v14761_v41  ;;  %v14764_v33 = vpop.f32.mrf.mxu1  ;;  %10348 = vtanh.f32 %v20607_v30  ;;  %v14777_v41 = vld [vmem:[%s20298_s3 + $0x110] sm:$0xff]  ;;  %v14787_v30 = vld [vmem:[%s20298_s3 + $0x128] sm:$0xff] }
 0x224   : > { %20606 = vst [vmem:[#allocation46_spill] sm:$0xff] %v14764_v33  ;;  %2985 = vmatmul.mubr.f32.gmra.mxu0 %v14751_v18  ;;  %v14768_v16 = vpop.f32.mrf.mxu0  ;;  %10350 = vtanh.f32 %v20609_v35  ;;  %20610 = vst [vmem:[#allocation48_spill] sm:$0xff] %v14777_v41  ;;  %v20612_v33 = vld [vmem:[#allocation49_spill] sm:$0xff]  ;;  %v20613_v35 = vld [vmem:[#allocation50_spill] sm:$0xff] }
 0x225   : > { %20608 = vst [vmem:[#allocation47_spill] sm:$0xff] %v14768_v16  ;;  %3194 = vmatmul.mubr.f32.gmra.mxu1 %v14751_v18  ;;  %9499 = vmatprep.mubr.msk.f32.mxu0 %vm2751_vm4, %v14759_v38  ;;  %v14779_v62 = vpop.f32.mrf.mxu1  ;;  %10352 = vtanh.f32 %v20612_v33  ;;  %v20614_v16 = vld [vmem:[#allocation51_spill] sm:$0xff] }
 0x226   : > { %20611 = vst [vmem:[#allocation68_spill] sm:$0xff] %v14779_v62  ;;  %9523 = vmatprep.mubr.msk.f32.mxu1 %vm2751_vm4, %v14759_v38  ;;  %10354 = vtanh.f32 %v20613_v35  ;;  %v14801_v33 = vld [vmem:[%s20298_s3 + $0x120] sm:$0xff]  ;;  %v20619_v35 = vld [vmem:[#allocation53_spill] sm:$0xff] }
 0x227   : > { %10356 = vtanh.f32 %v20614_v16  ;;  %20617 = vst [vmem:[#allocation50_spill] sm:$0xff] %v14801_v33 }
 0x228   : > { %2991 = vmatmul.mubr.f32.gmra.mxu0 %v14777_v41  ;;  %v14792_v18 = vpop.f32.mrf.mxu0  ;;  %10358 = vtanh.f32 %v20616_v48  ;;  %v14811_v48 = vld [vmem:[%s20298_s3 + $0x138] sm:$0xff] }
 0x229   : > { %20615 = vst [vmem:[#allocation49_spill] sm:$0xff] %v14792_v18  ;;  %3200 = vmatmul.mubr.f32.gmra.mxu1 %v14777_v41  ;;  %9500 = vmatprep.mubr.msk.f32.mxu0 %vm2751_vm4, %v14787_v30  ;;  %v14803_v62 = vpop.f32.mrf.mxu1  ;;  %10360 = vtanh.f32 %v20619_v35  ;;  %20620 = vst [vmem:[#allocation52_spill] sm:$0xff] %v14811_v48  ;;  %v20622_v18 = vld [vmem:[#allocation58_spill] sm:$0xff] }
 0x22a   : > { %20618 = vst [vmem:[#allocation51_spill] sm:$0xff] %v14803_v62  ;;  %9524 = vmatprep.mubr.msk.f32.mxu1 %vm2751_vm4, %v14787_v30  ;;  %v14813_v16 = vpop.f32.mrf.mxu0  ;;  %10362 = vtanh.f32 %v20622_v18  ;;  %v14831_v18 = vld [vmem:[%s20298_s3 + $0x130] sm:$0xff] }
 0x22b   : > { %20621 = vst [vmem:[#allocation53_spill] sm:$0xff] %v14813_v16  ;;  %v14816_v41 = vpop.f32.mrf.mxu1  ;;  %v14818_v38 = vpop.eup %10338  ;;  %10364 = vtanh.f32 %v20624_v51  ;;  %20625 = vst [vmem:[#allocation60_spill] sm:$0xff] %v14831_v18 }
 0x22c   : > { %20623 = vst [vmem:[#allocation58_spill] sm:$0xff] %v14816_v41  ;;  %2997 = vmatmul.mubr.f32.gmra.mxu0 %v14801_v33  ;;  %v14822_v35 = vpop.eup %10340  ;;  %10366 = vtanh.f32 %v14345_v45  ;;  %v14841_v45 = vld [vmem:[%s20298_s3 + $0x148] sm:$0xff] }
 0x22d   : > { %3206 = vmatmul.mubr.f32.gmra.mxu1 %v14801_v33  ;;  %9501 = vmatprep.mubr.msk.f32.mxu0 %vm2751_vm4, %v14811_v48  ;;  %v14833_v62 = vpop.eup %10342  ;;  %10368 = vtanh.f32 %v14354_v47  ;;  %20626 = vst [vmem:[#allocation69_spill] sm:$0xff] %v14841_v45 }
 0x22e   : > { %9525 = vmatprep.mubr.msk.f32.mxu1 %vm2751_vm4, %v14811_v48  ;;  %v14843_v51 = vpop.f32.mrf.mxu0  ;;  %v14845_v41 = vpop.eup %10344  ;;  %10370 = vtanh.f32 %v14381_v49  ;;  %v14865_v49 = vld [vmem:[%s20298_s3 + $0x140] sm:$0xff] }
 0x22f   : > { %20627 = vst [vmem:[#allocation70_spill] sm:$0xff] %v14843_v51  ;;  %v14848_v16 = vpop.f32.mrf.mxu1  ;;  %v14850_v33 = vpop.eup %10346  ;;  %10372 = vtanh.f32 %v14389_v21  ;;  %20630 = vst [vmem:[#allocation73_spill] sm:$0xff] %v14865_v49 }
 0x230   : > { %20628 = vst [vmem:[#allocation71_spill] sm:$0xff] %v14848_v16  ;;  %3003 = vmatmul.mubr.f32.gmra.mxu0 %v14831_v18  ;;  %v14854_v47 = vpop.f32.mrf.mxu0  ;;  %v14856_v48 = vpop.eup %10348  ;;  %10374 = vtanh.f32 %v14417_v0  ;;  %v14877_v0 = vld [vmem:[%s20298_s3 + $0x158] sm:$0xff] }
 0x231   : > { %20629 = vst [vmem:[#allocation72_spill] sm:$0xff] %v14854_v47  ;;  %3212 = vmatmul.mubr.f32.gmra.mxu1 %v14831_v18  ;;  %9502 = vmatprep.mubr.msk.f32.mxu0 %vm2751_vm4, %v14841_v45  ;;  %v14867_v16 = vpop.f32.mrf.mxu1  ;;  %v14869_v21 = vpop.eup %10350  ;;  %10376 = vtanh.f32 %v14426_v2  ;;  %20632 = vst [vmem:[#allocation75_spill] sm:$0xff] %v14877_v0 }
 0x232   : > { %20631 = vst [vmem:[#allocation74_spill] sm:$0xff] %v14867_v16  ;;  %9526 = vmatprep.mubr.msk.f32.mxu1 %vm2751_vm4, %v14841_v45  ;;  %v14879_v18 = vpop.eup %10352  ;;  %10378 = vtanh.f32 %v14454_v15  ;;  %v14897_v15 = vld [vmem:[%s20298_s3 + $0x150] sm:$0xff] }
 0x233   : > { %v14882_v47 = vpop.eup %10354  ;;  %10380 = vtanh.f32 %v14465_v29  ;;  %20634 = vst [vmem:[#allocation77_spill] sm:$0xff] %v14897_v15 }
 0x234   : > { %3009 = vmatmul.mubr.f32.gmra.mxu0 %v14865_v49  ;;  %v14886_v16 = vpop.f32.mrf.mxu0  ;;  %v14888_v2 = vpop.eup %10356  ;;  %10382 = vtanh.f32 %v14493_v3  ;;  %v14909_v3 = vld [vmem:[%s20298_s3 + $0x168] sm:$0xff] }
 0x235   : > { %20633 = vst [vmem:[#allocation76_spill] sm:$0xff] %v14886_v16  ;;  %3218 = vmatmul.mubr.f32.gmra.mxu1 %v14865_v49  ;;  %9503 = vmatprep.mubr.msk.f32.mxu0 %vm2751_vm4, %v14877_v0  ;;  %v14899_v45 = vpop.f32.mrf.mxu1  ;;  %v14901_v29 = vpop.eup %10358  ;;  %10384 = vtanh.f32 %v14501_v54  ;;  %20636 = vst [vmem:[#allocation79_spill] sm:$0xff] %v14909_v3 }
 0x236   : > { %20635 = vst [vmem:[#allocation78_spill] sm:$0xff] %v14899_v45  ;;  %9527 = vmatprep.mubr.msk.f32.mxu1 %vm2751_vm4, %v14877_v0  ;;  %v14911_v16 = vpop.f32.mrf.mxu0  ;;  %v14913_v49 = vpop.eup %10360  ;;  %10386 = vtanh.f32 %v14510_v1  ;;  %v14931_v1 = vld [vmem:[%s20298_s3 + $0x160] sm:$0xff] }
 0x237   : > { %20637 = vst [vmem:[#allocation80_spill] sm:$0xff] %v14911_v16  ;;  %v14916_v51 = vpop.f32.mrf.mxu1  ;;  %v14918_v45 = vpop.eup %10362  ;;  %10388 = vtanh.f32 %v14516_v53  ;;  %20639 = vst [vmem:[#allocation82_spill] sm:$0xff] %v14931_v1 }
 0x238   : > { %20638 = vst [vmem:[#allocation81_spill] sm:$0xff] %v14916_v51  ;;  %3015 = vmatmul.mubr.f32.gmra.mxu0 %v14897_v15  ;;  %v14922_v54 = vpop.eup %10364  ;;  %10390 = vtanh.f32 %v14504_v39  ;;  %v14941_v39 = vld [vmem:[%s20298_s3 + $0x178] sm:$0xff] }
 0x239   : > { %3224 = vmatmul.mubr.f32.gmra.mxu1 %v14897_v15  ;;  %9504 = vmatprep.mubr.msk.f32.mxu0 %vm2751_vm4, %v14909_v3  ;;  %v14933_v51 = vpop.eup %10366  ;;  %10392 = vtanh.f32 %v14497_v40 }
 0x23a   : > { %9528 = vmatprep.mubr.msk.f32.mxu1 %vm2751_vm4, %v14909_v3  ;;  %v14943_v53 = vpop.f32.mrf.mxu0  ;;  %v14945_v16 = vpop.eup %10368  ;;  %10394 = vtanh.f32 %v14482_v9  ;;  %v14965_v9 = vld [vmem:[%s20298_s3 + $0x170] sm:$0xff] }
 0x23b   : > { %20640 = vst [vmem:[#allocation83_spill] sm:$0xff] %v14943_v53  ;;  %v14948_v15 = vpop.f32.mrf.mxu1  ;;  %v14950_v0 = vpop.eup %10370  ;;  %10396 = vtanh.f32 %v14486_v6  ;;  %20643 = vst [vmem:[#allocation86_spill] sm:$0xff] %v14965_v9 }
 0x23c   : > { %20641 = vst [vmem:[#allocation84_spill] sm:$0xff] %v14948_v15  ;;  %3021 = vmatmul.mubr.f32.gmra.mxu0 %v14931_v1  ;;  %v14954_v40 = vpop.f32.mrf.mxu0  ;;  %v14956_v3 = vpop.eup %10372  ;;  %10398 = vtanh.f32 %v14473_v50 }
 0x23d   : > { %20642 = vst [vmem:[#allocation85_spill] sm:$0xff] %v14954_v40  ;;  %3230 = vmatmul.mubr.f32.gmra.mxu1 %v14931_v1  ;;  %9505 = vmatprep.mubr.msk.f32.mxu0 %vm2751_vm4, %v14941_v39  ;;  %v14967_v15 = vpop.f32.mrf.mxu1  ;;  %v14969_v6 = vpop.eup %10374  ;;  %10400 = vtanh.f32 %v14476_v26  ;;  %v14986_v26 = vld [vmem:[%s20298_s3 + $0x8] sm:$0xff] }
 0x23e   : > { %20644 = vst [vmem:[#allocation87_spill] sm:$0xff] %v14967_v15  ;;  %9529 = vmatprep.mubr.msk.f32.mxu1 %vm2751_vm4, %v14941_v39  ;;  %v14974_v50 = vpop.eup %10376  ;;  %10402 = vtanh.f32 %v14469_v20  ;;  %20646 = vst [vmem:[#allocation89_spill] sm:$0xff] %v14986_v26 }
 0x23f   : > { %v10379_v1 = vpop.eup %10378  ;;  %10404 = vtanh.f32 %v14458_v56 }
 0x240   : > { %3027 = vmatmul.mubr.f32.gmra.mxu0 %v14965_v9  ;;  %v14979_v40 = vpop.f32.mrf.mxu0  ;;  %v10381_v53 = vpop.eup %10380  ;;  %10406 = vtanh.f32 %v14445_v36 }
 0x241   : > { %20645 = vst [vmem:[#allocation88_spill] sm:$0xff] %v14979_v40  ;;  %3236 = vmatmul.mubr.f32.gmra.mxu1 %v14965_v9  ;;  %9530 = vmatprep.mubr.msk.f32.mxu0 %vm2751_vm4, %v14986_v26  ;;  %v14990_v20 = vpop.f32.mrf.mxu1  ;;  %v10383_v56 = vpop.eup %10382  ;;  %10408 = vtanh.f32 %v14448_v58 }
 0x242   : > { %20647 = vst [vmem:[#allocation90_spill] sm:$0xff] %v14990_v20  ;;  %9554 = vmatprep.mubr.msk.f32.mxu1 %vm2751_vm4, %v14986_v26  ;;  %v14995_v15 = vpop.f32.mrf.mxu0  ;;  %v10385_v36 = vpop.eup %10384  ;;  %10410 = vtanh.f32 %v14437_v43  ;;  %v15004_v20 = vld [vmem:[%s20298_s3] sm:$0xff] }
 0x243   : > { %20648 = vst [vmem:[#allocation91_spill] sm:$0xff] %v14995_v15  ;;  %v14998_v40 = vpop.f32.mrf.mxu1  ;;  %v10387_v9 = vpop.eup %10386  ;;  %10412 = vtanh.f32 %v14441_v37 }
 0x244   : > { %20649 = vst [vmem:[#allocation92_spill] sm:$0xff] %v14998_v40  ;;  %3307 = vmatmul.mubr.f32.vlgmr.msra.gmra.mxu0 %v15004_v20  ;;  %v10389_v58 = vpop.eup %10388  ;;  %10414 = vtanh.f32 %v14430_v10  ;;  %v15019_v10 = vld [vmem:[%s20298_s3 + $0x18] sm:$0xff] }
 0x245   : > { %3516 = vmatmul.mubr.f32.vlgmr.msra.gmra.mxu1 %v15004_v20  ;;  %3661 = vmatpush1.msra.mxu0 %v10387_v9  ;;  %v10391_v15 = vpop.eup %10390  ;;  %10416 = vtanh.f32 %v14420_v27 }
 0x246   : > { %3870 = vmatpush1.msra.mxu1 %v10389_v58  ;;  %3662 = vmatprep.subr.mxu0 %v10385_v36  ;;  %v15010_v43 = vpop.f32.mrf.mxu0  ;;  %v10393_v37 = vpop.eup %10392  ;;  %10418 = vtanh.f32 %v14409_v32 }
 0x247   : > { %3871 = vmatprep.subr.mxu1 %v10391_v15  ;;  %3663 = vmatpush1.msra.mxu0 %v10383_v56  ;;  %v15013_v40 = vpop.f32.mrf.mxu1  ;;  %v10395_v26 = vpop.eup %10394  ;;  %10420 = vtanh.f32 %v14413_v12  ;;  %v15034_v15 = vld [vmem:[%s20298_s3 + $0x10] sm:$0xff] }
 0x248   : > { %3872 = vmatpush1.msra.mxu1 %v10393_v37  ;;  %9531 = vmatprep.mubr.msk.f32.mxu0 %vm2751_vm4, %v15019_v10  ;;  %v15023_v27 = vpop.f32.mrf.mxu0  ;;  %v10397_v9 = vpop.eup %10396  ;;  %10422 = vtanh.f32 %v14398_v31 }
 0x249   : > { %9555 = vmatprep.mubr.msk.f32.mxu1 %vm2751_vm4, %v15019_v10  ;;  %3664 = vmatprep.subr.mxu0 %v10395_v26  ;;  %v15028_v32 = vpop.f32.mrf.mxu1  ;;  %v10399_v12 = vpop.eup %10398  ;;  %10424 = vtanh.f32 %v14402_v4 }
 0x24a   : > { %3873 = vmatprep.subr.mxu1 %v10397_v9  ;;  %3313 = vmatmul.mubr.f32.gmra.mxu0 %v15034_v15  ;;  %v10401_v56 = vpop.eup %10400  ;;  %10426 = vtanh.f32 %v14392_v24  ;;  %v15049_v24 = vld [vmem:[%s20298_s3 + $0x28] sm:$0xff] }
 0x24b   : > { %3522 = vmatmul.mubr.f32.gmra.mxu1 %v15034_v15  ;;  %3665 = vmatpush1.msra.mxu0 %v10399_v12  ;;  %v10403_v31 = vpop.eup %10402  ;;  %10428 = vtanh.f32 %v14385_v11  ;;  %v20650_v12 = vld [vmem:[#allocation64_spill] sm:$0xff] }
 0x24c   : > { %3874 = vmatpush1.msra.mxu1 %v10401_v56  ;;  %3666 = vmatprep.subr.mxu0 %v10381_v53  ;;  %v15040_v4 = vpop.f32.mrf.mxu0  ;;  %v10405_v26 = vpop.eup %10404  ;;  %10430 = vtanh.f32 %v14371_v55 }
 0x24d   : > { %3875 = vmatprep.subr.mxu1 %v10403_v31  ;;  %3667 = vmatpush1.msra.mxu0 %v10379_v1  ;;  %v15043_v36 = vpop.f32.mrf.mxu1  ;;  %v10407_v58 = vpop.eup %10406  ;;  %10432 = vtanh.f32 %v14374_v13  ;;  %v15064_v1 = vld [vmem:[%s20298_s3 + $0x20] sm:$0xff]  ;;  %v20651_v31 = vld [vmem:[#allocation65_spill] sm:$0xff] }
 0x24e   : > { %3876 = vmatpush1.msra.mxu1 %v10405_v26  ;;  %9532 = vmatprep.mubr.msk.f32.mxu0 %vm2751_vm4, %v15049_v24  ;;  %v15053_v11 = vpop.f32.mrf.mxu0  ;;  %v10409_v53 = vpop.eup %10408  ;;  %10434 = vtanh.f32 %v14362_v22 }
 0x24f   : > { %9556 = vmatprep.mubr.msk.f32.mxu1 %vm2751_vm4, %v15049_v24  ;;  %3668 = vmatprep.subr.mxu0 %v10407_v58  ;;  %v15058_v55 = vpop.f32.mrf.mxu1  ;;  %v10411_v13 = vpop.eup %10410  ;;  %10436 = vtanh.f32 %v14365_v57  ;;  %v20653_v58 = vld [vmem:[#allocation62_spill] sm:$0xff] }
 0x250   : > { %3877 = vmatprep.subr.mxu1 %v10409_v53  ;;  %3319 = vmatmul.mubr.f32.gmra.mxu0 %v15064_v1  ;;  %v10413_v37 = vpop.eup %10412  ;;  %10438 = vtanh.f32 %v14358_v61 }
 0x251   : > { %3528 = vmatmul.mubr.f32.gmra.mxu1 %v15064_v1  ;;  %3669 = vmatpush1.msra.mxu0 %v10411_v13  ;;  %v10415_v22 = vpop.eup %10414  ;;  %10440 = vtanh.f32 %v14348_v63  ;;  %v15081_v63 = vld [vmem:[%s20298_s3 + $0x38] sm:$0xff]  ;;  %v20654_v13 = vld [vmem:[#allocation63_spill] sm:$0xff] }
 0x252   : > { %3878 = vmatpush1.msra.mxu1 %v10413_v37  ;;  %3670 = vmatprep.subr.mxu0 %v14974_v50  ;;  %v15071_v57 = vpop.f32.mrf.mxu0  ;;  %v10417_v9 = vpop.eup %10416  ;;  %10442 = vtanh.f32 %v20650_v12  ;;  %20652 = vst [vmem:[#allocation64_spill] sm:$0xff] %v15081_v63  ;;  %v15096_v37 = vld [vmem:[%s20298_s3 + $0x30] sm:$0xff] }
 0x253   : > { %3879 = vmatprep.subr.mxu1 %v10415_v22  ;;  %3671 = vmatpush1.msra.mxu0 %v14969_v6  ;;  %v15075_v56 = vpop.f32.mrf.mxu1  ;;  %v10419_v61 = vpop.eup %10418  ;;  %10444 = vtanh.f32 %v20651_v31 }
 0x254   : > { %3880 = vmatpush1.msra.mxu1 %v10417_v9  ;;  %9533 = vmatprep.mubr.msk.f32.mxu0 %vm2751_vm4, %v15081_v63  ;;  %v15085_v50 = vpop.f32.mrf.mxu0  ;;  %v10421_v26 = vpop.eup %10420  ;;  %10446 = vtanh.f32 %v20653_v58  ;;  %v20655_v9 = vld [vmem:[#allocation61_spill] sm:$0xff]  ;;  %v20657_v58 = vld [vmem:[#allocation56_spill] sm:$0xff] }
 0x255   : > { %9557 = vmatprep.mubr.msk.f32.mxu1 %vm2751_vm4, %v15081_v63  ;;  %3672 = vmatprep.subr.mxu0 %v10419_v61  ;;  %v15090_v6 = vpop.f32.mrf.mxu1  ;;  %v10423_v53 = vpop.eup %10422  ;;  %10448 = vtanh.f32 %v20654_v13  ;;  %v20656_v61 = vld [vmem:[#allocation59_spill] sm:$0xff]  ;;  %v20658_v63 = vld [vmem:[#allocation57_spill] sm:$0xff] }
 0x256   : > { %3881 = vmatprep.subr.mxu1 %v10421_v26  ;;  %3325 = vmatmul.mubr.f32.gmra.mxu0 %v15096_v37  ;;  %v10425_v22 = vpop.eup %10424  ;;  %10450 = vtanh.f32 %v20655_v9 }
 0x257   : > { %3534 = vmatmul.mubr.f32.gmra.mxu1 %v15096_v37  ;;  %3673 = vmatpush1.msra.mxu0 %v10423_v53  ;;  %v10427_v12 = vpop.eup %10426  ;;  %10452 = vtanh.f32 %v20656_v61  ;;  %v15113_v53 = vld [vmem:[%s20298_s3 + $0x48] sm:$0xff]  ;;  %v20660_v61 = vld [vmem:[#allocation55_spill] sm:$0xff] }
 0x258   : > { %3882 = vmatpush1.msra.mxu1 %v10425_v22  ;;  %3674 = vmatprep.subr.mxu0 %v14956_v3  ;;  %v15103_v31 = vpop.f32.mrf.mxu0  ;;  %v10429_v26 = vpop.eup %10428  ;;  %10454 = vtanh.f32 %v20657_v58 }
 0x259   : > { %3883 = vmatprep.subr.mxu1 %v10427_v12  ;;  %3675 = vmatpush1.msra.mxu0 %v14950_v0  ;;  %v15107_v13 = vpop.f32.mrf.mxu1  ;;  %v10431_v9 = vpop.eup %10430  ;;  %10456 = vtanh.f32 %v20658_v63  ;;  %v20659_v12 = vld [vmem:[#allocation54_spill] sm:$0xff] }
 0x25a   : > { %3884 = vmatpush1.msra.mxu1 %v10429_v26  ;;  %9534 = vmatprep.mubr.msk.f32.mxu0 %vm2751_vm4, %v15113_v53  ;;  %v15117_v3 = vpop.f32.mrf.mxu0  ;;  %v10433_v22 = vpop.eup %10432  ;;  %10458 = vtanh.f32 %v20659_v12  ;;  %v15128_v26 = vld [vmem:[%s20298_s3 + $0x40] sm:$0xff] }
 0x25b   : > { %9558 = vmatprep.mubr.msk.f32.mxu1 %vm2751_vm4, %v15113_v53  ;;  %3676 = vmatprep.subr.mxu0 %v10431_v9  ;;  %v15122_v0 = vpop.f32.mrf.mxu1  ;;  %v10435_v63 = vpop.eup %10434  ;;  %10460 = vtanh.f32 %v20660_v61  ;;  %20661 = vst [vmem:[#allocation65_spill] sm:$0xff] %v15128_v26 }
 0x25c   : > { %3885 = vmatprep.subr.mxu1 %v10433_v22  ;;  %3331 = vmatmul.mubr.f32.gmra.mxu0 %v15128_v26  ;;  %v10437_v58 = vpop.eup %10436  ;;  %10462 = vtanh.f32 %v14540_v7 }
 0x25d   : > { %3540 = vmatmul.mubr.f32.gmra.mxu1 %v15128_v26  ;;  %3677 = vmatpush1.msra.mxu0 %v10435_v63  ;;  %v15133_v9 = vpop.f32.mrf.mxu0  ;;  %v10439_v12 = vpop.eup %10438  ;;  %10464 = vtanh.f32 %v14555_v46  ;;  %v15147_v46 = vld [vmem:[%s20298_s3 + $0x58] sm:$0xff]  ;;  %v15162_v63 = vld [vmem:[%s20298_s3 + $0x50] sm:$0xff] }
 0x25e   : > { %3886 = vmatpush1.msra.mxu1 %v10437_v58  ;;  %3678 = vmatprep.subr.mxu0 %v14945_v16  ;;  %v15137_v22 = vpop.f32.mrf.mxu1  ;;  %v10441_v61 = vpop.eup %10440  ;;  %10466 = vtanh.f32 %v14586_v44  ;;  %20662 = vst [vmem:[#allocation62_spill] sm:$0xff] %v15162_v63 }
 0x25f   : > { %3887 = vmatprep.subr.mxu1 %v10439_v12  ;;  %3679 = vmatpush1.msra.mxu0 %v14933_v51  ;;  %v15141_v7 = vpop.f32.mrf.mxu0  ;;  %v10443_v26 = vpop.eup %10442  ;;  %10468 = vtanh.f32 %v14595_v17 }
 0x260   : > { %3888 = vmatpush1.msra.mxu1 %v10441_v61  ;;  %9535 = vmatprep.mubr.msk.f32.mxu0 %vm2751_vm4, %v15147_v46  ;;  %v15151_v16 = vpop.f32.mrf.mxu1  ;;  %v10445_v44 = vpop.eup %10444  ;;  %10470 = vtanh.f32 %v14623_v52 }
 0x261   : > { %9559 = vmatprep.mubr.msk.f32.mxu1 %vm2751_vm4, %v15147_v46  ;;  %3680 = vmatprep.subr.mxu0 %v10443_v26  ;;  %v15156_v51 = vpop.f32.mrf.mxu0  ;;  %v10447_v17 = vpop.eup %10446  ;;  %10472 = vtanh.f32 %v14630_v8 }
 0x262   : > { %3889 = vmatprep.subr.mxu1 %v10445_v44  ;;  %3337 = vmatmul.mubr.f32.gmra.mxu0 %v15162_v63  ;;  %v15165_v58 = vpop.f32.mrf.mxu1  ;;  %v10449_v52 = vpop.eup %10448  ;;  %10474 = vtanh.f32 %v14652_v34 }
 0x263   : > { %3546 = vmatmul.mubr.f32.gmra.mxu1 %v15162_v63  ;;  %3681 = vmatpush1.msra.mxu0 %v10447_v17  ;;  %v15169_v26 = vpop.f32.mrf.mxu0  ;;  %v10451_v12 = vpop.eup %10450  ;;  %10476 = vtanh.f32 %v14659_v25  ;;  %v15183_v25 = vld [vmem:[%s20298_s3 + $0x68] sm:$0xff]  ;;  %v15198_v17 = vld [vmem:[%s20298_s3 + $0x60] sm:$0xff]  ;;  %v20687_v63 = vld [vmem:[#allocation45_spill] sm:$0xff] }
 0x264   : > { %3890 = vmatpush1.msra.mxu1 %v10449_v52  ;;  %3682 = vmatprep.subr.mxu0 %v14922_v54  ;;  %v15173_v8 = vpop.f32.mrf.mxu1  ;;  %v10453_v61 = vpop.eup %10452  ;;  %10478 = vtanh.f32 %v14677_v60  ;;  %20663 = vst [vmem:[#allocation63_spill] sm:$0xff] %v15183_v25  ;;  %20664 = vst [vmem:[#allocation61_spill] sm:$0xff] %v15198_v17 }
 0x265   : > { %3891 = vmatprep.subr.mxu1 %v10451_v12  ;;  %3683 = vmatpush1.msra.mxu0 %v14918_v45  ;;  %v15177_v34 = vpop.f32.mrf.mxu0  ;;  %v10455_v44 = vpop.eup %10454  ;;  %10480 = vtanh.f32 %v14685_v42 }
 0x266   : > { %3892 = vmatpush1.msra.mxu1 %v10453_v61  ;;  %9536 = vmatprep.mubr.msk.f32.mxu0 %vm2751_vm4, %v15183_v25  ;;  %v15187_v54 = vpop.f32.mrf.mxu1  ;;  %v10457_v60 = vpop.eup %10456  ;;  %10482 = vtanh.f32 %v14671_v19 }
 0x267   : > { %9560 = vmatprep.mubr.msk.f32.mxu1 %vm2751_vm4, %v15183_v25  ;;  %3684 = vmatprep.subr.mxu0 %v10455_v44  ;;  %v15192_v45 = vpop.f32.mrf.mxu0  ;;  %v10459_v42 = vpop.eup %10458  ;;  %10484 = vtanh.f32 %v14674_v14  ;;  %v20673_v25 = vld [vmem:[#allocation16_spill] sm:$0xff] }
 0x268   : > { %3893 = vmatprep.subr.mxu1 %v10457_v60  ;;  %3343 = vmatmul.mubr.f32.gmra.mxu0 %v15198_v17  ;;  %v15201_v52 = vpop.f32.mrf.mxu1  ;;  %v10461_v19 = vpop.eup %10460  ;;  %10486 = vtanh.f32 %v14665_v23 }
 0x269   : > { %3552 = vmatmul.mubr.f32.gmra.mxu1 %v15198_v17  ;;  %3685 = vmatpush1.msra.mxu0 %v10459_v42  ;;  %v15205_v12 = vpop.f32.mrf.mxu0  ;;  %v15207_v61 = vpop.eup %10462  ;;  %10488 = vtanh.f32 %v14654_v59  ;;  %v15227_v59 = vld [vmem:[%s20298_s3 + $0x78] sm:$0xff]  ;;  %v15248_v42 = vld [vmem:[%s20298_s3 + $0x70] sm:$0xff] }
 0x26a   : > { %3894 = vmatpush1.msra.mxu1 %v10461_v19  ;;  %3686 = vmatprep.subr.mxu0 %v14901_v29  ;;  %v15211_v14 = vpop.f32.mrf.mxu1  ;;  %v15213_v44 = vpop.eup %10464  ;;  %10490 = vtanh.f32 %v14646_v28  ;;  %20665 = vst [vmem:[#allocation59_spill] sm:$0xff] %v15227_v59  ;;  %v20667_v29 = vld [vmem:[#allocation34_spill] sm:$0xff]  ;;  %20668 = vst [vmem:[#allocation56_spill] sm:$0xff] %v15248_v42 }
 0x26b   : > { %3895 = vmatprep.subr.mxu1 %v14913_v49  ;;  %3687 = vmatpush1.msra.mxu0 %v14882_v47  ;;  %v15218_v23 = vpop.f32.mrf.mxu0  ;;  %v15220_v60 = vpop.eup %10466  ;;  %10492 = vtanh.f32 %v14649_v5  ;;  %v20666_v47 = vld [vmem:[#allocation32_spill] sm:$0xff] }
 0x26c   : > { %3896 = vmatpush1.msra.mxu1 %v14888_v2  ;;  %9537 = vmatprep.mubr.msk.f32.mxu0 %vm2751_vm4, %v15227_v59  ;;  %v15231_v28 = vpop.f32.mrf.mxu1  ;;  %v15233_v49 = vpop.eup %10468  ;;  %10494 = vtanh.f32 %v20666_v47 }
 0x26d   : > { %9561 = vmatprep.mubr.msk.f32.mxu1 %vm2751_vm4, %v15227_v59  ;;  %3688 = vmatprep.subr.mxu0 %v14869_v21  ;;  %v15239_v5 = vpop.f32.mrf.mxu0  ;;  %v15241_v2 = vpop.eup %10470  ;;  %10496 = vtanh.f32 %v20667_v29  ;;  %v20670_v21 = vld [vmem:[#allocation23_spill] sm:$0xff]  ;;  %v20671_v59 = vld [vmem:[#allocation36_spill] sm:$0xff] }
 0x26e   : > { %3897 = vmatprep.subr.mxu1 %v14879_v18  ;;  %3349 = vmatmul.mubr.f32.gmra.mxu0 %v15248_v42  ;;  %v15251_v19 = vpop.f32.mrf.mxu1  ;;  %v15253_v47 = vpop.eup %10472  ;;  %10498 = vtanh.f32 %v20670_v21 }
 0x26f   : > { %20669 = vst [vmem:[#allocation57_spill] sm:$0xff] %v15251_v19  ;;  %3558 = vmatmul.mubr.f32.gmra.mxu1 %v15248_v42  ;;  %3689 = vmatpush1.msra.mxu0 %v14850_v33  ;;  %v15258_v29 = vpop.f32.mrf.mxu0  ;;  %v10475_v18 = vpop.eup %10474  ;;  %10500 = vtanh.f32 %v20671_v59  ;;  %v20675_v42 = vld [vmem:[#allocation24_spill] sm:$0xff]  ;;  %v20680_v59 = vld [vmem:[#allocation42_spill] sm:$0xff] }
 0x270   : > { %3898 = vmatpush1.msra.mxu1 %v14856_v48  ;;  %3690 = vmatprep.subr.mxu0 %v14833_v62  ;;  %v15263_v17 = vpop.f32.mrf.mxu1  ;;  %v10477_v19 = vpop.eup %10476  ;;  %10502 = vtanh.f32 %v20673_v25  ;;  %v15275_v62 = vld [vmem:[%s20298_s3 + $0x88] sm:$0xff]  ;;  %v20678_v25 = vld [vmem:[#allocation41_spill] sm:$0xff] }
 0x271   : > { %20672 = vst [vmem:[#allocation54_spill] sm:$0xff] %v15263_v17  ;;  %3899 = vmatprep.subr.mxu1 %v14845_v41  ;;  %3691 = vmatpush1.msra.mxu0 %v14818_v38  ;;  %v15268_v21 = vpop.f32.mrf.mxu0  ;;  %v10479_v33 = vpop.eup %10478  ;;  %10504 = vtanh.f32 %v20675_v42  ;;  %20676 = vst [vmem:[#allocation32_spill] sm:$0xff] %v15275_v62  ;;  %v15290_v42 = vld [vmem:[%s20298_s3 + $0x80] sm:$0xff] }
 0x272   : > { %20674 = vst [vmem:[#allocation55_spill] sm:$0xff] %v15268_v21  ;;  %3900 = vmatpush1.msra.mxu1 %v14822_v35  ;;  %9538 = vmatprep.mubr.msk.f32.mxu0 %vm2751_vm4, %v15275_v62  ;;  %v15279_v48 = vpop.f32.mrf.mxu1  ;;  %v10481_v41 = vpop.eup %10480  ;;  %10506 = vtanh.f32 %v20678_v25  ;;  %20681 = vst [vmem:[#allocation36_spill] sm:$0xff] %v15290_v42 }
 0x273   : > { %20677 = vst [vmem:[#allocation34_spill] sm:$0xff] %v15279_v48  ;;  %9562 = vmatprep.mubr.msk.f32.mxu1 %vm2751_vm4, %v15275_v62  ;;  %3708 = vmatprep.subr.mxu0 %v10479_v33  ;;  %v15284_v38 = vpop.f32.mrf.mxu0  ;;  %v10483_v35 = vpop.eup %10482  ;;  %10508 = vtanh.f32 %v20680_v59  ;;  %v20683_v48 = vld [vmem:[#allocation44_spill] sm:$0xff]  ;;  %v20684_v59 = vld [vmem:[#allocation43_spill] sm:$0xff]  ;;  %v20686_v62 = vld [vmem:[#allocation21_spill] sm:$0xff] }
 0x274   : > { %20679 = vst [vmem:[#allocation23_spill] sm:$0xff] %v15284_v38  ;;  %3917 = vmatprep.subr.mxu1 %v10481_v41  ;;  %3355 = vmatmul.mubr.f32.gmra.mxu0 %v15290_v42  ;;  %v15293_v17 = vpop.f32.mrf.mxu1  ;;  %v10485_v25 = vpop.eup %10484  ;;  %10510 = vtanh.f32 %v20683_v48 }
 0x275   : > { %20682 = vst [vmem:[#allocation16_spill] sm:$0xff] %v15293_v17  ;;  %3564 = vmatmul.mubr.f32.gmra.mxu1 %v15290_v42  ;;  %3709 = vmatpush2.msra.mxu0 %v10483_v35  ;;  %v15297_v33 = vpop.f32.mrf.mxu0  ;;  %v10487_v21 = vpop.eup %10486  ;;  %10512 = vtanh.f32 %v20684_v59  ;;  %v15309_v35 = vld [vmem:[%s20298_s3 + $0x98] sm:$0xff] }
 0x276   : > { %3918 = vmatpush2.msra.mxu1 %v10485_v25  ;;  %3710 = vmatprep.subr.mxu0 %v10477_v19  ;;  %v15300_v41 = vpop.f32.mrf.mxu1  ;;  %v10489_v38 = vpop.eup %10488  ;;  %10514 = vtanh.f32 %v20686_v62  ;;  %20688 = vst [vmem:[#allocation41_spill] sm:$0xff] %v15309_v35  ;;  %v20690_v62 = vld [vmem:[#allocation20_spill] sm:$0xff] }
 0x277   : > { %20685 = vst [vmem:[#allocation24_spill] sm:$0xff] %v15300_v41  ;;  %3919 = vmatprep.subr.mxu1 %v10487_v21  ;;  %3711 = vmatpush2.msra.mxu0 %v10475_v18  ;;  %v15303_v17 = vpop.f32.mrf.mxu0  ;;  %v10491_v48 = vpop.eup %10490  ;;  %10516 = vtanh.f32 %v20687_v63  ;;  %v20692_v21 = vld [vmem:[#allocation19_spill] sm:$0xff]  ;;  %v20695_v41 = vld [vmem:[#allocation18_spill] sm:$0xff] }
 0x278   : > { %3920 = vmatpush2.msra.mxu1 %v10489_v38  ;;  %9539 = vmatprep.mubr.msk.f32.mxu0 %vm2751_vm4, %v15309_v35  ;;  %v15313_v19 = vpop.f32.mrf.mxu1  ;;  %v10493_v25 = vpop.eup %10492  ;;  %10518 = vtanh.f32 %v20690_v62  ;;  %v15324_v38 = vld [vmem:[%s20298_s3 + $0x90] sm:$0xff] }
 0x279   : > { %20689 = vst [vmem:[#allocation42_spill] sm:$0xff] %v15313_v19  ;;  %9563 = vmatprep.mubr.msk.f32.mxu1 %vm2751_vm4, %v15309_v35  ;;  %3712 = vmatprep.subr.mxu0 %v10491_v48  ;;  %v15318_v18 = vpop.f32.mrf.mxu0  ;;  %v10495_v63 = vpop.eup %10494  ;;  %10520 = vtanh.f32 %v20692_v21  ;;  %20693 = vst [vmem:[#allocation43_spill] sm:$0xff] %v15324_v38  ;;  %v20697_v21 = vld [vmem:[#allocation17_spill] sm:$0xff] }
 0x27a   : > { %20691 = vst [vmem:[#allocation44_spill] sm:$0xff] %v15318_v18  ;;  %3921 = vmatprep.subr.mxu1 %v10493_v25  ;;  %3361 = vmatmul.mubr.f32.gmra.mxu0 %v15324_v38  ;;  %v15327_v59 = vpop.f32.mrf.mxu1  ;;  %v10497_v62 = vpop.eup %10496  ;;  %10522 = vtanh.f32 %v20695_v41 }
 0x27b   : > { %20694 = vst [vmem:[#allocation21_spill] sm:$0xff] %v15327_v59  ;;  %3570 = vmatmul.mubr.f32.gmra.mxu1 %v15324_v38  ;;  %3713 = vmatpush2.msra.mxu0 %v10495_v63  ;;  %v15331_v48 = vpop.f32.mrf.mxu0  ;;  %v10499_v35 = vpop.eup %10498  ;;  %10524 = vtanh.f32 %v20697_v21  ;;  %v15344_v63 = vld [vmem:[%s20298_s3 + $0xa8] sm:$0xff] }
 0x27c   : > { %20696 = vst [vmem:[#allocation45_spill] sm:$0xff] %v15331_v48  ;;  %3922 = vmatpush2.msra.mxu1 %v10497_v62  ;;  %3714 = vmatprep.subr.mxu0 %v15253_v47  ;;  %v15335_v25 = vpop.f32.mrf.mxu1  ;;  %v10501_v19 = vpop.eup %10500  ;;  %10526 = vtanh.f32 %v15218_v23  ;;  %20699 = vst [vmem:[#allocation19_spill] sm:$0xff] %v15344_v63 }
 0x27d   : > { %20698 = vst [vmem:[#allocation20_spill] sm:$0xff] %v15335_v25  ;;  %3923 = vmatprep.subr.mxu1 %v10499_v35  ;;  %3715 = vmatpush2.msra.mxu0 %v15241_v2  ;;  %v15339_v41 = vpop.f32.mrf.mxu0  ;;  %v10503_v38 = vpop.eup %10502  ;;  %10528 = vtanh.f32 %v15231_v28 }
 0x27e   : > { %3924 = vmatpush2.msra.mxu1 %v10501_v19  ;;  %9540 = vmatprep.mubr.msk.f32.mxu0 %vm2751_vm4, %v15344_v63  ;;  %v15349_v47 = vpop.f32.mrf.mxu1  ;;  %v10505_v35 = vpop.eup %10504  ;;  %v15358_v19 = vld [vmem:[%s20298_s3 + $0xa0] sm:$0xff] }
 0x27f   : > { %20700 = vst [vmem:[#allocation18_spill] sm:$0xff] %v15349_v47  ;;  %9564 = vmatprep.mubr.msk.f32.mxu1 %vm2751_vm4, %v15344_v63  ;;  %3716 = vmatprep.subr.mxu0 %v10503_v38  ;;  %v15353_v23 = vpop.f32.mrf.mxu0  ;;  %v10507_v2 = vpop.eup %10506  ;;  %20701 = vst [vmem:[#allocation17_spill] sm:$0xff] %v15358_v19 }
 0x280   : > { %3925 = vmatprep.subr.mxu1 %v10505_v35  ;;  %3367 = vmatmul.mubr.f32.gmra.mxu0 %v15358_v19  ;;  %v15361_v62 = vpop.f32.mrf.mxu1  ;;  %v10509_v28 = vpop.eup %10508 }
 0x281   : > { %20702 = vst [vmem:[#allocation93_spill] sm:$0xff] %v15361_v62  ;;  %3576 = vmatmul.mubr.f32.gmra.mxu1 %v15358_v19  ;;  %3717 = vmatpush2.msra.mxu0 %v10507_v2  ;;  %v15364_v21 = vpop.f32.mrf.mxu0  ;;  %v10511_v38 = vpop.eup %10510  ;;  %v15375_v2 = vld [vmem:[%s20298_s3 + $0xb8] sm:$0xff] }
 0x282   : > { %20703 = vst [vmem:[#allocation94_spill] sm:$0xff] %v15364_v21  ;;  %3926 = vmatpush2.msra.mxu1 %v10509_v28  ;;  %3718 = vmatprep.subr.mxu0 %v15233_v49  ;;  %v15367_v35 = vpop.f32.mrf.mxu1  ;;  %v10513_v63 = vpop.eup %10512  ;;  %20705 = vst [vmem:[#allocation96_spill] sm:$0xff] %v15375_v2  ;;  %v20715_v21 = vld [vmem:[#allocation28_spill] sm:$0xff] }
 0x283   : > { %20704 = vst [vmem:[#allocation95_spill] sm:$0xff] %v15367_v35  ;;  %3927 = vmatprep.subr.mxu1 %v10511_v38  ;;  %3719 = vmatpush2.msra.mxu0 %v15220_v60  ;;  %v15370_v42 = vpop.f32.mrf.mxu0  ;;  %v10515_v59 = vpop.eup %10514 }
 0x284   : > { %3928 = vmatpush2.msra.mxu1 %v10513_v63  ;;  %9541 = vmatprep.mubr.msk.f32.mxu0 %vm2751_vm4, %v15375_v2  ;;  %v15379_v28 = vpop.f32.mrf.mxu1  ;;  %v10517_v49 = vpop.eup %10516  ;;  %v15388_v63 = vld [vmem:[%s20298_s3 + $0xb0] sm:$0xff] }
 0x285   : > { %20706 = vst [vmem:[#allocation97_spill] sm:$0xff] %v15379_v28  ;;  %9565 = vmatprep.mubr.msk.f32.mxu1 %vm2751_vm4, %v15375_v2  ;;  %3720 = vmatprep.subr.mxu0 %v10515_v59  ;;  %v15383_v60 = vpop.f32.mrf.mxu0  ;;  %v10519_v38 = vpop.eup %10518  ;;  %20707 = vst [vmem:[#allocation98_spill] sm:$0xff] %v15388_v63 }
 0x286   : > { %3929 = vmatprep.subr.mxu1 %v10517_v49  ;;  %3373 = vmatmul.mubr.f32.gmra.mxu0 %v15388_v63  ;;  %v15391_v19 = vpop.f32.mrf.mxu1  ;;  %v10521_v18 = vpop.eup %10520 }
 0x287   : > { %3582 = vmatmul.mubr.f32.gmra.mxu1 %v15388_v63  ;;  %3721 = vmatpush2.msra.mxu0 %v10519_v38  ;;  %v15394_v25 = vpop.f32.mrf.mxu0  ;;  %v10523_v59 = vpop.eup %10522  ;;  %v15405_v38 = vld [vmem:[%s20298_s3 + $0xc8] sm:$0xff] }
 0x288   : > { %3930 = vmatpush2.msra.mxu1 %v10521_v18  ;;  %3722 = vmatprep.subr.mxu0 %v15213_v44  ;;  %v15397_v49 = vpop.f32.mrf.mxu1  ;;  %v10525_v2 = vpop.eup %10524  ;;  %20708 = vst [vmem:[#allocation99_spill] sm:$0xff] %v15405_v38 }
 0x289   : > { %3931 = vmatprep.subr.mxu1 %v10523_v59  ;;  %3723 = vmatpush2.msra.mxu0 %v15207_v61  ;;  %v15400_v48 = vpop.f32.mrf.mxu0  ;;  %v10527_v47 = vpop.eup %10526  ;;  %v15416_v61 = vld [vmem:[%s20298_s3 + $0xc0] sm:$0xff]  ;;  %v15425_v59 = vld [vmem:[%s20298_s3 + $0xd8] sm:$0xff] }
 0x28a   : > { %3932 = vmatpush2.msra.mxu1 %v10525_v2  ;;  %9542 = vmatprep.mubr.msk.f32.mxu0 %vm2751_vm4, %v15405_v38  ;;  %v15409_v18 = vpop.f32.mrf.mxu1  ;;  %v10529_v44 = vpop.eup %10528  ;;  %20709 = vst [vmem:[#allocation100_spill] sm:$0xff] %v15416_v61  ;;  %20710 = vst [vmem:[#allocation101_spill] sm:$0xff] %v15425_v59 }
 0x28b   : > { %9566 = vmatprep.mubr.msk.f32.mxu1 %vm2751_vm4, %v15405_v38  ;;  %3379 = vmatmul.mubr.f32.gmra.mxu0 %v15416_v61  ;;  %v15419_v2 = vpop.f32.mrf.mxu0 }
 0x28c   : > { %3588 = vmatmul.mubr.f32.gmra.mxu1 %v15416_v61  ;;  %9543 = vmatprep.mubr.msk.f32.mxu0 %vm2751_vm4, %v15425_v59  ;;  %v15429_v38 = vpop.f32.mrf.mxu1  ;;  %v20713_v61 = vld [vmem:[#allocation27_spill] sm:$0xff] }
 0x28d   : > { %9567 = vmatprep.mubr.msk.f32.mxu1 %vm2751_vm4, %v15425_v59  ;;  %4078 = vmatprep.subr.mxu0 %v10527_v47  ;;  %v15433_v63 = vpop.f32.mrf.mxu0  ;;  %v20717_v47 = vld [vmem:[#allocation37_spill] sm:$0xff]  ;;  %v20725_v59 = vld [vmem:[#allocation39_spill] sm:$0xff] }
 0x28e   : > { %20711 = vst [vmem:[#allocation102_spill] sm:$0xff] %v15433_v63  ;;  %4287 = vmatprep.subr.mxu1 %v10529_v44  ;;  %v15435_v62 = vpop.f32.mrf.mxu1  ;;  %v20719_v44 = vld [vmem:[#allocation33_spill] sm:$0xff] }
 0x28f   : > { %20712 = vst [vmem:[#allocation103_spill] sm:$0xff] %v15435_v62  ;;  %3385 = vmatmul.mubr.f32.gmra.mxu0 %v20713_v61  ;;  %v15438_v35 = vpop.f32.mrf.mxu0 }
 0x290   : > { %20714 = vst [vmem:[#allocation27_spill] sm:$0xff] %v15438_v35  ;;  %3594 = vmatmul.mubr.f32.gmra.mxu1 %v20713_v61  ;;  %9544 = vmatprep.mubr.msk.f32.mxu0 %vm2751_vm4, %v20715_v21  ;;  %v15443_v28 = vpop.f32.mrf.mxu1 }
 0x291   : > { %20716 = vst [vmem:[#allocation28_spill] sm:$0xff] %v15443_v28  ;;  %9568 = vmatprep.mubr.msk.f32.mxu1 %vm2751_vm4, %v20715_v21  ;;  %v20722_v28 = vld [vmem:[#allocation35_spill] sm:$0xff]  ;;  %v20724_v21 = vld [vmem:[#allocation38_spill] sm:$0xff] }
 0x292   : > { %10530 = vtanh.f32 %v20722_v28  ;;  %v20730_v28 = vld [vmem:[#allocation30_spill] sm:$0xff] }
 0x293   : > { %3391 = vmatmul.mubr.f32.gmra.mxu0 %v20717_v47  ;;  %v15448_v63 = vpop.f32.mrf.mxu0  ;;  %10532 = vtanh.f32 %v20724_v21  ;;  %v20732_v21 = vld [vmem:[#allocation15_spill] sm:$0xff] }
 0x294   : > { %20718 = vst [vmem:[#allocation37_spill] sm:$0xff] %v15448_v63  ;;  %3600 = vmatmul.mubr.f32.gmra.mxu1 %v20717_v47  ;;  %9545 = vmatprep.mubr.msk.f32.mxu0 %vm2751_vm4, %v20719_v44  ;;  %v15453_v35 = vpop.f32.mrf.mxu1  ;;  %v20726_v63 = vld [vmem:[#allocation26_spill] sm:$0xff] }
 0x295   : > { %20720 = vst [vmem:[#allocation33_spill] sm:$0xff] %v15453_v35  ;;  %9569 = vmatprep.mubr.msk.f32.mxu1 %vm2751_vm4, %v20719_v44  ;;  %v15457_v61 = vpop.f32.mrf.mxu0  ;;  %10534 = vtanh.f32 %v20726_v63  ;;  %v20727_v47 = vld [vmem:[#allocation66_spill] sm:$0xff]  ;;  %v20728_v35 = vld [vmem:[#allocation31_spill] sm:$0xff] }
 0x296   : > { %20721 = vst [vmem:[#allocation104_spill] sm:$0xff] %v15457_v61  ;;  %v15460_v62 = vpop.f32.mrf.mxu1  ;;  %10536 = vtanh.f32 %v20728_v35  ;;  %v20733_v61 = vld [vmem:[#allocation25_spill] sm:$0xff]  ;;  %v20736_v35 = vld [vmem:[#allocation22_spill] sm:$0xff] }
 0x297   : > { %20723 = vst [vmem:[#allocation35_spill] sm:$0xff] %v15460_v62  ;;  %3397 = vmatmul.mubr.f32.gmra.mxu0 %v20725_v59  ;;  %10538 = vtanh.f32 %v20730_v28  ;;  %v20739_v28 = vld [vmem:[#allocation40_spill] sm:$0xff] }
 0x298   : > { %3606 = vmatmul.mubr.f32.gmra.mxu1 %v20725_v59  ;;  %9546 = vmatprep.mubr.msk.f32.mxu0 %vm2751_vm4, %v20727_v47  ;;  %10540 = vtanh.f32 %v20732_v21  ;;  %v20735_v59 = vld [vmem:[#allocation67_spill] sm:$0xff]  ;;  %v20740_v21 = vld [vmem:[#allocation46_spill] sm:$0xff] }
 0x299   : > { %9570 = vmatprep.mubr.msk.f32.mxu1 %vm2751_vm4, %v20727_v47  ;;  %v15471_v44 = vpop.f32.mrf.mxu0  ;;  %10542 = vtanh.f32 %v20735_v59  ;;  %v20743_v59 = vld [vmem:[#allocation47_spill] sm:$0xff] }
 0x29a   : > { %20729 = vst [vmem:[#allocation38_spill] sm:$0xff] %v15471_v44  ;;  %v15474_v62 = vpop.f32.mrf.mxu1  ;;  %v20738_v44 = vld [vmem:[#allocation29_spill] sm:$0xff] }
 0x29b   : > { %20731 = vst [vmem:[#allocation39_spill] sm:$0xff] %v15474_v62  ;;  %3403 = vmatmul.mubr.f32.gmra.mxu0 %v20733_v61  ;;  %v15478_v63 = vpop.f32.mrf.mxu0  ;;  %10544 = vtanh.f32 %v20738_v44  ;;  %v20741_v62 = vld [vmem:[#allocation48_spill] sm:$0xff] }
 0x29c   : > { %20734 = vst [vmem:[#allocation26_spill] sm:$0xff] %v15478_v63  ;;  %3612 = vmatmul.mubr.f32.gmra.mxu1 %v20733_v61  ;;  %9547 = vmatprep.mubr.msk.f32.mxu0 %vm2751_vm4, %v20736_v35  ;;  %v15484_v47 = vpop.f32.mrf.mxu1  ;;  %10546 = vtanh.f32 %v20739_v28  ;;  %v20745_v44 = vld [vmem:[#allocation68_spill] sm:$0xff]  ;;  %v20747_v28 = vld [vmem:[#allocation70_spill] sm:$0xff] }
 0x29d   : > { %20737 = vst [vmem:[#allocation66_spill] sm:$0xff] %v15484_v47  ;;  %9571 = vmatprep.mubr.msk.f32.mxu1 %vm2751_vm4, %v20736_v35  ;;  %10548 = vtanh.f32 %v20740_v21 }
 0x29e   : > { %10550 = vtanh.f32 %v20743_v59  ;;  %v20749_v59 = vld [vmem:[#allocation72_spill] sm:$0xff] }
 0x29f   : > { %3409 = vmatmul.mubr.f32.gmra.mxu0 %v20741_v62  ;;  %v15492_v63 = vpop.f32.mrf.mxu0  ;;  %10552 = vtanh.f32 %v20745_v44  ;;  %v20753_v44 = vld [vmem:[#allocation52_spill] sm:$0xff] }
 0x2a0   : > { %20742 = vst [vmem:[#allocation31_spill] sm:$0xff] %v15492_v63  ;;  %3618 = vmatmul.mubr.f32.gmra.mxu1 %v20741_v62  ;;  %9548 = vmatprep.mubr.msk.f32.mxu0 %vm2751_vm4, %v14787_v30  ;;  %v15498_v61 = vpop.f32.mrf.mxu1  ;;  %10554 = vtanh.f32 %v20747_v28  ;;  %v15508_v63 = vpop.eup %10530  ;;  %v20750_v62 = vld [vmem:[#allocation50_spill] sm:$0xff]  ;;  %v20754_v28 = vld [vmem:[#allocation85_spill] sm:$0xff] }
 0x2a1   : > { %20744 = vst [vmem:[#allocation30_spill] sm:$0xff] %v15498_v61  ;;  %9572 = vmatprep.mubr.msk.f32.mxu1 %vm2751_vm4, %v14787_v30  ;;  %v15503_v35 = vpop.f32.mrf.mxu0  ;;  %10556 = vtanh.f32 %v20749_v59  ;;  %v15512_v47 = vpop.eup %10532  ;;  %v20752_v61 = vld [vmem:[#allocation83_spill] sm:$0xff] }
 0x2a2   : > { %20746 = vst [vmem:[#allocation15_spill] sm:$0xff] %v15503_v35  ;;  %v15506_v21 = vpop.f32.mrf.mxu1  ;;  %20751 = vst [vmem:[#allocation67_spill] sm:$0xff] %v15512_v47  ;;  %10558 = vtanh.f32 %v20752_v61  ;;  %v15518_v30 = vpop.eup %10534 }
 0x2a3   : > { %20748 = vst [vmem:[#allocation25_spill] sm:$0xff] %v15506_v21  ;;  %3415 = vmatmul.mubr.f32.gmra.mxu0 %v20750_v62  ;;  %10560 = vtanh.f32 %v20754_v28  ;;  %v15525_v59 = vpop.eup %10536 }
 0x2a4   : > { %3624 = vmatmul.mubr.f32.gmra.mxu1 %v20750_v62  ;;  %9549 = vmatprep.mubr.msk.f32.mxu0 %vm2751_vm4, %v20753_v44  ;;  %10562 = vtanh.f32 %v15010_v43  ;;  %v15530_v61 = vpop.eup %10538  ;;  %v20757_v62 = vld [vmem:[#allocation60_spill] sm:$0xff] }
 0x2a5   : > { %9573 = vmatprep.mubr.msk.f32.mxu1 %vm2751_vm4, %v20753_v44  ;;  %v15523_v21 = vpop.f32.mrf.mxu0  ;;  %10564 = vtanh.f32 %v15023_v27  ;;  %v15536_v28 = vpop.eup %10540  ;;  %v20759_v44 = vld [vmem:[#allocation69_spill] sm:$0xff] }
 0x2a6   : > { %20755 = vst [vmem:[#allocation22_spill] sm:$0xff] %v15523_v21  ;;  %v15528_v35 = vpop.f32.mrf.mxu1  ;;  %10566 = vtanh.f32 %v15071_v57  ;;  %v20761_v57 = vld [vmem:[#allocation73_spill] sm:$0xff] }
 0x2a7   : > { %20756 = vst [vmem:[#allocation29_spill] sm:$0xff] %v15528_v35  ;;  %3421 = vmatmul.mubr.f32.gmra.mxu0 %v20757_v62  ;;  %v15534_v47 = vpop.f32.mrf.mxu0  ;;  %v15544_v35 = vpop.eup %10542  ;;  %10568 = vtanh.f32 %v15085_v50  ;;  %v20763_v50 = vld [vmem:[#allocation75_spill] sm:$0xff] }
 0x2a8   : > { %20758 = vst [vmem:[#allocation40_spill] sm:$0xff] %v15534_v47  ;;  %3630 = vmatmul.mubr.f32.gmra.mxu1 %v20757_v62  ;;  %9550 = vmatprep.mubr.msk.f32.mxu0 %vm2751_vm4, %v20759_v44  ;;  %v15542_v43 = vpop.f32.mrf.mxu1  ;;  %v15549_v27 = vpop.eup %10544  ;;  %10570 = vtanh.f32 %v15133_v9 }
 0x2a9   : > { %20760 = vst [vmem:[#allocation46_spill] sm:$0xff] %v15542_v43  ;;  %9574 = vmatprep.mubr.msk.f32.mxu1 %vm2751_vm4, %v20759_v44  ;;  %v15552_v47 = vpop.eup %10546  ;;  %10572 = vtanh.f32 %v15141_v7 }
 0x2aa   : > { %v15558_v43 = vpop.eup %10548  ;;  %10574 = vtanh.f32 %v15177_v34 }
 0x2ab   : > { %3427 = vmatmul.mubr.f32.gmra.mxu0 %v20761_v57  ;;  %v15556_v62 = vpop.f32.mrf.mxu0  ;;  %v15566_v9 = vpop.eup %10550  ;;  %10576 = vtanh.f32 %v15192_v45  ;;  %v20768_v45 = vld [vmem:[#allocation79_spill] sm:$0xff] }
 0x2ac   : > { %20762 = vst [vmem:[#allocation48_spill] sm:$0xff] %v15556_v62  ;;  %3636 = vmatmul.mubr.f32.gmra.mxu1 %v20761_v57  ;;  %9551 = vmatprep.mubr.msk.f32.mxu0 %vm2751_vm4, %v20763_v50  ;;  %v15564_v44 = vpop.f32.mrf.mxu1  ;;  %v15573_v62 = vpop.eup %10552  ;;  %10578 = vtanh.f32 %v15205_v12 }
 0x2ad   : > { %20764 = vst [vmem:[#allocation47_spill] sm:$0xff] %v15564_v44  ;;  %9575 = vmatprep.mubr.msk.f32.mxu1 %vm2751_vm4, %v20763_v50  ;;  %v15571_v7 = vpop.f32.mrf.mxu0  ;;  %v15578_v57 = vpop.eup %10554  ;;  %10580 = vtanh.f32 %v15211_v14  ;;  %v20767_v44 = vld [vmem:[#allocation77_spill] sm:$0xff] }
 0x2ae   : > { %20765 = vst [vmem:[#allocation68_spill] sm:$0xff] %v15571_v7  ;;  %v15576_v34 = vpop.f32.mrf.mxu1  ;;  %v15582_v21 = vpop.eup %10556  ;;  %10582 = vtanh.f32 %v15201_v52 }
 0x2af   : > { %20766 = vst [vmem:[#allocation70_spill] sm:$0xff] %v15576_v34  ;;  %3433 = vmatmul.mubr.f32.gmra.mxu0 %v20767_v44  ;;  %v15588_v50 = vpop.eup %10558  ;;  %10584 = vtanh.f32 %v15187_v54 }
 0x2b0   : > { %3642 = vmatmul.mubr.f32.gmra.mxu1 %v20767_v44  ;;  %9552 = vmatprep.mubr.msk.f32.mxu0 %vm2751_vm4, %v20768_v45  ;;  %v15595_v14 = vpop.eup %10560  ;;  %10586 = vtanh.f32 %v15169_v26  ;;  %v20770_v44 = vld [vmem:[#allocation82_spill] sm:$0xff] }
 0x2b1   : > { %9576 = vmatprep.mubr.msk.f32.mxu1 %vm2751_vm4, %v20768_v45  ;;  %v15593_v12 = vpop.f32.mrf.mxu0  ;;  %v15600_v52 = vpop.eup %10562  ;;  %10588 = vtanh.f32 %v15173_v8 }
 0x2b2   : > { %v15598_v34 = vpop.f32.mrf.mxu1  ;;  %v15606_v54 = vpop.eup %10564  ;;  %10590 = vtanh.f32 %v15156_v51  ;;  %v20773_v51 = vld [vmem:[#allocation86_spill] sm:$0xff] }
 0x2b3   : > { %20769 = vst [vmem:[#allocation72_spill] sm:$0xff] %v15598_v34  ;;  %3439 = vmatmul.mubr.f32.gmra.mxu0 %v20770_v44  ;;  %v15604_v7 = vpop.f32.mrf.mxu0  ;;  %v15614_v45 = vpop.eup %10566  ;;  %10592 = vtanh.f32 %v15165_v58  ;;  %v20775_v58 = vld [vmem:[#allocation89_spill] sm:$0xff] }
 0x2b4   : > { %20771 = vst [vmem:[#allocation50_spill] sm:$0xff] %v15604_v7  ;;  %3648 = vmatmul.mubr.f32.gmra.mxu1 %v20770_v44  ;;  %9553 = vmatprep.mubr.msk.f32.mxu0 %vm2751_vm4, %v14941_v39  ;;  %v15612_v26 = vpop.f32.mrf.mxu1  ;;  %v15619_v8 = vpop.eup %10568  ;;  %10594 = vtanh.f32 %v15151_v16 }
 0x2b5   : > { %20772 = vst [vmem:[#allocation83_spill] sm:$0xff] %v15612_v26  ;;  %9577 = vmatprep.mubr.msk.f32.mxu1 %vm2751_vm4, %v14941_v39  ;;  %v10571_v34 = vpop.eup %10570  ;;  %10596 = vtanh.f32 %v15137_v22 }
 0x2b6   : > { %v10573_v7 = vpop.eup %10572  ;;  %10598 = vtanh.f32 %v15117_v3 }
 0x2b7   : > { %3445 = vmatmul.mubr.f32.gmra.mxu0 %v20773_v51  ;;  %v15624_v44 = vpop.f32.mrf.mxu0  ;;  %v10575_v26 = vpop.eup %10574  ;;  %10600 = vtanh.f32 %v15122_v0 }
 0x2b8   : > { %20774 = vst [vmem:[#allocation52_spill] sm:$0xff] %v15624_v44  ;;  %3654 = vmatmul.mubr.f32.gmra.mxu1 %v20773_v51  ;;  %9578 = vmatprep.mubr.msk.f32.mxu0 %vm2751_vm4, %v20775_v58  ;;  %v15630_v39 = vpop.f32.mrf.mxu1  ;;  %v10577_v16 = vpop.eup %10576  ;;  %10602 = vtanh.f32 %v15103_v31 }
 0x2b9   : > { %20776 = vst [vmem:[#allocation85_spill] sm:$0xff] %v15630_v39  ;;  %9602 = vmatprep.mubr.msk.f32.mxu1 %vm2751_vm4, %v20775_v58  ;;  %v15635_v22 = vpop.f32.mrf.mxu0  ;;  %v10579_v3 = vpop.eup %10578  ;;  %10604 = vtanh.f32 %v15107_v13 }
 0x2ba   : > { %v15638_v44 = vpop.f32.mrf.mxu1  ;;  %v10581_v51 = vpop.eup %10580  ;;  %10606 = vtanh.f32 %v15090_v6 }
 0x2bb   : > { %3725 = vmatmul.mubr.f32.vlgmr.msra.gmra.mxu0 %v15004_v20  ;;  %v10583_v0 = vpop.eup %10582  ;;  %10608 = vtanh.f32 %v15075_v56 }
 0x2bc   : > { %3934 = vmatmul.mubr.f32.vlgmr.msra.gmra.mxu1 %v15004_v20  ;;  %4079 = vmatpush1.msra.mxu0 %v10579_v3  ;;  %v10585_v31 = vpop.eup %10584  ;;  %10610 = vtanh.f32 %v15053_v11  ;;  %v20778_v3 = vld [vmem:[#allocation92_spill] sm:$0xff] }
 0x2bd   : > { %4288 = vmatpush1.msra.mxu1 %v10581_v51  ;;  %4080 = vmatprep.subr.mxu0 %v10577_v16  ;;  %v15645_v58 = vpop.f32.mrf.mxu0  ;;  %v10587_v39 = vpop.eup %10586  ;;  %10612 = vtanh.f32 %v15058_v55  ;;  %v20780_v51 = vld [vmem:[#allocation90_spill] sm:$0xff] }
 0x2be   : > { %4289 = vmatprep.subr.mxu1 %v10583_v0  ;;  %4081 = vmatpush1.msra.mxu0 %v10575_v26  ;;  %v15648_v13 = vpop.f32.mrf.mxu1  ;;  %v10589_v56 = vpop.eup %10588  ;;  %10614 = vtanh.f32 %v15040_v4 }
 0x2bf   : > { %4290 = vmatpush1.msra.mxu1 %v10585_v31  ;;  %9579 = vmatprep.mubr.msk.f32.mxu0 %vm2751_vm4, %v15019_v10  ;;  %v15653_v20 = vpop.f32.mrf.mxu0  ;;  %v10591_v6 = vpop.eup %10590  ;;  %10616 = vtanh.f32 %v15043_v36  ;;  %v20781_v31 = vld [vmem:[#allocation87_spill] sm:$0xff] }
 0x2c0   : > { %9603 = vmatprep.mubr.msk.f32.mxu1 %vm2751_vm4, %v15019_v10  ;;  %4082 = vmatprep.subr.mxu0 %v10587_v39  ;;  %v15658_v11 = vpop.f32.mrf.mxu1  ;;  %v10593_v55 = vpop.eup %10592  ;;  %10618 = vtanh.f32 %v15028_v32  ;;  %v20777_v39 = vld [vmem:[#allocation91_spill] sm:$0xff] }
 0x2c1   : > { %4291 = vmatprep.subr.mxu1 %v10589_v56  ;;  %3731 = vmatmul.mubr.f32.gmra.mxu0 %v15034_v15  ;;  %v10595_v26 = vpop.eup %10594  ;;  %10620 = vtanh.f32 %v15013_v40 }
 0x2c2   : > { %3940 = vmatmul.mubr.f32.gmra.mxu1 %v15034_v15  ;;  %4083 = vmatpush1.msra.mxu0 %v10591_v6  ;;  %v10597_v4 = vpop.eup %10596  ;;  %10622 = vtanh.f32 %v20777_v39  ;;  %v20779_v15 = vld [vmem:[#allocation88_spill] sm:$0xff] }
 0x2c3   : > { %4292 = vmatpush1.msra.mxu1 %v10593_v55  ;;  %4084 = vmatprep.subr.mxu0 %v10573_v7  ;;  %v15665_v10 = vpop.f32.mrf.mxu0  ;;  %v10599_v16 = vpop.eup %10598  ;;  %10624 = vtanh.f32 %v20778_v3  ;;  %v20782_v6 = vld [vmem:[#allocation84_spill] sm:$0xff] }
 0x2c4   : > { %4293 = vmatprep.subr.mxu1 %v10595_v26  ;;  %4085 = vmatpush1.msra.mxu0 %v10571_v34  ;;  %v15668_v36 = vpop.f32.mrf.mxu1  ;;  %v10601_v40 = vpop.eup %10600  ;;  %10626 = vtanh.f32 %v20779_v15  ;;  %v20783_v26 = vld [vmem:[#allocation80_spill] sm:$0xff] }
 0x2c5   : > { %4294 = vmatpush1.msra.mxu1 %v10597_v4  ;;  %9580 = vmatprep.mubr.msk.f32.mxu0 %vm2751_vm4, %v15049_v24  ;;  %v15673_v32 = vpop.f32.mrf.mxu0  ;;  %v10603_v34 = vpop.eup %10602  ;;  %10628 = vtanh.f32 %v20780_v51 }
 0x2c6   : > { %9604 = vmatprep.mubr.msk.f32.mxu1 %vm2751_vm4, %v15049_v24  ;;  %4086 = vmatprep.subr.mxu0 %v10599_v16  ;;  %v15678_v7 = vpop.f32.mrf.mxu1  ;;  %v10605_v0 = vpop.eup %10604  ;;  %10630 = vtanh.f32 %v20781_v31  ;;  %v20784_v16 = vld [vmem:[#allocation81_spill] sm:$0xff] }
 0x2c7   : > { %4295 = vmatprep.subr.mxu1 %v10601_v40  ;;  %3737 = vmatmul.mubr.f32.gmra.mxu0 %v15064_v1  ;;  %v10607_v56 = vpop.eup %10606  ;;  %10632 = vtanh.f32 %v20782_v6  ;;  %v20786_v40 = vld [vmem:[#allocation76_spill] sm:$0xff] }
 0x2c8   : > { %3946 = vmatmul.mubr.f32.gmra.mxu1 %v15064_v1  ;;  %4087 = vmatpush1.msra.mxu0 %v10603_v34  ;;  %v10609_v55 = vpop.eup %10608  ;;  %10634 = vtanh.f32 %v20783_v26  ;;  %v20785_v1 = vld [vmem:[#allocation64_spill] sm:$0xff]  ;;  %v20787_v34 = vld [vmem:[#allocation78_spill] sm:$0xff]  ;;  %v20790_v26 = vld [vmem:[#allocation53_spill] sm:$0xff] }
 0x2c9   : > { %4296 = vmatpush1.msra.mxu1 %v10605_v0  ;;  %4088 = vmatprep.subr.mxu0 %v15619_v8  ;;  %v15686_v24 = vpop.f32.mrf.mxu0  ;;  %v10611_v39 = vpop.eup %10610  ;;  %10636 = vtanh.f32 %v20784_v16  ;;  %v20788_v0 = vld [vmem:[#allocation74_spill] sm:$0xff] }
 0x2ca   : > { %4297 = vmatprep.subr.mxu1 %v10607_v56  ;;  %4089 = vmatpush1.msra.mxu0 %v15614_v45  ;;  %v15690_v4 = vpop.f32.mrf.mxu1  ;;  %v10613_v8 = vpop.eup %10612  ;;  %10638 = vtanh.f32 %v20786_v40  ;;  %v20789_v56 = vld [vmem:[#allocation71_spill] sm:$0xff] }
 0x2cb   : > { %4298 = vmatpush1.msra.mxu1 %v10609_v55  ;;  %9581 = vmatprep.mubr.msk.f32.mxu0 %vm2751_vm4, %v20785_v1  ;;  %v15695_v3 = vpop.f32.mrf.mxu0  ;;  %v10615_v45 = vpop.eup %10614  ;;  %10640 = vtanh.f32 %v20787_v34  ;;  %v20794_v34 = vld [vmem:[#allocation65_spill] sm:$0xff] }
 0x2cc   : > { %9605 = vmatprep.mubr.msk.f32.mxu1 %vm2751_vm4, %v20785_v1  ;;  %4090 = vmatprep.subr.mxu0 %v10611_v39  ;;  %v15700_v15 = vpop.f32.mrf.mxu1  ;;  %v10617_v51 = vpop.eup %10616  ;;  %10642 = vtanh.f32 %v20788_v0  ;;  %v20791_v1 = vld [vmem:[#allocation58_spill] sm:$0xff] }
 0x2cd   : > { %4299 = vmatprep.subr.mxu1 %v10613_v8  ;;  %3743 = vmatmul.mubr.f32.gmra.mxu0 %v15096_v37  ;;  %v10619_v31 = vpop.eup %10618  ;;  %10644 = vtanh.f32 %v20789_v56  ;;  %v20792_v8 = vld [vmem:[#allocation49_spill] sm:$0xff] }
 0x2ce   : > { %3952 = vmatmul.mubr.f32.gmra.mxu1 %v15096_v37  ;;  %4091 = vmatpush1.msra.mxu0 %v10615_v45  ;;  %v10621_v55 = vpop.eup %10620  ;;  %10646 = vtanh.f32 %v20790_v26  ;;  %v20793_v45 = vld [vmem:[#allocation51_spill] sm:$0xff] }
 0x2cf   : > { %4300 = vmatpush1.msra.mxu1 %v10617_v51  ;;  %4092 = vmatprep.subr.mxu0 %v15606_v54  ;;  %v15708_v6 = vpop.f32.mrf.mxu0  ;;  %v10623_v16 = vpop.eup %10622  ;;  %10648 = vtanh.f32 %v20791_v1 }
 0x2d0   : > { %4301 = vmatprep.subr.mxu1 %v10619_v31  ;;  %4093 = vmatpush1.msra.mxu0 %v15600_v52  ;;  %v15712_v39 = vpop.f32.mrf.mxu1  ;;  %v10625_v54 = vpop.eup %10624  ;;  %10650 = vtanh.f32 %v20792_v8  ;;  %v20796_v8 = vld [vmem:[#allocation63_spill] sm:$0xff] }
 0x2d1   : > { %4302 = vmatpush1.msra.mxu1 %v10621_v55  ;;  %9582 = vmatprep.mubr.msk.f32.mxu0 %vm2751_vm4, %v15113_v53  ;;  %v15717_v37 = vpop.f32.mrf.mxu0  ;;  %v10627_v52 = vpop.eup %10626  ;;  %10652 = vtanh.f32 %v20793_v45 }
 0x2d2   : > { %9606 = vmatprep.mubr.msk.f32.mxu1 %vm2751_vm4, %v15113_v53  ;;  %4094 = vmatprep.subr.mxu0 %v10623_v16  ;;  %v15722_v40 = vpop.f32.mrf.mxu1  ;;  %v10629_v51 = vpop.eup %10628  ;;  %10654 = vtanh.f32 %v15239_v5 }
 0x2d3   : > { %4303 = vmatprep.subr.mxu1 %v10625_v54  ;;  %3749 = vmatmul.mubr.f32.gmra.mxu0 %v20794_v34  ;;  %v10631_v31 = vpop.eup %10630  ;;  %10656 = vtanh.f32 %v15258_v29 }
 0x2d4   : > { %3958 = vmatmul.mubr.f32.gmra.mxu1 %v20794_v34  ;;  %4095 = vmatpush1.msra.mxu0 %v10627_v52  ;;  %v15728_v0 = vpop.f32.mrf.mxu0  ;;  %v10633_v56 = vpop.eup %10632  ;;  %10658 = vtanh.f32 %v15297_v33 }
 0x2d5   : > { %4304 = vmatpush1.msra.mxu1 %v10629_v51  ;;  %4096 = vmatprep.subr.mxu0 %v15595_v14  ;;  %v15732_v53 = vpop.f32.mrf.mxu1  ;;  %v10635_v55 = vpop.eup %10634  ;;  %10660 = vtanh.f32 %v15303_v17  ;;  %v20795_v17 = vld [vmem:[#allocation62_spill] sm:$0xff] }
 0x2d6   : > { %4305 = vmatprep.subr.mxu1 %v10631_v31  ;;  %4097 = vmatpush1.msra.mxu0 %v15588_v50  ;;  %v15736_v5 = vpop.f32.mrf.mxu0  ;;  %v10637_v14 = vpop.eup %10636  ;;  %10662 = vtanh.f32 %v15339_v41 }
 0x2d7   : > { %4306 = vmatpush1.msra.mxu1 %v10633_v56  ;;  %9583 = vmatprep.mubr.msk.f32.mxu0 %vm2751_vm4, %v15147_v46  ;;  %v15741_v29 = vpop.f32.mrf.mxu1  ;;  %v10639_v50 = vpop.eup %10638  ;;  %10664 = vtanh.f32 %v15353_v23  ;;  %v20798_v56 = vld [vmem:[#allocation97_spill] sm:$0xff] }
 0x2d8   : > { %9607 = vmatprep.mubr.msk.f32.mxu1 %vm2751_vm4, %v15147_v46  ;;  %4098 = vmatprep.subr.mxu0 %v10635_v55  ;;  %v15746_v33 = vpop.f32.mrf.mxu0  ;;  %v10641_v16 = vpop.eup %10640  ;;  %10666 = vtanh.f32 %v15383_v60 }
 0x2d9   : > { %4307 = vmatprep.subr.mxu1 %v10637_v14  ;;  %3755 = vmatmul.mubr.f32.gmra.mxu0 %v20795_v17  ;;  %v15750_v26 = vpop.f32.mrf.mxu1  ;;  %v10643_v46 = vpop.eup %10642  ;;  %10668 = vtanh.f32 %v15394_v25  ;;  %v20801_v14 = vld [vmem:[#allocation95_spill] sm:$0xff] }
 0x2da   : > { %3964 = vmatmul.mubr.f32.gmra.mxu1 %v20795_v17  ;;  %4099 = vmatpush1.msra.mxu0 %v10639_v50  ;;  %v15754_v41 = vpop.f32.mrf.mxu0  ;;  %v10645_v1 = vpop.eup %10644  ;;  %10670 = vtanh.f32 %v15419_v2 }
 0x2db   : > { %4308 = vmatpush1.msra.mxu1 %v10641_v16  ;;  %4100 = vmatprep.subr.mxu0 %v15582_v21  ;;  %v15758_v23 = vpop.f32.mrf.mxu1  ;;  %v10647_v54 = vpop.eup %10646  ;;  %10672 = vtanh.f32 %v15429_v38  ;;  %v20797_v38 = vld [vmem:[#allocation61_spill] sm:$0xff] }
 0x2dc   : > { %4309 = vmatprep.subr.mxu1 %v10643_v46  ;;  %4101 = vmatpush1.msra.mxu0 %v15578_v57  ;;  %v15762_v60 = vpop.f32.mrf.mxu0  ;;  %v10649_v21 = vpop.eup %10648  ;;  %10674 = vtanh.f32 %v15400_v48  ;;  %v20804_v16 = vld [vmem:[#allocation93_spill] sm:$0xff] }
 0x2dd   : > { %4310 = vmatpush1.msra.mxu1 %v10645_v1  ;;  %9584 = vmatprep.mubr.msk.f32.mxu0 %vm2751_vm4, %v20796_v8  ;;  %v15767_v25 = vpop.f32.mrf.mxu1  ;;  %v10651_v57 = vpop.eup %10650  ;;  %10676 = vtanh.f32 %v15409_v18  ;;  %v20805_v1 = vld [vmem:[#allocation18_spill] sm:$0xff] }
 0x2de   : > { %9608 = vmatprep.mubr.msk.f32.mxu1 %vm2751_vm4, %v20796_v8  ;;  %4102 = vmatprep.subr.mxu0 %v10647_v54  ;;  %v15772_v2 = vpop.f32.mrf.mxu0  ;;  %v10653_v45 = vpop.eup %10652  ;;  %10678 = vtanh.f32 %v15397_v49  ;;  %v20807_v8 = vld [vmem:[#allocation45_spill] sm:$0xff] }
 0x2df   : > { %4311 = vmatprep.subr.mxu1 %v10649_v21  ;;  %3761 = vmatmul.mubr.f32.gmra.mxu0 %v20797_v38  ;;  %v15776_v52 = vpop.f32.mrf.mxu1  ;;  %v15782_v34 = vpop.eup %10654  ;;  %10680 = vtanh.f32 %v15391_v19  ;;  %v20799_v19 = vld [vmem:[#allocation59_spill] sm:$0xff] }
 0x2e0   : > { %3970 = vmatmul.mubr.f32.gmra.mxu1 %v20797_v38  ;;  %4103 = vmatpush1.msra.mxu0 %v10651_v57  ;;  %v15780_v48 = vpop.f32.mrf.mxu0  ;;  %v15788_v51 = vpop.eup %10656  ;;  %10682 = vtanh.f32 %v15370_v42  ;;  %v20800_v42 = vld [vmem:[#allocation94_spill] sm:$0xff]  ;;  %v20809_v57 = vld [vmem:[#allocation20_spill] sm:$0xff]  ;;  %v20810_v38 = vld [vmem:[#allocation67_spill] sm:$0xff] }
 0x2e1   : > { %4312 = vmatpush1.msra.mxu1 %v10653_v45  ;;  %4104 = vmatprep.subr.mxu0 %v15566_v9  ;;  %v15786_v18 = vpop.f32.mrf.mxu1  ;;  %v15795_v31 = vpop.eup %10658  ;;  %10684 = vtanh.f32 %v20798_v56  ;;  %v20811_v45 = vld [vmem:[#allocation32_spill] sm:$0xff] }
 0x2e2   : > { %4313 = vmatprep.subr.mxu1 %v15573_v62  ;;  %4105 = vmatpush1.msra.mxu0 %v15552_v47  ;;  %v15793_v49 = vpop.f32.mrf.mxu0  ;;  %v15803_v55 = vpop.eup %10660  ;;  %10686 = vtanh.f32 %v20800_v42  ;;  %v20813_v56 = vld [vmem:[#allocation44_spill] sm:$0xff] }
 0x2e3   : > { %4314 = vmatpush1.msra.mxu1 %v15558_v43  ;;  %9585 = vmatprep.mubr.msk.f32.mxu0 %vm2751_vm4, %v20799_v19  ;;  %v15801_v9 = vpop.f32.mrf.mxu1  ;;  %v15811_v62 = vpop.eup %10662  ;;  %10688 = vtanh.f32 %v20801_v14  ;;  %v20802_v43 = vld [vmem:[#allocation56_spill] sm:$0xff] }
 0x2e4   : > { %9609 = vmatprep.mubr.msk.f32.mxu1 %vm2751_vm4, %v20799_v19  ;;  %4106 = vmatprep.subr.mxu0 %v15544_v35  ;;  %v15809_v47 = vpop.f32.mrf.mxu0  ;;  %v15818_v17 = vpop.eup %10664  ;;  %10690 = vtanh.f32 %v20804_v16  ;;  %v20815_v19 = vld [vmem:[#allocation21_spill] sm:$0xff]  ;;  %v20816_v42 = vld [vmem:[#allocation36_spill] sm:$0xff]  ;;  %v20818_v16 = vld [vmem:[#allocation42_spill] sm:$0xff] }
 0x2e5   : > { %4315 = vmatprep.subr.mxu1 %v15549_v27  ;;  %3767 = vmatmul.mubr.f32.gmra.mxu0 %v20802_v43  ;;  %v15816_v50 = vpop.f32.mrf.mxu1  ;;  %v10667_v46 = vpop.eup %10666  ;;  %10692 = vtanh.f32 %v20805_v1 }
 0x2e6   : > { %20803 = vst [vmem:[#allocation60_spill] sm:$0xff] %v15816_v50  ;;  %3976 = vmatmul.mubr.f32.gmra.mxu1 %v20802_v43  ;;  %4107 = vmatpush1.msra.mxu0 %v15530_v61  ;;  %v15823_v35 = vpop.f32.mrf.mxu0  ;;  %v10669_v54 = vpop.eup %10668  ;;  %10694 = vtanh.f32 %v20807_v8 }
 0x2e7   : > { %4316 = vmatpush1.msra.mxu1 %v15536_v28  ;;  %4108 = vmatprep.subr.mxu0 %v15518_v30  ;;  %v15828_v27 = vpop.f32.mrf.mxu1  ;;  %v10671_v61 = vpop.eup %10670  ;;  %10696 = vtanh.f32 %v20809_v57 }
 0x2e8   : > { %20806 = vst [vmem:[#allocation69_spill] sm:$0xff] %v15828_v27  ;;  %4317 = vmatprep.subr.mxu1 %v15525_v59  ;;  %4109 = vmatpush1.msra.mxu0 %v15508_v63  ;;  %v15833_v21 = vpop.f32.mrf.mxu0  ;;  %v10673_v28 = vpop.eup %10672  ;;  %10698 = vtanh.f32 %v20813_v56 }
 0x2e9   : > { %20808 = vst [vmem:[#allocation73_spill] sm:$0xff] %v15833_v21  ;;  %4318 = vmatpush1.msra.mxu1 %v20810_v38  ;;  %9586 = vmatprep.mubr.msk.f32.mxu0 %vm2751_vm4, %v20811_v45  ;;  %v15839_v30 = vpop.f32.mrf.mxu1  ;;  %v10675_v59 = vpop.eup %10674  ;;  %10700 = vtanh.f32 %v20815_v19  ;;  %v20822_v19 = vld [vmem:[#allocation16_spill] sm:$0xff] }
 0x2ea   : > { %20812 = vst [vmem:[#allocation75_spill] sm:$0xff] %v15839_v30  ;;  %9610 = vmatprep.mubr.msk.f32.mxu1 %vm2751_vm4, %v20811_v45  ;;  %4126 = vmatprep.subr.mxu0 %v10671_v61  ;;  %v15844_v63 = vpop.f32.mrf.mxu0  ;;  %v10677_v43 = vpop.eup %10676  ;;  %10702 = vtanh.f32 %v20818_v16  ;;  %v20819_v61 = vld [vmem:[#allocation24_spill] sm:$0xff]  ;;  %v20821_v45 = vld [vmem:[#allocation23_spill] sm:$0xff] }
 0x2eb   : > { %20814 = vst [vmem:[#allocation77_spill] sm:$0xff] %v15844_v63  ;;  %4335 = vmatprep.subr.mxu1 %v10673_v28  ;;  %3773 = vmatmul.mubr.f32.gmra.mxu0 %v20816_v42  ;;  %v15848_v14 = vpop.f32.mrf.mxu1  ;;  %v10679_v8 = vpop.eup %10678  ;;  %10704 = vtanh.f32 %v20819_v61  ;;  %v20828_v61 = vld [vmem:[#allocation43_spill] sm:$0xff]  ;;  %v20834_v30 = vld [vmem:[#allocation96_spill] sm:$0xff] }
 0x2ec   : > { %20817 = vst [vmem:[#allocation79_spill] sm:$0xff] %v15848_v14  ;;  %3982 = vmatmul.mubr.f32.gmra.mxu1 %v20816_v42  ;;  %4127 = vmatpush2.msra.mxu0 %v10675_v59  ;;  %v15852_v1 = vpop.f32.mrf.mxu0  ;;  %v10681_v38 = vpop.eup %10680  ;;  %10706 = vtanh.f32 %v20821_v45  ;;  %v20823_v59 = vld [vmem:[#allocation41_spill] sm:$0xff] }
 0x2ed   : > { %4336 = vmatpush2.msra.mxu1 %v10677_v43  ;;  %4128 = vmatprep.subr.mxu0 %v10669_v54  ;;  %v15855_v57 = vpop.f32.mrf.mxu1  ;;  %v10683_v56 = vpop.eup %10682  ;;  %10708 = vtanh.f32 %v20822_v19  ;;  %v20825_v54 = vld [vmem:[#allocation55_spill] sm:$0xff]  ;;  %v20830_v19 = vld [vmem:[#allocation54_spill] sm:$0xff] }
 0x2ee   : > { %20820 = vst [vmem:[#allocation82_spill] sm:$0xff] %v15855_v57  ;;  %4337 = vmatprep.subr.mxu1 %v10679_v8  ;;  %4129 = vmatpush2.msra.mxu0 %v10667_v46  ;;  %v15858_v28 = vpop.f32.mrf.mxu0  ;;  %v10685_v43 = vpop.eup %10684  ;;  %10710 = vtanh.f32 %v20825_v54  ;;  %v20827_v8 = vld [vmem:[#allocation34_spill] sm:$0xff]  ;;  %v20836_v57 = vld [vmem:[#allocation99_spill] sm:$0xff] }
 0x2ef   : > { %4338 = vmatpush2.msra.mxu1 %v10681_v38  ;;  %9587 = vmatprep.mubr.msk.f32.mxu0 %vm2751_vm4, %v20823_v59  ;;  %v15863_v42 = vpop.f32.mrf.mxu1  ;;  %v10687_v46 = vpop.eup %10686  ;;  %10712 = vtanh.f32 %v20827_v8 }
 0x2f0   : > { %20824 = vst [vmem:[#allocation86_spill] sm:$0xff] %v15863_v42  ;;  %9611 = vmatprep.mubr.msk.f32.mxu1 %vm2751_vm4, %v20823_v59  ;;  %4130 = vmatprep.subr.mxu0 %v10683_v56  ;;  %v15868_v16 = vpop.f32.mrf.mxu0  ;;  %v10689_v45 = vpop.eup %10688  ;;  %10714 = vtanh.f32 %v20830_v19  ;;  %v20831_v56 = vld [vmem:[#allocation57_spill] sm:$0xff] }
 0x2f1   : > { %20826 = vst [vmem:[#allocation89_spill] sm:$0xff] %v15868_v16  ;;  %4339 = vmatprep.subr.mxu1 %v10685_v43  ;;  %3779 = vmatmul.mubr.f32.gmra.mxu0 %v20828_v61  ;;  %v15872_v38 = vpop.f32.mrf.mxu1  ;;  %v10691_v59 = vpop.eup %10690  ;;  %10716 = vtanh.f32 %v20831_v56  ;;  %v16074_v16 = vld [vmem:[%s20298_s3 + $0x120] sm:$0xff] }
 0x2f2   : > { %20829 = vst [vmem:[#allocation91_spill] sm:$0xff] %v15872_v38  ;;  %3988 = vmatmul.mubr.f32.gmra.mxu1 %v20828_v61  ;;  %4131 = vmatpush2.msra.mxu0 %v10687_v46  ;;  %v15876_v54 = vpop.f32.mrf.mxu0  ;;  %v10693_v43 = vpop.eup %10692  ;;  %10718 = vtanh.f32 %v15793_v49  ;;  %v20832_v46 = vld [vmem:[#allocation19_spill] sm:$0xff]  ;;  %v20833_v49 = vld [vmem:[#allocation17_spill] sm:$0xff]  ;;  %20879 = vst [vmem:[#allocation18_spill] sm:$0xff] %v16074_v16 }
 0x2f3   : > { %4340 = vmatpush2.msra.mxu1 %v10689_v45  ;;  %4132 = vmatprep.subr.mxu0 %v15818_v17  ;;  %v15880_v8 = vpop.f32.mrf.mxu1  ;;  %v10695_v61 = vpop.eup %10694  ;;  %10720 = vtanh.f32 %v15801_v9  ;;  %v20854_v38 = vld [vmem:[#allocation27_spill] sm:$0xff] }
 0x2f4   : > { %4341 = vmatprep.subr.mxu1 %v10691_v59  ;;  %4133 = vmatpush2.msra.mxu0 %v15811_v62  ;;  %v15884_v19 = vpop.f32.mrf.mxu0  ;;  %v10697_v17 = vpop.eup %10696 }
 0x2f5   : > { %4342 = vmatpush2.msra.mxu1 %v10693_v43  ;;  %9588 = vmatprep.mubr.msk.f32.mxu0 %vm2751_vm4, %v20832_v46  ;;  %v15889_v45 = vpop.f32.mrf.mxu1  ;;  %v10699_v62 = vpop.eup %10698 }
 0x2f6   : > { %9612 = vmatprep.mubr.msk.f32.mxu1 %vm2751_vm4, %v20832_v46  ;;  %4134 = vmatprep.subr.mxu0 %v10695_v61  ;;  %v15893_v59 = vpop.f32.mrf.mxu0  ;;  %v10701_v43 = vpop.eup %10700 }
 0x2f7   : > { %4343 = vmatprep.subr.mxu1 %v10697_v17  ;;  %3785 = vmatmul.mubr.f32.gmra.mxu0 %v20833_v49  ;;  %v15896_v56 = vpop.f32.mrf.mxu1  ;;  %v10703_v50 = vpop.eup %10702 }
 0x2f8   : > { %3994 = vmatmul.mubr.f32.gmra.mxu1 %v20833_v49  ;;  %4135 = vmatpush2.msra.mxu0 %v10699_v62  ;;  %v15899_v9 = vpop.f32.mrf.mxu0  ;;  %v10705_v61 = vpop.eup %10704 }
 0x2f9   : > { %4344 = vmatpush2.msra.mxu1 %v10701_v43  ;;  %4136 = vmatprep.subr.mxu0 %v15803_v55  ;;  %v15902_v46 = vpop.f32.mrf.mxu1  ;;  %v10707_v27 = vpop.eup %10706 }
 0x2fa   : > { %4345 = vmatprep.subr.mxu1 %v10703_v50  ;;  %4137 = vmatpush2.msra.mxu0 %v15795_v31  ;;  %v15905_v17 = vpop.f32.mrf.mxu0  ;;  %v10709_v49 = vpop.eup %10708  ;;  %v20835_v50 = vld [vmem:[#allocation98_spill] sm:$0xff] }
 0x2fb   : > { %4346 = vmatpush2.msra.mxu1 %v10705_v61  ;;  %9589 = vmatprep.mubr.msk.f32.mxu0 %vm2751_vm4, %v20834_v30  ;;  %v15909_v62 = vpop.f32.mrf.mxu1  ;;  %v10711_v43 = vpop.eup %10710 }
 0x2fc   : > { %9613 = vmatprep.mubr.msk.f32.mxu1 %vm2751_vm4, %v20834_v30  ;;  %4138 = vmatprep.subr.mxu0 %v10707_v27  ;;  %v15913_v55 = vpop.f32.mrf.mxu0  ;;  %v10713_v21 = vpop.eup %10712 }
 0x2fd   : > { %4347 = vmatprep.subr.mxu1 %v10709_v49  ;;  %3791 = vmatmul.mubr.f32.gmra.mxu0 %v20835_v50  ;;  %v15916_v31 = vpop.f32.mrf.mxu1  ;;  %v10715_v14 = vpop.eup %10714 }
 0x2fe   : > { %4000 = vmatmul.mubr.f32.gmra.mxu1 %v20835_v50  ;;  %4139 = vmatpush2.msra.mxu0 %v10711_v43  ;;  %v15919_v61 = vpop.f32.mrf.mxu0  ;;  %v10717_v27 = vpop.eup %10716 }
 0x2ff   : > { %4348 = vmatpush2.msra.mxu1 %v10713_v21  ;;  %4140 = vmatprep.subr.mxu0 %v15788_v51  ;;  %v15922_v30 = vpop.f32.mrf.mxu1  ;;  %v10719_v63 = vpop.eup %10718  ;;  %v20837_v51 = vld [vmem:[#allocation100_spill] sm:$0xff] }
 0x300   : > { %4349 = vmatprep.subr.mxu1 %v10715_v14  ;;  %4141 = vmatpush2.msra.mxu0 %v15782_v34  ;;  %v15925_v49 = vpop.f32.mrf.mxu0  ;;  %v10721_v50 = vpop.eup %10720  ;;  %v20838_v34 = vld [vmem:[#allocation101_spill] sm:$0xff] }
 0x301   : > { %4350 = vmatpush2.msra.mxu1 %v10717_v27  ;;  %9590 = vmatprep.mubr.msk.f32.mxu0 %vm2751_vm4, %v20836_v57  ;;  %v15929_v43 = vpop.f32.mrf.mxu1 }
 0x302   : > { %9614 = vmatprep.mubr.msk.f32.mxu1 %vm2751_vm4, %v20836_v57  ;;  %3797 = vmatmul.mubr.f32.gmra.mxu0 %v20837_v51  ;;  %v15934_v21 = vpop.f32.mrf.mxu0  ;;  %v15950_v57 = vld [vmem:[%s20298_s3 + $0xd0] sm:$0xff] }
 0x303   : > { %4006 = vmatmul.mubr.f32.gmra.mxu1 %v20837_v51  ;;  %9591 = vmatprep.mubr.msk.f32.mxu0 %vm2751_vm4, %v20838_v34  ;;  %v15939_v14 = vpop.f32.mrf.mxu1  ;;  %20841 = vst [vmem:[#allocation90_spill] sm:$0xff] %v15950_v57 }
 0x304   : > { %9615 = vmatprep.mubr.msk.f32.mxu1 %vm2751_vm4, %v20838_v34  ;;  %5000 = vmatprep.subr.mxu0 %v10719_v63  ;;  %v15943_v27 = vpop.f32.mrf.mxu0  ;;  %v15959_v63 = vld [vmem:[%s20298_s3 + $0xe8] sm:$0xff]  ;;  %v15970_v34 = vld [vmem:[%s20298_s3 + $0xe0] sm:$0xff] }
 0x305   : > { %20839 = vst [vmem:[#allocation92_spill] sm:$0xff] %v15943_v27  ;;  %5209 = vmatprep.subr.mxu1 %v10721_v50  ;;  %v15945_v42 = vpop.f32.mrf.mxu1  ;;  %20843 = vst [vmem:[#allocation84_spill] sm:$0xff] %v15959_v63 }
 0x306   : > { %20840 = vst [vmem:[#allocation88_spill] sm:$0xff] %v15945_v42  ;;  %3803 = vmatmul.mubr.f32.gmra.mxu0 %v15950_v57  ;;  %v15953_v51 = vpop.f32.mrf.mxu0  ;;  %20845 = vst [vmem:[#allocation81_spill] sm:$0xff] %v15970_v34  ;;  %v15979_v42 = vld [vmem:[%s20298_s3 + $0xf8] sm:$0xff] }
 0x307   : > { %20842 = vst [vmem:[#allocation87_spill] sm:$0xff] %v15953_v51  ;;  %4012 = vmatmul.mubr.f32.gmra.mxu1 %v15950_v57  ;;  %9592 = vmatprep.mubr.msk.f32.mxu0 %vm2751_vm4, %v15959_v63  ;;  %v15963_v50 = vpop.f32.mrf.mxu1  ;;  %20847 = vst [vmem:[#allocation76_spill] sm:$0xff] %v15979_v42  ;;  %v15996_v57 = vld [vmem:[%s20298_s3 + $0xf0] sm:$0xff] }
 0x308   : > { %20844 = vst [vmem:[#allocation80_spill] sm:$0xff] %v15963_v50  ;;  %9616 = vmatprep.mubr.msk.f32.mxu1 %vm2751_vm4, %v15959_v63  ;;  %v20850_v63 = vld [vmem:[#allocation102_spill] sm:$0xff]  ;;  %20853 = vst [vmem:[#allocation53_spill] sm:$0xff] %v15996_v57 }
 0x309   : > { %10722 = vtanh.f32 %v20850_v63  ;;  %v20856_v63 = vld [vmem:[#allocation28_spill] sm:$0xff] }
 0x30a   : > { %3809 = vmatmul.mubr.f32.gmra.mxu0 %v15970_v34  ;;  %v15973_v51 = vpop.f32.mrf.mxu0 }
 0x30b   : > { %20846 = vst [vmem:[#allocation64_spill] sm:$0xff] %v15973_v51  ;;  %4018 = vmatmul.mubr.f32.gmra.mxu1 %v15970_v34  ;;  %9593 = vmatprep.mubr.msk.f32.mxu0 %vm2751_vm4, %v15979_v42  ;;  %v15983_v50 = vpop.f32.mrf.mxu1  ;;  %v20852_v34 = vld [vmem:[#allocation103_spill] sm:$0xff] }
 0x30c   : > { %20848 = vst [vmem:[#allocation78_spill] sm:$0xff] %v15983_v50  ;;  %9617 = vmatprep.mubr.msk.f32.mxu1 %vm2751_vm4, %v15979_v42  ;;  %v15987_v27 = vpop.f32.mrf.mxu0  ;;  %10724 = vtanh.f32 %v20852_v34  ;;  %v20860_v50 = vld [vmem:[#allocation33_spill] sm:$0xff] }
 0x30d   : > { %20849 = vst [vmem:[#allocation74_spill] sm:$0xff] %v15987_v27  ;;  %v15990_v51 = vpop.f32.mrf.mxu1  ;;  %10726 = vtanh.f32 %v20854_v38  ;;  %v16004_v27 = vld [vmem:[%s20298_s3 + $0x108] sm:$0xff] }
 0x30e   : > { %20851 = vst [vmem:[#allocation71_spill] sm:$0xff] %v15990_v51  ;;  %3815 = vmatmul.mubr.f32.gmra.mxu0 %v15996_v57  ;;  %20855 = vst [vmem:[#allocation58_spill] sm:$0xff] %v16004_v27  ;;  %10728 = vtanh.f32 %v20856_v63  ;;  %v20858_v51 = vld [vmem:[#allocation37_spill] sm:$0xff]  ;;  %v20863_v63 = vld [vmem:[#allocation104_spill] sm:$0xff] }
 0x30f   : > { %4024 = vmatmul.mubr.f32.gmra.mxu1 %v15996_v57  ;;  %9594 = vmatprep.mubr.msk.f32.mxu0 %vm2751_vm4, %v16004_v27  ;;  %10730 = vtanh.f32 %v20858_v51  ;;  %v16020_v57 = vld [vmem:[%s20298_s3 + $0x100] sm:$0xff]  ;;  %v16030_v51 = vld [vmem:[%s20298_s3 + $0x118] sm:$0xff] }
 0x310   : > { %9618 = vmatprep.mubr.msk.f32.mxu1 %vm2751_vm4, %v16004_v27  ;;  %v16011_v34 = vpop.f32.mrf.mxu0  ;;  %10732 = vtanh.f32 %v20860_v50  ;;  %20861 = vst [vmem:[#allocation65_spill] sm:$0xff] %v16020_v57  ;;  %20864 = vst [vmem:[#allocation63_spill] sm:$0xff] %v16030_v51  ;;  %v20871_v27 = vld [vmem:[#allocation26_spill] sm:$0xff] }
 0x311   : > { %20857 = vst [vmem:[#allocation49_spill] sm:$0xff] %v16011_v34  ;;  %v16014_v38 = vpop.f32.mrf.mxu1  ;;  %10734 = vtanh.f32 %v20863_v63  ;;  %v20868_v63 = vld [vmem:[#allocation39_spill] sm:$0xff]  ;;  %v16044_v34 = vld [vmem:[%s20298_s3 + $0x110] sm:$0xff] }
 0x312   : > { %20859 = vst [vmem:[#allocation51_spill] sm:$0xff] %v16014_v38  ;;  %3821 = vmatmul.mubr.f32.gmra.mxu0 %v16020_v57  ;;  %v16023_v42 = vpop.f32.mrf.mxu0  ;;  %v20866_v38 = vld [vmem:[#allocation35_spill] sm:$0xff]  ;;  %20869 = vst [vmem:[#allocation97_spill] sm:$0xff] %v16044_v34 }
 0x313   : > { %20862 = vst [vmem:[#allocation62_spill] sm:$0xff] %v16023_v42  ;;  %4030 = vmatmul.mubr.f32.gmra.mxu1 %v16020_v57  ;;  %9595 = vmatprep.mubr.msk.f32.mxu0 %vm2751_vm4, %v16030_v51  ;;  %v16034_v50 = vpop.f32.mrf.mxu1  ;;  %10736 = vtanh.f32 %v20866_v38  ;;  %v20867_v42 = vld [vmem:[#allocation38_spill] sm:$0xff]  ;;  %v16054_v38 = vld [vmem:[%s20298_s3 + $0x128] sm:$0xff] }
 0x314   : > { %20865 = vst [vmem:[#allocation61_spill] sm:$0xff] %v16034_v50  ;;  %9619 = vmatprep.mubr.msk.f32.mxu1 %vm2751_vm4, %v16030_v51  ;;  %10738 = vtanh.f32 %v20867_v42  ;;  %20872 = vst [vmem:[#allocation94_spill] sm:$0xff] %v16054_v38  ;;  %v20878_v51 = vld [vmem:[#allocation40_spill] sm:$0xff] }
 0x315   : > { %10740 = vtanh.f32 %v20868_v63  ;;  %v20874_v63 = vld [vmem:[#allocation66_spill] sm:$0xff] }
 0x316   : > { %3827 = vmatmul.mubr.f32.gmra.mxu0 %v16044_v34  ;;  %v16047_v57 = vpop.f32.mrf.mxu0  ;;  %10742 = vtanh.f32 %v20871_v27  ;;  %v20876_v27 = vld [vmem:[#allocation22_spill] sm:$0xff] }
 0x317   : > { %20870 = vst [vmem:[#allocation59_spill] sm:$0xff] %v16047_v57  ;;  %4036 = vmatmul.mubr.f32.gmra.mxu1 %v16044_v34  ;;  %9596 = vmatprep.mubr.msk.f32.mxu0 %vm2751_vm4, %v16054_v38  ;;  %v16058_v42 = vpop.f32.mrf.mxu1  ;;  %10744 = vtanh.f32 %v20874_v63  ;;  %v16068_v34 = vpop.eup %10722 }
 0x318   : > { %20873 = vst [vmem:[#allocation95_spill] sm:$0xff] %v16058_v42  ;;  %9620 = vmatprep.mubr.msk.f32.mxu1 %vm2751_vm4, %v16054_v38  ;;  %v16063_v57 = vpop.f32.mrf.mxu0  ;;  %10746 = vtanh.f32 %v20876_v27  ;;  %v16084_v27 = vld [vmem:[%s20298_s3 + $0x138] sm:$0xff]  ;;  %v16106_v38 = vld [vmem:[%s20298_s3 + $0x130] sm:$0xff] }
 0x319   : > { %20875 = vst [vmem:[#allocation56_spill] sm:$0xff] %v16063_v57  ;;  %v16066_v50 = vpop.f32.mrf.mxu1  ;;  %10748 = vtanh.f32 %v20878_v51  ;;  %v16077_v63 = vpop.eup %10724  ;;  %20881 = vst [vmem:[#allocation20_spill] sm:$0xff] %v16084_v27  ;;  %v20882_v42 = vld [vmem:[#allocation50_spill] sm:$0xff] }
 0x31a   : > { %20877 = vst [vmem:[#allocation93_spill] sm:$0xff] %v16066_v50  ;;  %3833 = vmatmul.mubr.f32.gmra.mxu0 %v16074_v16  ;;  %20880 = vst [vmem:[#allocation45_spill] sm:$0xff] %v16077_v63  ;;  %10750 = vtanh.f32 %v15593_v12  ;;  %v16088_v51 = vpop.eup %10726  ;;  %v12375_v63 = vld [vmem:[%s20298_s3] sm:$0xff] }
 0x31b   : > { %4042 = vmatmul.mubr.f32.gmra.mxu1 %v16074_v16  ;;  %9597 = vmatprep.mubr.msk.f32.mxu0 %vm2751_vm4, %v16084_v27  ;;  %10752 = vtanh.f32 %v20882_v42  ;;  %v16095_v12 = vpop.eup %10728  ;;  %20885 = vst [vmem:[#allocation44_spill] sm:$0xff] %v16106_v38 }
 0x31c   : > { %9621 = vmatprep.mubr.msk.f32.mxu1 %vm2751_vm4, %v16084_v27  ;;  %v16093_v50 = vpop.f32.mrf.mxu0  ;;  %10754 = vtanh.f32 %v15645_v58  ;;  %v16100_v16 = vpop.eup %10730  ;;  %v16118_v58 = vld [vmem:[%s20298_s3 + $0x148] sm:$0xff] }
 0x31d   : > { %20883 = vst [vmem:[#allocation67_spill] sm:$0xff] %v16093_v50  ;;  %v16098_v57 = vpop.f32.mrf.mxu1  ;;  %10756 = vtanh.f32 %v15653_v20  ;;  %v16111_v27 = vpop.eup %10732  ;;  %20887 = vst [vmem:[#allocation36_spill] sm:$0xff] %v16118_v58 }
 0x31e   : > { %20884 = vst [vmem:[#allocation32_spill] sm:$0xff] %v16098_v57  ;;  %3839 = vmatmul.mubr.f32.gmra.mxu0 %v16106_v38  ;;  %v16109_v42 = vpop.f32.mrf.mxu0  ;;  %10758 = vtanh.f32 %v15686_v24  ;;  %v16124_v57 = vpop.eup %10734 }
 0x31f   : > { %20886 = vst [vmem:[#allocation21_spill] sm:$0xff] %v16109_v42  ;;  %4048 = vmatmul.mubr.f32.gmra.mxu1 %v16106_v38  ;;  %9598 = vmatprep.mubr.msk.f32.mxu0 %vm2751_vm4, %v16118_v58  ;;  %v16122_v20 = vpop.f32.mrf.mxu1  ;;  %10760 = vtanh.f32 %v15695_v3  ;;  %v16138_v42 = vld [vmem:[%s20298_s3 + $0x140] sm:$0xff] }
 0x320   : > { %20888 = vst [vmem:[#allocation42_spill] sm:$0xff] %v16122_v20  ;;  %9622 = vmatprep.mubr.msk.f32.mxu1 %vm2751_vm4, %v16118_v58  ;;  %v16129_v24 = vpop.eup %10736  ;;  %10762 = vtanh.f32 %v15728_v0  ;;  %20889 = vst [vmem:[#allocation24_spill] sm:$0xff] %v16138_v42  ;;  %v16150_v0 = vld [vmem:[%s20298_s3 + $0x158] sm:$0xff] }
 0x321   : > { %v16132_v38 = vpop.eup %10738  ;;  %10764 = vtanh.f32 %v15736_v5  ;;  %20891 = vst [vmem:[#allocation16_spill] sm:$0xff] %v16150_v0 }
 0x322   : > { %3845 = vmatmul.mubr.f32.gmra.mxu0 %v16138_v42  ;;  %v16141_v20 = vpop.f32.mrf.mxu0  ;;  %v16143_v3 = vpop.eup %10740  ;;  %10766 = vtanh.f32 %v15762_v60 }
 0x323   : > { %20890 = vst [vmem:[#allocation23_spill] sm:$0xff] %v16141_v20  ;;  %4054 = vmatmul.mubr.f32.gmra.mxu1 %v16138_v42  ;;  %9599 = vmatprep.mubr.msk.f32.mxu0 %vm2751_vm4, %v16150_v0  ;;  %v16154_v5 = vpop.f32.mrf.mxu1  ;;  %v16156_v58 = vpop.eup %10742  ;;  %10768 = vtanh.f32 %v15772_v2 }
 0x324   : > { %20892 = vst [vmem:[#allocation41_spill] sm:$0xff] %v16154_v5  ;;  %9623 = vmatprep.mubr.msk.f32.mxu1 %vm2751_vm4, %v16150_v0  ;;  %v16161_v60 = vpop.f32.mrf.mxu0  ;;  %v16163_v20 = vpop.eup %10744  ;;  %10770 = vtanh.f32 %v15780_v48  ;;  %v16174_v5 = vld [vmem:[%s20298_s3 + $0x150] sm:$0xff]  ;;  %v16184_v48 = vld [vmem:[%s20298_s3 + $0x168] sm:$0xff]  ;;  %v16206_v0 = vld [vmem:[%s20298_s3 + $0x160] sm:$0xff] }
 0x325   : > { %20893 = vst [vmem:[#allocation55_spill] sm:$0xff] %v16161_v60  ;;  %v16166_v42 = vpop.f32.mrf.mxu1  ;;  %v16168_v50 = vpop.eup %10746  ;;  %10772 = vtanh.f32 %v15786_v18  ;;  %20895 = vst [vmem:[#allocation43_spill] sm:$0xff] %v16174_v5 }
 0x326   : > { %20894 = vst [vmem:[#allocation34_spill] sm:$0xff] %v16166_v42  ;;  %3851 = vmatmul.mubr.f32.gmra.mxu0 %v16174_v5  ;;  %v16177_v2 = vpop.eup %10748  ;;  %10774 = vtanh.f32 %v15776_v52  ;;  %20896 = vst [vmem:[#allocation54_spill] sm:$0xff] %v16184_v48 }
 0x327   : > { %4060 = vmatmul.mubr.f32.gmra.mxu1 %v16174_v5  ;;  %9600 = vmatprep.mubr.msk.f32.mxu0 %vm2751_vm4, %v16184_v48  ;;  %v16188_v18 = vpop.eup %10750  ;;  %10776 = vtanh.f32 %v15767_v25  ;;  %20899 = vst [vmem:[#allocation17_spill] sm:$0xff] %v16206_v0 }
 0x328   : > { %9624 = vmatprep.mubr.msk.f32.mxu1 %vm2751_vm4, %v16184_v48  ;;  %v16193_v42 = vpop.f32.mrf.mxu0  ;;  %v16195_v52 = vpop.eup %10752  ;;  %10778 = vtanh.f32 %v15754_v41  ;;  %v16218_v41 = vld [vmem:[%s20298_s3 + $0x178] sm:$0xff] }
 0x329   : > { %20897 = vst [vmem:[#allocation57_spill] sm:$0xff] %v16193_v42  ;;  %v16198_v60 = vpop.f32.mrf.mxu1  ;;  %v16200_v5 = vpop.eup %10754  ;;  %10780 = vtanh.f32 %v15758_v23  ;;  %20901 = vst [vmem:[#allocation98_spill] sm:$0xff] %v16218_v41 }
 0x32a   : > { %20898 = vst [vmem:[#allocation19_spill] sm:$0xff] %v16198_v60  ;;  %3857 = vmatmul.mubr.f32.gmra.mxu0 %v16206_v0  ;;  %v16209_v25 = vpop.f32.mrf.mxu0  ;;  %v16211_v48 = vpop.eup %10756  ;;  %10782 = vtanh.f32 %v15746_v33 }
 0x32b   : > { %20900 = vst [vmem:[#allocation96_spill] sm:$0xff] %v16209_v25  ;;  %4066 = vmatmul.mubr.f32.gmra.mxu1 %v16206_v0  ;;  %9601 = vmatprep.mubr.msk.f32.mxu0 %vm2751_vm4, %v16218_v41  ;;  %v16222_v23 = vpop.f32.mrf.mxu1  ;;  %v16224_v60 = vpop.eup %10758  ;;  %10784 = vtanh.f32 %v15750_v26  ;;  %v16238_v25 = vld [vmem:[%s20298_s3 + $0x170] sm:$0xff] }
 0x32c   : > { %20902 = vst [vmem:[#allocation99_spill] sm:$0xff] %v16222_v23  ;;  %9625 = vmatprep.mubr.msk.f32.mxu1 %vm2751_vm4, %v16218_v41  ;;  %v16229_v33 = vpop.eup %10760  ;;  %10786 = vtanh.f32 %v15741_v29  ;;  %20903 = vst [vmem:[#allocation100_spill] sm:$0xff] %v16238_v25  ;;  %v12374_v29 = vld [vmem:[%s20298_s3 + $0x8] sm:$0xff] }
 0x32d   : > { %v16232_v0 = vpop.eup %10762  ;;  %10788 = vtanh.f32 %v15732_v53 }
 0x32e   : > { %3863 = vmatmul.mubr.f32.gmra.mxu0 %v16238_v25  ;;  %v16241_v23 = vpop.f32.mrf.mxu0  ;;  %v10765_v26 = vpop.eup %10764  ;;  %10790 = vtanh.f32 %v15717_v37 }
 0x32f   : > { %20904 = vst [vmem:[#allocation101_spill] sm:$0xff] %v16241_v23  ;;  %4072 = vmatmul.mubr.f32.gmra.mxu1 %v16238_v25  ;;  %9626 = vmatprep.mubr.msk.f32.mxu0 %vm2751_vm4, %v12374_v29  ;;  %v16249_v53 = vpop.f32.mrf.mxu1  ;;  %v10767_v41 = vpop.eup %10766  ;;  %10792 = vtanh.f32 %v15722_v40 }
 0x330   : > { %20905 = vst [vmem:[#allocation102_spill] sm:$0xff] %v16249_v53  ;;  %9650 = vmatprep.mubr.msk.f32.mxu1 %vm2751_vm4, %v12374_v29  ;;  %v16253_v42 = vpop.f32.mrf.mxu0  ;;  %v10769_v23 = vpop.eup %10768  ;;  %10794 = vtanh.f32 %v15708_v6 }
 0x331   : > { %v16256_v37 = vpop.f32.mrf.mxu1  ;;  %v10771_v25 = vpop.eup %10770  ;;  %10796 = vtanh.f32 %v15712_v39 }
 0x332   : > { %20906 = vst [vmem:[#allocation103_spill] sm:$0xff] %v16256_v37  ;;  %4143 = vmatmul.mubr.f32.vlgmr.msra.gmra.mxu0 %v12375_v63  ;;  %v10773_v53 = vpop.eup %10772  ;;  %10798 = vtanh.f32 %v15700_v15  ;;  %v12376_v15 = vld [vmem:[%s20298_s3 + $0x18] sm:$0xff] }
 0x333   : > { %4352 = vmatmul.mubr.f32.vlgmr.msra.gmra.mxu1 %v12375_v63  ;;  %5001 = vmatpush1.msra.mxu0 %v10771_v25  ;;  %v10775_v40 = vpop.eup %10774  ;;  %10800 = vtanh.f32 %v15690_v4 }
 0x334   : > { %5210 = vmatpush1.msra.mxu1 %v10773_v53  ;;  %5002 = vmatprep.subr.mxu0 %v10769_v23  ;;  %v16264_v6 = vpop.f32.mrf.mxu0  ;;  %v10777_v29 = vpop.eup %10776  ;;  %10802 = vtanh.f32 %v15673_v32 }
 0x335   : > { %5211 = vmatprep.subr.mxu1 %v10775_v40  ;;  %5003 = vmatpush1.msra.mxu0 %v10767_v41  ;;  %v16267_v39 = vpop.f32.mrf.mxu1  ;;  %v10779_v37 = vpop.eup %10778  ;;  %10804 = vtanh.f32 %v15678_v7  ;;  %v12377_v7 = vld [vmem:[%s20298_s3 + $0x10] sm:$0xff]  ;;  %v20907_v40 = vld [vmem:[#allocation52_spill] sm:$0xff] }
 0x336   : > { %5212 = vmatpush1.msra.mxu1 %v10777_v29  ;;  %9627 = vmatprep.mubr.msk.f32.mxu0 %vm2751_vm4, %v12376_v15  ;;  %v16274_v4 = vpop.f32.mrf.mxu0  ;;  %v10781_v63 = vpop.eup %10780  ;;  %10806 = vtanh.f32 %v15665_v10  ;;  %v20908_v29 = vld [vmem:[#allocation85_spill] sm:$0xff] }
 0x337   : > { %9651 = vmatprep.mubr.msk.f32.mxu1 %vm2751_vm4, %v12376_v15  ;;  %5004 = vmatprep.subr.mxu0 %v10779_v37  ;;  %v16278_v32 = vpop.f32.mrf.mxu1  ;;  %v10783_v25 = vpop.eup %10782  ;;  %10808 = vtanh.f32 %v15668_v36 }
 0x338   : > { %5213 = vmatprep.subr.mxu1 %v10781_v63  ;;  %4149 = vmatmul.mubr.f32.gmra.mxu0 %v12377_v7  ;;  %v10785_v41 = vpop.eup %10784  ;;  %10810 = vtanh.f32 %v15658_v11  ;;  %v20909_v63 = vld [vmem:[#allocation83_spill] sm:$0xff] }
 0x339   : > { %4358 = vmatmul.mubr.f32.gmra.mxu1 %v12377_v7  ;;  %5005 = vmatpush1.msra.mxu0 %v10783_v25  ;;  %v10787_v10 = vpop.eup %10786  ;;  %10812 = vtanh.f32 %v15648_v13  ;;  %v12378_v13 = vld [vmem:[%s20298_s3 + $0x28] sm:$0xff] }
 0x33a   : > { %5214 = vmatpush1.msra.mxu1 %v10785_v41  ;;  %5006 = vmatprep.subr.mxu0 %v10765_v26  ;;  %v16286_v23 = vpop.f32.mrf.mxu0  ;;  %v10789_v53 = vpop.eup %10788  ;;  %10814 = vtanh.f32 %v15635_v22  ;;  %v20910_v7 = vld [vmem:[#allocation72_spill] sm:$0xff] }
 0x33b   : > { %5215 = vmatprep.subr.mxu1 %v10787_v10  ;;  %5007 = vmatpush1.msra.mxu0 %v16232_v0  ;;  %v16290_v36 = vpop.f32.mrf.mxu1  ;;  %v10791_v37 = vpop.eup %10790  ;;  %10816 = vtanh.f32 %v15638_v44  ;;  %v12379_v44 = vld [vmem:[%s20298_s3 + $0x20] sm:$0xff] }
 0x33c   : > { %5216 = vmatpush1.msra.mxu1 %v10789_v53  ;;  %9628 = vmatprep.mubr.msk.f32.mxu0 %vm2751_vm4, %v12378_v13  ;;  %v16297_v11 = vpop.f32.mrf.mxu0  ;;  %v10793_v26 = vpop.eup %10792  ;;  %10818 = vtanh.f32 %v20907_v40  ;;  %v20911_v53 = vld [vmem:[#allocation68_spill] sm:$0xff]  ;;  %v12380_v40 = vld [vmem:[%s20298_s3 + $0x38] sm:$0xff] }
 0x33d   : > { %9652 = vmatprep.mubr.msk.f32.mxu1 %vm2751_vm4, %v12378_v13  ;;  %5008 = vmatprep.subr.mxu0 %v10791_v37  ;;  %v16301_v22 = vpop.f32.mrf.mxu1  ;;  %v10795_v0 = vpop.eup %10794  ;;  %10820 = vtanh.f32 %v20908_v29  ;;  %v20913_v29 = vld [vmem:[#allocation48_spill] sm:$0xff] }
 0x33e   : > { %5217 = vmatprep.subr.mxu1 %v10793_v26  ;;  %4155 = vmatmul.mubr.f32.gmra.mxu0 %v12379_v44  ;;  %v10797_v15 = vpop.eup %10796  ;;  %10822 = vtanh.f32 %v20909_v63  ;;  %v20912_v26 = vld [vmem:[#allocation70_spill] sm:$0xff]  ;;  %v12381_v63 = vld [vmem:[%s20298_s3 + $0x30] sm:$0xff] }
 0x33f   : > { %4364 = vmatmul.mubr.f32.gmra.mxu1 %v12379_v44  ;;  %5009 = vmatpush1.msra.mxu0 %v10795_v0  ;;  %v10799_v25 = vpop.eup %10798  ;;  %10824 = vtanh.f32 %v20910_v7  ;;  %v20915_v7 = vld [vmem:[#allocation46_spill] sm:$0xff] }
 0x340   : > { %5218 = vmatpush1.msra.mxu1 %v10797_v15  ;;  %5010 = vmatprep.subr.mxu0 %v16229_v33  ;;  %v16310_v41 = vpop.f32.mrf.mxu0  ;;  %v10801_v10 = vpop.eup %10800  ;;  %10826 = vtanh.f32 %v20911_v53  ;;  %v20914_v15 = vld [vmem:[#allocation47_spill] sm:$0xff]  ;;  %v20916_v53 = vld [vmem:[#allocation29_spill] sm:$0xff] }
 0x341   : > { %5219 = vmatprep.subr.mxu1 %v10799_v25  ;;  %5011 = vmatpush1.msra.mxu0 %v16224_v60  ;;  %v16314_v37 = vpop.f32.mrf.mxu1  ;;  %v10803_v13 = vpop.eup %10802  ;;  %10828 = vtanh.f32 %v20912_v26 }
 0x342   : > { %5220 = vmatpush1.msra.mxu1 %v10801_v10  ;;  %9629 = vmatprep.mubr.msk.f32.mxu0 %vm2751_vm4, %v12380_v40  ;;  %v16321_v33 = vpop.f32.mrf.mxu0  ;;  %v10805_v0 = vpop.eup %10804  ;;  %10830 = vtanh.f32 %v20913_v29 }
 0x343   : > { %9653 = vmatprep.mubr.msk.f32.mxu1 %vm2751_vm4, %v12380_v40  ;;  %5012 = vmatprep.subr.mxu0 %v10803_v13  ;;  %v16325_v60 = vpop.f32.mrf.mxu1  ;;  %v10807_v44 = vpop.eup %10806  ;;  %10832 = vtanh.f32 %v20914_v15  ;;  %v20917_v40 = vld [vmem:[#allocation15_spill] sm:$0xff]  ;;  %v20918_v15 = vld [vmem:[#allocation25_spill] sm:$0xff] }
 0x344   : > { %5221 = vmatprep.subr.mxu1 %v10805_v0  ;;  %4161 = vmatmul.mubr.f32.gmra.mxu0 %v12381_v63  ;;  %v10809_v25 = vpop.eup %10808  ;;  %10834 = vtanh.f32 %v20915_v7 }
 0x345   : > { %4370 = vmatmul.mubr.f32.gmra.mxu1 %v12381_v63  ;;  %5013 = vmatpush1.msra.mxu0 %v10807_v44  ;;  %v10811_v10 = vpop.eup %10810  ;;  %10836 = vtanh.f32 %v20916_v53  ;;  %v12382_v44 = vld [vmem:[%s20298_s3 + $0x48] sm:$0xff]  ;;  %v12383_v53 = vld [vmem:[%s20298_s3 + $0x40] sm:$0xff] }
 0x346   : > { %5222 = vmatpush1.msra.mxu1 %v10809_v25  ;;  %5014 = vmatprep.subr.mxu0 %v16211_v48  ;;  %v16334_v13 = vpop.f32.mrf.mxu0  ;;  %v10813_v26 = vpop.eup %10812  ;;  %10838 = vtanh.f32 %v20917_v40  ;;  %v20919_v25 = vld [vmem:[#allocation31_spill] sm:$0xff] }
 0x347   : > { %5223 = vmatprep.subr.mxu1 %v10811_v10  ;;  %5015 = vmatpush1.msra.mxu0 %v16200_v5  ;;  %v16338_v0 = vpop.f32.mrf.mxu1  ;;  %v10815_v29 = vpop.eup %10814  ;;  %10840 = vtanh.f32 %v20918_v15  ;;  %v20920_v10 = vld [vmem:[#allocation30_spill] sm:$0xff] }
 0x348   : > { %5224 = vmatpush1.msra.mxu1 %v10813_v26  ;;  %9630 = vmatprep.mubr.msk.f32.mxu0 %vm2751_vm4, %v12382_v44  ;;  %v16345_v48 = vpop.f32.mrf.mxu0  ;;  %v10817_v63 = vpop.eup %10816  ;;  %10842 = vtanh.f32 %v20919_v25 }
 0x349   : > { %9654 = vmatprep.mubr.msk.f32.mxu1 %vm2751_vm4, %v12382_v44  ;;  %5016 = vmatprep.subr.mxu0 %v10815_v29  ;;  %v16349_v5 = vpop.f32.mrf.mxu1  ;;  %v10819_v7 = vpop.eup %10818  ;;  %10844 = vtanh.f32 %v20920_v10 }
 0x34a   : > { %5225 = vmatprep.subr.mxu1 %v10817_v63  ;;  %4167 = vmatmul.mubr.f32.gmra.mxu0 %v12383_v53  ;;  %v10821_v26 = vpop.eup %10820  ;;  %10846 = vtanh.f32 %v15809_v47 }
 0x34b   : > { %4376 = vmatmul.mubr.f32.gmra.mxu1 %v12383_v53  ;;  %5017 = vmatpush1.msra.mxu0 %v10819_v7  ;;  %v16356_v40 = vpop.f32.mrf.mxu0  ;;  %v10823_v15 = vpop.eup %10822  ;;  %10848 = vtanh.f32 %v15823_v35  ;;  %v12384_v35 = vld [vmem:[%s20298_s3 + $0x58] sm:$0xff] }
 0x34c   : > { %5226 = vmatpush1.msra.mxu1 %v10821_v26  ;;  %5018 = vmatprep.subr.mxu0 %v16195_v52  ;;  %v16360_v29 = vpop.f32.mrf.mxu1  ;;  %v10825_v44 = vpop.eup %10824  ;;  %10850 = vtanh.f32 %v15852_v1 }
 0x34d   : > { %5227 = vmatprep.subr.mxu1 %v10823_v15  ;;  %5019 = vmatpush1.msra.mxu0 %v16188_v18  ;;  %v16364_v63 = vpop.f32.mrf.mxu0  ;;  %v10827_v47 = vpop.eup %10826  ;;  %10852 = vtanh.f32 %v15858_v28  ;;  %v12385_v28 = vld [vmem:[%s20298_s3 + $0x50] sm:$0xff] }
 0x34e   : > { %5228 = vmatpush1.msra.mxu1 %v10825_v44  ;;  %9631 = vmatprep.mubr.msk.f32.mxu0 %vm2751_vm4, %v12384_v35  ;;  %v16371_v52 = vpop.f32.mrf.mxu1  ;;  %v10829_v25 = vpop.eup %10828  ;;  %10854 = vtanh.f32 %v15884_v19 }
 0x34f   : > { %9655 = vmatprep.mubr.msk.f32.mxu1 %vm2751_vm4, %v12384_v35  ;;  %5020 = vmatprep.subr.mxu0 %v10827_v47  ;;  %v16375_v1 = vpop.f32.mrf.mxu0  ;;  %v10831_v18 = vpop.eup %10830  ;;  %10856 = vtanh.f32 %v15893_v59 }
 0x350   : > { %5229 = vmatprep.subr.mxu1 %v10829_v25  ;;  %4173 = vmatmul.mubr.f32.gmra.mxu0 %v12385_v28  ;;  %v16381_v7 = vpop.f32.mrf.mxu1  ;;  %v10833_v10 = vpop.eup %10832  ;;  %10858 = vtanh.f32 %v15913_v55 }
 0x351   : > { %4382 = vmatmul.mubr.f32.gmra.mxu1 %v12385_v28  ;;  %5021 = vmatpush1.msra.mxu0 %v10831_v18  ;;  %v16384_v19 = vpop.f32.mrf.mxu0  ;;  %v10835_v53 = vpop.eup %10834  ;;  %10860 = vtanh.f32 %v15919_v61  ;;  %v12386_v61 = vld [vmem:[%s20298_s3 + $0x68] sm:$0xff] }
 0x352   : > { %5230 = vmatpush1.msra.mxu1 %v10833_v10  ;;  %5022 = vmatprep.subr.mxu0 %v16177_v2  ;;  %v16388_v59 = vpop.f32.mrf.mxu1  ;;  %v10837_v26 = vpop.eup %10836  ;;  %10862 = vtanh.f32 %v15934_v21 }
 0x353   : > { %5231 = vmatprep.subr.mxu1 %v10835_v53  ;;  %5023 = vmatpush1.msra.mxu0 %v16168_v50  ;;  %v16392_v15 = vpop.f32.mrf.mxu0  ;;  %v10839_v55 = vpop.eup %10838  ;;  %10864 = vtanh.f32 %v15939_v14  ;;  %v12387_v14 = vld [vmem:[%s20298_s3 + $0x60] sm:$0xff]  ;;  %v20924_v53 = vld [vmem:[#allocation45_spill] sm:$0xff] }
 0x354   : > { %5232 = vmatpush1.msra.mxu1 %v10837_v26  ;;  %9632 = vmatprep.mubr.msk.f32.mxu0 %vm2751_vm4, %v12386_v61  ;;  %v16399_v2 = vpop.f32.mrf.mxu1  ;;  %v10841_v44 = vpop.eup %10840  ;;  %10866 = vtanh.f32 %v15925_v49  ;;  %v12391_v26 = vld [vmem:[%s20298_s3 + $0x80] sm:$0xff] }
 0x355   : > { %9656 = vmatprep.mubr.msk.f32.mxu1 %vm2751_vm4, %v12386_v61  ;;  %5024 = vmatprep.subr.mxu0 %v10839_v55  ;;  %v16403_v21 = vpop.f32.mrf.mxu0  ;;  %v10843_v50 = vpop.eup %10842  ;;  %10868 = vtanh.f32 %v15929_v43 }
 0x356   : > { %5233 = vmatprep.subr.mxu1 %v10841_v44  ;;  %4179 = vmatmul.mubr.f32.gmra.mxu0 %v12387_v14  ;;  %v16409_v47 = vpop.f32.mrf.mxu1  ;;  %v10845_v35 = vpop.eup %10844  ;;  %10870 = vtanh.f32 %v15922_v30  ;;  %v20930_v44 = vld [vmem:[#allocation86_spill] sm:$0xff] }
 0x357   : > { %4388 = vmatmul.mubr.f32.gmra.mxu1 %v12387_v14  ;;  %5025 = vmatpush1.msra.mxu0 %v10843_v50  ;;  %v16412_v49 = vpop.f32.mrf.mxu0  ;;  %v16414_v25 = vpop.eup %10846  ;;  %10872 = vtanh.f32 %v15916_v31  ;;  %v12388_v31 = vld [vmem:[%s20298_s3 + $0x78] sm:$0xff] }
 0x358   : > { %5234 = vmatpush1.msra.mxu1 %v10845_v35  ;;  %5026 = vmatprep.subr.mxu0 %v16156_v58  ;;  %v16418_v43 = vpop.f32.mrf.mxu1  ;;  %v16420_v18 = vpop.eup %10848  ;;  %10874 = vtanh.f32 %v15905_v17  ;;  %v20931_v35 = vld [vmem:[#allocation82_spill] sm:$0xff] }
 0x359   : > { %5235 = vmatprep.subr.mxu1 %v16163_v20  ;;  %5027 = vmatpush1.msra.mxu0 %v16132_v38  ;;  %v16425_v30 = vpop.f32.mrf.mxu0  ;;  %v16427_v28 = vpop.eup %10850  ;;  %10876 = vtanh.f32 %v15909_v62  ;;  %v12389_v20 = vld [vmem:[%s20298_s3 + $0x70] sm:$0xff] }
 0x35a   : > { %5236 = vmatpush1.msra.mxu1 %v16143_v3  ;;  %9633 = vmatprep.mubr.msk.f32.mxu0 %vm2751_vm4, %v12388_v31  ;;  %v16435_v58 = vpop.f32.mrf.mxu1  ;;  %v16437_v17 = vpop.eup %10852  ;;  %10878 = vtanh.f32 %v15899_v9 }
 0x35b   : > { %9657 = vmatprep.mubr.msk.f32.mxu1 %vm2751_vm4, %v12388_v31  ;;  %5028 = vmatprep.subr.mxu0 %v16124_v57  ;;  %v16442_v38 = vpop.f32.mrf.mxu0  ;;  %v16444_v62 = vpop.eup %10854  ;;  %10880 = vtanh.f32 %v15902_v46 }
 0x35c   : > { %5237 = vmatprep.subr.mxu1 %v16129_v24  ;;  %4185 = vmatmul.mubr.f32.gmra.mxu0 %v12389_v20  ;;  %v16451_v3 = vpop.f32.mrf.mxu1  ;;  %v16453_v9 = vpop.eup %10856  ;;  %10882 = vtanh.f32 %v15896_v56 }
 0x35d   : > { %20921 = vst [vmem:[#allocation27_spill] sm:$0xff] %v16451_v3  ;;  %4394 = vmatmul.mubr.f32.gmra.mxu1 %v12389_v20  ;;  %5029 = vmatpush1.msra.mxu0 %v16100_v16  ;;  %v16457_v57 = vpop.f32.mrf.mxu0  ;;  %v10859_v10 = vpop.eup %10858  ;;  %10884 = vtanh.f32 %v15889_v45  ;;  %v12390_v45 = vld [vmem:[%s20298_s3 + $0x88] sm:$0xff] }
 0x35e   : > { %5238 = vmatpush1.msra.mxu1 %v16111_v27  ;;  %5030 = vmatprep.subr.mxu0 %v16088_v51  ;;  %v16462_v46 = vpop.f32.mrf.mxu1  ;;  %v10861_v24 = vpop.eup %10860  ;;  %10886 = vtanh.f32 %v15876_v54  ;;  %v20926_v51 = vld [vmem:[#allocation89_spill] sm:$0xff] }
 0x35f   : > { %20922 = vst [vmem:[#allocation28_spill] sm:$0xff] %v16462_v46  ;;  %5239 = vmatprep.subr.mxu1 %v16095_v12  ;;  %5031 = vmatpush1.msra.mxu0 %v16068_v34  ;;  %v16467_v56 = vpop.f32.mrf.mxu0  ;;  %v10863_v16 = vpop.eup %10862  ;;  %10888 = vtanh.f32 %v15880_v8  ;;  %v20928_v8 = vld [vmem:[#allocation91_spill] sm:$0xff] }
 0x360   : > { %20923 = vst [vmem:[#allocation37_spill] sm:$0xff] %v16467_v56  ;;  %5240 = vmatpush1.msra.mxu1 %v20924_v53  ;;  %9634 = vmatprep.mubr.msk.f32.mxu0 %vm2751_vm4, %v12390_v45  ;;  %v16475_v27 = vpop.f32.mrf.mxu1  ;;  %v10865_v54 = vpop.eup %10864  ;;  %10890 = vtanh.f32 %v20926_v51  ;;  %v12392_v51 = vld [vmem:[%s20298_s3 + $0x98] sm:$0xff] }
 0x361   : > { %20925 = vst [vmem:[#allocation33_spill] sm:$0xff] %v16475_v27  ;;  %9658 = vmatprep.mubr.msk.f32.mxu1 %vm2751_vm4, %v12390_v45  ;;  %5048 = vmatprep.subr.mxu0 %v10863_v16  ;;  %v16479_v34 = vpop.f32.mrf.mxu0  ;;  %v10867_v12 = vpop.eup %10866  ;;  %10892 = vtanh.f32 %v20928_v8  ;;  %v20933_v16 = vld [vmem:[#allocation77_spill] sm:$0xff] }
 0x362   : > { %20927 = vst [vmem:[#allocation104_spill] sm:$0xff] %v16479_v34  ;;  %5257 = vmatprep.subr.mxu1 %v10865_v54  ;;  %4191 = vmatmul.mubr.f32.gmra.mxu0 %v12391_v26  ;;  %v16485_v55 = vpop.f32.mrf.mxu1  ;;  %v10869_v61 = vpop.eup %10868  ;;  %10894 = vtanh.f32 %v20930_v44  ;;  %v20934_v54 = vld [vmem:[#allocation79_spill] sm:$0xff]  ;;  %v20936_v8 = vld [vmem:[#allocation73_spill] sm:$0xff]  ;;  %v20944_v34 = vld [vmem:[#allocation90_spill] sm:$0xff] }
 0x363   : > { %20929 = vst [vmem:[#allocation35_spill] sm:$0xff] %v16485_v55  ;;  %4400 = vmatmul.mubr.f32.gmra.mxu1 %v12391_v26  ;;  %5049 = vmatpush2.msra.mxu0 %v10867_v12  ;;  %v16488_v50 = vpop.f32.mrf.mxu0  ;;  %v10871_v14 = vpop.eup %10870  ;;  %10896 = vtanh.f32 %v20931_v35  ;;  %v12393_v44 = vld [vmem:[%s20298_s3 + $0x90] sm:$0xff] }
 0x364   : > { %5258 = vmatpush2.msra.mxu1 %v10869_v61  ;;  %5050 = vmatprep.subr.mxu0 %v10861_v24  ;;  %v16491_v31 = vpop.f32.mrf.mxu1  ;;  %v10873_v20 = vpop.eup %10872  ;;  %10898 = vtanh.f32 %v20933_v16  ;;  %v20938_v61 = vld [vmem:[#allocation75_spill] sm:$0xff] }
 0x365   : > { %20932 = vst [vmem:[#allocation38_spill] sm:$0xff] %v16491_v31  ;;  %5259 = vmatprep.subr.mxu1 %v10871_v14  ;;  %5051 = vmatpush2.msra.mxu0 %v10859_v10  ;;  %v16494_v53 = vpop.f32.mrf.mxu0  ;;  %v10875_v45 = vpop.eup %10874  ;;  %10900 = vtanh.f32 %v20934_v54  ;;  %v20941_v54 = vld [vmem:[#allocation60_spill] sm:$0xff] }
 0x366   : > { %5260 = vmatpush2.msra.mxu1 %v10873_v20  ;;  %9635 = vmatprep.mubr.msk.f32.mxu0 %vm2751_vm4, %v12392_v51  ;;  %v16501_v24 = vpop.f32.mrf.mxu1  ;;  %v10877_v12 = vpop.eup %10876  ;;  %10902 = vtanh.f32 %v20936_v8  ;;  %v20940_v20 = vld [vmem:[#allocation69_spill] sm:$0xff] }
 0x367   : > { %20935 = vst [vmem:[#allocation39_spill] sm:$0xff] %v16501_v24  ;;  %9659 = vmatprep.mubr.msk.f32.mxu1 %vm2751_vm4, %v12392_v51  ;;  %5052 = vmatprep.subr.mxu0 %v10875_v45  ;;  %v16505_v10 = vpop.f32.mrf.mxu0  ;;  %v10879_v26 = vpop.eup %10878  ;;  %10904 = vtanh.f32 %v20938_v61 }
 0x368   : > { %20937 = vst [vmem:[#allocation26_spill] sm:$0xff] %v16505_v10  ;;  %5261 = vmatprep.subr.mxu1 %v10877_v12  ;;  %4197 = vmatmul.mubr.f32.gmra.mxu0 %v12393_v44  ;;  %v16511_v14 = vpop.f32.mrf.mxu1  ;;  %v10881_v35 = vpop.eup %10880  ;;  %10906 = vtanh.f32 %v20940_v20 }
 0x369   : > { %20939 = vst [vmem:[#allocation66_spill] sm:$0xff] %v16511_v14  ;;  %4406 = vmatmul.mubr.f32.gmra.mxu1 %v12393_v44  ;;  %5053 = vmatpush2.msra.mxu0 %v10879_v26  ;;  %v16514_v16 = vpop.f32.mrf.mxu0  ;;  %v10883_v45 = vpop.eup %10882  ;;  %10908 = vtanh.f32 %v20941_v54  ;;  %v12394_v26 = vld [vmem:[%s20298_s3 + $0xa8] sm:$0xff] }
 0x36a   : > { %5262 = vmatpush2.msra.mxu1 %v10881_v35  ;;  %5054 = vmatprep.subr.mxu0 %v16453_v9  ;;  %v16518_v51 = vpop.f32.mrf.mxu1  ;;  %v10885_v12 = vpop.eup %10884  ;;  %10910 = vtanh.f32 %v16425_v30  ;;  %v12395_v35 = vld [vmem:[%s20298_s3 + $0xa0] sm:$0xff] }
 0x36b   : > { %5263 = vmatprep.subr.mxu1 %v10883_v45  ;;  %5055 = vmatpush2.msra.mxu0 %v16444_v62  ;;  %v16522_v8 = vpop.f32.mrf.mxu0  ;;  %v10887_v61 = vpop.eup %10886  ;;  %10912 = vtanh.f32 %v16435_v58 }
 0x36c   : > { %5264 = vmatpush2.msra.mxu1 %v10885_v12  ;;  %9636 = vmatprep.mubr.msk.f32.mxu0 %vm2751_vm4, %v12394_v26  ;;  %v16529_v9 = vpop.f32.mrf.mxu1  ;;  %v10889_v44 = vpop.eup %10888 }
 0x36d   : > { %9660 = vmatprep.mubr.msk.f32.mxu1 %vm2751_vm4, %v12394_v26  ;;  %5056 = vmatprep.subr.mxu0 %v10887_v61  ;;  %v16532_v62 = vpop.f32.mrf.mxu0  ;;  %v10891_v30 = vpop.eup %10890 }
 0x36e   : > { %5265 = vmatprep.subr.mxu1 %v10889_v44  ;;  %4203 = vmatmul.mubr.f32.gmra.mxu0 %v12395_v35  ;;  %v16537_v20 = vpop.f32.mrf.mxu1  ;;  %v10893_v45 = vpop.eup %10892 }
 0x36f   : > { %4412 = vmatmul.mubr.f32.gmra.mxu1 %v12395_v35  ;;  %5057 = vmatpush2.msra.mxu0 %v10891_v30  ;;  %v16539_v58 = vpop.f32.mrf.mxu0  ;;  %v10895_v54 = vpop.eup %10894  ;;  %v12396_v30 = vld [vmem:[%s20298_s3 + $0xb8] sm:$0xff] }
 0x370   : > { %5266 = vmatpush2.msra.mxu1 %v10893_v45  ;;  %5058 = vmatprep.subr.mxu0 %v16437_v17  ;;  %v16542_v12 = vpop.f32.mrf.mxu1  ;;  %v10897_v61 = vpop.eup %10896 }
 0x371   : > { %5267 = vmatprep.subr.mxu1 %v10895_v54  ;;  %5059 = vmatpush2.msra.mxu0 %v16427_v28  ;;  %v16545_v26 = vpop.f32.mrf.mxu0  ;;  %v10899_v44 = vpop.eup %10898  ;;  %v12397_v28 = vld [vmem:[%s20298_s3 + $0xb0] sm:$0xff] }
 0x372   : > { %5268 = vmatpush2.msra.mxu1 %v10897_v61  ;;  %9637 = vmatprep.mubr.msk.f32.mxu0 %vm2751_vm4, %v12396_v30  ;;  %v16551_v35 = vpop.f32.mrf.mxu1  ;;  %v10901_v45 = vpop.eup %10900 }
 0x373   : > { %9661 = vmatprep.mubr.msk.f32.mxu1 %vm2751_vm4, %v12396_v30  ;;  %5060 = vmatprep.subr.mxu0 %v10899_v44  ;;  %v16554_v17 = vpop.f32.mrf.mxu0  ;;  %v10903_v54 = vpop.eup %10902 }
 0x374   : > { %5269 = vmatprep.subr.mxu1 %v10901_v45  ;;  %4209 = vmatmul.mubr.f32.gmra.mxu0 %v12397_v28  ;;  %v16559_v61 = vpop.f32.mrf.mxu1  ;;  %v10905_v3 = vpop.eup %10904 }
 0x375   : > { %4418 = vmatmul.mubr.f32.gmra.mxu1 %v12397_v28  ;;  %5061 = vmatpush2.msra.mxu0 %v10903_v54  ;;  %v16561_v46 = vpop.f32.mrf.mxu0  ;;  %v10907_v27 = vpop.eup %10906  ;;  %v12398_v54 = vld [vmem:[%s20298_s3 + $0xc8] sm:$0xff] }
 0x376   : > { %5270 = vmatpush2.msra.mxu1 %v10905_v3  ;;  %5062 = vmatprep.subr.mxu0 %v16420_v18  ;;  %v16564_v44 = vpop.f32.mrf.mxu1  ;;  %v10909_v30 = vpop.eup %10908  ;;  %v12399_v18 = vld [vmem:[%s20298_s3 + $0xc0] sm:$0xff] }
 0x377   : > { %5271 = vmatprep.subr.mxu1 %v10907_v27  ;;  %5063 = vmatpush2.msra.mxu0 %v16414_v25  ;;  %v16567_v45 = vpop.f32.mrf.mxu0  ;;  %v10911_v56 = vpop.eup %10910  ;;  %v12400_v27 = vld [vmem:[%s20298_s3 + $0xd8] sm:$0xff] }
 0x378   : > { %5272 = vmatpush2.msra.mxu1 %v10909_v30  ;;  %9638 = vmatprep.mubr.msk.f32.mxu0 %vm2751_vm4, %v12398_v54  ;;  %v16573_v28 = vpop.f32.mrf.mxu1  ;;  %v10913_v3 = vpop.eup %10912 }
 0x379   : > { %9662 = vmatprep.mubr.msk.f32.mxu1 %vm2751_vm4, %v12398_v54  ;;  %4215 = vmatmul.mubr.f32.gmra.mxu0 %v12399_v18  ;;  %v16579_v25 = vpop.f32.mrf.mxu0 }
 0x37a   : > { %4424 = vmatmul.mubr.f32.gmra.mxu1 %v12399_v18  ;;  %9639 = vmatprep.mubr.msk.f32.mxu0 %vm2751_vm4, %v12400_v27  ;;  %v16585_v30 = vpop.f32.mrf.mxu1  ;;  %v20946_v18 = vld [vmem:[#allocation84_spill] sm:$0xff] }
 0x37b   : > { %9663 = vmatprep.mubr.msk.f32.mxu1 %vm2751_vm4, %v12400_v27  ;;  %5418 = vmatprep.subr.mxu0 %v10911_v56  ;;  %v16588_v54 = vpop.f32.mrf.mxu0  ;;  %v20948_v56 = vld [vmem:[#allocation81_spill] sm:$0xff] }
 0x37c   : > { %20942 = vst [vmem:[#allocation22_spill] sm:$0xff] %v16588_v54  ;;  %5627 = vmatprep.subr.mxu1 %v10913_v3  ;;  %v16590_v55 = vpop.f32.mrf.mxu1  ;;  %v20950_v3 = vld [vmem:[#allocation76_spill] sm:$0xff]  ;;  %v20956_v54 = vld [vmem:[#allocation53_spill] sm:$0xff] }
 0x37d   : > { %20943 = vst [vmem:[#allocation40_spill] sm:$0xff] %v16590_v55  ;;  %4221 = vmatmul.mubr.f32.gmra.mxu0 %v20944_v34  ;;  %v16593_v31 = vpop.f32.mrf.mxu0 }
 0x37e   : > { %20945 = vst [vmem:[#allocation50_spill] sm:$0xff] %v16593_v31  ;;  %4430 = vmatmul.mubr.f32.gmra.mxu1 %v20944_v34  ;;  %9640 = vmatprep.mubr.msk.f32.mxu0 %vm2751_vm4, %v20946_v18  ;;  %v16598_v24 = vpop.f32.mrf.mxu1 }
 0x37f   : > { %20947 = vst [vmem:[#allocation52_spill] sm:$0xff] %v16598_v24  ;;  %9664 = vmatprep.mubr.msk.f32.mxu1 %vm2751_vm4, %v20946_v18  ;;  %v20953_v24 = vld [vmem:[#allocation92_spill] sm:$0xff] }
 0x380   : > { %10914 = vtanh.f32 %v20953_v24  ;;  %v20955_v18 = vld [vmem:[#allocation88_spill] sm:$0xff] }
 0x381   : > { %4227 = vmatmul.mubr.f32.gmra.mxu0 %v20948_v56  ;;  %v16603_v27 = vpop.f32.mrf.mxu0  ;;  %10916 = vtanh.f32 %v20955_v18  ;;  %v20961_v24 = vld [vmem:[#allocation64_spill] sm:$0xff]  ;;  %v20963_v18 = vld [vmem:[#allocation78_spill] sm:$0xff] }
 0x382   : > { %20949 = vst [vmem:[#allocation85_spill] sm:$0xff] %v16603_v27  ;;  %4436 = vmatmul.mubr.f32.gmra.mxu1 %v20948_v56  ;;  %9641 = vmatprep.mubr.msk.f32.mxu0 %vm2751_vm4, %v20950_v3  ;;  %v16608_v31 = vpop.f32.mrf.mxu1  ;;  %v20957_v27 = vld [vmem:[#allocation87_spill] sm:$0xff]  ;;  %v20958_v56 = vld [vmem:[#allocation58_spill] sm:$0xff] }
 0x383   : > { %20951 = vst [vmem:[#allocation83_spill] sm:$0xff] %v16608_v31  ;;  %9665 = vmatprep.mubr.msk.f32.mxu1 %vm2751_vm4, %v20950_v3  ;;  %v16612_v34 = vpop.f32.mrf.mxu0  ;;  %10918 = vtanh.f32 %v20957_v27  ;;  %v20959_v31 = vld [vmem:[#allocation80_spill] sm:$0xff] }
 0x384   : > { %20952 = vst [vmem:[#allocation72_spill] sm:$0xff] %v16612_v34  ;;  %v16615_v55 = vpop.f32.mrf.mxu1  ;;  %10920 = vtanh.f32 %v20959_v31  ;;  %v20964_v34 = vld [vmem:[#allocation65_spill] sm:$0xff]  ;;  %v20967_v31 = vld [vmem:[#allocation63_spill] sm:$0xff] }
 0x385   : > { %20954 = vst [vmem:[#allocation68_spill] sm:$0xff] %v16615_v55  ;;  %4233 = vmatmul.mubr.f32.gmra.mxu0 %v20956_v54  ;;  %10922 = vtanh.f32 %v20961_v24  ;;  %v20970_v24 = vld [vmem:[#allocation49_spill] sm:$0xff] }
 0x386   : > { %4442 = vmatmul.mubr.f32.gmra.mxu1 %v20956_v54  ;;  %9642 = vmatprep.mubr.msk.f32.mxu0 %vm2751_vm4, %v20958_v56  ;;  %10924 = vtanh.f32 %v20963_v18  ;;  %v20966_v54 = vld [vmem:[#allocation74_spill] sm:$0xff]  ;;  %v20971_v18 = vld [vmem:[#allocation51_spill] sm:$0xff] }
 0x387   : > { %9666 = vmatprep.mubr.msk.f32.mxu1 %vm2751_vm4, %v20958_v56  ;;  %v16626_v3 = vpop.f32.mrf.mxu0  ;;  %10926 = vtanh.f32 %v20966_v54  ;;  %v20974_v54 = vld [vmem:[#allocation62_spill] sm:$0xff] }
 0x388   : > { %20960 = vst [vmem:[#allocation70_spill] sm:$0xff] %v16626_v3  ;;  %v16629_v55 = vpop.f32.mrf.mxu1  ;;  %v20969_v3 = vld [vmem:[#allocation71_spill] sm:$0xff] }
 0x389   : > { %20962 = vst [vmem:[#allocation48_spill] sm:$0xff] %v16629_v55  ;;  %4239 = vmatmul.mubr.f32.gmra.mxu0 %v20964_v34  ;;  %v16633_v27 = vpop.f32.mrf.mxu0  ;;  %10928 = vtanh.f32 %v20969_v3  ;;  %v20972_v55 = vld [vmem:[#allocation97_spill] sm:$0xff] }
 0x38a   : > { %20965 = vst [vmem:[#allocation47_spill] sm:$0xff] %v16633_v27  ;;  %4448 = vmatmul.mubr.f32.gmra.mxu1 %v20964_v34  ;;  %9643 = vmatprep.mubr.msk.f32.mxu0 %vm2751_vm4, %v20967_v31  ;;  %v16639_v56 = vpop.f32.mrf.mxu1  ;;  %10930 = vtanh.f32 %v20970_v24  ;;  %v20975_v34 = vld [vmem:[#allocation94_spill] sm:$0xff]  ;;  %v20977_v3 = vld [vmem:[#allocation61_spill] sm:$0xff]  ;;  %v20979_v24 = vld [vmem:[#allocation67_spill] sm:$0xff] }
 0x38b   : > { %20968 = vst [vmem:[#allocation46_spill] sm:$0xff] %v16639_v56  ;;  %9667 = vmatprep.mubr.msk.f32.mxu1 %vm2751_vm4, %v20967_v31  ;;  %10932 = vtanh.f32 %v20971_v18 }
 0x38c   : > { %10934 = vtanh.f32 %v20974_v54  ;;  %v20981_v54 = vld [vmem:[#allocation21_spill] sm:$0xff] }
 0x38d   : > { %4245 = vmatmul.mubr.f32.gmra.mxu0 %v20972_v55  ;;  %v16647_v27 = vpop.f32.mrf.mxu0  ;;  %10936 = vtanh.f32 %v20977_v3  ;;  %v20985_v3 = vld [vmem:[#allocation20_spill] sm:$0xff] }
 0x38e   : > { %20973 = vst [vmem:[#allocation29_spill] sm:$0xff] %v16647_v27  ;;  %4454 = vmatmul.mubr.f32.gmra.mxu1 %v20972_v55  ;;  %9644 = vmatprep.mubr.msk.f32.mxu0 %vm2751_vm4, %v20975_v34  ;;  %v16653_v56 = vpop.f32.mrf.mxu1  ;;  %10938 = vtanh.f32 %v20979_v24  ;;  %v16663_v27 = vpop.eup %10914  ;;  %v20982_v55 = vld [vmem:[#allocation18_spill] sm:$0xff]  ;;  %v20986_v24 = vld [vmem:[#allocation96_spill] sm:$0xff] }
 0x38f   : > { %20976 = vst [vmem:[#allocation15_spill] sm:$0xff] %v16653_v56  ;;  %9668 = vmatprep.mubr.msk.f32.mxu1 %vm2751_vm4, %v20975_v34  ;;  %v16658_v31 = vpop.f32.mrf.mxu0  ;;  %10940 = vtanh.f32 %v20981_v54  ;;  %v16667_v14 = vpop.eup %10916  ;;  %v20984_v56 = vld [vmem:[#allocation57_spill] sm:$0xff] }
 0x390   : > { %20978 = vst [vmem:[#allocation25_spill] sm:$0xff] %v16658_v31  ;;  %v16661_v18 = vpop.f32.mrf.mxu1  ;;  %20983 = vst [vmem:[#allocation30_spill] sm:$0xff] %v16667_v14  ;;  %10942 = vtanh.f32 %v20984_v56  ;;  %v16673_v34 = vpop.eup %10918 }
 0x391   : > { %20980 = vst [vmem:[#allocation31_spill] sm:$0xff] %v16661_v18  ;;  %4251 = vmatmul.mubr.f32.gmra.mxu0 %v20982_v55  ;;  %10944 = vtanh.f32 %v20986_v24  ;;  %v16680_v54 = vpop.eup %10920 }
 0x392   : > { %4460 = vmatmul.mubr.f32.gmra.mxu1 %v20982_v55  ;;  %9645 = vmatprep.mubr.msk.f32.mxu0 %vm2751_vm4, %v20985_v3  ;;  %10946 = vtanh.f32 %v16264_v6  ;;  %v16685_v56 = vpop.eup %10922  ;;  %v20989_v55 = vld [vmem:[#allocation44_spill] sm:$0xff] }
 0x393   : > { %9669 = vmatprep.mubr.msk.f32.mxu1 %vm2751_vm4, %v20985_v3  ;;  %v16678_v18 = vpop.f32.mrf.mxu0  ;;  %10948 = vtanh.f32 %v16274_v4  ;;  %v16691_v24 = vpop.eup %10924  ;;  %v20991_v3 = vld [vmem:[#allocation36_spill] sm:$0xff] }
 0x394   : > { %20987 = vst [vmem:[#allocation45_spill] sm:$0xff] %v16678_v18  ;;  %v16683_v31 = vpop.f32.mrf.mxu1  ;;  %10950 = vtanh.f32 %v16310_v41  ;;  %v20993_v41 = vld [vmem:[#allocation24_spill] sm:$0xff] }
 0x395   : > { %20988 = vst [vmem:[#allocation89_spill] sm:$0xff] %v16683_v31  ;;  %4257 = vmatmul.mubr.f32.gmra.mxu0 %v20989_v55  ;;  %v16689_v10 = vpop.f32.mrf.mxu0  ;;  %v16699_v31 = vpop.eup %10926  ;;  %10952 = vtanh.f32 %v16321_v33  ;;  %v20995_v33 = vld [vmem:[#allocation16_spill] sm:$0xff] }
 0x396   : > { %20990 = vst [vmem:[#allocation91_spill] sm:$0xff] %v16689_v10  ;;  %4466 = vmatmul.mubr.f32.gmra.mxu1 %v20989_v55  ;;  %9646 = vmatprep.mubr.msk.f32.mxu0 %vm2751_vm4, %v20991_v3  ;;  %v16697_v6 = vpop.f32.mrf.mxu1  ;;  %v16704_v4 = vpop.eup %10928  ;;  %10954 = vtanh.f32 %v16356_v40 }
 0x397   : > { %20992 = vst [vmem:[#allocation86_spill] sm:$0xff] %v16697_v6  ;;  %9670 = vmatprep.mubr.msk.f32.mxu1 %vm2751_vm4, %v20991_v3  ;;  %v16707_v10 = vpop.eup %10930  ;;  %10956 = vtanh.f32 %v16364_v63 }
 0x398   : > { %v16713_v6 = vpop.eup %10932  ;;  %10958 = vtanh.f32 %v16392_v15 }
 0x399   : > { %4263 = vmatmul.mubr.f32.gmra.mxu0 %v20993_v41  ;;  %v16711_v55 = vpop.f32.mrf.mxu0  ;;  %v16721_v40 = vpop.eup %10934  ;;  %10960 = vtanh.f32 %v16403_v21  ;;  %v21000_v21 = vld [vmem:[#allocation54_spill] sm:$0xff] }
 0x39a   : > { %20994 = vst [vmem:[#allocation82_spill] sm:$0xff] %v16711_v55  ;;  %4472 = vmatmul.mubr.f32.gmra.mxu1 %v20993_v41  ;;  %9647 = vmatprep.mubr.msk.f32.mxu0 %vm2751_vm4, %v20995_v33  ;;  %v16719_v3 = vpop.f32.mrf.mxu1  ;;  %v16728_v55 = vpop.eup %10936  ;;  %10962 = vtanh.f32 %v16412_v49 }
 0x39b   : > { %20996 = vst [vmem:[#allocation77_spill] sm:$0xff] %v16719_v3  ;;  %9671 = vmatprep.mubr.msk.f32.mxu1 %vm2751_vm4, %v20995_v33  ;;  %v16726_v63 = vpop.f32.mrf.mxu0  ;;  %v16733_v41 = vpop.eup %10938  ;;  %10964 = vtanh.f32 %v16418_v43  ;;  %v20999_v3 = vld [vmem:[#allocation43_spill] sm:$0xff] }
 0x39c   : > { %20997 = vst [vmem:[#allocation79_spill] sm:$0xff] %v16726_v63  ;;  %v16731_v15 = vpop.f32.mrf.mxu1  ;;  %v16737_v18 = vpop.eup %10940  ;;  %10966 = vtanh.f32 %v16409_v47 }
 0x39d   : > { %20998 = vst [vmem:[#allocation73_spill] sm:$0xff] %v16731_v15  ;;  %4269 = vmatmul.mubr.f32.gmra.mxu0 %v20999_v3  ;;  %v16743_v33 = vpop.eup %10942  ;;  %10968 = vtanh.f32 %v16399_v2 }
 0x39e   : > { %4478 = vmatmul.mubr.f32.gmra.mxu1 %v20999_v3  ;;  %9648 = vmatprep.mubr.msk.f32.mxu0 %vm2751_vm4, %v21000_v21  ;;  %v16750_v43 = vpop.eup %10944  ;;  %10970 = vtanh.f32 %v16384_v19  ;;  %v21003_v3 = vld [vmem:[#allocation17_spill] sm:$0xff] }
 0x39f   : > { %9672 = vmatprep.mubr.msk.f32.mxu1 %vm2751_vm4, %v21000_v21  ;;  %v16748_v49 = vpop.f32.mrf.mxu0  ;;  %v16755_v47 = vpop.eup %10946  ;;  %10972 = vtanh.f32 %v16388_v59  ;;  %v21005_v21 = vld [vmem:[#allocation98_spill] sm:$0xff]  ;;  %v4881_v59 = vld [vmem:[#allocation3 + $0x8] sm:$0xff] }
 0x3a0   : > { %21001 = vst [vmem:[#allocation75_spill] sm:$0xff] %v16748_v49  ;;  %v16753_v15 = vpop.f32.mrf.mxu1  ;;  %v16761_v2 = vpop.eup %10948  ;;  %10974 = vtanh.f32 %v16375_v1 }
 0x3a1   : > { %21002 = vst [vmem:[#allocation69_spill] sm:$0xff] %v16753_v15  ;;  %4275 = vmatmul.mubr.f32.gmra.mxu0 %v21003_v3  ;;  %v16759_v63 = vpop.f32.mrf.mxu0  ;;  %v16769_v15 = vpop.eup %10950  ;;  %10976 = vtanh.f32 %v16381_v7  ;;  %v4880_v7 = vld [vmem:[#allocation3] sm:$0xff] }
 0x3a2   : > { %21004 = vst [vmem:[#allocation60_spill] sm:$0xff] %v16759_v63  ;;  %4484 = vmatmul.mubr.f32.gmra.mxu1 %v21003_v3  ;;  %9649 = vmatprep.mubr.msk.f32.mxu0 %vm2751_vm4, %v21005_v21  ;;  %v16767_v19 = vpop.f32.mrf.mxu1  ;;  %v16774_v63 = vpop.eup %10952  ;;  %10978 = vtanh.f32 %v16371_v52  ;;  %v21007_v3 = vld [vmem:[#allocation100_spill] sm:$0xff] }
 0x3a3   : > { %21006 = vst [vmem:[#allocation90_spill] sm:$0xff] %v16767_v19  ;;  %9673 = vmatprep.mubr.msk.f32.mxu1 %vm2751_vm4, %v21005_v21  ;;  %v10955_v1 = vpop.eup %10954  ;;  %10980 = vtanh.f32 %v16360_v29 }
 0x3a4   : > { %v10957_v19 = vpop.eup %10956  ;;  %10982 = vtanh.f32 %v16345_v48 }
 0x3a5   : > { %4281 = vmatmul.mubr.f32.gmra.mxu0 %v21007_v3  ;;  %v16779_v49 = vpop.f32.mrf.mxu0  ;;  %v10959_v14 = vpop.eup %10958  ;;  %10984 = vtanh.f32 %v16349_v5 }
 0x3a6   : > { %21008 = vst [vmem:[#allocation84_spill] sm:$0xff] %v16779_v49  ;;  %4490 = vmatmul.mubr.f32.gmra.mxu1 %v21007_v3  ;;  %9674 = vmatprep.mubr.msk.f32.mxu0 %vm2751_vm4, %v4881_v59  ;;  %v16784_v21 = vpop.f32.mrf.mxu1  ;;  %v10961_v52 = vpop.eup %10960  ;;  %10986 = vtanh.f32 %v16334_v13 }
 0x3a7   : > { %21009 = vst [vmem:[#allocation81_spill] sm:$0xff] %v16784_v21  ;;  %9698 = vmatprep.mubr.msk.f32.mxu1 %vm2751_vm4, %v4881_v59  ;;  %v16788_v29 = vpop.f32.mrf.mxu0  ;;  %v10963_v48 = vpop.eup %10962  ;;  %10988 = vtanh.f32 %v16338_v0  ;;  %v4883_v21 = vld [vmem:[#allocation3 + $0x18] sm:$0xff]  ;;  %v4882_v0 = vld [vmem:[#allocation3 + $0x10] sm:$0xff] }
 0x3a8   : > { %21010 = vst [vmem:[#allocation76_spill] sm:$0xff] %v16788_v29  ;;  %v16791_v49 = vpop.f32.mrf.mxu1  ;;  %v10965_v3 = vpop.eup %10964  ;;  %10990 = vtanh.f32 %v16325_v60 }
 0x3a9   : > { %21011 = vst [vmem:[#allocation92_spill] sm:$0xff] %v16791_v49  ;;  %5065 = vmatmul.mubr.f32.vlgmr.msra.gmra.mxu0 %v4880_v7  ;;  %v10967_v5 = vpop.eup %10966  ;;  %10992 = vtanh.f32 %v16314_v37 }
 0x3aa   : > { %5274 = vmatmul.mubr.f32.vlgmr.msra.gmra.mxu1 %v4880_v7  ;;  %5419 = vmatpush1.msra.mxu0 %v10963_v48  ;;  %v10969_v13 = vpop.eup %10968  ;;  %10994 = vtanh.f32 %v16297_v11 }
 0x3ab   : > { %5628 = vmatpush1.msra.mxu1 %v10965_v3  ;;  %5420 = vmatprep.subr.mxu0 %v10961_v52  ;;  %v16796_v59 = vpop.f32.mrf.mxu0  ;;  %v10971_v29 = vpop.eup %10970  ;;  %10996 = vtanh.f32 %v16301_v22  ;;  %v4885_v22 = vld [vmem:[#allocation3 + $0x28] sm:$0xff] }
 0x3ac   : > { %5629 = vmatprep.subr.mxu1 %v10967_v5  ;;  %5421 = vmatpush1.msra.mxu0 %v10959_v14  ;;  %v16799_v49 = vpop.f32.mrf.mxu1  ;;  %v10973_v37 = vpop.eup %10972  ;;  %10998 = vtanh.f32 %v16286_v23  ;;  %v21014_v5 = vld [vmem:[#allocation102_spill] sm:$0xff] }
 0x3ad   : > { %5630 = vmatpush1.msra.mxu1 %v10969_v13  ;;  %9675 = vmatprep.mubr.msk.f32.mxu0 %vm2751_vm4, %v4883_v21  ;;  %v16803_v60 = vpop.f32.mrf.mxu0  ;;  %v10975_v14 = vpop.eup %10974  ;;  %11000 = vtanh.f32 %v16290_v36  ;;  %v4884_v36 = vld [vmem:[#allocation3 + $0x20] sm:$0xff] }
 0x3ae   : > { %9699 = vmatprep.mubr.msk.f32.mxu1 %vm2751_vm4, %v4883_v21  ;;  %5422 = vmatprep.subr.mxu0 %v10971_v29  ;;  %v16807_v11 = vpop.f32.mrf.mxu1  ;;  %v10977_v7 = vpop.eup %10976  ;;  %11002 = vtanh.f32 %v16278_v32  ;;  %v21012_v32 = vld [vmem:[#allocation103_spill] sm:$0xff] }
 0x3af   : > { %5631 = vmatprep.subr.mxu1 %v10973_v37  ;;  %5071 = vmatmul.mubr.f32.gmra.mxu0 %v4882_v0  ;;  %v10979_v52 = vpop.eup %10978  ;;  %11004 = vtanh.f32 %v16267_v39  ;;  %v4887_v37 = vld [vmem:[#allocation3 + $0x38] sm:$0xff] }
 0x3b0   : > { %5280 = vmatmul.mubr.f32.gmra.mxu1 %v4882_v0  ;;  %5423 = vmatpush1.msra.mxu0 %v10975_v14  ;;  %v10981_v21 = vpop.eup %10980  ;;  %11006 = vtanh.f32 %v16253_v42  ;;  %v21015_v0 = vld [vmem:[#allocation99_spill] sm:$0xff] }
 0x3b1   : > { %5632 = vmatpush1.msra.mxu1 %v10977_v7  ;;  %5424 = vmatprep.subr.mxu0 %v10957_v19  ;;  %v16812_v23 = vpop.f32.mrf.mxu0  ;;  %v10983_v48 = vpop.eup %10982  ;;  %11008 = vtanh.f32 %v21012_v32  ;;  %v21013_v19 = vld [vmem:[#allocation101_spill] sm:$0xff]  ;;  %v21016_v7 = vld [vmem:[#allocation19_spill] sm:$0xff] }
 0x3b2   : > { %5633 = vmatprep.subr.mxu1 %v10979_v52  ;;  %5425 = vmatpush1.msra.mxu0 %v10955_v1  ;;  %v16815_v29 = vpop.f32.mrf.mxu1  ;;  %v10985_v39 = vpop.eup %10984  ;;  %11010 = vtanh.f32 %v21013_v19 }
 0x3b3   : > { %5634 = vmatpush1.msra.mxu1 %v10981_v21  ;;  %9676 = vmatprep.mubr.msk.f32.mxu0 %vm2751_vm4, %v4885_v22  ;;  %v16819_v3 = vpop.f32.mrf.mxu0  ;;  %v10987_v1 = vpop.eup %10986  ;;  %11012 = vtanh.f32 %v21014_v5  ;;  %v21017_v21 = vld [vmem:[#allocation55_spill] sm:$0xff] }
 0x3b4   : > { %9700 = vmatprep.mubr.msk.f32.mxu1 %vm2751_vm4, %v4885_v22  ;;  %5426 = vmatprep.subr.mxu0 %v10983_v48  ;;  %v16823_v42 = vpop.f32.mrf.mxu1  ;;  %v10989_v13 = vpop.eup %10988  ;;  %11014 = vtanh.f32 %v21015_v0  ;;  %v4886_v48 = vld [vmem:[#allocation3 + $0x30] sm:$0xff] }
 0x3b5   : > { %5635 = vmatprep.subr.mxu1 %v10985_v39  ;;  %5077 = vmatmul.mubr.f32.gmra.mxu0 %v4884_v36  ;;  %v10991_v14 = vpop.eup %10990  ;;  %11016 = vtanh.f32 %v21016_v7  ;;  %v21018_v39 = vld [vmem:[#allocation34_spill] sm:$0xff]  ;;  %v4889_v7 = vld [vmem:[#allocation3 + $0x48] sm:$0xff] }
 0x3b6   : > { %5286 = vmatmul.mubr.f32.gmra.mxu1 %v4884_v36  ;;  %5427 = vmatpush1.msra.mxu0 %v10987_v1  ;;  %v10993_v52 = vpop.eup %10992  ;;  %11018 = vtanh.f32 %v21017_v21  ;;  %v21019_v1 = vld [vmem:[#allocation23_spill] sm:$0xff]  ;;  %v21022_v21 = vld [vmem:[#allocation32_spill] sm:$0xff] }
 0x3b7   : > { %5636 = vmatpush1.msra.mxu1 %v10989_v13  ;;  %5428 = vmatprep.subr.mxu0 %v16774_v63  ;;  %v16829_v22 = vpop.f32.mrf.mxu0  ;;  %v10995_v36 = vpop.eup %10994  ;;  %11020 = vtanh.f32 %v21018_v39  ;;  %v21020_v13 = vld [vmem:[#allocation41_spill] sm:$0xff]  ;;  %v21023_v39 = vld [vmem:[#allocation56_spill] sm:$0xff] }
 0x3b8   : > { %5637 = vmatprep.subr.mxu1 %v10991_v14  ;;  %5429 = vmatpush1.msra.mxu0 %v16769_v15  ;;  %v16833_v32 = vpop.f32.mrf.mxu1  ;;  %v10997_v63 = vpop.eup %10996  ;;  %11022 = vtanh.f32 %v21019_v1  ;;  %v21021_v14 = vld [vmem:[#allocation42_spill] sm:$0xff] }
 0x3b9   : > { %5638 = vmatpush1.msra.mxu1 %v10993_v52  ;;  %9677 = vmatprep.mubr.msk.f32.mxu0 %vm2751_vm4, %v4887_v37  ;;  %v16837_v19 = vpop.f32.mrf.mxu0  ;;  %v10999_v15 = vpop.eup %10998  ;;  %11024 = vtanh.f32 %v21020_v13 }
 0x3ba   : > { %9701 = vmatprep.mubr.msk.f32.mxu1 %vm2751_vm4, %v4887_v37  ;;  %5430 = vmatprep.subr.mxu0 %v10995_v36  ;;  %v16841_v5 = vpop.f32.mrf.mxu1  ;;  %v11001_v0 = vpop.eup %11000  ;;  %11026 = vtanh.f32 %v21021_v14 }
 0x3bb   : > { %5639 = vmatprep.subr.mxu1 %v10997_v63  ;;  %5083 = vmatmul.mubr.f32.gmra.mxu0 %v4886_v48  ;;  %v11003_v52 = vpop.eup %11002  ;;  %11028 = vtanh.f32 %v21022_v21  ;;  %v4888_v63 = vld [vmem:[#allocation3 + $0x40] sm:$0xff] }
 0x3bc   : > { %5292 = vmatmul.mubr.f32.gmra.mxu1 %v4886_v48  ;;  %5431 = vmatpush1.msra.mxu0 %v10999_v15  ;;  %v11005_v36 = vpop.eup %11004  ;;  %11030 = vtanh.f32 %v21023_v39  ;;  %v21024_v15 = vld [vmem:[#allocation93_spill] sm:$0xff] }
 0x3bd   : > { %5640 = vmatpush1.msra.mxu1 %v11001_v0  ;;  %5432 = vmatprep.subr.mxu0 %v16761_v2  ;;  %v16847_v37 = vpop.f32.mrf.mxu0  ;;  %v11007_v48 = vpop.eup %11006  ;;  %11032 = vtanh.f32 %v21024_v15  ;;  %v21025_v0 = vld [vmem:[#allocation59_spill] sm:$0xff] }
 0x3be   : > { %5641 = vmatprep.subr.mxu1 %v11003_v52  ;;  %5433 = vmatpush1.msra.mxu0 %v16755_v47  ;;  %v16851_v1 = vpop.f32.mrf.mxu1  ;;  %v11009_v2 = vpop.eup %11008  ;;  %11034 = vtanh.f32 %v21025_v0  ;;  %v21026_v52 = vld [vmem:[#allocation95_spill] sm:$0xff] }
 0x3bf   : > { %5642 = vmatpush1.msra.mxu1 %v11005_v36  ;;  %9678 = vmatprep.mubr.msk.f32.mxu0 %vm2751_vm4, %v4889_v7  ;;  %v16855_v13 = vpop.f32.mrf.mxu0  ;;  %v11011_v47 = vpop.eup %11010  ;;  %11036 = vtanh.f32 %v21026_v52  ;;  %v4891_v36 = vld [vmem:[#allocation3 + $0x58] sm:$0xff] }
 0x3c0   : > { %9702 = vmatprep.mubr.msk.f32.mxu1 %vm2751_vm4, %v4889_v7  ;;  %5434 = vmatprep.subr.mxu0 %v11007_v48  ;;  %v16859_v14 = vpop.f32.mrf.mxu1  ;;  %v11013_v21 = vpop.eup %11012  ;;  %11038 = vtanh.f32 %v16442_v38  ;;  %v4890_v38 = vld [vmem:[#allocation3 + $0x50] sm:$0xff] }
 0x3c1   : > { %5643 = vmatprep.subr.mxu1 %v11009_v2  ;;  %5089 = vmatmul.mubr.f32.gmra.mxu0 %v4888_v63  ;;  %v11015_v15 = vpop.eup %11014  ;;  %11040 = vtanh.f32 %v16457_v57 }
 0x3c2   : > { %5298 = vmatmul.mubr.f32.gmra.mxu1 %v4888_v63  ;;  %5435 = vmatpush1.msra.mxu0 %v11011_v47  ;;  %v16863_v39 = vpop.f32.mrf.mxu0  ;;  %v11017_v48 = vpop.eup %11016  ;;  %11042 = vtanh.f32 %v16488_v50  ;;  %v4893_v47 = vld [vmem:[#allocation3 + $0x68] sm:$0xff] }
 0x3c3   : > { %5644 = vmatpush1.msra.mxu1 %v11013_v21  ;;  %5436 = vmatprep.subr.mxu0 %v16750_v43  ;;  %v16867_v7 = vpop.f32.mrf.mxu1  ;;  %v11019_v2 = vpop.eup %11018  ;;  %11044 = vtanh.f32 %v16494_v53 }
 0x3c4   : > { %5645 = vmatprep.subr.mxu1 %v11015_v15  ;;  %5437 = vmatpush1.msra.mxu0 %v16743_v33  ;;  %v16871_v63 = vpop.f32.mrf.mxu0  ;;  %v11021_v43 = vpop.eup %11020  ;;  %11046 = vtanh.f32 %v16522_v8 }
 0x3c5   : > { %5646 = vmatpush1.msra.mxu1 %v11017_v48  ;;  %9679 = vmatprep.mubr.msk.f32.mxu0 %vm2751_vm4, %v4891_v36  ;;  %v16875_v57 = vpop.f32.mrf.mxu1  ;;  %v11023_v33 = vpop.eup %11022  ;;  %11048 = vtanh.f32 %v16532_v62 }
 0x3c6   : > { %9703 = vmatprep.mubr.msk.f32.mxu1 %vm2751_vm4, %v4891_v36  ;;  %5438 = vmatprep.subr.mxu0 %v11019_v2  ;;  %v16879_v50 = vpop.f32.mrf.mxu0  ;;  %v11025_v53 = vpop.eup %11024  ;;  %11050 = vtanh.f32 %v16554_v17  ;;  %v4892_v17 = vld [vmem:[#allocation3 + $0x60] sm:$0xff] }
 0x3c7   : > { %5647 = vmatprep.subr.mxu1 %v11021_v43  ;;  %5095 = vmatmul.mubr.f32.gmra.mxu0 %v4890_v38  ;;  %v16882_v0 = vpop.f32.mrf.mxu1  ;;  %v11027_v8 = vpop.eup %11026  ;;  %11052 = vtanh.f32 %v16561_v46 }
 0x3c8   : > { %5304 = vmatmul.mubr.f32.gmra.mxu1 %v4890_v38  ;;  %5439 = vmatpush1.msra.mxu0 %v11023_v33  ;;  %v16885_v52 = vpop.f32.mrf.mxu0  ;;  %v11029_v62 = vpop.eup %11028  ;;  %11054 = vtanh.f32 %v16579_v25  ;;  %v4895_v38 = vld [vmem:[#allocation3 + $0x78] sm:$0xff] }
 0x3c9   : > { %5648 = vmatpush1.msra.mxu1 %v11025_v53  ;;  %5440 = vmatprep.subr.mxu0 %v16737_v18  ;;  %v16889_v21 = vpop.f32.mrf.mxu1  ;;  %v11031_v15 = vpop.eup %11030  ;;  %11056 = vtanh.f32 %v16585_v30 }
 0x3ca   : > { %5649 = vmatprep.subr.mxu1 %v11027_v8  ;;  %5441 = vmatpush1.msra.mxu0 %v16733_v41  ;;  %v16893_v36 = vpop.f32.mrf.mxu0  ;;  %v11033_v18 = vpop.eup %11032  ;;  %11058 = vtanh.f32 %v16567_v45  ;;  %v21032_v8 = vld [vmem:[#allocation26_spill] sm:$0xff] }
 0x3cb   : > { %5650 = vmatpush1.msra.mxu1 %v11029_v62  ;;  %9680 = vmatprep.mubr.msk.f32.mxu0 %vm2751_vm4, %v4893_v47  ;;  %v16897_v46 = vpop.f32.mrf.mxu1  ;;  %v11035_v41 = vpop.eup %11034  ;;  %11060 = vtanh.f32 %v16573_v28 }
 0x3cc   : > { %9704 = vmatprep.mubr.msk.f32.mxu1 %vm2751_vm4, %v4893_v47  ;;  %5442 = vmatprep.subr.mxu0 %v11031_v15  ;;  %v16901_v25 = vpop.f32.mrf.mxu0  ;;  %v11037_v30 = vpop.eup %11036  ;;  %11062 = vtanh.f32 %v16564_v44  ;;  %v4894_v44 = vld [vmem:[#allocation3 + $0x70] sm:$0xff]  ;;  %v4899_v15 = vld [vmem:[#allocation3 + $0x98] sm:$0xff] }
 0x3cd   : > { %5651 = vmatprep.subr.mxu1 %v11033_v18  ;;  %5101 = vmatmul.mubr.f32.gmra.mxu0 %v4892_v17  ;;  %v16904_v48 = vpop.f32.mrf.mxu1  ;;  %v16909_v45 = vpop.eup %11038  ;;  %11064 = vtanh.f32 %v16559_v61 }
 0x3ce   : > { %5310 = vmatmul.mubr.f32.gmra.mxu1 %v4892_v17  ;;  %5443 = vmatpush1.msra.mxu0 %v11035_v41  ;;  %v16907_v2 = vpop.f32.mrf.mxu0  ;;  %v16915_v43 = vpop.eup %11040  ;;  %11066 = vtanh.f32 %v16545_v26  ;;  %v21036_v17 = vld [vmem:[#allocation39_spill] sm:$0xff] }
 0x3cf   : > { %5652 = vmatpush1.msra.mxu1 %v11037_v30  ;;  %5444 = vmatprep.subr.mxu0 %v16721_v40  ;;  %v16913_v28 = vpop.f32.mrf.mxu1  ;;  %v16922_v53 = vpop.eup %11042  ;;  %11068 = vtanh.f32 %v16551_v35  ;;  %v21037_v30 = vld [vmem:[#allocation38_spill] sm:$0xff] }
 0x3d0   : > { %5653 = vmatprep.subr.mxu1 %v16728_v55  ;;  %5445 = vmatpush1.msra.mxu0 %v16707_v10  ;;  %v16920_v33 = vpop.f32.mrf.mxu0  ;;  %v16929_v40 = vpop.eup %11044  ;;  %11070 = vtanh.f32 %v16539_v58  ;;  %v4897_v58 = vld [vmem:[#allocation3 + $0x88] sm:$0xff] }
 0x3d1   : > { %5654 = vmatpush1.msra.mxu1 %v16713_v6  ;;  %9681 = vmatprep.mubr.msk.f32.mxu0 %vm2751_vm4, %v4895_v38  ;;  %v16927_v61 = vpop.f32.mrf.mxu1  ;;  %v16936_v26 = vpop.eup %11046  ;;  %11072 = vtanh.f32 %v16542_v12 }
 0x3d2   : > { %9705 = vmatprep.mubr.msk.f32.mxu1 %vm2751_vm4, %v4895_v38  ;;  %5446 = vmatprep.subr.mxu0 %v16699_v31  ;;  %v16934_v10 = vpop.f32.mrf.mxu0  ;;  %v16942_v6 = vpop.eup %11048  ;;  %11074 = vtanh.f32 %v16537_v20  ;;  %v4896_v20 = vld [vmem:[#allocation3 + $0x80] sm:$0xff] }
 0x3d3   : > { %5655 = vmatprep.subr.mxu1 %v16704_v4  ;;  %5107 = vmatmul.mubr.f32.gmra.mxu0 %v4894_v44  ;;  %v16940_v35 = vpop.f32.mrf.mxu1  ;;  %v11051_v55 = vpop.eup %11050  ;;  %11076 = vtanh.f32 %v16529_v9  ;;  %v21030_v9 = vld [vmem:[#allocation30_spill] sm:$0xff] }
 0x3d4   : > { %21027 = vst [vmem:[#allocation88_spill] sm:$0xff] %v16940_v35  ;;  %5316 = vmatmul.mubr.f32.gmra.mxu1 %v4894_v44  ;;  %5447 = vmatpush1.msra.mxu0 %v16685_v56  ;;  %v16946_v31 = vpop.f32.mrf.mxu0  ;;  %v11053_v4 = vpop.eup %11052  ;;  %11078 = vtanh.f32 %v16514_v16 }
 0x3d5   : > { %5656 = vmatpush1.msra.mxu1 %v16691_v24  ;;  %5448 = vmatprep.subr.mxu0 %v16673_v34  ;;  %v16951_v12 = vpop.f32.mrf.mxu1  ;;  %v11055_v47 = vpop.eup %11054  ;;  %11080 = vtanh.f32 %v16518_v51 }
 0x3d6   : > { %21028 = vst [vmem:[#allocation53_spill] sm:$0xff] %v16951_v12  ;;  %5657 = vmatprep.subr.mxu1 %v16680_v54  ;;  %5449 = vmatpush1.msra.mxu0 %v16663_v27  ;;  %v16956_v56 = vpop.f32.mrf.mxu0  ;;  %v11057_v24 = vpop.eup %11056  ;;  %11082 = vtanh.f32 %v21032_v8  ;;  %v21034_v54 = vld [vmem:[#allocation66_spill] sm:$0xff]  ;;  %v4905_v12 = vld [vmem:[#allocation3 + $0xc8] sm:$0xff] }
 0x3d7   : > { %21029 = vst [vmem:[#allocation87_spill] sm:$0xff] %v16956_v56  ;;  %5658 = vmatpush1.msra.mxu1 %v21030_v9  ;;  %9682 = vmatprep.mubr.msk.f32.mxu0 %vm2751_vm4, %v4897_v58  ;;  %v16961_v34 = vpop.f32.mrf.mxu1  ;;  %v11059_v27 = vpop.eup %11058  ;;  %11084 = vtanh.f32 %v21034_v54  ;;  %v4904_v56 = vld [vmem:[#allocation3 + $0xc0] sm:$0xff] }
 0x3d8   : > { %21031 = vst [vmem:[#allocation58_spill] sm:$0xff] %v16961_v34  ;;  %9706 = vmatprep.mubr.msk.f32.mxu1 %vm2751_vm4, %v4897_v58  ;;  %5466 = vmatprep.subr.mxu0 %v11055_v47  ;;  %v16965_v16 = vpop.f32.mrf.mxu0  ;;  %v11061_v62 = vpop.eup %11060  ;;  %11086 = vtanh.f32 %v21036_v17  ;;  %v21039_v58 = vld [vmem:[#allocation104_spill] sm:$0xff]  ;;  %v4898_v47 = vld [vmem:[#allocation3 + $0x90] sm:$0xff] }
 0x3d9   : > { %21033 = vst [vmem:[#allocation80_spill] sm:$0xff] %v16965_v16  ;;  %5675 = vmatprep.subr.mxu1 %v11057_v24  ;;  %5113 = vmatmul.mubr.f32.gmra.mxu0 %v4896_v20  ;;  %v16968_v51 = vpop.f32.mrf.mxu1  ;;  %v11063_v41 = vpop.eup %11062  ;;  %11088 = vtanh.f32 %v21037_v30  ;;  %v21040_v24 = vld [vmem:[#allocation35_spill] sm:$0xff]  ;;  %v21046_v30 = vld [vmem:[#allocation28_spill] sm:$0xff] }
 0x3da   : > { %21035 = vst [vmem:[#allocation64_spill] sm:$0xff] %v16968_v51  ;;  %5322 = vmatmul.mubr.f32.gmra.mxu1 %v4896_v20  ;;  %5467 = vmatpush2.msra.mxu0 %v11059_v27  ;;  %v16971_v18 = vpop.f32.mrf.mxu0  ;;  %v11065_v44 = vpop.eup %11064  ;;  %11090 = vtanh.f32 %v21039_v58 }
 0x3db   : > { %5676 = vmatpush2.msra.mxu1 %v11061_v62  ;;  %5468 = vmatprep.subr.mxu0 %v11053_v4  ;;  %v16974_v38 = vpop.f32.mrf.mxu1  ;;  %v11067_v20 = vpop.eup %11066  ;;  %11092 = vtanh.f32 %v21040_v24  ;;  %v21042_v4 = vld [vmem:[#allocation37_spill] sm:$0xff] }
 0x3dc   : > { %21038 = vst [vmem:[#allocation78_spill] sm:$0xff] %v16974_v38  ;;  %5677 = vmatprep.subr.mxu1 %v11063_v41  ;;  %5469 = vmatpush2.msra.mxu0 %v11051_v55  ;;  %v16977_v9 = vpop.f32.mrf.mxu0  ;;  %v11069_v27 = vpop.eup %11068  ;;  %11094 = vtanh.f32 %v21042_v4  ;;  %v21044_v62 = vld [vmem:[#allocation33_spill] sm:$0xff]  ;;  %v4900_v4 = vld [vmem:[#allocation3 + $0xa0] sm:$0xff] }
 0x3dd   : > { %5678 = vmatpush2.msra.mxu1 %v11065_v44  ;;  %9683 = vmatprep.mubr.msk.f32.mxu0 %vm2751_vm4, %v4899_v15  ;;  %v16981_v8 = vpop.f32.mrf.mxu1  ;;  %v11071_v55 = vpop.eup %11070  ;;  %11096 = vtanh.f32 %v21044_v62  ;;  %v4901_v44 = vld [vmem:[#allocation3 + $0xa8] sm:$0xff] }
 0x3de   : > { %21041 = vst [vmem:[#allocation65_spill] sm:$0xff] %v16981_v8  ;;  %9707 = vmatprep.mubr.msk.f32.mxu1 %vm2751_vm4, %v4899_v15  ;;  %5470 = vmatprep.subr.mxu0 %v11067_v20  ;;  %v16985_v54 = vpop.f32.mrf.mxu0  ;;  %v11073_v41 = vpop.eup %11072  ;;  %11098 = vtanh.f32 %v21046_v30  ;;  %v21047_v15 = vld [vmem:[#allocation27_spill] sm:$0xff] }
 0x3df   : > { %21043 = vst [vmem:[#allocation74_spill] sm:$0xff] %v16985_v54  ;;  %5679 = vmatprep.subr.mxu1 %v11069_v27  ;;  %5119 = vmatmul.mubr.f32.gmra.mxu0 %v4898_v47  ;;  %v16988_v17 = vpop.f32.mrf.mxu1  ;;  %v11075_v24 = vpop.eup %11074  ;;  %11100 = vtanh.f32 %v21047_v15  ;;  %v21079_v54 = vld [vmem:[#allocation75_spill] sm:$0xff] }
 0x3e0   : > { %21045 = vst [vmem:[#allocation63_spill] sm:$0xff] %v16988_v17  ;;  %5328 = vmatmul.mubr.f32.gmra.mxu1 %v4898_v47  ;;  %5471 = vmatpush2.msra.mxu0 %v11071_v55  ;;  %v16991_v58 = vpop.f32.mrf.mxu0  ;;  %v11077_v27 = vpop.eup %11076  ;;  %11102 = vtanh.f32 %v16920_v33  ;;  %v4911_v17 = vld [vmem:[#allocation3 + $0xf8] sm:$0xff] }
 0x3e1   : > { %5680 = vmatpush2.msra.mxu1 %v11073_v41  ;;  %5472 = vmatprep.subr.mxu0 %v16942_v6  ;;  %v16995_v20 = vpop.f32.mrf.mxu1  ;;  %v11079_v55 = vpop.eup %11078  ;;  %11104 = vtanh.f32 %v16927_v61 }
 0x3e2   : > { %5681 = vmatprep.subr.mxu1 %v11075_v24  ;;  %5473 = vmatpush2.msra.mxu0 %v16936_v26  ;;  %v16999_v47 = vpop.f32.mrf.mxu0  ;;  %v11081_v6 = vpop.eup %11080  ;;  %v4903_v24 = vld [vmem:[#allocation3 + $0xb8] sm:$0xff] }
 0x3e3   : > { %5682 = vmatpush2.msra.mxu1 %v11077_v27  ;;  %9684 = vmatprep.mubr.msk.f32.mxu0 %vm2751_vm4, %v4901_v44  ;;  %v17003_v62 = vpop.f32.mrf.mxu1  ;;  %v11083_v26 = vpop.eup %11082 }
 0x3e4   : > { %9708 = vmatprep.mubr.msk.f32.mxu1 %vm2751_vm4, %v4901_v44  ;;  %5474 = vmatprep.subr.mxu0 %v11079_v55  ;;  %v17006_v41 = vpop.f32.mrf.mxu0  ;;  %v11085_v30 = vpop.eup %11084  ;;  %v4902_v55 = vld [vmem:[#allocation3 + $0xb0] sm:$0xff] }
 0x3e5   : > { %5683 = vmatprep.subr.mxu1 %v11081_v6  ;;  %5125 = vmatmul.mubr.f32.gmra.mxu0 %v4900_v4  ;;  %v17008_v33 = vpop.f32.mrf.mxu1  ;;  %v11087_v61 = vpop.eup %11086 }
 0x3e6   : > { %5334 = vmatmul.mubr.f32.gmra.mxu1 %v4900_v4  ;;  %5475 = vmatpush2.msra.mxu0 %v11083_v26  ;;  %v17010_v15 = vpop.f32.mrf.mxu0  ;;  %v11089_v44 = vpop.eup %11088 }
 0x3e7   : > { %5684 = vmatpush2.msra.mxu1 %v11085_v30  ;;  %5476 = vmatprep.subr.mxu0 %v16929_v40  ;;  %v17013_v27 = vpop.f32.mrf.mxu1  ;;  %v11091_v35 = vpop.eup %11090 }
 0x3e8   : > { %5685 = vmatprep.subr.mxu1 %v11087_v61  ;;  %5477 = vmatpush2.msra.mxu0 %v16922_v53  ;;  %v17016_v6 = vpop.f32.mrf.mxu0  ;;  %v11093_v26 = vpop.eup %11092 }
 0x3e9   : > { %5686 = vmatpush2.msra.mxu1 %v11089_v44  ;;  %9685 = vmatprep.mubr.msk.f32.mxu0 %vm2751_vm4, %v4903_v24  ;;  %v17019_v4 = vpop.f32.mrf.mxu1  ;;  %v11095_v30 = vpop.eup %11094 }
 0x3ea   : > { %9709 = vmatprep.mubr.msk.f32.mxu1 %vm2751_vm4, %v4903_v24  ;;  %5478 = vmatprep.subr.mxu0 %v11091_v35  ;;  %v17022_v40 = vpop.f32.mrf.mxu0  ;;  %v11097_v53 = vpop.eup %11096 }
 0x3eb   : > { %5687 = vmatprep.subr.mxu1 %v11093_v26  ;;  %5131 = vmatmul.mubr.f32.gmra.mxu0 %v4902_v55  ;;  %v17024_v61 = vpop.f32.mrf.mxu1  ;;  %v11099_v34 = vpop.eup %11098  ;;  %v4907_v26 = vld [vmem:[#allocation3 + $0xd8] sm:$0xff] }
 0x3ec   : > { %5340 = vmatmul.mubr.f32.gmra.mxu1 %v4902_v55  ;;  %5479 = vmatpush2.msra.mxu0 %v11095_v30  ;;  %v17026_v44 = vpop.f32.mrf.mxu0  ;;  %v11101_v35 = vpop.eup %11100 }
 0x3ed   : > { %5688 = vmatpush2.msra.mxu1 %v11097_v53  ;;  %5480 = vmatprep.subr.mxu0 %v16915_v43  ;;  %v17029_v24 = vpop.f32.mrf.mxu1  ;;  %v11103_v16 = vpop.eup %11102  ;;  %v4909_v53 = vld [vmem:[#allocation3 + $0xe8] sm:$0xff] }
 0x3ee   : > { %5689 = vmatprep.subr.mxu1 %v11099_v34  ;;  %5481 = vmatpush2.msra.mxu0 %v16909_v45  ;;  %v17032_v51 = vpop.f32.mrf.mxu0  ;;  %v11105_v30 = vpop.eup %11104  ;;  %v4906_v34 = vld [vmem:[#allocation3 + $0xd0] sm:$0xff] }
 0x3ef   : > { %5690 = vmatpush2.msra.mxu1 %v11101_v35  ;;  %9686 = vmatprep.mubr.msk.f32.mxu0 %vm2751_vm4, %v4905_v12  ;;  %v17035_v55 = vpop.f32.mrf.mxu1 }
 0x3f0   : > { %9710 = vmatprep.mubr.msk.f32.mxu1 %vm2751_vm4, %v4905_v12  ;;  %5137 = vmatmul.mubr.f32.gmra.mxu0 %v4904_v56  ;;  %v17038_v43 = vpop.f32.mrf.mxu0 }
 0x3f1   : > { %5346 = vmatmul.mubr.f32.gmra.mxu1 %v4904_v56  ;;  %9687 = vmatprep.mubr.msk.f32.mxu0 %vm2751_vm4, %v4907_v26  ;;  %v17041_v45 = vpop.f32.mrf.mxu1  ;;  %v4908_v56 = vld [vmem:[#allocation3 + $0xe0] sm:$0xff] }
 0x3f2   : > { %9711 = vmatprep.mubr.msk.f32.mxu1 %vm2751_vm4, %v4907_v26  ;;  %5836 = vmatprep.subr.mxu0 %v11103_v16  ;;  %v17044_v35 = vpop.f32.mrf.mxu0  ;;  %v4910_v16 = vld [vmem:[#allocation3 + $0xf0] sm:$0xff] }
 0x3f3   : > { %21048 = vst [vmem:[#allocation71_spill] sm:$0xff] %v17044_v35  ;;  %6045 = vmatprep.subr.mxu1 %v11105_v30  ;;  %v17046_v38 = vpop.f32.mrf.mxu1  ;;  %v21058_v35 = vld [vmem:[#allocation50_spill] sm:$0xff] }
 0x3f4   : > { %21049 = vst [vmem:[#allocation49_spill] sm:$0xff] %v17046_v38  ;;  %5143 = vmatmul.mubr.f32.gmra.mxu0 %v4906_v34  ;;  %v17048_v12 = vpop.f32.mrf.mxu0  ;;  %v21055_v38 = vld [vmem:[#allocation22_spill] sm:$0xff] }
 0x3f5   : > { %21050 = vst [vmem:[#allocation51_spill] sm:$0xff] %v17048_v12  ;;  %5352 = vmatmul.mubr.f32.gmra.mxu1 %v4906_v34  ;;  %9688 = vmatprep.mubr.msk.f32.mxu0 %vm2751_vm4, %v4909_v53  ;;  %v17051_v8 = vpop.f32.mrf.mxu1  ;;  %v4913_v34 = vld [vmem:[#allocation3 + $0x108] sm:$0xff]  ;;  %11106 = vtanh.f32 %v21055_v38 }
 0x3f6   : > { %21051 = vst [vmem:[#allocation97_spill] sm:$0xff] %v17051_v8  ;;  %9712 = vmatprep.mubr.msk.f32.mxu1 %vm2751_vm4, %v4909_v53  ;;  %v21057_v53 = vld [vmem:[#allocation40_spill] sm:$0xff] }
 0x3f7   : > { %11108 = vtanh.f32 %v21057_v53 }
 0x3f8   : > { %5149 = vmatmul.mubr.f32.gmra.mxu0 %v4908_v56  ;;  %v17054_v26 = vpop.f32.mrf.mxu0  ;;  %11110 = vtanh.f32 %v21058_v35  ;;  %v21065_v35 = vld [vmem:[#allocation72_spill] sm:$0xff] }
 0x3f9   : > { %21052 = vst [vmem:[#allocation62_spill] sm:$0xff] %v17054_v26  ;;  %5358 = vmatmul.mubr.f32.gmra.mxu1 %v4908_v56  ;;  %9689 = vmatprep.mubr.msk.f32.mxu0 %vm2751_vm4, %v4911_v17  ;;  %v17057_v30 = vpop.f32.mrf.mxu1  ;;  %v4912_v56 = vld [vmem:[#allocation3 + $0x100] sm:$0xff]  ;;  %v21059_v26 = vld [vmem:[#allocation52_spill] sm:$0xff] }
 0x3fa   : > { %21053 = vst [vmem:[#allocation94_spill] sm:$0xff] %v17057_v30  ;;  %9713 = vmatprep.mubr.msk.f32.mxu1 %vm2751_vm4, %v4911_v17  ;;  %v17060_v12 = vpop.f32.mrf.mxu0  ;;  %11112 = vtanh.f32 %v21059_v26  ;;  %v4915_v17 = vld [vmem:[#allocation3 + $0x118] sm:$0xff]  ;;  %v4914_v26 = vld [vmem:[#allocation3 + $0x110] sm:$0xff] }
 0x3fb   : > { %21054 = vst [vmem:[#allocation61_spill] sm:$0xff] %v17060_v12  ;;  %v17063_v8 = vpop.f32.mrf.mxu1  ;;  %v21061_v12 = vld [vmem:[#allocation85_spill] sm:$0xff] }
 0x3fc   : > { %21056 = vst [vmem:[#allocation67_spill] sm:$0xff] %v17063_v8  ;;  %5155 = vmatmul.mubr.f32.gmra.mxu0 %v4910_v16  ;;  %11114 = vtanh.f32 %v21061_v12  ;;  %v21063_v8 = vld [vmem:[#allocation83_spill] sm:$0xff]  ;;  %v4917_v12 = vld [vmem:[#allocation3 + $0x128] sm:$0xff] }
 0x3fd   : > { %5364 = vmatmul.mubr.f32.gmra.mxu1 %v4910_v16  ;;  %9690 = vmatprep.mubr.msk.f32.mxu0 %vm2751_vm4, %v4913_v34  ;;  %11116 = vtanh.f32 %v21063_v8 }
 0x3fe   : > { %9714 = vmatprep.mubr.msk.f32.mxu1 %vm2751_vm4, %v4913_v34  ;;  %v17070_v30 = vpop.f32.mrf.mxu0  ;;  %11118 = vtanh.f32 %v21065_v35  ;;  %v21067_v34 = vld [vmem:[#allocation68_spill] sm:$0xff] }
 0x3ff   : > { %21060 = vst [vmem:[#allocation21_spill] sm:$0xff] %v17070_v30  ;;  %v17073_v38 = vpop.f32.mrf.mxu1  ;;  %11120 = vtanh.f32 %v21067_v34  ;;  %v21068_v30 = vld [vmem:[#allocation70_spill] sm:$0xff] }
 0x400   : > { %21062 = vst [vmem:[#allocation18_spill] sm:$0xff] %v17073_v38  ;;  %5161 = vmatmul.mubr.f32.gmra.mxu0 %v4912_v56  ;;  %v17076_v53 = vpop.f32.mrf.mxu0  ;;  %11122 = vtanh.f32 %v21068_v30  ;;  %v21069_v38 = vld [vmem:[#allocation48_spill] sm:$0xff]  ;;  %v21075_v30 = vld [vmem:[#allocation45_spill] sm:$0xff] }
 0x401   : > { %21064 = vst [vmem:[#allocation57_spill] sm:$0xff] %v17076_v53  ;;  %5370 = vmatmul.mubr.f32.gmra.mxu1 %v4912_v56  ;;  %9691 = vmatprep.mubr.msk.f32.mxu0 %vm2751_vm4, %v4915_v17  ;;  %v17080_v16 = vpop.f32.mrf.mxu1  ;;  %11124 = vtanh.f32 %v21069_v38  ;;  %v21071_v53 = vld [vmem:[#allocation47_spill] sm:$0xff] }
 0x402   : > { %21066 = vst [vmem:[#allocation20_spill] sm:$0xff] %v17080_v16  ;;  %9715 = vmatprep.mubr.msk.f32.mxu1 %vm2751_vm4, %v4915_v17  ;;  %11126 = vtanh.f32 %v21071_v53  ;;  %v4916_v56 = vld [vmem:[#allocation3 + $0x120] sm:$0xff]  ;;  %v21073_v16 = vld [vmem:[#allocation46_spill] sm:$0xff] }
 0x403   : > { %11128 = vtanh.f32 %v21073_v16  ;;  %v4919_v17 = vld [vmem:[#allocation3 + $0x138] sm:$0xff]  ;;  %v21077_v53 = vld [vmem:[#allocation91_spill] sm:$0xff]  ;;  %v4918_v16 = vld [vmem:[#allocation3 + $0x130] sm:$0xff] }
 0x404   : > { %5167 = vmatmul.mubr.f32.gmra.mxu0 %v4914_v26  ;;  %v17086_v8 = vpop.f32.mrf.mxu0  ;;  %11130 = vtanh.f32 %v21075_v30  ;;  %v4921_v30 = vld [vmem:[#allocation3 + $0x148] sm:$0xff] }
 0x405   : > { %21070 = vst [vmem:[#allocation96_spill] sm:$0xff] %v17086_v8  ;;  %5376 = vmatmul.mubr.f32.gmra.mxu1 %v4914_v26  ;;  %9692 = vmatprep.mubr.msk.f32.mxu0 %vm2751_vm4, %v4917_v12  ;;  %v17090_v35 = vpop.f32.mrf.mxu1  ;;  %v17099_v8 = vpop.eup %11106  ;;  %11132 = vtanh.f32 %v21077_v53 }
 0x406   : > { %21072 = vst [vmem:[#allocation44_spill] sm:$0xff] %v17090_v35  ;;  %9716 = vmatprep.mubr.msk.f32.mxu1 %vm2751_vm4, %v4917_v12  ;;  %v17094_v34 = vpop.f32.mrf.mxu0  ;;  %v17102_v26 = vpop.eup %11108  ;;  %11134 = vtanh.f32 %v21079_v54 }
 0x407   : > { %21074 = vst [vmem:[#allocation36_spill] sm:$0xff] %v17094_v34  ;;  %v17097_v38 = vpop.f32.mrf.mxu1  ;;  %21078 = vst [vmem:[#allocation16_spill] sm:$0xff] %v17102_v26  ;;  %v17106_v12 = vpop.eup %11110  ;;  %v21080_v34 = vld [vmem:[#allocation60_spill] sm:$0xff] }
 0x408   : > { %21076 = vst [vmem:[#allocation24_spill] sm:$0xff] %v17097_v38  ;;  %5173 = vmatmul.mubr.f32.gmra.mxu0 %v4916_v56  ;;  %11136 = vtanh.f32 %v21080_v34  ;;  %v17112_v35 = vpop.eup %11112 }
 0x409   : > { %5382 = vmatmul.mubr.f32.gmra.mxu1 %v4916_v56  ;;  %9693 = vmatprep.mubr.msk.f32.mxu0 %vm2751_vm4, %v4919_v17  ;;  %11138 = vtanh.f32 %v16796_v59  ;;  %v17117_v54 = vpop.eup %11114 }
 0x40a   : > { %9717 = vmatprep.mubr.msk.f32.mxu1 %vm2751_vm4, %v4919_v17  ;;  %v17110_v38 = vpop.f32.mrf.mxu0  ;;  %11140 = vtanh.f32 %v16803_v60  ;;  %v17122_v26 = vpop.eup %11116  ;;  %v4920_v17 = vld [vmem:[#allocation3 + $0x140] sm:$0xff]  ;;  %v4923_v60 = vld [vmem:[#allocation3 + $0x158] sm:$0xff] }
 0x40b   : > { %21081 = vst [vmem:[#allocation43_spill] sm:$0xff] %v17110_v38  ;;  %v17115_v53 = vpop.f32.mrf.mxu1  ;;  %11142 = vtanh.f32 %v16829_v22  ;;  %v17128_v59 = vpop.eup %11118 }
 0x40c   : > { %21082 = vst [vmem:[#allocation54_spill] sm:$0xff] %v17115_v53  ;;  %5179 = vmatmul.mubr.f32.gmra.mxu0 %v4918_v16  ;;  %v17120_v56 = vpop.f32.mrf.mxu0  ;;  %11144 = vtanh.f32 %v16837_v19  ;;  %v17132_v53 = vpop.eup %11120  ;;  %v4922_v19 = vld [vmem:[#allocation3 + $0x150] sm:$0xff] }
 0x40d   : > { %21083 = vst [vmem:[#allocation17_spill] sm:$0xff] %v17120_v56  ;;  %5388 = vmatmul.mubr.f32.gmra.mxu1 %v4918_v16  ;;  %9694 = vmatprep.mubr.msk.f32.mxu0 %vm2751_vm4, %v4921_v30  ;;  %v17126_v34 = vpop.f32.mrf.mxu1  ;;  %11146 = vtanh.f32 %v16863_v39  ;;  %v17135_v56 = vpop.eup %11122  ;;  %v4925_v39 = vld [vmem:[#allocation3 + $0x168] sm:$0xff] }
 0x40e   : > { %21084 = vst [vmem:[#allocation98_spill] sm:$0xff] %v17126_v34  ;;  %9718 = vmatprep.mubr.msk.f32.mxu1 %vm2751_vm4, %v4921_v30  ;;  %11148 = vtanh.f32 %v16871_v63  ;;  %v17140_v16 = vpop.eup %11124 }
 0x40f   : > { %11150 = vtanh.f32 %v16893_v36  ;;  %v17146_v34 = vpop.eup %11126 }
 0x410   : > { %5185 = vmatmul.mubr.f32.gmra.mxu0 %v4920_v17  ;;  %v17138_v22 = vpop.f32.mrf.mxu0  ;;  %11152 = vtanh.f32 %v16901_v25  ;;  %v4924_v25 = vld [vmem:[#allocation3 + $0x160] sm:$0xff] }
 0x411   : > { %21085 = vst [vmem:[#allocation100_spill] sm:$0xff] %v17138_v22  ;;  %5394 = vmatmul.mubr.f32.gmra.mxu1 %v4920_v17  ;;  %9695 = vmatprep.mubr.msk.f32.mxu0 %vm2751_vm4, %v4923_v60  ;;  %v17144_v30 = vpop.f32.mrf.mxu1  ;;  %v17152_v22 = vpop.eup %11128  ;;  %11154 = vtanh.f32 %v16907_v2  ;;  %v4927_v2 = vld [vmem:[#allocation3 + $0x178] sm:$0xff] }
 0x412   : > { %21086 = vst [vmem:[#allocation103_spill] sm:$0xff] %v17144_v30  ;;  %9719 = vmatprep.mubr.msk.f32.mxu1 %vm2751_vm4, %v4923_v60  ;;  %v17150_v63 = vpop.f32.mrf.mxu0  ;;  %v17157_v17 = vpop.eup %11130  ;;  %11156 = vtanh.f32 %v16913_v28 }
 0x413   : > { %21087 = vst [vmem:[#allocation101_spill] sm:$0xff] %v17150_v63  ;;  %v17155_v36 = vpop.f32.mrf.mxu1  ;;  %v17160_v30 = vpop.eup %11132  ;;  %11158 = vtanh.f32 %v16904_v48 }
 0x414   : > { %21088 = vst [vmem:[#allocation102_spill] sm:$0xff] %v17155_v36  ;;  %5191 = vmatmul.mubr.f32.gmra.mxu0 %v4922_v19  ;;  %v17164_v60 = vpop.eup %11134  ;;  %11160 = vtanh.f32 %v16897_v46  ;;  %v4926_v46 = vld [vmem:[#allocation3 + $0x170] sm:$0xff] }
 0x415   : > { %5400 = vmatmul.mubr.f32.gmra.mxu1 %v4922_v19  ;;  %9696 = vmatprep.mubr.msk.f32.mxu0 %vm2751_vm4, %v4925_v39  ;;  %v17170_v63 = vpop.eup %11136  ;;  %11162 = vtanh.f32 %v16885_v52 }
 0x416   : > { %9720 = vmatprep.mubr.msk.f32.mxu1 %vm2751_vm4, %v4925_v39  ;;  %v17168_v36 = vpop.f32.mrf.mxu0  ;;  %v17175_v48 = vpop.eup %11138  ;;  %11164 = vtanh.f32 %v16889_v21 }
 0x417   : > { %v17173_v28 = vpop.f32.mrf.mxu1  ;;  %v17180_v38 = vpop.eup %11140  ;;  %11166 = vtanh.f32 %v16879_v50 }
 0x418   : > { %21089 = vst [vmem:[#allocation99_spill] sm:$0xff] %v17173_v28  ;;  %5197 = vmatmul.mubr.f32.gmra.mxu0 %v4924_v25  ;;  %v17178_v19 = vpop.f32.mrf.mxu0  ;;  %v17186_v52 = vpop.eup %11142  ;;  %11168 = vtanh.f32 %v16882_v0 }
 0x419   : > { %21090 = vst [vmem:[#allocation19_spill] sm:$0xff] %v17178_v19  ;;  %5406 = vmatmul.mubr.f32.gmra.mxu1 %v4924_v25  ;;  %9697 = vmatprep.mubr.msk.f32.mxu0 %vm2751_vm4, %v4927_v2  ;;  %v17184_v39 = vpop.f32.mrf.mxu1  ;;  %v17190_v21 = vpop.eup %11144  ;;  %11170 = vtanh.f32 %v16875_v57 }
 0x41a   : > { %21091 = vst [vmem:[#allocation55_spill] sm:$0xff] %v17184_v39  ;;  %9721 = vmatprep.mubr.msk.f32.mxu1 %vm2751_vm4, %v4927_v2  ;;  %v11147_v19 = vpop.eup %11146  ;;  %11172 = vtanh.f32 %v16867_v7  ;;  %v12401_v39 = vld [vmem:[#allocation3 + $0x8] sm:$0xff] }
 0x41b   : > { %v11149_v25 = vpop.eup %11148  ;;  %11174 = vtanh.f32 %v16855_v13  ;;  %v12402_v13 = vld [vmem:[#allocation3] sm:$0xff] }
 0x41c   : > { %5203 = vmatmul.mubr.f32.gmra.mxu0 %v4926_v46  ;;  %v17194_v50 = vpop.f32.mrf.mxu0  ;;  %v11151_v2 = vpop.eup %11150  ;;  %11176 = vtanh.f32 %v16859_v14 }
 0x41d   : > { %21092 = vst [vmem:[#allocation34_spill] sm:$0xff] %v17194_v50  ;;  %5412 = vmatmul.mubr.f32.gmra.mxu1 %v4926_v46  ;;  %9722 = vmatprep.mubr.msk.f32.mxu0 %vm2751_vm4, %v12401_v39  ;;  %v17198_v0 = vpop.f32.mrf.mxu1  ;;  %v11153_v7 = vpop.eup %11152  ;;  %11178 = vtanh.f32 %v16847_v37 }
 0x41e   : > { %9746 = vmatprep.mubr.msk.f32.mxu1 %vm2751_vm4, %v12401_v39  ;;  %v17202_v57 = vpop.f32.mrf.mxu0  ;;  %v11155_v28 = vpop.eup %11154  ;;  %11180 = vtanh.f32 %v16851_v1 }
 0x41f   : > { %v17205_v50 = vpop.f32.mrf.mxu1  ;;  %v11157_v46 = vpop.eup %11156  ;;  %11182 = vtanh.f32 %v16841_v5  ;;  %v12403_v5 = vld [vmem:[#allocation3 + $0x18] sm:$0xff] }
 0x420   : > { %21093 = vst [vmem:[#allocation23_spill] sm:$0xff] %v17205_v50  ;;  %5483 = vmatmul.mubr.f32.vlgmr.msra.gmra.mxu0 %v12402_v13  ;;  %v11159_v14 = vpop.eup %11158  ;;  %11184 = vtanh.f32 %v16833_v32 }
 0x421   : > { %5692 = vmatmul.mubr.f32.vlgmr.msra.gmra.mxu1 %v12402_v13  ;;  %5837 = vmatpush1.msra.mxu0 %v11155_v28  ;;  %v11161_v37 = vpop.eup %11160  ;;  %11186 = vtanh.f32 %v16819_v3 }
 0x422   : > { %6046 = vmatpush1.msra.mxu1 %v11157_v46  ;;  %5838 = vmatprep.subr.mxu0 %v11153_v7  ;;  %v17210_v39 = vpop.f32.mrf.mxu0  ;;  %v11163_v50 = vpop.eup %11162  ;;  %11188 = vtanh.f32 %v16823_v42  ;;  %v12404_v7 = vld [vmem:[#allocation3 + $0x10] sm:$0xff]  ;;  %v21095_v46 = vld [vmem:[#allocation76_spill] sm:$0xff] }
 0x423   : > { %6047 = vmatprep.subr.mxu1 %v11159_v14  ;;  %5839 = vmatpush1.msra.mxu0 %v11151_v2  ;;  %v17213_v1 = vpop.f32.mrf.mxu1  ;;  %v11165_v32 = vpop.eup %11164  ;;  %11190 = vtanh.f32 %v16812_v23 }
 0x424   : > { %6048 = vmatpush1.msra.mxu1 %v11161_v37  ;;  %9723 = vmatprep.mubr.msk.f32.mxu0 %vm2751_vm4, %v12403_v5  ;;  %v17217_v28 = vpop.f32.mrf.mxu0  ;;  %v11167_v2 = vpop.eup %11166  ;;  %11192 = vtanh.f32 %v16815_v29  ;;  %v21097_v37 = vld [vmem:[#allocation92_spill] sm:$0xff] }
 0x425   : > { %9747 = vmatprep.mubr.msk.f32.mxu1 %vm2751_vm4, %v12403_v5  ;;  %5840 = vmatprep.subr.mxu0 %v11163_v50  ;;  %v17221_v3 = vpop.f32.mrf.mxu1  ;;  %v11169_v42 = vpop.eup %11168  ;;  %11194 = vtanh.f32 %v16807_v11  ;;  %v12405_v11 = vld [vmem:[#allocation3 + $0x28] sm:$0xff] }
 0x426   : > { %6049 = vmatprep.subr.mxu1 %v11165_v32  ;;  %5489 = vmatmul.mubr.f32.gmra.mxu0 %v12404_v7  ;;  %v11171_v13 = vpop.eup %11170  ;;  %11196 = vtanh.f32 %v16799_v49 }
 0x427   : > { %5698 = vmatmul.mubr.f32.gmra.mxu1 %v12404_v7  ;;  %5841 = vmatpush1.msra.mxu0 %v11167_v2  ;;  %v11173_v50 = vpop.eup %11172  ;;  %11198 = vtanh.f32 %v21095_v46  ;;  %v21099_v2 = vld [vmem:[#allocation81_spill] sm:$0xff]  ;;  %v12406_v7 = vld [vmem:[#allocation3 + $0x20] sm:$0xff] }
 0x428   : > { %6050 = vmatpush1.msra.mxu1 %v11169_v42  ;;  %5842 = vmatprep.subr.mxu0 %v11149_v25  ;;  %v17226_v23 = vpop.f32.mrf.mxu0  ;;  %v11175_v14 = vpop.eup %11174  ;;  %11200 = vtanh.f32 %v21097_v37  ;;  %v21098_v25 = vld [vmem:[#allocation84_spill] sm:$0xff]  ;;  %v21101_v46 = vld [vmem:[#allocation69_spill] sm:$0xff] }
 0x429   : > { %21094 = vst [vmem:[#allocation41_spill] sm:$0xff] %v17226_v23  ;;  %6051 = vmatprep.subr.mxu1 %v11171_v13  ;;  %5843 = vmatpush1.msra.mxu0 %v11147_v19  ;;  %v17229_v29 = vpop.f32.mrf.mxu1  ;;  %v11177_v49 = vpop.eup %11176  ;;  %11202 = vtanh.f32 %v21098_v25  ;;  %v21100_v13 = vld [vmem:[#allocation90_spill] sm:$0xff] }
 0x42a   : > { %21096 = vst [vmem:[#allocation42_spill] sm:$0xff] %v17229_v29  ;;  %6052 = vmatpush1.msra.mxu1 %v11173_v50  ;;  %9724 = vmatprep.mubr.msk.f32.mxu0 %vm2751_vm4, %v12405_v11  ;;  %v17233_v5 = vpop.f32.mrf.mxu0  ;;  %v11179_v19 = vpop.eup %11178  ;;  %11204 = vtanh.f32 %v21099_v2  ;;  %v21103_v2 = vld [vmem:[#allocation73_spill] sm:$0xff] }
 0x42b   : > { %9748 = vmatprep.mubr.msk.f32.mxu1 %vm2751_vm4, %v12405_v11  ;;  %5844 = vmatprep.subr.mxu0 %v11175_v14  ;;  %v17237_v32 = vpop.f32.mrf.mxu1  ;;  %v11181_v42 = vpop.eup %11180  ;;  %11206 = vtanh.f32 %v21100_v13  ;;  %v21102_v11 = vld [vmem:[#allocation79_spill] sm:$0xff]  ;;  %v21107_v29 = vld [vmem:[#allocation89_spill] sm:$0xff] }
 0x42c   : > { %6053 = vmatprep.subr.mxu1 %v11177_v49  ;;  %5495 = vmatmul.mubr.f32.gmra.mxu0 %v12406_v7  ;;  %v11183_v50 = vpop.eup %11182  ;;  %11208 = vtanh.f32 %v21101_v46  ;;  %v12408_v46 = vld [vmem:[#allocation3 + $0x30] sm:$0xff] }
 0x42d   : > { %5704 = vmatmul.mubr.f32.gmra.mxu1 %v12406_v7  ;;  %5845 = vmatpush1.msra.mxu0 %v11179_v19  ;;  %v11185_v37 = vpop.eup %11184  ;;  %11210 = vtanh.f32 %v21102_v11  ;;  %v12407_v19 = vld [vmem:[#allocation3 + $0x38] sm:$0xff] }
 0x42e   : > { %6054 = vmatpush1.msra.mxu1 %v11181_v42  ;;  %5846 = vmatprep.subr.mxu0 %v17190_v21  ;;  %v17243_v14 = vpop.f32.mrf.mxu0  ;;  %v11187_v25 = vpop.eup %11186  ;;  %11212 = vtanh.f32 %v21103_v2  ;;  %v21104_v42 = vld [vmem:[#allocation82_spill] sm:$0xff] }
 0x42f   : > { %6055 = vmatprep.subr.mxu1 %v11183_v50  ;;  %5847 = vmatpush1.msra.mxu0 %v17186_v52  ;;  %v17247_v49 = vpop.f32.mrf.mxu1  ;;  %v11189_v21 = vpop.eup %11188  ;;  %11214 = vtanh.f32 %v21104_v42  ;;  %v21105_v50 = vld [vmem:[#allocation77_spill] sm:$0xff]  ;;  %v21106_v11 = vld [vmem:[#allocation86_spill] sm:$0xff] }
 0x430   : > { %6056 = vmatpush1.msra.mxu1 %v11185_v37  ;;  %9725 = vmatprep.mubr.msk.f32.mxu0 %vm2751_vm4, %v12407_v19  ;;  %v17251_v7 = vpop.f32.mrf.mxu0  ;;  %v11191_v52 = vpop.eup %11190  ;;  %11216 = vtanh.f32 %v21105_v50  ;;  %v21108_v42 = vld [vmem:[#allocation25_spill] sm:$0xff] }
 0x431   : > { %9749 = vmatprep.mubr.msk.f32.mxu1 %vm2751_vm4, %v12407_v19  ;;  %5848 = vmatprep.subr.mxu0 %v11187_v25  ;;  %v17255_v13 = vpop.f32.mrf.mxu1  ;;  %v11193_v37 = vpop.eup %11192  ;;  %11218 = vtanh.f32 %v21106_v11  ;;  %v21109_v11 = vld [vmem:[#allocation31_spill] sm:$0xff] }
 0x432   : > { %6057 = vmatprep.subr.mxu1 %v11189_v21  ;;  %5501 = vmatmul.mubr.f32.gmra.mxu0 %v12408_v46  ;;  %v11195_v2 = vpop.eup %11194  ;;  %11220 = vtanh.f32 %v21107_v29 }
 0x433   : > { %5710 = vmatmul.mubr.f32.gmra.mxu1 %v12408_v46  ;;  %5849 = vmatpush1.msra.mxu0 %v11191_v52  ;;  %v11197_v19 = vpop.eup %11196  ;;  %11222 = vtanh.f32 %v21108_v42  ;;  %v12409_v52 = vld [vmem:[#allocation3 + $0x48] sm:$0xff]  ;;  %v21110_v46 = vld [vmem:[#allocation29_spill] sm:$0xff]  ;;  %v12410_v42 = vld [vmem:[#allocation3 + $0x40] sm:$0xff] }
 0x434   : > { %6058 = vmatpush1.msra.mxu1 %v11193_v37  ;;  %5850 = vmatprep.subr.mxu0 %v17180_v38  ;;  %v17261_v25 = vpop.f32.mrf.mxu0  ;;  %v11199_v50 = vpop.eup %11198  ;;  %11224 = vtanh.f32 %v21109_v11 }
 0x435   : > { %6059 = vmatprep.subr.mxu1 %v11195_v2  ;;  %5851 = vmatpush1.msra.mxu0 %v17175_v48  ;;  %v17265_v21 = vpop.f32.mrf.mxu1  ;;  %v11201_v38 = vpop.eup %11200  ;;  %11226 = vtanh.f32 %v21110_v46  ;;  %v21111_v2 = vld [vmem:[#allocation15_spill] sm:$0xff]  ;;  %v12411_v46 = vld [vmem:[#allocation3 + $0x58] sm:$0xff] }
 0x436   : > { %6060 = vmatpush1.msra.mxu1 %v11197_v19  ;;  %9726 = vmatprep.mubr.msk.f32.mxu0 %vm2751_vm4, %v12409_v52  ;;  %v17269_v29 = vpop.f32.mrf.mxu0  ;;  %v11203_v48 = vpop.eup %11202  ;;  %11228 = vtanh.f32 %v21111_v2 }
 0x437   : > { %9750 = vmatprep.mubr.msk.f32.mxu1 %vm2751_vm4, %v12409_v52  ;;  %5852 = vmatprep.subr.mxu0 %v11199_v50  ;;  %v17273_v37 = vpop.f32.mrf.mxu1  ;;  %v11205_v19 = vpop.eup %11204  ;;  %11230 = vtanh.f32 %v16934_v10 }
 0x438   : > { %6061 = vmatprep.subr.mxu1 %v11201_v38  ;;  %5507 = vmatmul.mubr.f32.gmra.mxu0 %v12410_v42  ;;  %v11207_v23 = vpop.eup %11206  ;;  %11232 = vtanh.f32 %v16946_v31 }
 0x439   : > { %5716 = vmatmul.mubr.f32.gmra.mxu1 %v12410_v42  ;;  %5853 = vmatpush1.msra.mxu0 %v11203_v48  ;;  %v17277_v11 = vpop.f32.mrf.mxu0  ;;  %v11209_v52 = vpop.eup %11208  ;;  %11234 = vtanh.f32 %v16971_v18 }
 0x43a   : > { %6062 = vmatpush1.msra.mxu1 %v11205_v19  ;;  %5854 = vmatprep.subr.mxu0 %v17170_v63  ;;  %v17281_v50 = vpop.f32.mrf.mxu1  ;;  %v11211_v10 = vpop.eup %11210  ;;  %11236 = vtanh.f32 %v16977_v9 }
 0x43b   : > { %6063 = vmatprep.subr.mxu1 %v11207_v23  ;;  %5855 = vmatpush1.msra.mxu0 %v17164_v60  ;;  %v17285_v38 = vpop.f32.mrf.mxu0  ;;  %v11213_v63 = vpop.eup %11212  ;;  %11238 = vtanh.f32 %v16999_v47  ;;  %v12412_v23 = vld [vmem:[#allocation3 + $0x50] sm:$0xff] }
 0x43c   : > { %6064 = vmatpush1.msra.mxu1 %v11209_v52  ;;  %9727 = vmatprep.mubr.msk.f32.mxu0 %vm2751_vm4, %v12411_v46  ;;  %v17289_v31 = vpop.f32.mrf.mxu1  ;;  %v11215_v60 = vpop.eup %11214  ;;  %11240 = vtanh.f32 %v17006_v41  ;;  %v12413_v52 = vld [vmem:[#allocation3 + $0x68] sm:$0xff] }
 0x43d   : > { %9751 = vmatprep.mubr.msk.f32.mxu1 %vm2751_vm4, %v12411_v46  ;;  %5856 = vmatprep.subr.mxu0 %v11211_v10  ;;  %v17293_v18 = vpop.f32.mrf.mxu0  ;;  %v11217_v48 = vpop.eup %11216  ;;  %11242 = vtanh.f32 %v17022_v40  ;;  %v12414_v10 = vld [vmem:[#allocation3 + $0x60] sm:$0xff] }
 0x43e   : > { %6065 = vmatprep.subr.mxu1 %v11213_v63  ;;  %5513 = vmatmul.mubr.f32.gmra.mxu0 %v12412_v23  ;;  %v17296_v9 = vpop.f32.mrf.mxu1  ;;  %v11219_v47 = vpop.eup %11218  ;;  %11244 = vtanh.f32 %v17026_v44 }
 0x43f   : > { %5722 = vmatmul.mubr.f32.gmra.mxu1 %v12412_v23  ;;  %5857 = vmatpush1.msra.mxu0 %v11215_v60  ;;  %v17299_v2 = vpop.f32.mrf.mxu0  ;;  %v11221_v41 = vpop.eup %11220  ;;  %11246 = vtanh.f32 %v17038_v43 }
 0x440   : > { %6066 = vmatpush1.msra.mxu1 %v11217_v48  ;;  %5858 = vmatprep.subr.mxu0 %v17160_v30  ;;  %v17303_v42 = vpop.f32.mrf.mxu1  ;;  %v11223_v40 = vpop.eup %11222  ;;  %11248 = vtanh.f32 %v17041_v45 }
 0x441   : > { %6067 = vmatprep.subr.mxu1 %v11219_v47  ;;  %5859 = vmatpush1.msra.mxu0 %v17157_v17  ;;  %v17307_v19 = vpop.f32.mrf.mxu0  ;;  %v11225_v30 = vpop.eup %11224  ;;  %11250 = vtanh.f32 %v17032_v51  ;;  %v21112_v47 = vld [vmem:[#allocation16_spill] sm:$0xff] }
 0x442   : > { %6068 = vmatpush1.msra.mxu1 %v11221_v41  ;;  %9728 = vmatprep.mubr.msk.f32.mxu0 %vm2751_vm4, %v12413_v52  ;;  %v17311_v44 = vpop.f32.mrf.mxu1  ;;  %v11227_v17 = vpop.eup %11226  ;;  %11252 = vtanh.f32 %v17035_v55  ;;  %v21113_v41 = vld [vmem:[#allocation74_spill] sm:$0xff] }
 0x443   : > { %9752 = vmatprep.mubr.msk.f32.mxu1 %vm2751_vm4, %v12413_v52  ;;  %5860 = vmatprep.subr.mxu0 %v11223_v40  ;;  %v17315_v43 = vpop.f32.mrf.mxu0  ;;  %v11229_v46 = vpop.eup %11228  ;;  %11254 = vtanh.f32 %v17029_v24 }
 0x444   : > { %6069 = vmatprep.subr.mxu1 %v11225_v30  ;;  %5519 = vmatmul.mubr.f32.gmra.mxu0 %v12414_v10  ;;  %v17318_v45 = vpop.f32.mrf.mxu1  ;;  %v17323_v51 = vpop.eup %11230  ;;  %11256 = vtanh.f32 %v17024_v61  ;;  %v12415_v61 = vld [vmem:[#allocation3 + $0x78] sm:$0xff]  ;;  %v21115_v30 = vld [vmem:[#allocation65_spill] sm:$0xff] }
 0x445   : > { %5728 = vmatmul.mubr.f32.gmra.mxu1 %v12414_v10  ;;  %5861 = vmatpush1.msra.mxu0 %v11227_v17  ;;  %v17321_v63 = vpop.f32.mrf.mxu0  ;;  %v17329_v60 = vpop.eup %11232  ;;  %11258 = vtanh.f32 %v17016_v6 }
 0x446   : > { %6070 = vmatpush1.msra.mxu1 %v11229_v46  ;;  %5862 = vmatprep.subr.mxu0 %v17146_v34  ;;  %v17327_v55 = vpop.f32.mrf.mxu1  ;;  %v17336_v23 = vpop.eup %11234  ;;  %11260 = vtanh.f32 %v17019_v4  ;;  %v12416_v4 = vld [vmem:[#allocation3 + $0x70] sm:$0xff]  ;;  %v21116_v46 = vld [vmem:[#allocation78_spill] sm:$0xff] }
 0x447   : > { %6071 = vmatprep.subr.mxu1 %v17152_v22  ;;  %5863 = vmatpush1.msra.mxu0 %v17135_v56  ;;  %v17334_v24 = vpop.f32.mrf.mxu0  ;;  %v17343_v48 = vpop.eup %11236  ;;  %11262 = vtanh.f32 %v17010_v15 }
 0x448   : > { %6072 = vmatpush1.msra.mxu1 %v17140_v16  ;;  %9729 = vmatprep.mubr.msk.f32.mxu0 %vm2751_vm4, %v12415_v61  ;;  %v17341_v34 = vpop.f32.mrf.mxu1  ;;  %v17350_v56 = vpop.eup %11238  ;;  %11264 = vtanh.f32 %v17013_v27 }
 0x449   : > { %9753 = vmatprep.mubr.msk.f32.mxu1 %vm2751_vm4, %v12415_v61  ;;  %5864 = vmatprep.subr.mxu0 %v17128_v59  ;;  %v17348_v6 = vpop.f32.mrf.mxu0  ;;  %v17356_v16 = vpop.eup %11240  ;;  %11266 = vtanh.f32 %v17008_v33 }
 0x44a   : > { %6073 = vmatprep.subr.mxu1 %v17132_v53  ;;  %5525 = vmatmul.mubr.f32.gmra.mxu0 %v12416_v4  ;;  %v17354_v22 = vpop.f32.mrf.mxu1  ;;  %v11243_v59 = vpop.eup %11242  ;;  %11268 = vtanh.f32 %v17003_v62  ;;  %v12417_v62 = vld [vmem:[#allocation3 + $0x88] sm:$0xff] }
 0x44b   : > { %5734 = vmatmul.mubr.f32.gmra.mxu1 %v12416_v4  ;;  %5865 = vmatpush1.msra.mxu0 %v17117_v54  ;;  %v17360_v15 = vpop.f32.mrf.mxu0  ;;  %v11245_v53 = vpop.eup %11244  ;;  %11270 = vtanh.f32 %v16991_v58 }
 0x44c   : > { %6074 = vmatpush1.msra.mxu1 %v17122_v26  ;;  %5866 = vmatprep.subr.mxu0 %v17106_v12  ;;  %v17365_v27 = vpop.f32.mrf.mxu1  ;;  %v11247_v54 = vpop.eup %11246  ;;  %11272 = vtanh.f32 %v16995_v20  ;;  %v12418_v20 = vld [vmem:[#allocation3 + $0x80] sm:$0xff] }
 0x44d   : > { %6075 = vmatprep.subr.mxu1 %v17112_v35  ;;  %5867 = vmatpush1.msra.mxu0 %v17099_v8  ;;  %v17370_v33 = vpop.f32.mrf.mxu0  ;;  %v11249_v12 = vpop.eup %11248  ;;  %11274 = vtanh.f32 %v21113_v41  ;;  %v21114_v35 = vld [vmem:[#allocation63_spill] sm:$0xff]  ;;  %v12419_v41 = vld [vmem:[#allocation3 + $0x98] sm:$0xff] }
 0x44e   : > { %6076 = vmatpush1.msra.mxu1 %v21112_v47  ;;  %9730 = vmatprep.mubr.msk.f32.mxu0 %vm2751_vm4, %v12417_v62  ;;  %v17375_v26 = vpop.f32.mrf.mxu1  ;;  %v11251_v8 = vpop.eup %11250  ;;  %11276 = vtanh.f32 %v21114_v35 }
 0x44f   : > { %9754 = vmatprep.mubr.msk.f32.mxu1 %vm2751_vm4, %v12417_v62  ;;  %5884 = vmatprep.subr.mxu0 %v11247_v54  ;;  %v17379_v58 = vpop.f32.mrf.mxu0  ;;  %v11253_v52 = vpop.eup %11252  ;;  %11278 = vtanh.f32 %v21115_v30  ;;  %v21117_v54 = vld [vmem:[#allocation80_spill] sm:$0xff]  ;;  %v12420_v30 = vld [vmem:[#allocation3 + $0x90] sm:$0xff] }
 0x450   : > { %6093 = vmatprep.subr.mxu1 %v11249_v12  ;;  %5531 = vmatmul.mubr.f32.gmra.mxu0 %v12418_v20  ;;  %v17382_v40 = vpop.f32.mrf.mxu1  ;;  %v11255_v10 = vpop.eup %11254  ;;  %11280 = vtanh.f32 %v21116_v46  ;;  %v21118_v12 = vld [vmem:[#allocation64_spill] sm:$0xff] }
 0x451   : > { %5740 = vmatmul.mubr.f32.gmra.mxu1 %v12418_v20  ;;  %5885 = vmatpush2.msra.mxu0 %v11251_v8  ;;  %v17385_v17 = vpop.f32.mrf.mxu0  ;;  %v11257_v4 = vpop.eup %11256  ;;  %11282 = vtanh.f32 %v21117_v54 }
 0x452   : > { %6094 = vmatpush2.msra.mxu1 %v11253_v52  ;;  %5886 = vmatprep.subr.mxu0 %v11245_v53  ;;  %v17388_v61 = vpop.f32.mrf.mxu1  ;;  %v11259_v62 = vpop.eup %11258  ;;  %11284 = vtanh.f32 %v21118_v12  ;;  %v21119_v53 = vld [vmem:[#allocation87_spill] sm:$0xff]  ;;  %v21120_v52 = vld [vmem:[#allocation58_spill] sm:$0xff] }
 0x453   : > { %6095 = vmatprep.subr.mxu1 %v11255_v10  ;;  %5887 = vmatpush2.msra.mxu0 %v11243_v59  ;;  %v17391_v47 = vpop.f32.mrf.mxu0  ;;  %v11261_v35 = vpop.eup %11260  ;;  %11286 = vtanh.f32 %v21119_v53 }
 0x454   : > { %6096 = vmatpush2.msra.mxu1 %v11257_v4  ;;  %9731 = vmatprep.mubr.msk.f32.mxu0 %vm2751_vm4, %v12419_v41  ;;  %v17395_v8 = vpop.f32.mrf.mxu1  ;;  %v11263_v59 = vpop.eup %11262  ;;  %11288 = vtanh.f32 %v21120_v52  ;;  %v21121_v4 = vld [vmem:[#allocation53_spill] sm:$0xff] }
 0x455   : > { %9755 = vmatprep.mubr.msk.f32.mxu1 %vm2751_vm4, %v12419_v41  ;;  %5888 = vmatprep.subr.mxu0 %v11259_v62  ;;  %v17399_v20 = vpop.f32.mrf.mxu0  ;;  %v11265_v46 = vpop.eup %11264  ;;  %11290 = vtanh.f32 %v21121_v4  ;;  %v21122_v41 = vld [vmem:[#allocation88_spill] sm:$0xff] }
 0x456   : > { %6097 = vmatprep.subr.mxu1 %v11261_v35  ;;  %5537 = vmatmul.mubr.f32.gmra.mxu0 %v12420_v30  ;;  %v17402_v10 = vpop.f32.mrf.mxu1  ;;  %v11267_v12 = vpop.eup %11266  ;;  %11292 = vtanh.f32 %v21122_v41 }
 0x457   : > { %5746 = vmatmul.mubr.f32.gmra.mxu1 %v12420_v30  ;;  %5889 = vmatpush2.msra.mxu0 %v11263_v59  ;;  %v17405_v54 = vpop.f32.mrf.mxu0  ;;  %v11269_v35 = vpop.eup %11268  ;;  %11294 = vtanh.f32 %v17334_v24  ;;  %v12421_v59 = vld [vmem:[#allocation3 + $0xa8] sm:$0xff]  ;;  %v12422_v24 = vld [vmem:[#allocation3 + $0xa0] sm:$0xff] }
 0x458   : > { %6098 = vmatpush2.msra.mxu1 %v11265_v46  ;;  %5890 = vmatprep.subr.mxu0 %v17356_v16  ;;  %v17409_v62 = vpop.f32.mrf.mxu1  ;;  %v11271_v52 = vpop.eup %11270  ;;  %11296 = vtanh.f32 %v17341_v34 }
 0x459   : > { %6099 = vmatprep.subr.mxu1 %v11267_v12  ;;  %5891 = vmatpush2.msra.mxu0 %v17350_v56  ;;  %v17413_v53 = vpop.f32.mrf.mxu0  ;;  %v11273_v16 = vpop.eup %11272 }
 0x45a   : > { %6100 = vmatpush2.msra.mxu1 %v11269_v35  ;;  %9732 = vmatprep.mubr.msk.f32.mxu0 %vm2751_vm4, %v12421_v59  ;;  %v17417_v30 = vpop.f32.mrf.mxu1  ;;  %v11275_v56 = vpop.eup %11274 }
 0x45b   : > { %9756 = vmatprep.mubr.msk.f32.mxu1 %vm2751_vm4, %v12421_v59  ;;  %5892 = vmatprep.subr.mxu0 %v11271_v52  ;;  %v17420_v46 = vpop.f32.mrf.mxu0  ;;  %v11277_v12 = vpop.eup %11276 }
 0x45c   : > { %21123 = vst [vmem:[#allocation32_spill] sm:$0xff] %v17420_v46  ;;  %6101 = vmatprep.subr.mxu1 %v11273_v16  ;;  %5543 = vmatmul.mubr.f32.gmra.mxu0 %v12422_v24  ;;  %v17422_v4 = vpop.f32.mrf.mxu1  ;;  %v11279_v34 = vpop.eup %11278  ;;  %v21127_v46 = vld [vmem:[#allocation71_spill] sm:$0xff] }
 0x45d   : > { %5752 = vmatmul.mubr.f32.gmra.mxu1 %v12422_v24  ;;  %5893 = vmatpush2.msra.mxu0 %v11275_v56  ;;  %v17424_v41 = vpop.f32.mrf.mxu0  ;;  %v11281_v52 = vpop.eup %11280  ;;  %11298 = vtanh.f32 %v21127_v46  ;;  %v12423_v24 = vld [vmem:[#allocation3 + $0xb8] sm:$0xff] }
 0x45e   : > { %21124 = vst [vmem:[#allocation56_spill] sm:$0xff] %v17424_v41  ;;  %6102 = vmatpush2.msra.mxu1 %v11277_v12  ;;  %5894 = vmatprep.subr.mxu0 %v17343_v48  ;;  %v17427_v35 = vpop.f32.mrf.mxu1  ;;  %v11283_v16 = vpop.eup %11282  ;;  %v21129_v41 = vld [vmem:[#allocation49_spill] sm:$0xff] }
 0x45f   : > { %21125 = vst [vmem:[#allocation93_spill] sm:$0xff] %v17427_v35  ;;  %6103 = vmatprep.subr.mxu1 %v11279_v34  ;;  %5895 = vmatpush2.msra.mxu0 %v17336_v23  ;;  %v17430_v59 = vpop.f32.mrf.mxu0  ;;  %v11285_v12 = vpop.eup %11284  ;;  %11300 = vtanh.f32 %v21129_v41  ;;  %v21130_v34 = vld [vmem:[#allocation51_spill] sm:$0xff]  ;;  %v21132_v35 = vld [vmem:[#allocation97_spill] sm:$0xff] }
 0x460   : > { %21126 = vst [vmem:[#allocation59_spill] sm:$0xff] %v17430_v59  ;;  %6104 = vmatpush2.msra.mxu1 %v11281_v52  ;;  %9733 = vmatprep.mubr.msk.f32.mxu0 %vm2751_vm4, %v12423_v24  ;;  %v17434_v56 = vpop.f32.mrf.mxu1  ;;  %v11287_v23 = vpop.eup %11286  ;;  %11302 = vtanh.f32 %v21130_v34  ;;  %v12424_v59 = vld [vmem:[#allocation3 + $0xb0] sm:$0xff]  ;;  %v21135_v34 = vld [vmem:[#allocation94_spill] sm:$0xff] }
 0x461   : > { %21128 = vst [vmem:[#allocation95_spill] sm:$0xff] %v17434_v56  ;;  %9757 = vmatprep.mubr.msk.f32.mxu1 %vm2751_vm4, %v12423_v24  ;;  %5896 = vmatprep.subr.mxu0 %v11283_v16  ;;  %v17438_v48 = vpop.f32.mrf.mxu0  ;;  %v11289_v52 = vpop.eup %11288  ;;  %11304 = vtanh.f32 %v21132_v35  ;;  %v21133_v24 = vld [vmem:[#allocation62_spill] sm:$0xff] }
 0x462   : > { %6105 = vmatprep.subr.mxu1 %v11285_v12  ;;  %5549 = vmatmul.mubr.f32.gmra.mxu0 %v12424_v59  ;;  %v17441_v46 = vpop.f32.mrf.mxu1  ;;  %v11291_v41 = vpop.eup %11290  ;;  %11306 = vtanh.f32 %v21133_v24  ;;  %v21139_v24 = vld [vmem:[#allocation67_spill] sm:$0xff] }
 0x463   : > { %21131 = vst [vmem:[#allocation30_spill] sm:$0xff] %v17441_v46  ;;  %5758 = vmatmul.mubr.f32.gmra.mxu1 %v12424_v59  ;;  %5897 = vmatpush2.msra.mxu0 %v11287_v23  ;;  %v17444_v56 = vpop.f32.mrf.mxu0  ;;  %v11293_v12 = vpop.eup %11292  ;;  %11308 = vtanh.f32 %v21135_v34  ;;  %v21137_v59 = vld [vmem:[#allocation61_spill] sm:$0xff]  ;;  %v12425_v23 = vld [vmem:[#allocation3 + $0xc8] sm:$0xff]  ;;  %v12426_v34 = vld [vmem:[#allocation3 + $0xc0] sm:$0xff] }
 0x464   : > { %6106 = vmatpush2.msra.mxu1 %v11289_v52  ;;  %5898 = vmatprep.subr.mxu0 %v17329_v60  ;;  %v17448_v16 = vpop.f32.mrf.mxu1  ;;  %v11295_v35 = vpop.eup %11294  ;;  %11310 = vtanh.f32 %v21137_v59  ;;  %v21142_v59 = vld [vmem:[#allocation18_spill] sm:$0xff] }
 0x465   : > { %21134 = vst [vmem:[#allocation26_spill] sm:$0xff] %v17448_v16  ;;  %6107 = vmatprep.subr.mxu1 %v11291_v41  ;;  %5899 = vmatpush2.msra.mxu0 %v17323_v51  ;;  %v17452_v46 = vpop.f32.mrf.mxu0  ;;  %v11297_v60 = vpop.eup %11296  ;;  %11312 = vtanh.f32 %v21139_v24  ;;  %v21141_v51 = vld [vmem:[#allocation21_spill] sm:$0xff]  ;;  %v12427_v16 = vld [vmem:[#allocation3 + $0xd8] sm:$0xff] }
 0x466   : > { %21136 = vst [vmem:[#allocation66_spill] sm:$0xff] %v17452_v46  ;;  %6108 = vmatpush2.msra.mxu1 %v11293_v12  ;;  %9734 = vmatprep.mubr.msk.f32.mxu0 %vm2751_vm4, %v12425_v23  ;;  %v17456_v52 = vpop.f32.mrf.mxu1  ;;  %11314 = vtanh.f32 %v21141_v51  ;;  %v21146_v46 = vld [vmem:[#allocation20_spill] sm:$0xff] }
 0x467   : > { %21138 = vst [vmem:[#allocation39_spill] sm:$0xff] %v17456_v52  ;;  %9758 = vmatprep.mubr.msk.f32.mxu1 %vm2751_vm4, %v12425_v23  ;;  %5555 = vmatmul.mubr.f32.gmra.mxu0 %v12426_v34  ;;  %v17460_v41 = vpop.f32.mrf.mxu0  ;;  %11316 = vtanh.f32 %v21142_v59  ;;  %v21144_v23 = vld [vmem:[#allocation57_spill] sm:$0xff]  ;;  %v12429_v59 = vld [vmem:[#allocation3 + $0xe8] sm:$0xff] }
 0x468   : > { %21140 = vst [vmem:[#allocation38_spill] sm:$0xff] %v17460_v41  ;;  %5764 = vmatmul.mubr.f32.gmra.mxu1 %v12426_v34  ;;  %9735 = vmatprep.mubr.msk.f32.mxu0 %vm2751_vm4, %v12427_v16  ;;  %v17464_v12 = vpop.f32.mrf.mxu1  ;;  %11318 = vtanh.f32 %v21144_v23  ;;  %v12428_v34 = vld [vmem:[#allocation3 + $0xd0] sm:$0xff]  ;;  %v21148_v41 = vld [vmem:[#allocation96_spill] sm:$0xff] }
 0x469   : > { %9759 = vmatprep.mubr.msk.f32.mxu1 %vm2751_vm4, %v12427_v16  ;;  %6254 = vmatprep.subr.mxu0 %v11295_v35  ;;  %v17468_v24 = vpop.f32.mrf.mxu0  ;;  %11320 = vtanh.f32 %v21146_v46  ;;  %v21151_v23 = vld [vmem:[#allocation44_spill] sm:$0xff] }
 0x46a   : > { %21143 = vst [vmem:[#allocation104_spill] sm:$0xff] %v17468_v24  ;;  %6463 = vmatprep.subr.mxu1 %v11297_v60  ;;  %v17471_v52 = vpop.f32.mrf.mxu1  ;;  %11322 = vtanh.f32 %v21148_v41  ;;  %v17480_v35 = vpop.eup %11298  ;;  %v21153_v46 = vld [vmem:[#allocation36_spill] sm:$0xff]  ;;  %v12430_v41 = vld [vmem:[#allocation3 + $0xe0] sm:$0xff] }
 0x46b   : > { %21145 = vst [vmem:[#allocation35_spill] sm:$0xff] %v17471_v52  ;;  %5561 = vmatmul.mubr.f32.gmra.mxu0 %v12428_v34  ;;  %v17474_v51 = vpop.f32.mrf.mxu0  ;;  %21150 = vst [vmem:[#allocation28_spill] sm:$0xff] %v17480_v35  ;;  %11324 = vtanh.f32 %v21151_v23  ;;  %v12431_v23 = vld [vmem:[#allocation3 + $0xf8] sm:$0xff] }
 0x46c   : > { %21147 = vst [vmem:[#allocation37_spill] sm:$0xff] %v17474_v51  ;;  %5770 = vmatmul.mubr.f32.gmra.mxu1 %v12428_v34  ;;  %9736 = vmatprep.mubr.msk.f32.mxu0 %vm2751_vm4, %v12429_v59  ;;  %v17478_v16 = vpop.f32.mrf.mxu1  ;;  %v17484_v60 = vpop.eup %11300  ;;  %11326 = vtanh.f32 %v21153_v46  ;;  %v21155_v51 = vld [vmem:[#allocation24_spill] sm:$0xff]  ;;  %v21161_v46 = vld [vmem:[#allocation54_spill] sm:$0xff] }
 0x46d   : > { %21149 = vst [vmem:[#allocation33_spill] sm:$0xff] %v17478_v16  ;;  %9760 = vmatprep.mubr.msk.f32.mxu1 %vm2751_vm4, %v12429_v59  ;;  %21152 = vst [vmem:[#allocation27_spill] sm:$0xff] %v17484_v60  ;;  %v17487_v52 = vpop.eup %11302  ;;  %11328 = vtanh.f32 %v21155_v51  ;;  %v21158_v16 = vld [vmem:[#allocation43_spill] sm:$0xff] }
 0x46e   : > { %21154 = vst [vmem:[#allocation22_spill] sm:$0xff] %v17487_v52  ;;  %v17492_v24 = vpop.eup %11304  ;;  %11330 = vtanh.f32 %v21158_v16  ;;  %v21164_v52 = vld [vmem:[#allocation17_spill] sm:$0xff] }
 0x46f   : > { %5567 = vmatmul.mubr.f32.gmra.mxu0 %v12430_v41  ;;  %v17490_v34 = vpop.f32.mrf.mxu0  ;;  %21157 = vst [vmem:[#allocation50_spill] sm:$0xff] %v17492_v24  ;;  %v17498_v60 = vpop.eup %11306  ;;  %11332 = vtanh.f32 %v21161_v46 }
 0x470   : > { %21156 = vst [vmem:[#allocation40_spill] sm:$0xff] %v17490_v34  ;;  %5776 = vmatmul.mubr.f32.gmra.mxu1 %v12430_v41  ;;  %9737 = vmatprep.mubr.msk.f32.mxu0 %vm2751_vm4, %v12431_v23  ;;  %v17496_v59 = vpop.f32.mrf.mxu1  ;;  %21160 = vst [vmem:[#allocation85_spill] sm:$0xff] %v17498_v60  ;;  %v17504_v35 = vpop.eup %11308  ;;  %11334 = vtanh.f32 %v21164_v52  ;;  %v21167_v41 = vld [vmem:[#allocation98_spill] sm:$0xff]  ;;  %v12432_v34 = vld [vmem:[#allocation3 + $0xf0] sm:$0xff] }
 0x471   : > { %21159 = vst [vmem:[#allocation52_spill] sm:$0xff] %v17496_v59  ;;  %9761 = vmatprep.mubr.msk.f32.mxu1 %vm2751_vm4, %v12431_v23  ;;  %v17502_v51 = vpop.f32.mrf.mxu0  ;;  %21163 = vst [vmem:[#allocation72_spill] sm:$0xff] %v17504_v35  ;;  %v17509_v16 = vpop.eup %11310  ;;  %11336 = vtanh.f32 %v21167_v41  ;;  %v21169_v60 = vld [vmem:[#allocation100_spill] sm:$0xff]  ;;  %v21174_v41 = vld [vmem:[#allocation101_spill] sm:$0xff] }
 0x472   : > { %21162 = vst [vmem:[#allocation83_spill] sm:$0xff] %v17502_v51  ;;  %v17507_v24 = vpop.f32.mrf.mxu1  ;;  %21166 = vst [vmem:[#allocation70_spill] sm:$0xff] %v17509_v16  ;;  %v17512_v59 = vpop.eup %11312  ;;  %11338 = vtanh.f32 %v21169_v60  ;;  %v12433_v23 = vld [vmem:[#allocation3 + $0x108] sm:$0xff]  ;;  %v21171_v51 = vld [vmem:[#allocation103_spill] sm:$0xff] }
 0x473   : > { %21165 = vst [vmem:[#allocation68_spill] sm:$0xff] %v17507_v24  ;;  %5573 = vmatmul.mubr.f32.gmra.mxu0 %v12432_v34  ;;  %21168 = vst [vmem:[#allocation48_spill] sm:$0xff] %v17512_v59  ;;  %v17516_v46 = vpop.eup %11314  ;;  %11340 = vtanh.f32 %v21171_v51  ;;  %v21177_v60 = vld [vmem:[#allocation102_spill] sm:$0xff] }
 0x474   : > { %5782 = vmatmul.mubr.f32.gmra.mxu1 %v12432_v34  ;;  %9738 = vmatprep.mubr.msk.f32.mxu0 %vm2751_vm4, %v12433_v23  ;;  %21170 = vst [vmem:[#allocation47_spill] sm:$0xff] %v17516_v46  ;;  %v17522_v24 = vpop.eup %11316  ;;  %11342 = vtanh.f32 %v21174_v41  ;;  %v12434_v34 = vld [vmem:[#allocation3 + $0x100] sm:$0xff]  ;;  %v12435_v51 = vld [vmem:[#allocation3 + $0x118] sm:$0xff] }
 0x475   : > { %9762 = vmatprep.mubr.msk.f32.mxu1 %vm2751_vm4, %v12433_v23  ;;  %v17520_v52 = vpop.f32.mrf.mxu0  ;;  %21173 = vst [vmem:[#allocation45_spill] sm:$0xff] %v17522_v24  ;;  %v17527_v59 = vpop.eup %11318  ;;  %11344 = vtanh.f32 %v21177_v60  ;;  %v21185_v24 = vld [vmem:[#allocation55_spill] sm:$0xff] }
 0x476   : > { %21172 = vst [vmem:[#allocation46_spill] sm:$0xff] %v17520_v52  ;;  %v17525_v35 = vpop.f32.mrf.mxu1  ;;  %21176 = vst [vmem:[#allocation75_spill] sm:$0xff] %v17527_v59  ;;  %v17532_v46 = vpop.eup %11320  ;;  %11346 = vtanh.f32 %v17168_v36  ;;  %v21184_v52 = vld [vmem:[#allocation19_spill] sm:$0xff]  ;;  %v12436_v36 = vld [vmem:[#allocation3 + $0x110] sm:$0xff] }
 0x477   : > { %21175 = vst [vmem:[#allocation91_spill] sm:$0xff] %v17525_v35  ;;  %5579 = vmatmul.mubr.f32.gmra.mxu0 %v12434_v34  ;;  %v17530_v16 = vpop.f32.mrf.mxu0  ;;  %21179 = vst [vmem:[#allocation76_spill] sm:$0xff] %v17532_v46  ;;  %v17538_v41 = vpop.eup %11322  ;;  %v21182_v35 = vld [vmem:[#allocation99_spill] sm:$0xff] }
 0x478   : > { %21178 = vst [vmem:[#allocation60_spill] sm:$0xff] %v17530_v16  ;;  %5788 = vmatmul.mubr.f32.gmra.mxu1 %v12434_v34  ;;  %9739 = vmatprep.mubr.msk.f32.mxu0 %vm2751_vm4, %v12435_v51  ;;  %v17536_v23 = vpop.f32.mrf.mxu1  ;;  %21181 = vst [vmem:[#allocation84_spill] sm:$0xff] %v17538_v41  ;;  %11348 = vtanh.f32 %v21182_v35  ;;  %v17542_v60 = vpop.eup %11324  ;;  %v12437_v35 = vld [vmem:[#allocation3 + $0x128] sm:$0xff] }
 0x479   : > { %21180 = vst [vmem:[#allocation92_spill] sm:$0xff] %v17536_v23  ;;  %9763 = vmatprep.mubr.msk.f32.mxu1 %vm2751_vm4, %v12435_v51  ;;  %21183 = vst [vmem:[#allocation81_spill] sm:$0xff] %v17542_v60  ;;  %11350 = vtanh.f32 %v21184_v52  ;;  %v17545_v16 = vpop.eup %11326  ;;  %v21187_v23 = vld [vmem:[#allocation34_spill] sm:$0xff]  ;;  %v12438_v60 = vld [vmem:[#allocation3 + $0x120] sm:$0xff] }
 0x47a   : > { %11352 = vtanh.f32 %v21185_v24  ;;  %v17550_v46 = vpop.eup %11328 }
 0x47b   : > { %5585 = vmatmul.mubr.f32.gmra.mxu0 %v12436_v36  ;;  %v17548_v34 = vpop.f32.mrf.mxu0  ;;  %11354 = vtanh.f32 %v21187_v23  ;;  %v17556_v59 = vpop.eup %11330 }
 0x47c   : > { %21186 = vst [vmem:[#allocation90_spill] sm:$0xff] %v17548_v34  ;;  %5794 = vmatmul.mubr.f32.gmra.mxu1 %v12436_v36  ;;  %9740 = vmatprep.mubr.msk.f32.mxu0 %vm2751_vm4, %v12437_v35  ;;  %v17554_v51 = vpop.f32.mrf.mxu1  ;;  %11356 = vtanh.f32 %v17198_v0  ;;  %v17562_v52 = vpop.eup %11332  ;;  %v21191_v36 = vld [vmem:[#allocation23_spill] sm:$0xff]  ;;  %v12439_v0 = vld [vmem:[#allocation3 + $0x138] sm:$0xff] }
 0x47d   : > { %21188 = vst [vmem:[#allocation69_spill] sm:$0xff] %v17554_v51  ;;  %9764 = vmatprep.mubr.msk.f32.mxu1 %vm2751_vm4, %v12437_v35  ;;  %v17560_v24 = vpop.f32.mrf.mxu0  ;;  %11358 = vtanh.f32 %v17202_v57  ;;  %v17567_v23 = vpop.eup %11334 }
 0x47e   : > { %21189 = vst [vmem:[#allocation79_spill] sm:$0xff] %v17560_v24  ;;  %v17565_v34 = vpop.f32.mrf.mxu1  ;;  %11360 = vtanh.f32 %v21191_v36  ;;  %v17570_v51 = vpop.eup %11336 }
 0x47f   : > { %21190 = vst [vmem:[#allocation73_spill] sm:$0xff] %v17565_v34  ;;  %5591 = vmatmul.mubr.f32.gmra.mxu0 %v12438_v60  ;;  %11362 = vtanh.f32 %v17210_v39  ;;  %v17574_v35 = vpop.eup %11338  ;;  %v12440_v39 = vld [vmem:[#allocation3 + $0x130] sm:$0xff] }
 0x480   : > { %5800 = vmatmul.mubr.f32.gmra.mxu1 %v12438_v60  ;;  %9741 = vmatprep.mubr.msk.f32.mxu0 %vm2751_vm4, %v12439_v0  ;;  %11364 = vtanh.f32 %v17213_v1  ;;  %v17580_v34 = vpop.eup %11340  ;;  %v12441_v1 = vld [vmem:[#allocation3 + $0x148] sm:$0xff] }
 0x481   : > { %9765 = vmatprep.mubr.msk.f32.mxu1 %vm2751_vm4, %v12439_v0  ;;  %v17578_v57 = vpop.f32.mrf.mxu0  ;;  %11366 = vtanh.f32 %v17217_v28  ;;  %v17585_v24 = vpop.eup %11342 }
 0x482   : > { %21192 = vst [vmem:[#allocation82_spill] sm:$0xff] %v17578_v57  ;;  %v17583_v36 = vpop.f32.mrf.mxu1  ;;  %11368 = vtanh.f32 %v17221_v3  ;;  %v17590_v41 = vpop.eup %11344 }
 0x483   : > { %21193 = vst [vmem:[#allocation77_spill] sm:$0xff] %v17583_v36  ;;  %5597 = vmatmul.mubr.f32.gmra.mxu0 %v12440_v39  ;;  %v17588_v60 = vpop.f32.mrf.mxu0  ;;  %11370 = vtanh.f32 %v17243_v14  ;;  %v17596_v28 = vpop.eup %11346  ;;  %v12442_v14 = vld [vmem:[#allocation3 + $0x140] sm:$0xff] }
 0x484   : > { %21194 = vst [vmem:[#allocation86_spill] sm:$0xff] %v17588_v60  ;;  %5806 = vmatmul.mubr.f32.gmra.mxu1 %v12440_v39  ;;  %9742 = vmatprep.mubr.msk.f32.mxu0 %vm2751_vm4, %v12441_v1  ;;  %v17594_v0 = vpop.f32.mrf.mxu1  ;;  %11372 = vtanh.f32 %v17251_v7  ;;  %v12443_v7 = vld [vmem:[#allocation3 + $0x158] sm:$0xff] }
 0x485   : > { %21195 = vst [vmem:[#allocation89_spill] sm:$0xff] %v17594_v0  ;;  %9766 = vmatprep.mubr.msk.f32.mxu1 %vm2751_vm4, %v12441_v1  ;;  %v17600_v3 = vpop.eup %11348  ;;  %11374 = vtanh.f32 %v17277_v11 }
 0x486   : > { %v17603_v60 = vpop.eup %11350  ;;  %11376 = vtanh.f32 %v17285_v38 }
 0x487   : > { %5603 = vmatmul.mubr.f32.gmra.mxu0 %v12442_v14  ;;  %v17606_v39 = vpop.f32.mrf.mxu0  ;;  %v17608_v36 = vpop.eup %11352  ;;  %11378 = vtanh.f32 %v17307_v19 }
 0x488   : > { %21196 = vst [vmem:[#allocation25_spill] sm:$0xff] %v17606_v39  ;;  %5812 = vmatmul.mubr.f32.gmra.mxu1 %v12442_v14  ;;  %9743 = vmatprep.mubr.msk.f32.mxu0 %vm2751_vm4, %v12443_v7  ;;  %v17612_v1 = vpop.f32.mrf.mxu1  ;;  %v17614_v0 = vpop.eup %11354  ;;  %11380 = vtanh.f32 %v17315_v43  ;;  %v12444_v14 = vld [vmem:[#allocation3 + $0x150] sm:$0xff]  ;;  %v12445_v43 = vld [vmem:[#allocation3 + $0x168] sm:$0xff] }
 0x489   : > { %21197 = vst [vmem:[#allocation31_spill] sm:$0xff] %v17612_v1  ;;  %9767 = vmatprep.mubr.msk.f32.mxu1 %vm2751_vm4, %v12443_v7  ;;  %v17618_v11 = vpop.f32.mrf.mxu0  ;;  %v17620_v38 = vpop.eup %11356  ;;  %11382 = vtanh.f32 %v17321_v63 }
 0x48a   : > { %21198 = vst [vmem:[#allocation29_spill] sm:$0xff] %v17618_v11  ;;  %v17623_v39 = vpop.f32.mrf.mxu1  ;;  %v17625_v19 = vpop.eup %11358  ;;  %11384 = vtanh.f32 %v17327_v55 }
 0x48b   : > { %21199 = vst [vmem:[#allocation15_spill] sm:$0xff] %v17623_v39  ;;  %5609 = vmatmul.mubr.f32.gmra.mxu0 %v12444_v14  ;;  %v17628_v1 = vpop.eup %11360  ;;  %11386 = vtanh.f32 %v17318_v45  ;;  %v12446_v45 = vld [vmem:[#allocation3 + $0x160] sm:$0xff] }
 0x48c   : > { %5818 = vmatmul.mubr.f32.gmra.mxu1 %v12444_v14  ;;  %9744 = vmatprep.mubr.msk.f32.mxu0 %vm2751_vm4, %v12445_v43  ;;  %v17632_v7 = vpop.eup %11362  ;;  %11388 = vtanh.f32 %v17311_v44  ;;  %v12447_v44 = vld [vmem:[#allocation3 + $0x178] sm:$0xff] }
 0x48d   : > { %9768 = vmatprep.mubr.msk.f32.mxu1 %vm2751_vm4, %v12445_v43  ;;  %v17636_v63 = vpop.f32.mrf.mxu0  ;;  %v17638_v39 = vpop.eup %11364  ;;  %11390 = vtanh.f32 %v17299_v2 }
 0x48e   : > { %21200 = vst [vmem:[#allocation16_spill] sm:$0xff] %v17636_v63  ;;  %v17641_v55 = vpop.f32.mrf.mxu1  ;;  %v17643_v11 = vpop.eup %11366  ;;  %11392 = vtanh.f32 %v17303_v42 }
 0x48f   : > { %21201 = vst [vmem:[#allocation74_spill] sm:$0xff] %v17641_v55  ;;  %5615 = vmatmul.mubr.f32.gmra.mxu0 %v12446_v45  ;;  %v17646_v14 = vpop.f32.mrf.mxu0  ;;  %v17648_v57 = vpop.eup %11368  ;;  %11394 = vtanh.f32 %v17293_v18  ;;  %v12448_v18 = vld [vmem:[#allocation3 + $0x170] sm:$0xff] }
 0x490   : > { %21202 = vst [vmem:[#allocation63_spill] sm:$0xff] %v17646_v14  ;;  %5824 = vmatmul.mubr.f32.gmra.mxu1 %v12446_v45  ;;  %9745 = vmatprep.mubr.msk.f32.mxu0 %vm2751_vm4, %v12447_v44  ;;  %v17652_v43 = vpop.f32.mrf.mxu1  ;;  %v17654_v2 = vpop.eup %11370  ;;  %11396 = vtanh.f32 %v17296_v9 }
 0x491   : > { %21203 = vst [vmem:[#allocation65_spill] sm:$0xff] %v17652_v43  ;;  %9769 = vmatprep.mubr.msk.f32.mxu1 %vm2751_vm4, %v12447_v44  ;;  %v17658_v42 = vpop.eup %11372  ;;  %11398 = vtanh.f32 %v17289_v31  ;;  %v12449_v43 = vld [vmem:[#allocation3 + $0x8] sm:$0xff] }
 0x492   : > { %v17661_v14 = vpop.eup %11374  ;;  %11400 = vtanh.f32 %v17281_v50 }
 0x493   : > { %5621 = vmatmul.mubr.f32.gmra.mxu0 %v12448_v18  ;;  %v17664_v45 = vpop.f32.mrf.mxu0  ;;  %v11377_v55 = vpop.eup %11376  ;;  %11402 = vtanh.f32 %v17269_v29  ;;  %v12450_v29 = vld [vmem:[#allocation3] sm:$0xff] }
 0x494   : > { %21204 = vst [vmem:[#allocation78_spill] sm:$0xff] %v17664_v45  ;;  %5830 = vmatmul.mubr.f32.gmra.mxu1 %v12448_v18  ;;  %9770 = vmatprep.mubr.msk.f32.mxu0 %vm2751_vm4, %v12449_v43  ;;  %v17668_v9 = vpop.f32.mrf.mxu1  ;;  %v11379_v44 = vpop.eup %11378  ;;  %11404 = vtanh.f32 %v17273_v37 }
 0x495   : > { %9794 = vmatprep.mubr.msk.f32.mxu1 %vm2751_vm4, %v12449_v43  ;;  %v17672_v31 = vpop.f32.mrf.mxu0  ;;  %v11381_v50 = vpop.eup %11380  ;;  %11406 = vtanh.f32 %v17261_v25 }
 0x496   : > { %v17675_v45 = vpop.f32.mrf.mxu1  ;;  %v11383_v63 = vpop.eup %11382  ;;  %11408 = vtanh.f32 %v17265_v21 }
 0x497   : > { %21205 = vst [vmem:[#allocation80_spill] sm:$0xff] %v17675_v45  ;;  %5901 = vmatmul.mubr.f32.vlgmr.msra.gmra.mxu0 %v12450_v29  ;;  %v11385_v18 = vpop.eup %11384  ;;  %11410 = vtanh.f32 %v17255_v13  ;;  %v12451_v13 = vld [vmem:[#allocation3 + $0x18] sm:$0xff] }
 0x498   : > { %6110 = vmatmul.mubr.f32.vlgmr.msra.gmra.mxu1 %v12450_v29  ;;  %6255 = vmatpush1.msra.mxu0 %v11383_v63  ;;  %v11387_v37 = vpop.eup %11386  ;;  %11412 = vtanh.f32 %v17247_v49  ;;  %v21207_v29 = vld [vmem:[#allocation42_spill] sm:$0xff] }
 0x499   : > { %6464 = vmatpush1.msra.mxu1 %v11385_v18  ;;  %6256 = vmatprep.subr.mxu0 %v11381_v50  ;;  %v17680_v43 = vpop.f32.mrf.mxu0  ;;  %v11389_v25 = vpop.eup %11388  ;;  %11414 = vtanh.f32 %v17233_v5  ;;  %v21206_v50 = vld [vmem:[#allocation41_spill] sm:$0xff] }
 0x49a   : > { %6465 = vmatprep.subr.mxu1 %v11387_v37  ;;  %6257 = vmatpush1.msra.mxu0 %v11379_v44  ;;  %v17683_v21 = vpop.f32.mrf.mxu1  ;;  %v11391_v45 = vpop.eup %11390  ;;  %11416 = vtanh.f32 %v17237_v32  ;;  %v12452_v18 = vld [vmem:[#allocation3 + $0x10] sm:$0xff] }
 0x49b   : > { %6466 = vmatpush1.msra.mxu1 %v11389_v25  ;;  %9771 = vmatprep.mubr.msk.f32.mxu0 %vm2751_vm4, %v12451_v13  ;;  %v17687_v63 = vpop.f32.mrf.mxu0  ;;  %v11393_v49 = vpop.eup %11392  ;;  %11418 = vtanh.f32 %v21206_v50  ;;  %v12454_v50 = vld [vmem:[#allocation3 + $0x20] sm:$0xff] }
 0x49c   : > { %9795 = vmatprep.mubr.msk.f32.mxu1 %vm2751_vm4, %v12451_v13  ;;  %6258 = vmatprep.subr.mxu0 %v11391_v45  ;;  %v17691_v5 = vpop.f32.mrf.mxu1  ;;  %v11395_v44 = vpop.eup %11394  ;;  %11420 = vtanh.f32 %v21207_v29 }
 0x49d   : > { %6467 = vmatprep.subr.mxu1 %v11393_v49  ;;  %5907 = vmatmul.mubr.f32.gmra.mxu0 %v12452_v18  ;;  %v11397_v32 = vpop.eup %11396  ;;  %11422 = vtanh.f32 %v17348_v6  ;;  %v12453_v6 = vld [vmem:[#allocation3 + $0x28] sm:$0xff] }
 0x49e   : > { %6116 = vmatmul.mubr.f32.gmra.mxu1 %v12452_v18  ;;  %6259 = vmatpush1.msra.mxu0 %v11395_v44  ;;  %v11399_v37 = vpop.eup %11398  ;;  %11424 = vtanh.f32 %v17354_v22 }
 0x49f   : > { %6468 = vmatpush1.msra.mxu1 %v11397_v32  ;;  %6260 = vmatprep.subr.mxu0 %v11377_v55  ;;  %v17696_v25 = vpop.f32.mrf.mxu0  ;;  %v11401_v45 = vpop.eup %11400  ;;  %11426 = vtanh.f32 %v17360_v15  ;;  %v12456_v32 = vld [vmem:[#allocation3 + $0x30] sm:$0xff] }
 0x4a0   : > { %6469 = vmatprep.subr.mxu1 %v11399_v37  ;;  %6261 = vmatpush1.msra.mxu0 %v17661_v14  ;;  %v17700_v13 = vpop.f32.mrf.mxu1  ;;  %v11403_v49 = vpop.eup %11402  ;;  %11428 = vtanh.f32 %v17365_v27 }
 0x4a1   : > { %6470 = vmatpush1.msra.mxu1 %v11401_v45  ;;  %9772 = vmatprep.mubr.msk.f32.mxu0 %vm2751_vm4, %v12453_v6  ;;  %v17704_v22 = vpop.f32.mrf.mxu0  ;;  %v11405_v55 = vpop.eup %11404  ;;  %11430 = vtanh.f32 %v17370_v33 }
 0x4a2   : > { %9796 = vmatprep.mubr.msk.f32.mxu1 %vm2751_vm4, %v12453_v6  ;;  %6262 = vmatprep.subr.mxu0 %v11403_v49  ;;  %v17708_v15 = vpop.f32.mrf.mxu1  ;;  %v11407_v14 = vpop.eup %11406  ;;  %11432 = vtanh.f32 %v17375_v26  ;;  %v21209_v6 = vld [vmem:[#allocation56_spill] sm:$0xff] }
 0x4a3   : > { %6471 = vmatprep.subr.mxu1 %v11405_v55  ;;  %5913 = vmatmul.mubr.f32.gmra.mxu0 %v12454_v50  ;;  %v11409_v27 = vpop.eup %11408  ;;  %11434 = vtanh.f32 %v17379_v58  ;;  %v12455_v58 = vld [vmem:[#allocation3 + $0x38] sm:$0xff] }
 0x4a4   : > { %6122 = vmatmul.mubr.f32.gmra.mxu1 %v12454_v50  ;;  %6263 = vmatpush1.msra.mxu0 %v11407_v14  ;;  %v11411_v44 = vpop.eup %11410  ;;  %11436 = vtanh.f32 %v17382_v40  ;;  %v21210_v14 = vld [vmem:[#allocation93_spill] sm:$0xff]  ;;  %v21211_v50 = vld [vmem:[#allocation59_spill] sm:$0xff] }
 0x4a5   : > { %6472 = vmatpush1.msra.mxu1 %v11409_v27  ;;  %6264 = vmatprep.subr.mxu0 %v17658_v42  ;;  %v17714_v33 = vpop.f32.mrf.mxu0  ;;  %v11413_v29 = vpop.eup %11412  ;;  %11438 = vtanh.f32 %v17385_v17  ;;  %v21212_v27 = vld [vmem:[#allocation95_spill] sm:$0xff] }
 0x4a6   : > { %6473 = vmatprep.subr.mxu1 %v11411_v44  ;;  %6265 = vmatpush1.msra.mxu0 %v17654_v2  ;;  %v17718_v26 = vpop.f32.mrf.mxu1  ;;  %v11415_v18 = vpop.eup %11414  ;;  %11440 = vtanh.f32 %v17388_v61 }
 0x4a7   : > { %6474 = vmatpush1.msra.mxu1 %v11413_v29  ;;  %9773 = vmatprep.mubr.msk.f32.mxu0 %vm2751_vm4, %v12455_v58  ;;  %v17722_v40 = vpop.f32.mrf.mxu0  ;;  %v11417_v42 = vpop.eup %11416  ;;  %11442 = vtanh.f32 %v17391_v47 }
 0x4a8   : > { %9797 = vmatprep.mubr.msk.f32.mxu1 %vm2751_vm4, %v12455_v58  ;;  %6266 = vmatprep.subr.mxu0 %v11415_v18  ;;  %v17726_v17 = vpop.f32.mrf.mxu1  ;;  %v11419_v2 = vpop.eup %11418  ;;  %11444 = vtanh.f32 %v17395_v8 }
 0x4a9   : > { %6475 = vmatprep.subr.mxu1 %v11417_v42  ;;  %5919 = vmatmul.mubr.f32.gmra.mxu0 %v12456_v32  ;;  %v11421_v61 = vpop.eup %11420  ;;  %11446 = vtanh.f32 %v17399_v20  ;;  %v21215_v42 = vld [vmem:[#allocation38_spill] sm:$0xff] }
 0x4aa   : > { %6128 = vmatmul.mubr.f32.gmra.mxu1 %v12456_v32  ;;  %6267 = vmatpush1.msra.mxu0 %v11419_v2  ;;  %v17730_v37 = vpop.eup %11422  ;;  %11448 = vtanh.f32 %v17402_v10  ;;  %v12457_v10 = vld [vmem:[#allocation3 + $0x48] sm:$0xff]  ;;  %v21218_v2 = vld [vmem:[#allocation66_spill] sm:$0xff] }
 0x4ab   : > { %6476 = vmatpush1.msra.mxu1 %v11421_v61  ;;  %6268 = vmatprep.subr.mxu0 %v17643_v11  ;;  %v17734_v47 = vpop.f32.mrf.mxu0  ;;  %v17736_v45 = vpop.eup %11424  ;;  %11450 = vtanh.f32 %v17405_v54 }
 0x4ac   : > { %6477 = vmatprep.subr.mxu1 %v17648_v57  ;;  %6269 = vmatpush1.msra.mxu0 %v17632_v7  ;;  %v17741_v8 = vpop.f32.mrf.mxu1  ;;  %v17743_v20 = vpop.eup %11426  ;;  %11452 = vtanh.f32 %v17409_v62  ;;  %v12458_v62 = vld [vmem:[#allocation3 + $0x40] sm:$0xff]  ;;  %v21208_v7 = vld [vmem:[#allocation32_spill] sm:$0xff] }
 0x4ad   : > { %6478 = vmatpush1.msra.mxu1 %v17638_v39  ;;  %9774 = vmatprep.mubr.msk.f32.mxu0 %vm2751_vm4, %v12457_v10  ;;  %v17748_v11 = vpop.f32.mrf.mxu0  ;;  %v17750_v49 = vpop.eup %11428  ;;  %11454 = vtanh.f32 %v17413_v53 }
 0x4ae   : > { %9798 = vmatprep.mubr.msk.f32.mxu1 %vm2751_vm4, %v12457_v10  ;;  %6270 = vmatprep.subr.mxu0 %v17625_v19  ;;  %v17755_v54 = vpop.f32.mrf.mxu1  ;;  %v17757_v57 = vpop.eup %11430  ;;  %11456 = vtanh.f32 %v17417_v30  ;;  %v21222_v10 = vld [vmem:[#allocation26_spill] sm:$0xff] }
 0x4af   : > { %6479 = vmatprep.subr.mxu1 %v17628_v1  ;;  %5925 = vmatmul.mubr.f32.gmra.mxu0 %v12458_v62  ;;  %v17761_v39 = vpop.eup %11432  ;;  %11458 = vtanh.f32 %v21208_v7 }
 0x4b0   : > { %6134 = vmatmul.mubr.f32.gmra.mxu1 %v12458_v62  ;;  %6271 = vmatpush1.msra.mxu0 %v17614_v0  ;;  %v17765_v53 = vpop.f32.mrf.mxu0  ;;  %v17767_v19 = vpop.eup %11434  ;;  %11460 = vtanh.f32 %v17422_v4  ;;  %v12459_v4 = vld [vmem:[#allocation3 + $0x58] sm:$0xff]  ;;  %v21223_v62 = vld [vmem:[#allocation84_spill] sm:$0xff] }
 0x4b1   : > { %6480 = vmatpush1.msra.mxu1 %v17620_v38  ;;  %6272 = vmatprep.subr.mxu0 %v17603_v60  ;;  %v17772_v30 = vpop.f32.mrf.mxu1  ;;  %v17774_v1 = vpop.eup %11436  ;;  %11462 = vtanh.f32 %v21209_v6  ;;  %v21225_v6 = vld [vmem:[#allocation30_spill] sm:$0xff] }
 0x4b2   : > { %6481 = vmatprep.subr.mxu1 %v17608_v36  ;;  %6273 = vmatpush1.msra.mxu0 %v17596_v28  ;;  %v17779_v0 = vpop.f32.mrf.mxu0  ;;  %v17781_v55 = vpop.eup %11438  ;;  %11464 = vtanh.f32 %v21210_v14  ;;  %v21226_v14 = vld [vmem:[#allocation81_spill] sm:$0xff] }
 0x4b3   : > { %6482 = vmatpush1.msra.mxu1 %v17600_v3  ;;  %9775 = vmatprep.mubr.msk.f32.mxu0 %vm2751_vm4, %v12459_v4  ;;  %v17786_v60 = vpop.f32.mrf.mxu1  ;;  %v17788_v38 = vpop.eup %11440  ;;  %11466 = vtanh.f32 %v21211_v50  ;;  %v12460_v3 = vld [vmem:[#allocation3 + $0x50] sm:$0xff] }
 0x4b4   : > { %9799 = vmatprep.mubr.msk.f32.mxu1 %vm2751_vm4, %v12459_v4  ;;  %6274 = vmatprep.subr.mxu0 %v17585_v24  ;;  %v17793_v36 = vpop.f32.mrf.mxu0  ;;  %v17795_v28 = vpop.eup %11442  ;;  %11468 = vtanh.f32 %v21212_v27  ;;  %v21229_v27 = vld [vmem:[#allocation104_spill] sm:$0xff] }
 0x4b5   : > { %6483 = vmatprep.subr.mxu1 %v17590_v41  ;;  %5931 = vmatmul.mubr.f32.gmra.mxu0 %v12460_v3  ;;  %v17799_v44 = vpop.f32.mrf.mxu1  ;;  %v17801_v29 = vpop.eup %11444  ;;  %11470 = vtanh.f32 %v17438_v48 }
 0x4b6   : > { %6140 = vmatmul.mubr.f32.gmra.mxu1 %v12460_v3  ;;  %6275 = vmatpush1.msra.mxu0 %v17574_v35  ;;  %v17805_v24 = vpop.f32.mrf.mxu0  ;;  %v17807_v18 = vpop.eup %11446  ;;  %11472 = vtanh.f32 %v17444_v56  ;;  %v12461_v56 = vld [vmem:[#allocation3 + $0x68] sm:$0xff] }
 0x4b7   : > { %21213 = vst [vmem:[#allocation64_spill] sm:$0xff] %v17805_v24  ;;  %6484 = vmatpush1.msra.mxu1 %v17580_v34  ;;  %6276 = vmatprep.subr.mxu0 %v17567_v23  ;;  %v17812_v41 = vpop.f32.mrf.mxu1  ;;  %v17814_v58 = vpop.eup %11448  ;;  %11474 = vtanh.f32 %v21215_v42  ;;  %v21230_v3 = vld [vmem:[#allocation76_spill] sm:$0xff]  ;;  %v21231_v42 = vld [vmem:[#allocation47_spill] sm:$0xff] }
 0x4b8   : > { %21214 = vst [vmem:[#allocation87_spill] sm:$0xff] %v17812_v41  ;;  %6485 = vmatprep.subr.mxu1 %v17570_v51  ;;  %6277 = vmatpush1.msra.mxu0 %v17556_v59  ;;  %v17819_v48 = vpop.f32.mrf.mxu0  ;;  %v17821_v35 = vpop.eup %11450  ;;  %11476 = vtanh.f32 %v17464_v12  ;;  %v21220_v12 = vld [vmem:[#allocation39_spill] sm:$0xff]  ;;  %v21258_v24 = vld [vmem:[#allocation60_spill] sm:$0xff] }
 0x4b9   : > { %21216 = vst [vmem:[#allocation58_spill] sm:$0xff] %v17819_v48  ;;  %6486 = vmatpush1.msra.mxu1 %v17562_v52  ;;  %9776 = vmatprep.mubr.msk.f32.mxu0 %vm2751_vm4, %v12461_v56  ;;  %v17826_v34 = vpop.f32.mrf.mxu1  ;;  %v17828_v23 = vpop.eup %11452  ;;  %11478 = vtanh.f32 %v21218_v2  ;;  %v12462_v52 = vld [vmem:[#allocation3 + $0x60] sm:$0xff] }
 0x4ba   : > { %21217 = vst [vmem:[#allocation53_spill] sm:$0xff] %v17826_v34  ;;  %9800 = vmatprep.mubr.msk.f32.mxu1 %vm2751_vm4, %v12461_v56  ;;  %6278 = vmatprep.subr.mxu0 %v17545_v16  ;;  %v17833_v59 = vpop.f32.mrf.mxu0  ;;  %v17835_v51 = vpop.eup %11454  ;;  %11480 = vtanh.f32 %v21220_v12  ;;  %v21232_v12 = vld [vmem:[#allocation35_spill] sm:$0xff] }
 0x4bb   : > { %21219 = vst [vmem:[#allocation88_spill] sm:$0xff] %v17833_v59  ;;  %6487 = vmatprep.subr.mxu1 %v17550_v46  ;;  %5937 = vmatmul.mubr.f32.gmra.mxu0 %v12462_v52  ;;  %v17839_v32 = vpop.f32.mrf.mxu1  ;;  %v17841_v61 = vpop.eup %11456  ;;  %11482 = vtanh.f32 %v21222_v10  ;;  %v21227_v46 = vld [vmem:[#allocation75_spill] sm:$0xff]  ;;  %v12463_v10 = vld [vmem:[#allocation3 + $0x78] sm:$0xff]  ;;  %v21243_v59 = vld [vmem:[#allocation52_spill] sm:$0xff] }
 0x4bc   : > { %21221 = vst [vmem:[#allocation71_spill] sm:$0xff] %v17839_v32  ;;  %6146 = vmatmul.mubr.f32.gmra.mxu1 %v12462_v52  ;;  %6279 = vmatpush1.msra.mxu0 %v21223_v62  ;;  %v17845_v16 = vpop.f32.mrf.mxu0  ;;  %v17847_v7 = vpop.eup %11458  ;;  %11484 = vtanh.f32 %v21225_v6  ;;  %v21233_v52 = vld [vmem:[#allocation45_spill] sm:$0xff]  ;;  %v21240_v32 = vld [vmem:[#allocation40_spill] sm:$0xff]  ;;  %v21247_v48 = vld [vmem:[#allocation83_spill] sm:$0xff] }
 0x4bd   : > { %21224 = vst [vmem:[#allocation49_spill] sm:$0xff] %v17845_v16  ;;  %6488 = vmatpush1.msra.mxu1 %v21226_v14  ;;  %6280 = vmatprep.subr.mxu0 %v21227_v46  ;;  %v17852_v4 = vpop.f32.mrf.mxu1  ;;  %v17854_v50 = vpop.eup %11460  ;;  %11486 = vtanh.f32 %v21229_v27  ;;  %v21234_v14 = vld [vmem:[#allocation37_spill] sm:$0xff]  ;;  %v21235_v46 = vld [vmem:[#allocation70_spill] sm:$0xff]  ;;  %v21252_v41 = vld [vmem:[#allocation27_spill] sm:$0xff] }
 0x4be   : > { %21228 = vst [vmem:[#allocation51_spill] sm:$0xff] %v17852_v4  ;;  %6489 = vmatprep.subr.mxu1 %v21230_v3  ;;  %6281 = vmatpush1.msra.mxu0 %v21231_v42  ;;  %v17859_v56 = vpop.f32.mrf.mxu0  ;;  %v17861_v2 = vpop.eup %11462  ;;  %11488 = vtanh.f32 %v21232_v12  ;;  %v21237_v42 = vld [vmem:[#allocation33_spill] sm:$0xff]  ;;  %v21238_v12 = vld [vmem:[#allocation48_spill] sm:$0xff] }
 0x4bf   : > { %6490 = vmatpush1.msra.mxu1 %v21233_v52  ;;  %9777 = vmatprep.mubr.msk.f32.mxu0 %vm2751_vm4, %v12463_v10  ;;  %v17866_v62 = vpop.f32.mrf.mxu1  ;;  %v17868_v6 = vpop.eup %11464  ;;  %11490 = vtanh.f32 %v21234_v14  ;;  %v12464_v52 = vld [vmem:[#allocation3 + $0x70] sm:$0xff] }
 0x4c0   : > { %9801 = vmatprep.mubr.msk.f32.mxu1 %vm2751_vm4, %v12463_v10  ;;  %6282 = vmatprep.subr.mxu0 %v21235_v46  ;;  %v17873_v27 = vpop.f32.mrf.mxu0  ;;  %v11467_v3 = vpop.eup %11466  ;;  %11492 = vtanh.f32 %v21237_v42  ;;  %v21241_v14 = vld [vmem:[#allocation85_spill] sm:$0xff]  ;;  %v21245_v42 = vld [vmem:[#allocation22_spill] sm:$0xff] }
 0x4c1   : > { %21236 = vst [vmem:[#allocation97_spill] sm:$0xff] %v17873_v27  ;;  %6491 = vmatprep.subr.mxu1 %v21238_v12  ;;  %5943 = vmatmul.mubr.f32.gmra.mxu0 %v12464_v52  ;;  %v17877_v4 = vpop.f32.mrf.mxu1  ;;  %v11469_v16 = vpop.eup %11468  ;;  %11494 = vtanh.f32 %v21240_v32  ;;  %v21244_v27 = vld [vmem:[#allocation72_spill] sm:$0xff] }
 0x4c2   : > { %21239 = vst [vmem:[#allocation62_spill] sm:$0xff] %v17877_v4  ;;  %6152 = vmatmul.mubr.f32.gmra.mxu1 %v12464_v52  ;;  %6283 = vmatpush1.msra.mxu0 %v21241_v14  ;;  %v17881_v10 = vpop.f32.mrf.mxu0  ;;  %v11471_v46 = vpop.eup %11470  ;;  %11496 = vtanh.f32 %v21243_v59  ;;  %v21248_v4 = vld [vmem:[#allocation50_spill] sm:$0xff]  ;;  %v21249_v32 = vld [vmem:[#allocation28_spill] sm:$0xff] }
 0x4c3   : > { %21242 = vst [vmem:[#allocation94_spill] sm:$0xff] %v17881_v10  ;;  %6492 = vmatpush1.msra.mxu1 %v21244_v27  ;;  %6284 = vmatprep.subr.mxu0 %v21245_v42  ;;  %v17886_v12 = vpop.f32.mrf.mxu1  ;;  %v11473_v34 = vpop.eup %11472  ;;  %11498 = vtanh.f32 %v21247_v48  ;;  %v21251_v10 = vld [vmem:[#allocation68_spill] sm:$0xff] }
 0x4c4   : > { %21246 = vst [vmem:[#allocation61_spill] sm:$0xff] %v17886_v12  ;;  %6493 = vmatprep.subr.mxu1 %v21248_v4  ;;  %6285 = vmatpush1.msra.mxu0 %v21249_v32  ;;  %v17891_v52 = vpop.f32.mrf.mxu0  ;;  %v11475_v14 = vpop.eup %11474  ;;  %11500 = vtanh.f32 %v21251_v10  ;;  %v12465_v59 = vld [vmem:[#allocation3 + $0x88] sm:$0xff]  ;;  %v21254_v12 = vld [vmem:[#allocation46_spill] sm:$0xff]  ;;  %v21256_v32 = vld [vmem:[#allocation91_spill] sm:$0xff] }
 0x4c5   : > { %21250 = vst [vmem:[#allocation67_spill] sm:$0xff] %v17891_v52  ;;  %6494 = vmatpush1.msra.mxu1 %v21252_v41  ;;  %9778 = vmatprep.mubr.msk.f32.mxu0 %vm2751_vm4, %v12465_v59  ;;  %v17896_v27 = vpop.f32.mrf.mxu1  ;;  %v11477_v42 = vpop.eup %11476  ;;  %11502 = vtanh.f32 %v21254_v12  ;;  %v12466_v10 = vld [vmem:[#allocation3 + $0x80] sm:$0xff] }
 0x4c6   : > { %21253 = vst [vmem:[#allocation21_spill] sm:$0xff] %v17896_v27  ;;  %9802 = vmatprep.mubr.msk.f32.mxu1 %vm2751_vm4, %v12465_v59  ;;  %6302 = vmatprep.subr.mxu0 %v11475_v14  ;;  %v17900_v48 = vpop.f32.mrf.mxu0  ;;  %v11479_v4 = vpop.eup %11478  ;;  %11504 = vtanh.f32 %v21256_v32  ;;  %v21259_v59 = vld [vmem:[#allocation92_spill] sm:$0xff] }
 0x4c7   : > { %21255 = vst [vmem:[#allocation18_spill] sm:$0xff] %v17900_v48  ;;  %6511 = vmatprep.subr.mxu1 %v11477_v42  ;;  %5949 = vmatmul.mubr.f32.gmra.mxu0 %v12466_v10  ;;  %v17903_v41 = vpop.f32.mrf.mxu1  ;;  %v11481_v52 = vpop.eup %11480  ;;  %11506 = vtanh.f32 %v21258_v24  ;;  %v21260_v42 = vld [vmem:[#allocation90_spill] sm:$0xff]  ;;  %v21262_v24 = vld [vmem:[#allocation69_spill] sm:$0xff] }
 0x4c8   : > { %21257 = vst [vmem:[#allocation57_spill] sm:$0xff] %v17903_v41  ;;  %6158 = vmatmul.mubr.f32.gmra.mxu1 %v12466_v10  ;;  %6303 = vmatpush2.msra.mxu0 %v11479_v4  ;;  %v17906_v27 = vpop.f32.mrf.mxu0  ;;  %v11483_v12 = vpop.eup %11482  ;;  %11508 = vtanh.f32 %v21259_v59  ;;  %v12467_v4 = vld [vmem:[#allocation3 + $0x98] sm:$0xff]  ;;  %v21266_v59 = vld [vmem:[#allocation73_spill] sm:$0xff] }
 0x4c9   : > { %6512 = vmatpush2.msra.mxu1 %v11481_v52  ;;  %6304 = vmatprep.subr.mxu0 %v11473_v34  ;;  %v17909_v14 = vpop.f32.mrf.mxu1  ;;  %v11485_v32 = vpop.eup %11484  ;;  %11510 = vtanh.f32 %v21260_v42  ;;  %v21264_v52 = vld [vmem:[#allocation79_spill] sm:$0xff] }
 0x4ca   : > { %6513 = vmatprep.subr.mxu1 %v11483_v12  ;;  %6305 = vmatpush2.msra.mxu0 %v11471_v46  ;;  %v17912_v41 = vpop.f32.mrf.mxu0  ;;  %v17914_v48 = vpop.eup %11486  ;;  %11512 = vtanh.f32 %v21262_v24 }
 0x4cb   : > { %21261 = vst [vmem:[#allocation20_spill] sm:$0xff] %v17914_v48  ;;  %6514 = vmatpush2.msra.mxu1 %v11485_v32  ;;  %9779 = vmatprep.mubr.msk.f32.mxu0 %vm2751_vm4, %v12467_v4  ;;  %v17918_v10 = vpop.f32.mrf.mxu1  ;;  %v17920_v34 = vpop.eup %11488  ;;  %11514 = vtanh.f32 %v21264_v52  ;;  %v12468_v32 = vld [vmem:[#allocation3 + $0x90] sm:$0xff]  ;;  %v21268_v48 = vld [vmem:[#allocation82_spill] sm:$0xff] }
 0x4cc   : > { %21263 = vst [vmem:[#allocation96_spill] sm:$0xff] %v17920_v34  ;;  %9803 = vmatprep.mubr.msk.f32.mxu1 %vm2751_vm4, %v12467_v4  ;;  %6306 = vmatprep.subr.mxu0 %v11467_v3  ;;  %v17924_v46 = vpop.f32.mrf.mxu0  ;;  %v17926_v12 = vpop.eup %11490  ;;  %11516 = vtanh.f32 %v21266_v59  ;;  %v21270_v52 = vld [vmem:[#allocation77_spill] sm:$0xff] }
 0x4cd   : > { %21265 = vst [vmem:[#allocation44_spill] sm:$0xff] %v17926_v12  ;;  %6515 = vmatprep.subr.mxu1 %v11469_v16  ;;  %5955 = vmatmul.mubr.f32.gmra.mxu0 %v12468_v32  ;;  %v17929_v42 = vpop.f32.mrf.mxu1  ;;  %v17931_v24 = vpop.eup %11492  ;;  %11518 = vtanh.f32 %v21268_v48  ;;  %v21282_v12 = vld [vmem:[#allocation29_spill] sm:$0xff] }
 0x4ce   : > { %21267 = vst [vmem:[#allocation36_spill] sm:$0xff] %v17931_v24  ;;  %6164 = vmatmul.mubr.f32.gmra.mxu1 %v12468_v32  ;;  %6307 = vmatpush2.msra.mxu0 %v17861_v2  ;;  %v17935_v4 = vpop.f32.mrf.mxu0  ;;  %v17937_v3 = vpop.eup %11494  ;;  %11520 = vtanh.f32 %v21270_v52  ;;  %v12469_v32 = vld [vmem:[#allocation3 + $0xa8] sm:$0xff]  ;;  %v12470_v52 = vld [vmem:[#allocation3 + $0xa0] sm:$0xff]  ;;  %v21278_v24 = vld [vmem:[#allocation25_spill] sm:$0xff] }
 0x4cf   : > { %21269 = vst [vmem:[#allocation24_spill] sm:$0xff] %v17937_v3  ;;  %6516 = vmatpush2.msra.mxu1 %v17868_v6  ;;  %6308 = vmatprep.subr.mxu0 %v17847_v7  ;;  %v17942_v16 = vpop.f32.mrf.mxu1  ;;  %v17944_v59 = vpop.eup %11496  ;;  %11522 = vtanh.f32 %v17859_v56 }
 0x4d0   : > { %21271 = vst [vmem:[#allocation43_spill] sm:$0xff] %v17944_v59  ;;  %6517 = vmatprep.subr.mxu1 %v17854_v50  ;;  %6309 = vmatpush2.msra.mxu0 %v17835_v51  ;;  %v17949_v2 = vpop.f32.mrf.mxu0  ;;  %v17951_v48 = vpop.eup %11498  ;;  %11524 = vtanh.f32 %v17866_v62  ;;  %v21274_v50 = vld [vmem:[#allocation86_spill] sm:$0xff] }
 0x4d1   : > { %21272 = vst [vmem:[#allocation54_spill] sm:$0xff] %v17951_v48  ;;  %6518 = vmatpush2.msra.mxu1 %v17841_v61  ;;  %9780 = vmatprep.mubr.msk.f32.mxu0 %vm2751_vm4, %v12469_v32  ;;  %v17956_v7 = vpop.f32.mrf.mxu1  ;;  %v17958_v6 = vpop.eup %11500  ;;  %11526 = vtanh.f32 %v21274_v50  ;;  %v21276_v61 = vld [vmem:[#allocation89_spill] sm:$0xff]  ;;  %v21280_v50 = vld [vmem:[#allocation31_spill] sm:$0xff]  ;;  %v21294_v48 = vld [vmem:[#allocation78_spill] sm:$0xff] }
 0x4d2   : > { %21273 = vst [vmem:[#allocation17_spill] sm:$0xff] %v17958_v6  ;;  %9804 = vmatprep.mubr.msk.f32.mxu1 %vm2751_vm4, %v12469_v32  ;;  %6310 = vmatprep.subr.mxu0 %v17821_v35  ;;  %v17963_v51 = vpop.f32.mrf.mxu0  ;;  %v17965_v56 = vpop.eup %11502  ;;  %11528 = vtanh.f32 %v21276_v61  ;;  %v21290_v6 = vld [vmem:[#allocation63_spill] sm:$0xff] }
 0x4d3   : > { %21275 = vst [vmem:[#allocation98_spill] sm:$0xff] %v17965_v56  ;;  %6519 = vmatprep.subr.mxu1 %v17828_v23  ;;  %5961 = vmatmul.mubr.f32.gmra.mxu0 %v12470_v52  ;;  %v17969_v62 = vpop.f32.mrf.mxu1  ;;  %v17971_v34 = vpop.eup %11504  ;;  %11530 = vtanh.f32 %v21278_v24  ;;  %v12476_v56 = vld [vmem:[#allocation3 + $0xd0] sm:$0xff] }
 0x4d4   : > { %21277 = vst [vmem:[#allocation100_spill] sm:$0xff] %v17971_v34  ;;  %6170 = vmatmul.mubr.f32.gmra.mxu1 %v12470_v52  ;;  %6311 = vmatpush2.msra.mxu0 %v17807_v18  ;;  %v17975_v35 = vpop.f32.mrf.mxu0  ;;  %v17977_v32 = vpop.eup %11506  ;;  %11532 = vtanh.f32 %v21280_v50  ;;  %v21284_v52 = vld [vmem:[#allocation15_spill] sm:$0xff] }
 0x4d5   : > { %21279 = vst [vmem:[#allocation103_spill] sm:$0xff] %v17977_v32  ;;  %6520 = vmatpush2.msra.mxu1 %v17814_v58  ;;  %6312 = vmatprep.subr.mxu0 %v17795_v28  ;;  %v17982_v23 = vpop.f32.mrf.mxu1  ;;  %v17984_v61 = vpop.eup %11508  ;;  %11534 = vtanh.f32 %v21282_v12  ;;  %v12471_v58 = vld [vmem:[#allocation3 + $0xb8] sm:$0xff]  ;;  %v21286_v12 = vld [vmem:[#allocation16_spill] sm:$0xff] }
 0x4d6   : > { %21281 = vst [vmem:[#allocation101_spill] sm:$0xff] %v17984_v61  ;;  %6521 = vmatprep.subr.mxu1 %v17801_v29  ;;  %6313 = vmatpush2.msra.mxu0 %v17781_v55  ;;  %v17989_v18 = vpop.f32.mrf.mxu0  ;;  %v17991_v24 = vpop.eup %11510  ;;  %11536 = vtanh.f32 %v21284_v52  ;;  %v21288_v52 = vld [vmem:[#allocation74_spill] sm:$0xff] }
 0x4d7   : > { %21283 = vst [vmem:[#allocation102_spill] sm:$0xff] %v17991_v24  ;;  %6522 = vmatpush2.msra.mxu1 %v17788_v38  ;;  %9781 = vmatprep.mubr.msk.f32.mxu0 %vm2751_vm4, %v12471_v58  ;;  %v17996_v28 = vpop.f32.mrf.mxu1  ;;  %v17998_v50 = vpop.eup %11512  ;;  %11538 = vtanh.f32 %v21286_v12  ;;  %v12472_v38 = vld [vmem:[#allocation3 + $0xb0] sm:$0xff] }
 0x4d8   : > { %21285 = vst [vmem:[#allocation99_spill] sm:$0xff] %v17998_v50  ;;  %9805 = vmatprep.mubr.msk.f32.mxu1 %vm2751_vm4, %v12471_v58  ;;  %6314 = vmatprep.subr.mxu0 %v17767_v19  ;;  %v18003_v55 = vpop.f32.mrf.mxu0  ;;  %v18005_v29 = vpop.eup %11514  ;;  %11540 = vtanh.f32 %v21288_v52  ;;  %v21292_v12 = vld [vmem:[#allocation65_spill] sm:$0xff] }
 0x4d9   : > { %21287 = vst [vmem:[#allocation19_spill] sm:$0xff] %v18005_v29  ;;  %6523 = vmatprep.subr.mxu1 %v17774_v1  ;;  %5967 = vmatmul.mubr.f32.gmra.mxu0 %v12472_v38  ;;  %v18009_v59 = vpop.f32.mrf.mxu1  ;;  %v18011_v3 = vpop.eup %11516  ;;  %11542 = vtanh.f32 %v21290_v6 }
 0x4da   : > { %21289 = vst [vmem:[#allocation55_spill] sm:$0xff] %v18011_v3  ;;  %6176 = vmatmul.mubr.f32.gmra.mxu1 %v12472_v38  ;;  %6315 = vmatpush2.msra.mxu0 %v17757_v57  ;;  %v18015_v19 = vpop.f32.mrf.mxu0  ;;  %v18017_v58 = vpop.eup %11518  ;;  %11544 = vtanh.f32 %v21292_v12  ;;  %v21296_v12 = vld [vmem:[#allocation80_spill] sm:$0xff] }
 0x4db   : > { %21291 = vst [vmem:[#allocation34_spill] sm:$0xff] %v18017_v58  ;;  %6524 = vmatpush2.msra.mxu1 %v17761_v39  ;;  %6316 = vmatprep.subr.mxu0 %v17743_v20  ;;  %v18022_v1 = vpop.f32.mrf.mxu1  ;;  %v18024_v52 = vpop.eup %11520  ;;  %11546 = vtanh.f32 %v21294_v48  ;;  %v12473_v39 = vld [vmem:[#allocation3 + $0xc8] sm:$0xff] }
 0x4dc   : > { %21293 = vst [vmem:[#allocation23_spill] sm:$0xff] %v18024_v52  ;;  %6525 = vmatprep.subr.mxu1 %v17750_v49  ;;  %6317 = vmatpush2.msra.mxu0 %v17730_v37  ;;  %v18029_v57 = vpop.f32.mrf.mxu0  ;;  %v11523_v6 = vpop.eup %11522  ;;  %11548 = vtanh.f32 %v17668_v9  ;;  %v12474_v49 = vld [vmem:[#allocation3 + $0xc0] sm:$0xff]  ;;  %v12475_v9 = vld [vmem:[#allocation3 + $0xd8] sm:$0xff] }
 0x4dd   : > { %6526 = vmatpush2.msra.mxu1 %v17736_v45  ;;  %9782 = vmatprep.mubr.msk.f32.mxu0 %vm2751_vm4, %v12473_v39  ;;  %v18034_v20 = vpop.f32.mrf.mxu1  ;;  %v11525_v38 = vpop.eup %11524  ;;  %11550 = vtanh.f32 %v17672_v31 }
 0x4de   : > { %9806 = vmatprep.mubr.msk.f32.mxu1 %vm2751_vm4, %v12473_v39  ;;  %5973 = vmatmul.mubr.f32.gmra.mxu0 %v12474_v49  ;;  %v18038_v37 = vpop.f32.mrf.mxu0  ;;  %v18040_v48 = vpop.eup %11526  ;;  %11552 = vtanh.f32 %v21296_v12 }
 0x4df   : > { %21295 = vst [vmem:[#allocation41_spill] sm:$0xff] %v18040_v48  ;;  %6182 = vmatmul.mubr.f32.gmra.mxu1 %v12474_v49  ;;  %9783 = vmatprep.mubr.msk.f32.mxu0 %vm2751_vm4, %v12475_v9  ;;  %v18044_v45 = vpop.f32.mrf.mxu1  ;;  %v18046_v34 = vpop.eup %11528  ;;  %11554 = vtanh.f32 %v17680_v43 }
 0x4e0   : > { %21297 = vst [vmem:[#allocation42_spill] sm:$0xff] %v18046_v34  ;;  %9807 = vmatprep.mubr.msk.f32.mxu1 %vm2751_vm4, %v12475_v9  ;;  %7061 = vmatprep.subr.mxu0 %v11523_v6  ;;  %v18050_v31 = vpop.f32.mrf.mxu0  ;;  %v18052_v39 = vpop.eup %11530  ;;  %11556 = vtanh.f32 %v17683_v21  ;;  %v12477_v6 = vld [vmem:[#allocation3 + $0xe8] sm:$0xff] }
 0x4e1   : > { %21298 = vst [vmem:[#allocation32_spill] sm:$0xff] %v18052_v39  ;;  %7132 = vmatprep.subr.mxu1 %v11525_v38  ;;  %v18055_v49 = vpop.f32.mrf.mxu1  ;;  %v18057_v12 = vpop.eup %11532  ;;  %11558 = vtanh.f32 %v17687_v63 }
 0x4e2   : > { %21299 = vst [vmem:[#allocation56_spill] sm:$0xff] %v18057_v12  ;;  %5979 = vmatmul.mubr.f32.gmra.mxu0 %v12476_v56  ;;  %v18060_v61 = vpop.f32.mrf.mxu0  ;;  %v18062_v43 = vpop.eup %11534  ;;  %11560 = vtanh.f32 %v17691_v5  ;;  %v12478_v5 = vld [vmem:[#allocation3 + $0xe0] sm:$0xff] }
 0x4e3   : > { %21300 = vst [vmem:[#allocation93_spill] sm:$0xff] %v18062_v43  ;;  %6188 = vmatmul.mubr.f32.gmra.mxu1 %v12476_v56  ;;  %9784 = vmatprep.mubr.msk.f32.mxu0 %vm2751_vm4, %v12477_v6  ;;  %v18066_v21 = vpop.f32.mrf.mxu1  ;;  %v18068_v38 = vpop.eup %11536  ;;  %11562 = vtanh.f32 %v17696_v25  ;;  %v12479_v25 = vld [vmem:[#allocation3 + $0xf8] sm:$0xff] }
 0x4e4   : > { %21301 = vst [vmem:[#allocation59_spill] sm:$0xff] %v18068_v38  ;;  %9808 = vmatprep.mubr.msk.f32.mxu1 %vm2751_vm4, %v12477_v6  ;;  %v18072_v63 = vpop.eup %11538  ;;  %11564 = vtanh.f32 %v17700_v13  ;;  %v12486_v38 = vld [vmem:[#allocation3 + $0x120] sm:$0xff] }
 0x4e5   : > { %21302 = vst [vmem:[#allocation95_spill] sm:$0xff] %v18072_v63  ;;  %v18075_v9 = vpop.eup %11540  ;;  %11566 = vtanh.f32 %v17704_v22 }
 0x4e6   : > { %21303 = vst [vmem:[#allocation38_spill] sm:$0xff] %v18075_v9  ;;  %5985 = vmatmul.mubr.f32.gmra.mxu0 %v12478_v5  ;;  %v18078_v56 = vpop.f32.mrf.mxu0  ;;  %v18080_v32 = vpop.eup %11542  ;;  %11568 = vtanh.f32 %v17708_v15 }
 0x4e7   : > { %21304 = vst [vmem:[#allocation66_spill] sm:$0xff] %v18080_v32  ;;  %6194 = vmatmul.mubr.f32.gmra.mxu1 %v12478_v5  ;;  %9785 = vmatprep.mubr.msk.f32.mxu0 %vm2751_vm4, %v12479_v25  ;;  %v18084_v6 = vpop.f32.mrf.mxu1  ;;  %v18086_v50 = vpop.eup %11544  ;;  %11570 = vtanh.f32 %v17714_v33  ;;  %v12480_v5 = vld [vmem:[#allocation3 + $0xf0] sm:$0xff]  ;;  %v12481_v33 = vld [vmem:[#allocation3 + $0x108] sm:$0xff] }
 0x4e8   : > { %21305 = vst [vmem:[#allocation39_spill] sm:$0xff] %v18086_v50  ;;  %9809 = vmatprep.mubr.msk.f32.mxu1 %vm2751_vm4, %v12479_v25  ;;  %v18090_v13 = vpop.f32.mrf.mxu0  ;;  %v18092_v22 = vpop.eup %11546  ;;  %11572 = vtanh.f32 %v17718_v26  ;;  %v21332_v32 = vld [vmem:[#allocation97_spill] sm:$0xff] }
 0x4e9   : > { %21306 = vst [vmem:[#allocation26_spill] sm:$0xff] %v18092_v22  ;;  %v18095_v24 = vpop.f32.mrf.mxu1  ;;  %v18097_v15 = vpop.eup %11548  ;;  %11574 = vtanh.f32 %v17722_v40 }
 0x4ea   : > { %21307 = vst [vmem:[#allocation84_spill] sm:$0xff] %v18095_v24  ;;  %21308 = vst [vmem:[#allocation30_spill] sm:$0xff] %v18097_v15  ;;  %5991 = vmatmul.mubr.f32.gmra.mxu0 %v12480_v5  ;;  %v18100_v3 = vpop.eup %11550  ;;  %11576 = vtanh.f32 %v17726_v17  ;;  %v12482_v17 = vld [vmem:[#allocation3 + $0x100] sm:$0xff] }
 0x4eb   : > { %21309 = vst [vmem:[#allocation81_spill] sm:$0xff] %v18100_v3  ;;  %6200 = vmatmul.mubr.f32.gmra.mxu1 %v12480_v5  ;;  %9786 = vmatprep.mubr.msk.f32.mxu0 %vm2751_vm4, %v12481_v33  ;;  %v18104_v25 = vpop.eup %11552  ;;  %11578 = vtanh.f32 %v17734_v47  ;;  %v12483_v47 = vld [vmem:[#allocation3 + $0x118] sm:$0xff] }
 0x4ec   : > { %21310 = vst [vmem:[#allocation75_spill] sm:$0xff] %v18104_v25  ;;  %9810 = vmatprep.mubr.msk.f32.mxu1 %vm2751_vm4, %v12481_v33  ;;  %v18108_v26 = vpop.f32.mrf.mxu0  ;;  %v18110_v29 = vpop.eup %11554  ;;  %11580 = vtanh.f32 %v17741_v8  ;;  %v12492_v25 = vld [vmem:[#allocation3 + $0x150] sm:$0xff] }
 0x4ed   : > { %21311 = vst [vmem:[#allocation104_spill] sm:$0xff] %v18108_v26  ;;  %v18113_v40 = vpop.f32.mrf.mxu1  ;;  %v18115_v52 = vpop.eup %11556  ;;  %11582 = vtanh.f32 %v17748_v11  ;;  %v21341_v26 = vld [vmem:[#allocation21_spill] sm:$0xff] }
 0x4ee   : > { %21312 = vst [vmem:[#allocation76_spill] sm:$0xff] %v18113_v40  ;;  %21313 = vst [vmem:[#allocation47_spill] sm:$0xff] %v18115_v52  ;;  %5997 = vmatmul.mubr.f32.gmra.mxu0 %v12482_v17  ;;  %v18118_v5 = vpop.f32.mrf.mxu0  ;;  %v18120_v58 = vpop.eup %11558  ;;  %11584 = vtanh.f32 %v17755_v54  ;;  %v12484_v54 = vld [vmem:[#allocation3 + $0x110] sm:$0xff] }
 0x4ef   : > { %21314 = vst [vmem:[#allocation35_spill] sm:$0xff] %v18118_v5  ;;  %6206 = vmatmul.mubr.f32.gmra.mxu1 %v12482_v17  ;;  %9787 = vmatprep.mubr.msk.f32.mxu0 %vm2751_vm4, %v12483_v47  ;;  %v18124_v33 = vpop.f32.mrf.mxu1  ;;  %v18126_v8 = vpop.eup %11560  ;;  %11586 = vtanh.f32 %v17765_v53  ;;  %v12485_v53 = vld [vmem:[#allocation3 + $0x128] sm:$0xff] }
 0x4f0   : > { %21315 = vst [vmem:[#allocation45_spill] sm:$0xff] %v18124_v33  ;;  %9811 = vmatprep.mubr.msk.f32.mxu1 %vm2751_vm4, %v12483_v47  ;;  %v18130_v11 = vpop.eup %11562  ;;  %11588 = vtanh.f32 %v17772_v30  ;;  %v21331_v33 = vld [vmem:[#allocation51_spill] sm:$0xff] }
 0x4f1   : > { %v18133_v34 = vpop.eup %11564  ;;  %11590 = vtanh.f32 %v17779_v0 }
 0x4f2   : > { %6003 = vmatmul.mubr.f32.gmra.mxu0 %v12484_v54  ;;  %v18136_v17 = vpop.f32.mrf.mxu0  ;;  %v18138_v48 = vpop.eup %11566  ;;  %11592 = vtanh.f32 %v17786_v60 }
 0x4f3   : > { %21316 = vst [vmem:[#allocation37_spill] sm:$0xff] %v18136_v17  ;;  %6212 = vmatmul.mubr.f32.gmra.mxu1 %v12484_v54  ;;  %9788 = vmatprep.mubr.msk.f32.mxu0 %vm2751_vm4, %v12485_v53  ;;  %v18142_v47 = vpop.f32.mrf.mxu1  ;;  %v18144_v12 = vpop.eup %11568  ;;  %11594 = vtanh.f32 %v17793_v36  ;;  %v21320_v54 = vld [vmem:[#allocation64_spill] sm:$0xff]  ;;  %v12487_v36 = vld [vmem:[#allocation3 + $0x138] sm:$0xff] }
 0x4f4   : > { %21317 = vst [vmem:[#allocation70_spill] sm:$0xff] %v18142_v47  ;;  %9812 = vmatprep.mubr.msk.f32.mxu1 %vm2751_vm4, %v12485_v53  ;;  %v18148_v30 = vpop.f32.mrf.mxu0  ;;  %v18150_v0 = vpop.eup %11570  ;;  %11596 = vtanh.f32 %v17799_v44  ;;  %v21321_v47 = vld [vmem:[#allocation87_spill] sm:$0xff] }
 0x4f5   : > { %21318 = vst [vmem:[#allocation33_spill] sm:$0xff] %v18148_v30  ;;  %v18153_v39 = vpop.f32.mrf.mxu1  ;;  %v18155_v60 = vpop.eup %11572  ;;  %11598 = vtanh.f32 %v21320_v54  ;;  %v21322_v30 = vld [vmem:[#allocation58_spill] sm:$0xff]  ;;  %v21324_v54 = vld [vmem:[#allocation53_spill] sm:$0xff] }
 0x4f6   : > { %21319 = vst [vmem:[#allocation48_spill] sm:$0xff] %v18153_v39  ;;  %6009 = vmatmul.mubr.f32.gmra.mxu0 %v12486_v38  ;;  %v18158_v43 = vpop.eup %11574  ;;  %11600 = vtanh.f32 %v21321_v47  ;;  %v12488_v47 = vld [vmem:[#allocation3 + $0x130] sm:$0xff] }
 0x4f7   : > { %6218 = vmatmul.mubr.f32.gmra.mxu1 %v12486_v38  ;;  %9789 = vmatprep.mubr.msk.f32.mxu0 %vm2751_vm4, %v12487_v36  ;;  %v18162_v53 = vpop.eup %11576  ;;  %11602 = vtanh.f32 %v21322_v30  ;;  %v21326_v38 = vld [vmem:[#allocation88_spill] sm:$0xff]  ;;  %v21328_v30 = vld [vmem:[#allocation71_spill] sm:$0xff] }
 0x4f8   : > { %9813 = vmatprep.mubr.msk.f32.mxu1 %vm2751_vm4, %v12487_v36  ;;  %v18166_v44 = vpop.f32.mrf.mxu0  ;;  %v18168_v39 = vpop.eup %11578  ;;  %11604 = vtanh.f32 %v21324_v54  ;;  %v12489_v36 = vld [vmem:[#allocation3 + $0x148] sm:$0xff] }
 0x4f9   : > { %21323 = vst [vmem:[#allocation40_spill] sm:$0xff] %v18166_v44  ;;  %v18171_v9 = vpop.f32.mrf.mxu1  ;;  %v18173_v17 = vpop.eup %11580  ;;  %11606 = vtanh.f32 %v21326_v38 }
 0x4fa   : > { %21325 = vst [vmem:[#allocation85_spill] sm:$0xff] %v18171_v9  ;;  %6015 = vmatmul.mubr.f32.gmra.mxu0 %v12488_v47  ;;  %v18176_v63 = vpop.f32.mrf.mxu0  ;;  %v18178_v50 = vpop.eup %11582  ;;  %11608 = vtanh.f32 %v21328_v30  ;;  %v21330_v9 = vld [vmem:[#allocation49_spill] sm:$0xff] }
 0x4fb   : > { %21327 = vst [vmem:[#allocation52_spill] sm:$0xff] %v18176_v63  ;;  %6224 = vmatmul.mubr.f32.gmra.mxu1 %v12488_v47  ;;  %9790 = vmatprep.mubr.msk.f32.mxu0 %vm2751_vm4, %v12489_v36  ;;  %v18182_v44 = vpop.f32.mrf.mxu1  ;;  %v18184_v54 = vpop.eup %11584  ;;  %11610 = vtanh.f32 %v21330_v9  ;;  %v12490_v47 = vld [vmem:[#allocation3 + $0x140] sm:$0xff]  ;;  %v12491_v9 = vld [vmem:[#allocation3 + $0x158] sm:$0xff] }
 0x4fc   : > { %21329 = vst [vmem:[#allocation72_spill] sm:$0xff] %v18182_v44  ;;  %9814 = vmatprep.mubr.msk.f32.mxu1 %vm2751_vm4, %v12489_v36  ;;  %v18188_v38 = vpop.eup %11586  ;;  %11612 = vtanh.f32 %v21331_v33  ;;  %v21334_v44 = vld [vmem:[#allocation62_spill] sm:$0xff] }
 0x4fd   : > { %v18191_v63 = vpop.eup %11588  ;;  %11614 = vtanh.f32 %v21332_v32  ;;  %v21336_v33 = vld [vmem:[#allocation94_spill] sm:$0xff] }
 0x4fe   : > { %6021 = vmatmul.mubr.f32.gmra.mxu0 %v12490_v47  ;;  %v18194_v30 = vpop.f32.mrf.mxu0  ;;  %v18196_v15 = vpop.eup %11590  ;;  %11616 = vtanh.f32 %v21334_v44 }
 0x4ff   : > { %21333 = vst [vmem:[#allocation22_spill] sm:$0xff] %v18194_v30  ;;  %6230 = vmatmul.mubr.f32.gmra.mxu1 %v12490_v47  ;;  %9791 = vmatprep.mubr.msk.f32.mxu0 %vm2751_vm4, %v12491_v9  ;;  %v18200_v36 = vpop.f32.mrf.mxu1  ;;  %v18202_v5 = vpop.eup %11592  ;;  %11618 = vtanh.f32 %v21336_v33  ;;  %v21338_v30 = vld [vmem:[#allocation61_spill] sm:$0xff]  ;;  %v21340_v47 = vld [vmem:[#allocation67_spill] sm:$0xff] }
 0x500   : > { %21335 = vst [vmem:[#allocation83_spill] sm:$0xff] %v18200_v36  ;;  %9815 = vmatprep.mubr.msk.f32.mxu1 %vm2751_vm4, %v12491_v9  ;;  %v18206_v32 = vpop.f32.mrf.mxu0  ;;  %v18208_v22 = vpop.eup %11594  ;;  %11620 = vtanh.f32 %v21338_v30  ;;  %v12493_v9 = vld [vmem:[#allocation3 + $0x168] sm:$0xff] }
 0x501   : > { %21337 = vst [vmem:[#allocation50_spill] sm:$0xff] %v18206_v32  ;;  %v18211_v40 = vpop.f32.mrf.mxu1  ;;  %v18213_v44 = vpop.eup %11596  ;;  %11622 = vtanh.f32 %v21340_v47  ;;  %v21342_v32 = vld [vmem:[#allocation18_spill] sm:$0xff]  ;;  %v21344_v47 = vld [vmem:[#allocation57_spill] sm:$0xff] }
 0x502   : > { %21339 = vst [vmem:[#allocation28_spill] sm:$0xff] %v18211_v40  ;;  %6027 = vmatmul.mubr.f32.gmra.mxu0 %v12492_v25  ;;  %v18216_v36 = vpop.eup %11598  ;;  %11624 = vtanh.f32 %v21341_v26 }
 0x503   : > { %6236 = vmatmul.mubr.f32.gmra.mxu1 %v12492_v25  ;;  %9792 = vmatprep.mubr.msk.f32.mxu0 %vm2751_vm4, %v12493_v9  ;;  %v18220_v33 = vpop.eup %11600  ;;  %11626 = vtanh.f32 %v21342_v32  ;;  %v12494_v25 = vld [vmem:[#allocation3 + $0x160] sm:$0xff]  ;;  %v12495_v32 = vld [vmem:[#allocation3 + $0x178] sm:$0xff] }
 0x504   : > { %9816 = vmatprep.mubr.msk.f32.mxu1 %vm2751_vm4, %v12493_v9  ;;  %v18224_v30 = vpop.f32.mrf.mxu0  ;;  %v11603_v40 = vpop.eup %11602  ;;  %11628 = vtanh.f32 %v21344_v47 }
 0x505   : > { %21343 = vst [vmem:[#allocation68_spill] sm:$0xff] %v18224_v30  ;;  %v18227_v3 = vpop.f32.mrf.mxu1  ;;  %v11605_v24 = vpop.eup %11604  ;;  %11630 = vtanh.f32 %v17906_v27 }
 0x506   : > { %6033 = vmatmul.mubr.f32.gmra.mxu0 %v12494_v25  ;;  %v18230_v26 = vpop.f32.mrf.mxu0  ;;  %v11607_v52 = vpop.eup %11606  ;;  %11632 = vtanh.f32 %v17909_v14 }
 0x507   : > { %21345 = vst [vmem:[#allocation27_spill] sm:$0xff] %v18230_v26  ;;  %6242 = vmatmul.mubr.f32.gmra.mxu1 %v12494_v25  ;;  %9793 = vmatprep.mubr.msk.f32.mxu0 %vm2751_vm4, %v12495_v32  ;;  %v18234_v9 = vpop.f32.mrf.mxu1  ;;  %v11609_v30 = vpop.eup %11608  ;;  %11634 = vtanh.f32 %v17912_v41  ;;  %v12496_v26 = vld [vmem:[#allocation3 + $0x170] sm:$0xff] }
 0x508   : > { %21346 = vst [vmem:[#allocation46_spill] sm:$0xff] %v18234_v9  ;;  %9817 = vmatprep.mubr.msk.f32.mxu1 %vm2751_vm4, %v12495_v32  ;;  %v11611_v47 = vpop.eup %11610  ;;  %11636 = vtanh.f32 %v17918_v10  ;;  %v12497_v9 = vld [vmem:[#allocation3 + $0x8] sm:$0xff] }
 0x509   : > { %v11613_v27 = vpop.eup %11612  ;;  %11638 = vtanh.f32 %v17924_v46 }
 0x50a   : > { %6039 = vmatmul.mubr.f32.gmra.mxu0 %v12496_v26  ;;  %v18240_v14 = vpop.f32.mrf.mxu0  ;;  %v18242_v25 = vpop.eup %11614  ;;  %11640 = vtanh.f32 %v17929_v42 }
 0x50b   : > { %21347 = vst [vmem:[#allocation91_spill] sm:$0xff] %v18242_v25  ;;  %6248 = vmatmul.mubr.f32.gmra.mxu1 %v12496_v26  ;;  %9818 = vmatprep.mubr.msk.f32.mxu0 %vm2751_vm4, %v12497_v9  ;;  %v18246_v41 = vpop.f32.mrf.mxu1  ;;  %v18248_v32 = vpop.eup %11616  ;;  %11642 = vtanh.f32 %v17935_v4  ;;  %v12498_v26 = vld [vmem:[#allocation3] sm:$0xff] }
 0x50c   : > { %21348 = vst [vmem:[#allocation60_spill] sm:$0xff] %v18246_v41  ;;  %21349 = vst [vmem:[#allocation92_spill] sm:$0xff] %v18248_v32  ;;  %9842 = vmatprep.mubr.msk.f32.mxu1 %vm2751_vm4, %v12497_v9  ;;  %v18252_v10 = vpop.f32.mrf.mxu0  ;;  %v18254_v46 = vpop.eup %11618  ;;  %11644 = vtanh.f32 %v17942_v16 }
 0x50d   : > { %v18257_v25 = vpop.f32.mrf.mxu1  ;;  %v18259_v42 = vpop.eup %11620  ;;  %11646 = vtanh.f32 %v17949_v2 }
 0x50e   : > { %21350 = vst [vmem:[#allocation90_spill] sm:$0xff] %v18259_v42  ;;  %6319 = vmatmul.mubr.f32.vlgmr.msra.gmra.mxu0 %v12498_v26  ;;  %v18262_v41 = vpop.eup %11622  ;;  %11648 = vtanh.f32 %v17956_v7  ;;  %v12499_v7 = vld [vmem:[#allocation3 + $0x18] sm:$0xff] }
 0x50f   : > { %6528 = vmatmul.mubr.f32.vlgmr.msra.gmra.mxu1 %v12498_v26  ;;  %7062 = vmatpush1.msra.mxu0 %v11611_v47  ;;  %v18265_v4 = vpop.eup %11624  ;;  %11650 = vtanh.f32 %v17963_v51  ;;  %v21357_v47 = vld [vmem:[#allocation26_spill] sm:$0xff] }
 0x510   : > { %7133 = vmatpush1.msra.mxu1 %v11613_v27  ;;  %7063 = vmatprep.subr.mxu0 %v11607_v52  ;;  %v18268_v16 = vpop.f32.mrf.mxu0  ;;  %v18270_v9 = vpop.eup %11626  ;;  %11652 = vtanh.f32 %v17969_v62 }
 0x511   : > { %7134 = vmatprep.subr.mxu1 %v11609_v30  ;;  %7064 = vmatpush1.msra.mxu0 %v11603_v40  ;;  %v18273_v2 = vpop.f32.mrf.mxu1  ;;  %v18275_v32 = vpop.eup %11628  ;;  %11654 = vtanh.f32 %v17975_v35  ;;  %v12500_v35 = vld [vmem:[#allocation3 + $0x10] sm:$0xff]  ;;  %v21356_v30 = vld [vmem:[#allocation76_spill] sm:$0xff] }
 0x512   : > { %7135 = vmatpush1.msra.mxu1 %v11605_v24  ;;  %9819 = vmatprep.mubr.msk.f32.mxu0 %vm2751_vm4, %v12499_v7  ;;  %v18279_v51 = vpop.f32.mrf.mxu0  ;;  %v18281_v52 = vpop.eup %11630  ;;  %11656 = vtanh.f32 %v17982_v23 }
 0x513   : > { %9843 = vmatprep.mubr.msk.f32.mxu1 %vm2751_vm4, %v12499_v7  ;;  %7065 = vmatprep.subr.mxu0 %v18216_v36  ;;  %v18286_v62 = vpop.f32.mrf.mxu1  ;;  %v18288_v40 = vpop.eup %11632  ;;  %11658 = vtanh.f32 %v17989_v18  ;;  %v21358_v7 = vld [vmem:[#allocation35_spill] sm:$0xff] }
 0x514   : > { %7136 = vmatprep.subr.mxu1 %v18220_v33  ;;  %6325 = vmatmul.mubr.f32.gmra.mxu0 %v12500_v35  ;;  %v18292_v24 = vpop.eup %11634  ;;  %11660 = vtanh.f32 %v17996_v28 }
 0x515   : > { %6534 = vmatmul.mubr.f32.gmra.mxu1 %v12500_v35  ;;  %7066 = vmatpush1.msra.mxu0 %v18208_v22  ;;  %v18296_v23 = vpop.eup %11636  ;;  %11662 = vtanh.f32 %v18003_v55  ;;  %v12501_v55 = vld [vmem:[#allocation3 + $0x28] sm:$0xff]  ;;  %v21359_v35 = vld [vmem:[#allocation30_spill] sm:$0xff] }
 0x516   : > { %7137 = vmatpush1.msra.mxu1 %v18213_v44  ;;  %7067 = vmatprep.subr.mxu0 %v18196_v15  ;;  %v18301_v18 = vpop.f32.mrf.mxu0  ;;  %v18303_v36 = vpop.eup %11638  ;;  %11664 = vtanh.f32 %v18009_v59 }
 0x517   : > { %7138 = vmatprep.subr.mxu1 %v18202_v5  ;;  %7068 = vmatpush1.msra.mxu0 %v18188_v38  ;;  %v18308_v28 = vpop.f32.mrf.mxu1  ;;  %v18310_v22 = vpop.eup %11640  ;;  %11666 = vtanh.f32 %v18015_v19  ;;  %v12502_v19 = vld [vmem:[#allocation3 + $0x20] sm:$0xff] }
 0x518   : > { %7139 = vmatpush1.msra.mxu1 %v18191_v63  ;;  %9820 = vmatprep.mubr.msk.f32.mxu0 %vm2751_vm4, %v12501_v55  ;;  %v18315_v15 = vpop.f32.mrf.mxu0  ;;  %v18317_v44 = vpop.eup %11642  ;;  %11668 = vtanh.f32 %v18022_v1  ;;  %v12506_v38 = vld [vmem:[#allocation3 + $0x40] sm:$0xff] }
 0x519   : > { %9844 = vmatprep.mubr.msk.f32.mxu1 %vm2751_vm4, %v12501_v55  ;;  %7069 = vmatprep.subr.mxu0 %v18178_v50  ;;  %v18322_v59 = vpop.f32.mrf.mxu1  ;;  %v18324_v5 = vpop.eup %11644  ;;  %11670 = vtanh.f32 %v18029_v57  ;;  %v21360_v55 = vld [vmem:[#allocation66_spill] sm:$0xff] }
 0x51a   : > { %7140 = vmatprep.subr.mxu1 %v18184_v54  ;;  %6331 = vmatmul.mubr.f32.gmra.mxu0 %v12502_v19  ;;  %v18328_v63 = vpop.eup %11646  ;;  %11672 = vtanh.f32 %v18034_v20  ;;  %v21355_v54 = vld [vmem:[#allocation75_spill] sm:$0xff] }
 0x51b   : > { %6540 = vmatmul.mubr.f32.gmra.mxu1 %v12502_v19  ;;  %7070 = vmatpush1.msra.mxu0 %v18168_v39  ;;  %v18332_v1 = vpop.eup %11648  ;;  %11674 = vtanh.f32 %v18038_v37  ;;  %v12503_v37 = vld [vmem:[#allocation3 + $0x38] sm:$0xff] }
 0x51c   : > { %7141 = vmatpush1.msra.mxu1 %v18173_v17  ;;  %7071 = vmatprep.subr.mxu0 %v18158_v43  ;;  %v18337_v50 = vpop.f32.mrf.mxu0  ;;  %v18339_v57 = vpop.eup %11650  ;;  %11676 = vtanh.f32 %v18044_v45 }
 0x51d   : > { %7142 = vmatprep.subr.mxu1 %v18162_v53  ;;  %7072 = vmatpush1.msra.mxu0 %v18150_v0  ;;  %v18344_v20 = vpop.f32.mrf.mxu1  ;;  %v18346_v39 = vpop.eup %11652  ;;  %11678 = vtanh.f32 %v18050_v31  ;;  %v12504_v31 = vld [vmem:[#allocation3 + $0x30] sm:$0xff] }
 0x51e   : > { %7143 = vmatpush1.msra.mxu1 %v18155_v60  ;;  %9821 = vmatprep.mubr.msk.f32.mxu0 %vm2751_vm4, %v12503_v37  ;;  %v18351_v43 = vpop.f32.mrf.mxu0  ;;  %v18353_v17 = vpop.eup %11654  ;;  %11680 = vtanh.f32 %v18055_v49 }
 0x51f   : > { %9845 = vmatprep.mubr.msk.f32.mxu1 %vm2751_vm4, %v12503_v37  ;;  %7073 = vmatprep.subr.mxu0 %v18138_v48  ;;  %v18358_v45 = vpop.f32.mrf.mxu1  ;;  %v18360_v0 = vpop.eup %11656  ;;  %11682 = vtanh.f32 %v18060_v61 }
 0x520   : > { %7144 = vmatprep.subr.mxu1 %v18144_v12  ;;  %6337 = vmatmul.mubr.f32.gmra.mxu0 %v12504_v31  ;;  %v18364_v60 = vpop.eup %11658  ;;  %11684 = vtanh.f32 %v18066_v21 }
 0x521   : > { %6546 = vmatmul.mubr.f32.gmra.mxu1 %v12504_v31  ;;  %7074 = vmatpush1.msra.mxu0 %v18130_v11  ;;  %v18368_v49 = vpop.eup %11660  ;;  %11686 = vtanh.f32 %v18078_v56  ;;  %v21351_v56 = vld [vmem:[#allocation47_spill] sm:$0xff]  ;;  %v21361_v31 = vld [vmem:[#allocation45_spill] sm:$0xff] }
 0x522   : > { %7145 = vmatpush1.msra.mxu1 %v18133_v34  ;;  %7075 = vmatprep.subr.mxu0 %v18120_v58  ;;  %v18373_v61 = vpop.f32.mrf.mxu0  ;;  %v18375_v48 = vpop.eup %11662  ;;  %11688 = vtanh.f32 %v18084_v6  ;;  %v12505_v34 = vld [vmem:[#allocation3 + $0x48] sm:$0xff] }
 0x523   : > { %7146 = vmatprep.subr.mxu1 %v18126_v8  ;;  %7076 = vmatpush1.msra.mxu0 %v18110_v29  ;;  %v18380_v12 = vpop.f32.mrf.mxu1  ;;  %v18382_v21 = vpop.eup %11664  ;;  %11690 = vtanh.f32 %v18090_v13  ;;  %v21352_v6 = vld [vmem:[#allocation84_spill] sm:$0xff]  ;;  %v21353_v29 = vld [vmem:[#allocation81_spill] sm:$0xff] }
 0x524   : > { %7147 = vmatpush1.msra.mxu1 %v21351_v56  ;;  %9822 = vmatprep.mubr.msk.f32.mxu0 %vm2751_vm4, %v12505_v34  ;;  %v18387_v58 = vpop.f32.mrf.mxu0  ;;  %v18389_v11 = vpop.eup %11666  ;;  %11692 = vtanh.f32 %v21352_v6  ;;  %v21354_v13 = vld [vmem:[#allocation104_spill] sm:$0xff]  ;;  %v21362_v56 = vld [vmem:[#allocation39_spill] sm:$0xff] }
 0x525   : > { %9846 = vmatprep.mubr.msk.f32.mxu1 %vm2751_vm4, %v12505_v34  ;;  %7077 = vmatprep.subr.mxu0 %v21353_v29  ;;  %v18394_v8 = vpop.f32.mrf.mxu1  ;;  %v18396_v53 = vpop.eup %11668  ;;  %11694 = vtanh.f32 %v21354_v13  ;;  %v21363_v34 = vld [vmem:[#allocation95_spill] sm:$0xff]  ;;  %v21364_v13 = vld [vmem:[#allocation37_spill] sm:$0xff] }
 0x526   : > { %7148 = vmatprep.subr.mxu1 %v21355_v54  ;;  %6343 = vmatmul.mubr.f32.gmra.mxu0 %v12506_v38  ;;  %v18400_v33 = vpop.eup %11670  ;;  %11696 = vtanh.f32 %v21356_v30  ;;  %v21365_v54 = vld [vmem:[#allocation38_spill] sm:$0xff] }
 0x527   : > { %6552 = vmatmul.mubr.f32.gmra.mxu1 %v12506_v38  ;;  %7078 = vmatpush1.msra.mxu0 %v21357_v47  ;;  %v18404_v27 = vpop.f32.mrf.mxu0  ;;  %v18406_v26 = vpop.eup %11672  ;;  %11698 = vtanh.f32 %v21358_v7  ;;  %v12507_v38 = vld [vmem:[#allocation3 + $0x58] sm:$0xff] }
 0x528   : > { %7149 = vmatpush1.msra.mxu1 %v21359_v35  ;;  %7079 = vmatprep.subr.mxu0 %v21360_v55  ;;  %v18411_v19 = vpop.f32.mrf.mxu1  ;;  %v18413_v37 = vpop.eup %11674  ;;  %11700 = vtanh.f32 %v21361_v31  ;;  %v21368_v7 = vld [vmem:[#allocation70_spill] sm:$0xff]  ;;  %v21369_v35 = vld [vmem:[#allocation93_spill] sm:$0xff] }
 0x529   : > { %7150 = vmatprep.subr.mxu1 %v21362_v56  ;;  %7080 = vmatpush1.msra.mxu0 %v21363_v34  ;;  %v18418_v6 = vpop.f32.mrf.mxu0  ;;  %v18420_v29 = vpop.eup %11676  ;;  %11702 = vtanh.f32 %v21364_v13  ;;  %v21372_v56 = vld [vmem:[#allocation33_spill] sm:$0xff]  ;;  %v21373_v34 = vld [vmem:[#allocation59_spill] sm:$0xff] }
 0x52a   : > { %7151 = vmatpush1.msra.mxu1 %v21365_v54  ;;  %9823 = vmatprep.mubr.msk.f32.mxu0 %vm2751_vm4, %v12507_v38  ;;  %v18425_v30 = vpop.f32.mrf.mxu1  ;;  %v18427_v47 = vpop.eup %11678  ;;  %11704 = vtanh.f32 %v21368_v7  ;;  %v12508_v13 = vld [vmem:[#allocation3 + $0x50] sm:$0xff] }
 0x52b   : > { %21366 = vst [vmem:[#allocation69_spill] sm:$0xff] %v18425_v30  ;;  %21367 = vst [vmem:[#allocation79_spill] sm:$0xff] %v18427_v47  ;;  %9847 = vmatprep.mubr.msk.f32.mxu1 %vm2751_vm4, %v12507_v38  ;;  %7081 = vmatprep.subr.mxu0 %v21369_v35  ;;  %v18432_v55 = vpop.f32.mrf.mxu0  ;;  %v18434_v31 = vpop.eup %11680  ;;  %11706 = vtanh.f32 %v21372_v56  ;;  %v21376_v47 = vld [vmem:[#allocation48_spill] sm:$0xff] }
 0x52c   : > { %21370 = vst [vmem:[#allocation73_spill] sm:$0xff] %v18432_v55  ;;  %21371 = vst [vmem:[#allocation82_spill] sm:$0xff] %v18434_v31  ;;  %7152 = vmatprep.subr.mxu1 %v21373_v34  ;;  %6349 = vmatmul.mubr.f32.gmra.mxu0 %v12508_v13  ;;  %v18438_v54 = vpop.f32.mrf.mxu1  ;;  %v18440_v30 = vpop.eup %11682  ;;  %11708 = vtanh.f32 %v21376_v47  ;;  %v21377_v38 = vld [vmem:[#allocation32_spill] sm:$0xff]  ;;  %v21382_v34 = vld [vmem:[#allocation41_spill] sm:$0xff] }
 0x52d   : > { %21374 = vst [vmem:[#allocation77_spill] sm:$0xff] %v18438_v54  ;;  %21375 = vst [vmem:[#allocation86_spill] sm:$0xff] %v18440_v30  ;;  %6558 = vmatmul.mubr.f32.gmra.mxu1 %v12508_v13  ;;  %7082 = vmatpush1.msra.mxu0 %v21377_v38  ;;  %v18444_v7 = vpop.f32.mrf.mxu0  ;;  %v18446_v35 = vpop.eup %11684  ;;  %v21380_v31 = vld [vmem:[#allocation40_spill] sm:$0xff]  ;;  %v21385_v30 = vld [vmem:[#allocation85_spill] sm:$0xff] }
 0x52e   : > { %21378 = vst [vmem:[#allocation89_spill] sm:$0xff] %v18444_v7  ;;  %21379 = vst [vmem:[#allocation25_spill] sm:$0xff] %v18446_v35  ;;  %11710 = vtanh.f32 %v21380_v31  ;;  %v21381_v56 = vld [vmem:[#allocation56_spill] sm:$0xff]  ;;  %7083 = vmatprep.subr.mxu0 %v21382_v34  ;;  %v18451_v55 = vpop.f32.mrf.mxu1  ;;  %v18453_v54 = vpop.eup %11686  ;;  %v21386_v47 = vld [vmem:[#allocation42_spill] sm:$0xff] }
 0x52f   : > { %7153 = vmatpush1.msra.mxu1 %v21381_v56  ;;  %21383 = vst [vmem:[#allocation31_spill] sm:$0xff] %v18451_v55  ;;  %21384 = vst [vmem:[#allocation29_spill] sm:$0xff] %v18453_v54  ;;  %11712 = vtanh.f32 %v21385_v30  ;;  %v21387_v13 = vld [vmem:[#allocation34_spill] sm:$0xff]  ;;  %v18458_v38 = vpop.f32.mrf.mxu0  ;;  %v18460_v7 = vpop.eup %11688  ;;  %v21390_v35 = vld [vmem:[#allocation52_spill] sm:$0xff] }
 0x530   : > { %7154 = vmatprep.subr.mxu1 %v21386_v47  ;;  %7084 = vmatpush1.msra.mxu0 %v21387_v13  ;;  %21388 = vst [vmem:[#allocation15_spill] sm:$0xff] %v18458_v38  ;;  %21389 = vst [vmem:[#allocation16_spill] sm:$0xff] %v18460_v7  ;;  %11714 = vtanh.f32 %v21390_v35  ;;  %v21391_v31 = vld [vmem:[#allocation23_spill] sm:$0xff]  ;;  %v12509_v56 = vld [vmem:[#allocation3 + $0x68] sm:$0xff]  ;;  %v18465_v34 = vpop.f32.mrf.mxu1  ;;  %v18467_v54 = vpop.eup %11690 }
 0x531   : > { %7155 = vmatpush1.msra.mxu1 %v21391_v31  ;;  %9824 = vmatprep.mubr.msk.f32.mxu0 %vm2751_vm4, %v12509_v56  ;;  %21392 = vst [vmem:[#allocation74_spill] sm:$0xff] %v18465_v34  ;;  %21393 = vst [vmem:[#allocation63_spill] sm:$0xff] %v18467_v54  ;;  %v21394_v30 = vld [vmem:[#allocation72_spill] sm:$0xff]  ;;  %v21395_v47 = vld [vmem:[#allocation19_spill] sm:$0xff]  ;;  %v18472_v13 = vpop.f32.mrf.mxu0  ;;  %v18474_v7 = vpop.eup %11692 }
 0x532   : > { %11716 = vtanh.f32 %v21394_v30  ;;  %9848 = vmatprep.mubr.msk.f32.mxu1 %vm2751_vm4, %v12509_v56  ;;  %7085 = vmatprep.subr.mxu0 %v21395_v47  ;;  %21396 = vst [vmem:[#allocation65_spill] sm:$0xff] %v18472_v13  ;;  %21397 = vst [vmem:[#allocation78_spill] sm:$0xff] %v18474_v7  ;;  %v21398_v35 = vld [vmem:[#allocation22_spill] sm:$0xff]  ;;  %v21399_v31 = vld [vmem:[#allocation55_spill] sm:$0xff]  ;;  %v18478_v55 = vpop.f32.mrf.mxu1  ;;  %v18480_v34 = vpop.eup %11694 }
 0x533   : > { %11718 = vtanh.f32 %v21398_v35  ;;  %7156 = vmatprep.subr.mxu1 %v21399_v31  ;;  %v12510_v38 = vld [vmem:[#allocation3 + $0x60] sm:$0xff]  ;;  %21400 = vst [vmem:[#allocation80_spill] sm:$0xff] %v18478_v55  ;;  %21401 = vst [vmem:[#allocation64_spill] sm:$0xff] %v18480_v34  ;;  %v21403_v56 = vld [vmem:[#allocation102_spill] sm:$0xff]  ;;  %v18484_v30 = vpop.f32.mrf.mxu0  ;;  %v18486_v47 = vpop.eup %11696 }
 0x534   : > { %6355 = vmatmul.mubr.f32.gmra.mxu0 %v12510_v38  ;;  %v21402_v54 = vld [vmem:[#allocation83_spill] sm:$0xff]  ;;  %6564 = vmatmul.mubr.f32.gmra.mxu1 %v12510_v38  ;;  %21404 = vst [vmem:[#allocation87_spill] sm:$0xff] %v18484_v30  ;;  %21405 = vst [vmem:[#allocation58_spill] sm:$0xff] %v18486_v47  ;;  %v21406_v7 = vld [vmem:[#allocation50_spill] sm:$0xff]  ;;  %v18491_v13 = vpop.f32.mrf.mxu1  ;;  %v18493_v55 = vpop.eup %11698 }
 0x535   : > { %11720 = vtanh.f32 %v21402_v54  ;;  %7086 = vmatpush1.msra.mxu0 %v21403_v56  ;;  %v21407_v35 = vld [vmem:[#allocation99_spill] sm:$0xff]  ;;  %21409 = vst [vmem:[#allocation53_spill] sm:$0xff] %v18491_v13  ;;  %21410 = vst [vmem:[#allocation88_spill] sm:$0xff] %v18493_v55  ;;  %v21411_v34 = vld [vmem:[#allocation28_spill] sm:$0xff]  ;;  %v18498_v56 = vpop.f32.mrf.mxu0  ;;  %v18500_v30 = vpop.eup %11700 }
 0x536   : > { %11722 = vtanh.f32 %v21406_v7  ;;  %7157 = vmatpush1.msra.mxu1 %v21407_v35  ;;  %v21408_v31 = vld [vmem:[#allocation103_spill] sm:$0xff]  ;;  %v21412_v54 = vld [vmem:[#allocation101_spill] sm:$0xff]  ;;  %v21413_v38 = vld [vmem:[#allocation98_spill] sm:$0xff]  ;;  %21414 = vst [vmem:[#allocation71_spill] sm:$0xff] %v18500_v30  ;;  %v18507_v55 = vpop.eup %11702 }
 0x537   : > { %7087 = vmatprep.subr.mxu0 %v21408_v31  ;;  %11724 = vtanh.f32 %v21411_v34  ;;  %7158 = vmatprep.subr.mxu1 %v21412_v54  ;;  %v21415_v47 = vld [vmem:[#allocation68_spill] sm:$0xff]  ;;  %v12511_v35 = vld [vmem:[#allocation3 + $0x78] sm:$0xff]  ;;  %v18505_v31 = vpop.f32.mrf.mxu1  ;;  %21417 = vst [vmem:[#allocation49_spill] sm:$0xff] %v18507_v55  ;;  %v18512_v54 = vpop.f32.mrf.mxu0  ;;  %v12512_v30 = vld [vmem:[#allocation3 + $0x70] sm:$0xff] }
 0x538   : > { %7088 = vmatpush1.msra.mxu0 %v21413_v38  ;;  %11726 = vtanh.f32 %v21415_v47  ;;  %v21416_v7 = vld [vmem:[#allocation100_spill] sm:$0xff]  ;;  %9825 = vmatprep.mubr.msk.f32.mxu0 %vm2751_vm4, %v12511_v35  ;;  %v21418_v34 = vld [vmem:[#allocation54_spill] sm:$0xff]  ;;  %v18514_v38 = vpop.eup %11704  ;;  %v21420_v47 = vld [vmem:[#allocation27_spill] sm:$0xff] }
 0x539   : > { %7159 = vmatpush1.msra.mxu1 %v21416_v7  ;;  %11728 = vtanh.f32 %v18227_v3  ;;  %9849 = vmatprep.mubr.msk.f32.mxu1 %vm2751_vm4, %v12511_v35  ;;  %21419 = vst [vmem:[#allocation51_spill] sm:$0xff] %v18514_v38  ;;  %v21421_v7 = vld [vmem:[#allocation17_spill] sm:$0xff]  ;;  %v18518_v13 = vpop.f32.mrf.mxu1  ;;  %v18520_v42 = vpop.eup %11706  ;;  %v21424_v55 = vld [vmem:[#allocation46_spill] sm:$0xff]  ;;  %v21425_v3 = vld [vmem:[#allocation24_spill] sm:$0xff] }
 0x53a   : > { %7089 = vmatprep.subr.mxu0 %v21418_v34  ;;  %11730 = vtanh.f32 %v21420_v47  ;;  %7160 = vmatprep.subr.mxu1 %v21421_v7  ;;  %21422 = vst [vmem:[#allocation97_spill] sm:$0xff] %v18518_v13  ;;  %21423 = vst [vmem:[#allocation62_spill] sm:$0xff] %v18520_v42  ;;  %v18524_v35 = vpop.f32.mrf.mxu0  ;;  %v18526_v34 = vpop.eup %11708  ;;  %v21428_v47 = vld [vmem:[#allocation43_spill] sm:$0xff]  ;;  %v21429_v7 = vld [vmem:[#allocation44_spill] sm:$0xff] }
 0x53b   : > { %6361 = vmatmul.mubr.f32.gmra.mxu0 %v12512_v30  ;;  %11732 = vtanh.f32 %v21424_v55  ;;  %6570 = vmatmul.mubr.f32.gmra.mxu1 %v12512_v30  ;;  %21426 = vst [vmem:[#allocation94_spill] sm:$0xff] %v18524_v35  ;;  %21427 = vst [vmem:[#allocation61_spill] sm:$0xff] %v18526_v34  ;;  %v18531_v38 = vpop.f32.mrf.mxu1  ;;  %v18533_v13 = vpop.eup %11710  ;;  %v21431_v42 = vld [vmem:[#allocation60_spill] sm:$0xff] }
 0x53c   : > { %7090 = vmatpush1.msra.mxu0 %v21425_v3  ;;  %11734 = vtanh.f32 %v18240_v14  ;;  %7161 = vmatpush1.msra.mxu1 %v21428_v47  ;;  %21430 = vst [vmem:[#allocation67_spill] sm:$0xff] %v18533_v13  ;;  %v21432_v55 = vld [vmem:[#allocation36_spill] sm:$0xff]  ;;  %v18538_v3 = vpop.f32.mrf.mxu0  ;;  %v18540_v35 = vpop.eup %11712  ;;  %v21465_v13 = vld [vmem:[#allocation15_spill] sm:$0xff] }
 0x53d   : > { %7091 = vmatprep.subr.mxu0 %v21429_v7  ;;  %11736 = vtanh.f32 %v21431_v42  ;;  %7162 = vmatprep.subr.mxu1 %v21432_v55  ;;  %v21433_v30 = vld [vmem:[#allocation20_spill] sm:$0xff]  ;;  %21434 = vst [vmem:[#allocation21_spill] sm:$0xff] %v18540_v35  ;;  %v18545_v7 = vpop.f32.mrf.mxu1  ;;  %v18547_v34 = vpop.eup %11714 }
 0x53e   : > { %7092 = vmatpush1.msra.mxu0 %v21433_v30  ;;  %11738 = vtanh.f32 %v18252_v10  ;;  %v21435_v14 = vld [vmem:[#allocation96_spill] sm:$0xff]  ;;  %21436 = vst [vmem:[#allocation18_spill] sm:$0xff] %v18547_v34  ;;  %v18552_v42 = vpop.f32.mrf.mxu0  ;;  %v12514_v10 = vld [vmem:[#allocation3 + $0x80] sm:$0xff]  ;;  %v21466_v34 = vld [vmem:[#allocation74_spill] sm:$0xff] }
 0x53f   : > { %7163 = vmatpush1.msra.mxu1 %v21435_v14  ;;  %v12513_v47 = vld [vmem:[#allocation3 + $0x88] sm:$0xff]  ;;  %11740 = vtanh.f32 %v18257_v25  ;;  %7109 = vmatprep.subr.mxu0 %v18413_v37  ;;  %v18554_v55 = vpop.eup %11716  ;;  %v18558_v30 = vpop.f32.mrf.mxu1 }
 0x540   : > { %9826 = vmatprep.mubr.msk.f32.mxu0 %vm2751_vm4, %v12513_v47  ;;  %9850 = vmatprep.mubr.msk.f32.mxu1 %vm2751_vm4, %v12513_v47  ;;  %21437 = vst [vmem:[#allocation57_spill] sm:$0xff] %v18554_v55  ;;  %11742 = vtanh.f32 %v18268_v16  ;;  %v18560_v14 = vpop.eup %11718  ;;  %v18564_v25 = vpop.f32.mrf.mxu0  ;;  %v21457_v47 = vld [vmem:[#allocation90_spill] sm:$0xff] }
 0x541   : > { %7180 = vmatprep.subr.mxu1 %v18420_v29  ;;  %6367 = vmatmul.mubr.f32.gmra.mxu0 %v12514_v10  ;;  %21438 = vst [vmem:[#allocation47_spill] sm:$0xff] %v18560_v14  ;;  %11744 = vtanh.f32 %v18273_v2  ;;  %v18571_v16 = vpop.f32.mrf.mxu1  ;;  %v21468_v14 = vld [vmem:[#allocation80_spill] sm:$0xff] }
 0x542   : > { %6576 = vmatmul.mubr.f32.gmra.mxu1 %v12514_v10  ;;  %7110 = vmatpush2.msra.mxu0 %v18400_v33  ;;  %v18566_v37 = vpop.eup %11720  ;;  %11746 = vtanh.f32 %v18279_v51  ;;  %v18578_v2 = vpop.f32.mrf.mxu0  ;;  %v21458_v10 = vld [vmem:[#allocation91_spill] sm:$0xff] }
 0x543   : > { %21439 = vst [vmem:[#allocation84_spill] sm:$0xff] %v18566_v37  ;;  %7181 = vmatpush2.msra.mxu1 %v18406_v26  ;;  %7111 = vmatprep.subr.mxu0 %v18389_v11  ;;  %v18573_v29 = vpop.eup %11722  ;;  %11748 = vtanh.f32 %v18286_v62  ;;  %v12515_v26 = vld [vmem:[#allocation3 + $0x98] sm:$0xff]  ;;  %v18585_v51 = vpop.f32.mrf.mxu1 }
 0x544   : > { %21440 = vst [vmem:[#allocation81_spill] sm:$0xff] %v18573_v29  ;;  %7182 = vmatprep.subr.mxu1 %v18396_v53  ;;  %7112 = vmatpush2.msra.mxu0 %v18375_v48  ;;  %v18580_v33 = vpop.eup %11724  ;;  %11750 = vtanh.f32 %v18301_v18  ;;  %v18592_v62 = vpop.f32.mrf.mxu0 }
 0x545   : > { %21441 = vst [vmem:[#allocation104_spill] sm:$0xff] %v18580_v33  ;;  %7183 = vmatpush2.msra.mxu1 %v18382_v21  ;;  %9827 = vmatprep.mubr.msk.f32.mxu0 %vm2751_vm4, %v12515_v26  ;;  %v18587_v11 = vpop.eup %11726  ;;  %11752 = vtanh.f32 %v18308_v28  ;;  %v12516_v21 = vld [vmem:[#allocation3 + $0x90] sm:$0xff]  ;;  %v18598_v18 = vpop.f32.mrf.mxu1 }
 0x546   : > { %21442 = vst [vmem:[#allocation75_spill] sm:$0xff] %v18587_v11  ;;  %9851 = vmatprep.mubr.msk.f32.mxu1 %vm2751_vm4, %v12515_v26  ;;  %7113 = vmatprep.subr.mxu0 %v18364_v60  ;;  %v18594_v48 = vpop.eup %11728  ;;  %11754 = vtanh.f32 %v18315_v15  ;;  %v18604_v28 = vpop.f32.mrf.mxu0 }
 0x547   : > { %21443 = vst [vmem:[#allocation76_spill] sm:$0xff] %v18594_v48  ;;  %7184 = vmatprep.subr.mxu1 %v18368_v49  ;;  %6373 = vmatmul.mubr.f32.gmra.mxu0 %v12516_v21  ;;  %v18600_v53 = vpop.eup %11730  ;;  %11756 = vtanh.f32 %v18322_v59  ;;  %v18611_v15 = vpop.f32.mrf.mxu1  ;;  %v21470_v48 = vld [vmem:[#allocation53_spill] sm:$0xff] }
 0x548   : > { %21444 = vst [vmem:[#allocation26_spill] sm:$0xff] %v18600_v53  ;;  %6582 = vmatmul.mubr.f32.gmra.mxu1 %v12516_v21  ;;  %7114 = vmatpush2.msra.mxu0 %v18353_v17  ;;  %v18606_v60 = vpop.eup %11732  ;;  %11758 = vtanh.f32 %v18337_v50  ;;  %v18618_v59 = vpop.f32.mrf.mxu0  ;;  %v21460_v21 = vld [vmem:[#allocation92_spill] sm:$0xff] }
 0x549   : > { %21445 = vst [vmem:[#allocation35_spill] sm:$0xff] %v18606_v60  ;;  %7185 = vmatpush2.msra.mxu1 %v18360_v0  ;;  %7115 = vmatprep.subr.mxu0 %v18339_v57  ;;  %v18613_v49 = vpop.eup %11734  ;;  %11760 = vtanh.f32 %v18498_v56  ;;  %v12517_v0 = vld [vmem:[#allocation3 + $0xa8] sm:$0xff]  ;;  %v18625_v50 = vpop.f32.mrf.mxu1  ;;  %v12527_v60 = vld [vmem:[#allocation3 + $0xf8] sm:$0xff] }
 0x54a   : > { %21446 = vst [vmem:[#allocation30_spill] sm:$0xff] %v18613_v49  ;;  %7186 = vmatprep.subr.mxu1 %v18346_v39  ;;  %7116 = vmatpush2.msra.mxu0 %v18328_v63  ;;  %v18620_v17 = vpop.eup %11736  ;;  %11762 = vtanh.f32 %v18505_v31  ;;  %v18632_v63 = vpop.f32.mrf.mxu0 }
 0x54b   : > { %21447 = vst [vmem:[#allocation66_spill] sm:$0xff] %v18620_v17  ;;  %7187 = vmatpush2.msra.mxu1 %v18332_v1  ;;  %9828 = vmatprep.mubr.msk.f32.mxu0 %vm2751_vm4, %v12517_v0  ;;  %v18627_v57 = vpop.eup %11738  ;;  %11764 = vtanh.f32 %v18344_v20  ;;  %v12518_v1 = vld [vmem:[#allocation3 + $0xa0] sm:$0xff]  ;;  %v18638_v56 = vpop.f32.mrf.mxu1  ;;  %v21472_v17 = vld [vmem:[#allocation94_spill] sm:$0xff] }
 0x54c   : > { %21448 = vst [vmem:[#allocation45_spill] sm:$0xff] %v18627_v57  ;;  %9852 = vmatprep.mubr.msk.f32.mxu1 %vm2751_vm4, %v12517_v0  ;;  %7117 = vmatprep.subr.mxu0 %v18317_v44  ;;  %v18634_v39 = vpop.eup %11740  ;;  %11766 = vtanh.f32 %v18351_v43  ;;  %v18644_v44 = vpop.f32.mrf.mxu0 }
 0x54d   : > { %21449 = vst [vmem:[#allocation39_spill] sm:$0xff] %v18634_v39  ;;  %7188 = vmatprep.subr.mxu1 %v18324_v5  ;;  %6379 = vmatmul.mubr.f32.gmra.mxu0 %v12518_v1  ;;  %v18640_v31 = vpop.eup %11742  ;;  %11768 = vtanh.f32 %v18358_v45  ;;  %v18651_v5 = vpop.f32.mrf.mxu1  ;;  %v12528_v39 = vld [vmem:[#allocation3 + $0xf0] sm:$0xff] }
 0x54e   : > { %21450 = vst [vmem:[#allocation95_spill] sm:$0xff] %v18640_v31  ;;  %6588 = vmatmul.mubr.f32.gmra.mxu1 %v12518_v1  ;;  %7118 = vmatpush2.msra.mxu0 %v18303_v36  ;;  %v18646_v20 = vpop.eup %11744  ;;  %11770 = vtanh.f32 %v18373_v61  ;;  %v18658_v36 = vpop.f32.mrf.mxu0  ;;  %v12522_v1 = vld [vmem:[#allocation3 + $0xc0] sm:$0xff] }
 0x54f   : > { %21451 = vst [vmem:[#allocation37_spill] sm:$0xff] %v18646_v20  ;;  %7189 = vmatpush2.msra.mxu1 %v18310_v22  ;;  %7119 = vmatprep.subr.mxu0 %v18292_v24  ;;  %v18653_v43 = vpop.eup %11746  ;;  %11772 = vtanh.f32 %v18380_v12  ;;  %v12519_v22 = vld [vmem:[#allocation3 + $0xb8] sm:$0xff]  ;;  %v18665_v24 = vpop.f32.mrf.mxu1  ;;  %v12530_v20 = vld [vmem:[#allocation3 + $0x100] sm:$0xff] }
 0x550   : > { %21452 = vst [vmem:[#allocation38_spill] sm:$0xff] %v18653_v43  ;;  %7190 = vmatprep.subr.mxu1 %v18296_v23  ;;  %7120 = vmatpush2.msra.mxu0 %v18281_v52  ;;  %v18660_v45 = vpop.eup %11748  ;;  %11774 = vtanh.f32 %v18387_v58  ;;  %v18672_v52 = vpop.f32.mrf.mxu0 }
 0x551   : > { %21453 = vst [vmem:[#allocation70_spill] sm:$0xff] %v18660_v45  ;;  %7191 = vmatpush2.msra.mxu1 %v18288_v40  ;;  %9829 = vmatprep.mubr.msk.f32.mxu0 %vm2751_vm4, %v12519_v22  ;;  %v18667_v61 = vpop.eup %11750  ;;  %11776 = vtanh.f32 %v18394_v8  ;;  %v12520_v40 = vld [vmem:[#allocation3 + $0xb0] sm:$0xff]  ;;  %v18678_v12 = vpop.f32.mrf.mxu1 }
 0x552   : > { %21454 = vst [vmem:[#allocation93_spill] sm:$0xff] %v18667_v61  ;;  %9853 = vmatprep.mubr.msk.f32.mxu1 %vm2751_vm4, %v12519_v22  ;;  %7121 = vmatprep.subr.mxu0 %v18270_v9  ;;  %v18674_v23 = vpop.eup %11752  ;;  %11778 = vtanh.f32 %v18404_v27  ;;  %v18684_v9 = vpop.f32.mrf.mxu0  ;;  %v21462_v22 = vld [vmem:[#allocation77_spill] sm:$0xff] }
 0x553   : > { %21455 = vst [vmem:[#allocation33_spill] sm:$0xff] %v18674_v23  ;;  %7192 = vmatprep.subr.mxu1 %v18275_v32  ;;  %6385 = vmatmul.mubr.f32.gmra.mxu0 %v12520_v40  ;;  %v18680_v58 = vpop.eup %11754  ;;  %11780 = vtanh.f32 %v18411_v19  ;;  %v18691_v32 = vpop.f32.mrf.mxu1  ;;  %v12533_v23 = vld [vmem:[#allocation3 + $0x128] sm:$0xff] }
 0x554   : > { %6594 = vmatmul.mubr.f32.gmra.mxu1 %v12520_v40  ;;  %7122 = vmatpush2.msra.mxu0 %v18262_v41  ;;  %v18686_v8 = vpop.eup %11756  ;;  %11782 = vtanh.f32 %v18418_v6  ;;  %v21459_v41 = vld [vmem:[#allocation69_spill] sm:$0xff]  ;;  %v18698_v19 = vpop.f32.mrf.mxu0 }
 0x555   : > { %21456 = vst [vmem:[#allocation59_spill] sm:$0xff] %v18686_v8  ;;  %7193 = vmatpush2.msra.mxu1 %v18265_v4  ;;  %7123 = vmatprep.subr.mxu0 %v18254_v46  ;;  %v18693_v27 = vpop.eup %11758  ;;  %11784 = vtanh.f32 %v21459_v41  ;;  %v12521_v4 = vld [vmem:[#allocation3 + $0xc8] sm:$0xff]  ;;  %v21461_v46 = vld [vmem:[#allocation73_spill] sm:$0xff]  ;;  %v18703_v6 = vpop.f32.mrf.mxu1  ;;  %v12534_v8 = vld [vmem:[#allocation3 + $0x120] sm:$0xff] }
 0x556   : > { %7194 = vmatprep.subr.mxu1 %v21457_v47  ;;  %7124 = vmatpush2.msra.mxu0 %v21458_v10  ;;  %v11761_v26 = vpop.eup %11760  ;;  %11786 = vtanh.f32 %v21461_v46  ;;  %v18707_v40 = vpop.f32.mrf.mxu0  ;;  %v12523_v10 = vld [vmem:[#allocation3 + $0xd8] sm:$0xff]  ;;  %v21463_v41 = vld [vmem:[#allocation89_spill] sm:$0xff] }
 0x557   : > { %7195 = vmatpush2.msra.mxu1 %v21460_v21  ;;  %9830 = vmatprep.mubr.msk.f32.mxu0 %vm2751_vm4, %v12521_v4  ;;  %v11763_v0 = vpop.eup %11762  ;;  %11788 = vtanh.f32 %v21462_v22  ;;  %v18713_v21 = vpop.f32.mrf.mxu1 }
 0x558   : > { %9854 = vmatprep.mubr.msk.f32.mxu1 %vm2751_vm4, %v12521_v4  ;;  %6391 = vmatmul.mubr.f32.gmra.mxu0 %v12522_v1  ;;  %v18709_v47 = vpop.eup %11764  ;;  %11790 = vtanh.f32 %v21463_v41  ;;  %v21464_v4 = vld [vmem:[#allocation31_spill] sm:$0xff]  ;;  %v18719_v22 = vpop.f32.mrf.mxu0  ;;  %v12524_v41 = vld [vmem:[#allocation3 + $0xd0] sm:$0xff] }
 0x559   : > { %6600 = vmatmul.mubr.f32.gmra.mxu1 %v12522_v1  ;;  %9831 = vmatprep.mubr.msk.f32.mxu0 %vm2751_vm4, %v12523_v10  ;;  %v18715_v46 = vpop.eup %11766  ;;  %11792 = vtanh.f32 %v21464_v4  ;;  %v18724_v1 = vpop.f32.mrf.mxu1  ;;  %v21467_v4 = vld [vmem:[#allocation65_spill] sm:$0xff] }
 0x55a   : > { %9855 = vmatprep.mubr.msk.f32.mxu1 %vm2751_vm4, %v12523_v10  ;;  %7203 = vmatprep.subr.mxu0 %v11761_v26  ;;  %v18721_v35 = vpop.eup %11768  ;;  %11794 = vtanh.f32 %v21465_v13  ;;  %v18729_v37 = vpop.f32.mrf.mxu0  ;;  %v12525_v26 = vld [vmem:[#allocation3 + $0xe8] sm:$0xff] }
 0x55b   : > { %7274 = vmatprep.subr.mxu1 %v11763_v0  ;;  %v18726_v55 = vpop.eup %11770  ;;  %11796 = vtanh.f32 %v21466_v34  ;;  %v18735_v13 = vpop.f32.mrf.mxu1  ;;  %v21469_v34 = vld [vmem:[#allocation87_spill] sm:$0xff] }
 0x55c   : > { %6397 = vmatmul.mubr.f32.gmra.mxu0 %v12524_v41  ;;  %v18731_v10 = vpop.eup %11772  ;;  %11798 = vtanh.f32 %v21467_v4 }
 0x55d   : > { %6606 = vmatmul.mubr.f32.gmra.mxu1 %v12524_v41  ;;  %9832 = vmatprep.mubr.msk.f32.mxu0 %vm2751_vm4, %v12525_v26  ;;  %v18737_v0 = vpop.eup %11774  ;;  %11800 = vtanh.f32 %v21468_v14  ;;  %v12526_v41 = vld [vmem:[#allocation3 + $0xe0] sm:$0xff]  ;;  %v18747_v11 = vpop.f32.mrf.mxu0 }
 0x55e   : > { %9856 = vmatprep.mubr.msk.f32.mxu1 %vm2751_vm4, %v12525_v26  ;;  %v18741_v33 = vpop.eup %11776  ;;  %11802 = vtanh.f32 %v21469_v34  ;;  %v18753_v14 = vpop.f32.mrf.mxu1  ;;  %v21471_v34 = vld [vmem:[#allocation97_spill] sm:$0xff] }
 0x55f   : > { %v18744_v29 = vpop.eup %11778  ;;  %11804 = vtanh.f32 %v21470_v48  ;;  %v18759_v53 = vpop.f32.mrf.mxu0 }
 0x560   : > { %6403 = vmatmul.mubr.f32.gmra.mxu0 %v12526_v41  ;;  %v18749_v4 = vpop.eup %11780  ;;  %11806 = vtanh.f32 %v18512_v54 }
 0x561   : > { %6612 = vmatmul.mubr.f32.gmra.mxu1 %v12526_v41  ;;  %9833 = vmatprep.mubr.msk.f32.mxu0 %vm2751_vm4, %v12527_v60  ;;  %v18755_v26 = vpop.eup %11782  ;;  %11808 = vtanh.f32 %v21471_v34  ;;  %v18764_v41 = vpop.f32.mrf.mxu1 }
 0x562   : > { %9857 = vmatprep.mubr.msk.f32.mxu1 %vm2751_vm4, %v12527_v60  ;;  %v18761_v48 = vpop.eup %11784  ;;  %11810 = vtanh.f32 %v21472_v17  ;;  %v12529_v60 = vld [vmem:[#allocation3 + $0x108] sm:$0xff] }
 0x563   : > { %v18766_v49 = vpop.eup %11786  ;;  %11812 = vtanh.f32 %v18531_v38  ;;  %v18777_v17 = vpop.f32.mrf.mxu0 }
 0x564   : > { %6409 = vmatmul.mubr.f32.gmra.mxu0 %v12528_v39  ;;  %v18769_v54 = vpop.eup %11788  ;;  %11814 = vtanh.f32 %v18538_v3  ;;  %v18782_v38 = vpop.f32.mrf.mxu1 }
 0x565   : > { %6618 = vmatmul.mubr.f32.gmra.mxu1 %v12528_v39  ;;  %9834 = vmatprep.mubr.msk.f32.mxu0 %vm2751_vm4, %v12529_v60  ;;  %v18773_v34 = vpop.eup %11790  ;;  %11816 = vtanh.f32 %v18545_v7  ;;  %v18787_v3 = vpop.f32.mrf.mxu0  ;;  %v12531_v7 = vld [vmem:[#allocation3 + $0x118] sm:$0xff] }
 0x566   : > { %9858 = vmatprep.mubr.msk.f32.mxu1 %vm2751_vm4, %v12529_v60  ;;  %v18779_v57 = vpop.eup %11792  ;;  %11818 = vtanh.f32 %v18552_v42  ;;  %v18793_v60 = vpop.f32.mrf.mxu1 }
 0x567   : > { %v18784_v39 = vpop.eup %11794  ;;  %11820 = vtanh.f32 %v18558_v30 }
 0x568   : > { %6415 = vmatmul.mubr.f32.gmra.mxu0 %v12530_v20  ;;  %v18789_v31 = vpop.eup %11796  ;;  %11822 = vtanh.f32 %v18564_v25 }
 0x569   : > { %6624 = vmatmul.mubr.f32.gmra.mxu1 %v12530_v20  ;;  %9835 = vmatprep.mubr.msk.f32.mxu0 %vm2751_vm4, %v12531_v7  ;;  %v18795_v42 = vpop.eup %11798  ;;  %11824 = vtanh.f32 %v18571_v16  ;;  %v12532_v20 = vld [vmem:[#allocation3 + $0x110] sm:$0xff]  ;;  %v18805_v43 = vpop.f32.mrf.mxu0 }
 0x56a   : > { %9859 = vmatprep.mubr.msk.f32.mxu1 %vm2751_vm4, %v12531_v7  ;;  %v18799_v45 = vpop.eup %11800  ;;  %11826 = vtanh.f32 %v18578_v2  ;;  %v18811_v16 = vpop.f32.mrf.mxu1 }
 0x56b   : > { %v18802_v30 = vpop.eup %11802  ;;  %11828 = vtanh.f32 %v18585_v51  ;;  %v18817_v2 = vpop.f32.mrf.mxu0 }
 0x56c   : > { %6421 = vmatmul.mubr.f32.gmra.mxu0 %v12532_v20  ;;  %v18807_v25 = vpop.eup %11804  ;;  %11830 = vtanh.f32 %v18592_v62 }
 0x56d   : > { %6630 = vmatmul.mubr.f32.gmra.mxu1 %v12532_v20  ;;  %9836 = vmatprep.mubr.msk.f32.mxu0 %vm2751_vm4, %v12533_v23  ;;  %v18813_v7 = vpop.eup %11806  ;;  %11832 = vtanh.f32 %v18598_v18  ;;  %v18822_v20 = vpop.f32.mrf.mxu1 }
 0x56e   : > { %21473 = vst [vmem:[#allocation48_spill] sm:$0xff] %v18813_v7  ;;  %9860 = vmatprep.mubr.msk.f32.mxu1 %vm2751_vm4, %v12533_v23  ;;  %v18819_v51 = vpop.eup %11808  ;;  %11834 = vtanh.f32 %v18604_v28  ;;  %v12535_v23 = vld [vmem:[#allocation3 + $0x138] sm:$0xff]  ;;  %v12536_v7 = vld [vmem:[#allocation3 + $0x130] sm:$0xff] }
 0x56f   : > { %21474 = vst [vmem:[#allocation32_spill] sm:$0xff] %v18819_v51  ;;  %v18824_v61 = vpop.eup %11810  ;;  %11836 = vtanh.f32 %v18611_v15  ;;  %v18835_v28 = vpop.f32.mrf.mxu0 }
 0x570   : > { %21475 = vst [vmem:[#allocation40_spill] sm:$0xff] %v18824_v61  ;;  %6427 = vmatmul.mubr.f32.gmra.mxu0 %v12534_v8  ;;  %v18827_v62 = vpop.eup %11812  ;;  %11838 = vtanh.f32 %v18618_v59  ;;  %v18840_v15 = vpop.f32.mrf.mxu1 }
 0x571   : > { %21476 = vst [vmem:[#allocation56_spill] sm:$0xff] %v18827_v62  ;;  %6636 = vmatmul.mubr.f32.gmra.mxu1 %v12534_v8  ;;  %9837 = vmatprep.mubr.msk.f32.mxu0 %vm2751_vm4, %v12535_v23  ;;  %v18831_v18 = vpop.eup %11814  ;;  %11840 = vtanh.f32 %v18625_v50  ;;  %v18845_v59 = vpop.f32.mrf.mxu0  ;;  %v12537_v50 = vld [vmem:[#allocation3 + $0x148] sm:$0xff] }
 0x572   : > { %21477 = vst [vmem:[#allocation41_spill] sm:$0xff] %v18831_v18  ;;  %9861 = vmatprep.mubr.msk.f32.mxu1 %vm2751_vm4, %v12535_v23  ;;  %v18837_v51 = vpop.eup %11816  ;;  %11842 = vtanh.f32 %v18632_v63  ;;  %v18851_v23 = vpop.f32.mrf.mxu1  ;;  %v12539_v18 = vld [vmem:[#allocation3 + $0x158] sm:$0xff] }
 0x573   : > { %21478 = vst [vmem:[#allocation85_spill] sm:$0xff] %v18837_v51  ;;  %v18842_v8 = vpop.eup %11818  ;;  %11844 = vtanh.f32 %v18638_v56 }
 0x574   : > { %21479 = vst [vmem:[#allocation42_spill] sm:$0xff] %v18842_v8  ;;  %6433 = vmatmul.mubr.f32.gmra.mxu0 %v12536_v7  ;;  %v18847_v62 = vpop.eup %11820  ;;  %11846 = vtanh.f32 %v18644_v44  ;;  %v12540_v8 = vld [vmem:[#allocation3 + $0x150] sm:$0xff] }
 0x575   : > { %21480 = vst [vmem:[#allocation34_spill] sm:$0xff] %v18847_v62  ;;  %6642 = vmatmul.mubr.f32.gmra.mxu1 %v12536_v7  ;;  %9838 = vmatprep.mubr.msk.f32.mxu0 %vm2751_vm4, %v12537_v50  ;;  %v18853_v63 = vpop.eup %11822  ;;  %11848 = vtanh.f32 %v18651_v5  ;;  %v12538_v7 = vld [vmem:[#allocation3 + $0x140] sm:$0xff]  ;;  %v18863_v51 = vpop.f32.mrf.mxu0 }
 0x576   : > { %21481 = vst [vmem:[#allocation52_spill] sm:$0xff] %v18853_v63  ;;  %9862 = vmatprep.mubr.msk.f32.mxu1 %vm2751_vm4, %v12537_v50  ;;  %v18857_v61 = vpop.eup %11824  ;;  %11850 = vtanh.f32 %v18658_v36  ;;  %v18869_v5 = vpop.f32.mrf.mxu1  ;;  %v12542_v63 = vld [vmem:[#allocation3 + $0x160] sm:$0xff] }
 0x577   : > { %21482 = vst [vmem:[#allocation23_spill] sm:$0xff] %v18857_v61  ;;  %v18860_v56 = vpop.eup %11826  ;;  %11852 = vtanh.f32 %v18665_v24  ;;  %v18875_v36 = vpop.f32.mrf.mxu0 }
 0x578   : > { %21483 = vst [vmem:[#allocation72_spill] sm:$0xff] %v18860_v56  ;;  %6439 = vmatmul.mubr.f32.gmra.mxu0 %v12538_v7  ;;  %v18865_v44 = vpop.eup %11828  ;;  %11854 = vtanh.f32 %v18672_v52 }
 0x579   : > { %21484 = vst [vmem:[#allocation19_spill] sm:$0xff] %v18865_v44  ;;  %6648 = vmatmul.mubr.f32.gmra.mxu1 %v12538_v7  ;;  %9839 = vmatprep.mubr.msk.f32.mxu0 %vm2751_vm4, %v12539_v18  ;;  %v18871_v50 = vpop.eup %11830  ;;  %11856 = vtanh.f32 %v18678_v12  ;;  %v18880_v7 = vpop.f32.mrf.mxu1 }
 0x57a   : > { %21485 = vst [vmem:[#allocation22_spill] sm:$0xff] %v18871_v50  ;;  %9863 = vmatprep.mubr.msk.f32.mxu1 %vm2751_vm4, %v12539_v18  ;;  %v18877_v24 = vpop.eup %11832  ;;  %11858 = vtanh.f32 %v18684_v9  ;;  %v12541_v18 = vld [vmem:[#allocation3 + $0x168] sm:$0xff] }
 0x57b   : > { %21486 = vst [vmem:[#allocation55_spill] sm:$0xff] %v18877_v24  ;;  %v18882_v62 = vpop.eup %11834  ;;  %11860 = vtanh.f32 %v18691_v32  ;;  %v18893_v9 = vpop.f32.mrf.mxu0 }
 0x57c   : > { %21487 = vst [vmem:[#allocation83_spill] sm:$0xff] %v18882_v62  ;;  %6445 = vmatmul.mubr.f32.gmra.mxu0 %v12540_v8  ;;  %v18885_v52 = vpop.eup %11836  ;;  %11862 = vtanh.f32 %v18698_v19  ;;  %v18898_v32 = vpop.f32.mrf.mxu1 }
 0x57d   : > { %21488 = vst [vmem:[#allocation102_spill] sm:$0xff] %v18885_v52  ;;  %6654 = vmatmul.mubr.f32.gmra.mxu1 %v12540_v8  ;;  %9840 = vmatprep.mubr.msk.f32.mxu0 %vm2751_vm4, %v12541_v18  ;;  %v18889_v12 = vpop.eup %11838  ;;  %11864 = vtanh.f32 %v18703_v6  ;;  %v18903_v19 = vpop.f32.mrf.mxu0  ;;  %v12543_v6 = vld [vmem:[#allocation3 + $0x178] sm:$0xff] }
 0x57e   : > { %9864 = vmatprep.mubr.msk.f32.mxu1 %vm2751_vm4, %v12541_v18  ;;  %v18895_v61 = vpop.eup %11840  ;;  %11866 = vtanh.f32 %v18707_v40  ;;  %v18909_v18 = vpop.f32.mrf.mxu1 }
 0x57f   : > { %v18900_v8 = vpop.eup %11842  ;;  %11868 = vtanh.f32 %v18713_v21  ;;  %v18917_v21 = vld [vmem:[%s20300_s5 + $0x8] sm:$0x3f] }
 0x580   : > { %6451 = vmatmul.mubr.f32.gmra.mxu0 %v12542_v63  ;;  %v18905_v44 = vpop.eup %11844  ;;  %11870 = vtanh.f32 %v18719_v22  ;;  %21489 = vst [vmem:[#allocation50_spill] sm:$0xff] %v18917_v21  ;;  %v12544_v22 = vld [vmem:[#allocation3 + $0x170] sm:$0xff] }
 0x581   : > { %6660 = vmatmul.mubr.f32.gmra.mxu1 %v12542_v63  ;;  %9841 = vmatprep.mubr.msk.f32.mxu0 %vm2751_vm4, %v12543_v6  ;;  %v18911_v40 = vpop.eup %11846  ;;  %11872 = vtanh.f32 %v18724_v1  ;;  %v18926_v24 = vpop.f32.mrf.mxu0  ;;  %v18935_v1 = vld [vmem:[%s20300_s5] sm:$0x3f] }
 0x582   : > { %9865 = vmatprep.mubr.msk.f32.mxu1 %vm2751_vm4, %v12543_v6  ;;  %v18920_v56 = vpop.eup %11848  ;;  %11874 = vtanh.f32 %v18729_v37  ;;  %21490 = vst [vmem:[#allocation99_spill] sm:$0xff] %v18935_v1  ;;  %v18938_v37 = vpop.f32.mrf.mxu1 }
 0x583   : > { %v18923_v63 = vpop.eup %11850  ;;  %11876 = vtanh.f32 %v18735_v13  ;;  %v18945_v13 = vpop.f32.mrf.mxu0 }
 0x584   : > { %6457 = vmatmul.mubr.f32.gmra.mxu0 %v12544_v22  ;;  %v18928_v6 = vpop.eup %11852  ;;  %11878 = vtanh.f32 %v18747_v11  ;;  %v18950_v52 = vpop.f32.mrf.mxu1 }
 0x585   : > { %6666 = vmatmul.mubr.f32.gmra.mxu1 %v12544_v22  ;;  %9866 = vmatprep.mubr.msk.f32.mxu0 %vm2751_vm4, %v18917_v21  ;;  %v18940_v50 = vpop.eup %11854  ;;  %11880 = vtanh.f32 %v18753_v14 }
 0x586   : > { %9867 = vmatprep.mubr.msk.f32.mxu1 %vm2751_vm4, %v18917_v21  ;;  %v18947_v22 = vpop.eup %11856  ;;  %11882 = vtanh.f32 %v18759_v53 }
 0x587   : > { %v18952_v62 = vpop.eup %11858  ;;  %11884 = vtanh.f32 %v18764_v41  ;;  %v18966_v53 = vpop.f32.mrf.mxu0 }
 0x588   : > { %7126 = vmatmul.mubr.f32.vlgmr.msra.gmra.mxu0 %v18935_v1  ;;  %v18956_v11 = vpop.eup %11860  ;;  %11886 = vtanh.f32 %v18777_v17  ;;  %v18973_v41 = vpop.f32.mrf.mxu1 }
 0x589   : > { %7197 = vmatmul.mubr.f32.vlgmr.msra.gmra.mxu1 %v18935_v1  ;;  %7204 = vmatpush1.msra.mxu0 %v18802_v30  ;;  %v18961_v14 = vpop.eup %11862  ;;  %11888 = vtanh.f32 %v18782_v38  ;;  %v18980_v38 = vpop.f32.mrf.mxu0 }
 0x58a   : > { %7275 = vmatpush1.msra.mxu1 %v18807_v25  ;;  %7205 = vmatprep.subr.mxu0 %v18795_v42  ;;  %v18968_v21 = vpop.eup %11864  ;;  %11890 = vtanh.f32 %v18787_v3  ;;  %v21499_v3 = vld [vmem:[#allocation95_spill] sm:$0xff]  ;;  %v21500_v25 = vld [vmem:[#allocation37_spill] sm:$0xff] }
 0x58b   : > { %7276 = vmatprep.subr.mxu1 %v18799_v45  ;;  %7206 = vmatpush1.msra.mxu0 %v18784_v39  ;;  %v18975_v17 = vpop.eup %11866  ;;  %11892 = vtanh.f32 %v18793_v60  ;;  %v18987_v45 = vpop.f32.mrf.mxu1 }
 0x58c   : > { %7277 = vmatpush1.msra.mxu1 %v18789_v31  ;;  %7207 = vmatprep.subr.mxu0 %v18773_v34  ;;  %v18982_v42 = vpop.eup %11868  ;;  %11894 = vtanh.f32 %v18805_v43  ;;  %v21498_v34 = vld [vmem:[#allocation70_spill] sm:$0xff] }
 0x58d   : > { %7278 = vmatprep.subr.mxu1 %v18779_v57  ;;  %7208 = vmatpush1.msra.mxu0 %v18766_v49  ;;  %v18989_v39 = vpop.eup %11870  ;;  %11896 = vtanh.f32 %v18811_v16  ;;  %v19004_v57 = vpop.f32.mrf.mxu0  ;;  %v21501_v16 = vld [vmem:[#allocation45_spill] sm:$0xff] }
 0x58e   : > { %21491 = vst [vmem:[#allocation103_spill] sm:$0xff] %v18989_v39  ;;  %7279 = vmatpush1.msra.mxu1 %v18769_v54  ;;  %7209 = vmatprep.subr.mxu0 %v18755_v26  ;;  %v18994_v31 = vpop.eup %11872  ;;  %11898 = vtanh.f32 %v18817_v2  ;;  %v21497_v54 = vld [vmem:[#allocation38_spill] sm:$0xff]  ;;  %v21530_v39 = vld [vmem:[#allocation25_spill] sm:$0xff] }
 0x58f   : > { %21492 = vst [vmem:[#allocation28_spill] sm:$0xff] %v18994_v31  ;;  %7280 = vmatprep.subr.mxu1 %v18761_v48  ;;  %7210 = vmatpush1.msra.mxu0 %v18744_v29  ;;  %v18999_v49 = vpop.eup %11874  ;;  %11900 = vtanh.f32 %v18822_v20  ;;  %v19011_v29 = vpop.f32.mrf.mxu1  ;;  %v21495_v48 = vld [vmem:[#allocation93_spill] sm:$0xff]  ;;  %v21502_v20 = vld [vmem:[#allocation39_spill] sm:$0xff]  ;;  %v21528_v31 = vld [vmem:[#allocation16_spill] sm:$0xff] }
 0x590   : > { %7281 = vmatpush1.msra.mxu1 %v18749_v4  ;;  %7211 = vmatprep.subr.mxu0 %v18737_v0  ;;  %v19006_v43 = vpop.eup %11876  ;;  %11902 = vtanh.f32 %v18835_v28  ;;  %v19018_v0 = vpop.f32.mrf.mxu0  ;;  %v21503_v28 = vld [vmem:[#allocation30_spill] sm:$0xff] }
 0x591   : > { %21493 = vst [vmem:[#allocation101_spill] sm:$0xff] %v19006_v43  ;;  %7282 = vmatprep.subr.mxu1 %v18741_v33  ;;  %7212 = vmatpush1.msra.mxu0 %v18726_v55  ;;  %v19013_v26 = vpop.eup %11878  ;;  %11904 = vtanh.f32 %v18840_v15  ;;  %v19025_v55 = vpop.f32.mrf.mxu1  ;;  %v21532_v43 = vld [vmem:[#allocation82_spill] sm:$0xff] }
 0x592   : > { %7283 = vmatpush1.msra.mxu1 %v18731_v10  ;;  %7213 = vmatprep.subr.mxu0 %v18715_v46  ;;  %v19020_v4 = vpop.eup %11880  ;;  %11906 = vtanh.f32 %v18845_v59  ;;  %v21494_v10 = vld [vmem:[#allocation59_spill] sm:$0xff] }
 0x593   : > { %7284 = vmatprep.subr.mxu1 %v18721_v35  ;;  %7214 = vmatpush1.msra.mxu0 %v18693_v27  ;;  %v19027_v33 = vpop.eup %11882  ;;  %11908 = vtanh.f32 %v18851_v23  ;;  %v21496_v27 = vld [vmem:[#allocation33_spill] sm:$0xff]  ;;  %v21504_v23 = vld [vmem:[#allocation66_spill] sm:$0xff] }
 0x594   : > { %7285 = vmatpush1.msra.mxu1 %v18709_v47  ;;  %7215 = vmatprep.subr.mxu0 %v18680_v58  ;;  %v19032_v46 = vpop.eup %11884  ;;  %11910 = vtanh.f32 %v18863_v51  ;;  %v19042_v47 = vpop.f32.mrf.mxu0 }
 0x595   : > { %7286 = vmatprep.subr.mxu1 %v21494_v10  ;;  %7216 = vmatpush1.msra.mxu0 %v21495_v48  ;;  %v19037_v35 = vpop.eup %11886  ;;  %11912 = vtanh.f32 %v18869_v5  ;;  %v19049_v60 = vpop.f32.mrf.mxu1  ;;  %v21505_v5 = vld [vmem:[#allocation26_spill] sm:$0xff]  ;;  %v21507_v10 = vld [vmem:[#allocation75_spill] sm:$0xff] }
 0x596   : > { %7287 = vmatpush1.msra.mxu1 %v21496_v27  ;;  %7217 = vmatprep.subr.mxu0 %v21497_v54  ;;  %v19044_v58 = vpop.eup %11888  ;;  %11914 = vtanh.f32 %v18875_v36  ;;  %v19056_v2 = vpop.f32.mrf.mxu0  ;;  %v21509_v27 = vld [vmem:[#allocation81_spill] sm:$0xff] }
 0x597   : > { %7288 = vmatprep.subr.mxu1 %v21498_v34  ;;  %7218 = vmatpush1.msra.mxu0 %v21499_v3  ;;  %v19051_v30 = vpop.eup %11890  ;;  %11916 = vtanh.f32 %v18880_v7  ;;  %v19063_v15 = vpop.f32.mrf.mxu1  ;;  %v21506_v7 = vld [vmem:[#allocation35_spill] sm:$0xff] }
 0x598   : > { %7289 = vmatpush1.msra.mxu1 %v21500_v25  ;;  %7219 = vmatprep.subr.mxu0 %v21501_v16  ;;  %v19058_v51 = vpop.eup %11892  ;;  %11918 = vtanh.f32 %v18893_v9  ;;  %v21508_v9 = vld [vmem:[#allocation76_spill] sm:$0xff]  ;;  %v21511_v3 = vld [vmem:[#allocation47_spill] sm:$0xff] }
 0x599   : > { %7290 = vmatprep.subr.mxu1 %v21502_v20  ;;  %7220 = vmatpush1.msra.mxu0 %v21503_v28  ;;  %v19065_v59 = vpop.eup %11894  ;;  %11920 = vtanh.f32 %v18898_v32  ;;  %v5968_v54 = vpop.f32.mrf.mxu0  ;;  %v21510_v32 = vld [vmem:[#allocation104_spill] sm:$0xff]  ;;  %v21513_v20 = vld [vmem:[#allocation18_spill] sm:$0xff] }
 0x59a   : > { %7291 = vmatpush1.msra.mxu1 %v21504_v23  ;;  %7221 = vmatprep.subr.mxu0 %v21505_v5  ;;  %v19070_v36 = vpop.eup %11896  ;;  %11922 = vtanh.f32 %v18903_v19  ;;  %v19085_v25 = vpop.f32.mrf.mxu1  ;;  %v21512_v16 = vld [vmem:[#allocation84_spill] sm:$0xff]  ;;  %v21514_v23 = vld [vmem:[#allocation57_spill] sm:$0xff]  ;;  %v21515_v5 = vld [vmem:[#allocation67_spill] sm:$0xff] }
 0x59b   : > { %7292 = vmatprep.subr.mxu1 %v21506_v7  ;;  %7222 = vmatpush1.msra.mxu0 %v21507_v10  ;;  %v19075_v48 = vpop.eup %11898  ;;  %11924 = vtanh.f32 %v18909_v18  ;;  %v5970_v18 = vpop.f32.mrf.mxu0  ;;  %v21516_v10 = vld [vmem:[#allocation21_spill] sm:$0xff] }
 0x59c   : > { %7293 = vmatpush1.msra.mxu1 %v21508_v9  ;;  %7223 = vmatprep.subr.mxu0 %v21509_v27  ;;  %v19080_v34 = vpop.eup %11900  ;;  %11926 = vtanh.f32 %v18926_v24  ;;  %v19097_v24 = vpop.f32.mrf.mxu1  ;;  %v21517_v9 = vld [vmem:[#allocation62_spill] sm:$0xff]  ;;  %v21518_v27 = vld [vmem:[#allocation61_spill] sm:$0xff] }
 0x59d   : > { %7294 = vmatprep.subr.mxu1 %v21510_v32  ;;  %7224 = vmatpush1.msra.mxu0 %v21511_v3  ;;  %v19087_v19 = vpop.eup %11902  ;;  %11928 = vtanh.f32 %v18938_v37  ;;  %v21519_v32 = vld [vmem:[#allocation49_spill] sm:$0xff] }
 0x59e   : > { %7295 = vmatpush1.msra.mxu1 %v21512_v16  ;;  %7225 = vmatprep.subr.mxu0 %v21513_v20  ;;  %v19092_v28 = vpop.eup %11904  ;;  %11930 = vtanh.f32 %v18945_v13  ;;  %v5974_v3 = vpop.f32.mrf.mxu0  ;;  %v21520_v16 = vld [vmem:[#allocation51_spill] sm:$0xff]  ;;  %v21521_v20 = vld [vmem:[#allocation88_spill] sm:$0xff] }
 0x59f   : > { %7296 = vmatprep.subr.mxu1 %v21514_v23  ;;  %7226 = vmatpush1.msra.mxu0 %v21515_v5  ;;  %v19099_v7 = vpop.eup %11906  ;;  %11932 = vtanh.f32 %v18950_v52  ;;  %v19114_v23 = vpop.f32.mrf.mxu1  ;;  %v21522_v5 = vld [vmem:[#allocation71_spill] sm:$0xff] }
 0x5a0   : > { %7297 = vmatpush1.msra.mxu1 %v21516_v10  ;;  %7227 = vmatprep.subr.mxu0 %v21517_v9  ;;  %v19104_v37 = vpop.eup %11908  ;;  %11934 = vtanh.f32 %v18966_v53  ;;  %v21523_v10 = vld [vmem:[#allocation64_spill] sm:$0xff]  ;;  %v5976_v53 = vpop.f32.mrf.mxu0 }
 0x5a1   : > { %7298 = vmatprep.subr.mxu1 %v21518_v27  ;;  %7228 = vmatpush1.msra.mxu0 %v21519_v32  ;;  %v19109_v13 = vpop.eup %11910  ;;  %11936 = vtanh.f32 %v18980_v38  ;;  %v21524_v27 = vld [vmem:[#allocation58_spill] sm:$0xff]  ;;  %v21525_v32 = vld [vmem:[#allocation63_spill] sm:$0xff]  ;;  %v19126_v38 = vpop.f32.mrf.mxu1 }
 0x5a2   : > { %7299 = vmatpush1.msra.mxu1 %v21520_v16  ;;  %7229 = vmatprep.subr.mxu0 %v21521_v20  ;;  %v19116_v52 = vpop.eup %11912  ;;  %11938 = vtanh.f32 %v19004_v57  ;;  %v21526_v20 = vld [vmem:[#allocation78_spill] sm:$0xff]  ;;  %v5980_v57 = vpop.f32.mrf.mxu0 }
 0x5a3   : > { %7300 = vmatprep.subr.mxu1 %v21522_v5  ;;  %7230 = vmatpush1.msra.mxu0 %v21523_v10  ;;  %v19121_v9 = vpop.eup %11914  ;;  %11940 = vtanh.f32 %v19018_v0  ;;  %v21527_v5 = vld [vmem:[#allocation29_spill] sm:$0xff]  ;;  %v19138_v0 = vpop.f32.mrf.mxu1 }
 0x5a4   : > { %7301 = vmatpush1.msra.mxu1 %v21524_v27  ;;  %7231 = vmatprep.subr.mxu0 %v21525_v32  ;;  %v19128_v16 = vpop.eup %11916  ;;  %11942 = vtanh.f32 %v19042_v47  ;;  %v21529_v27 = vld [vmem:[#allocation86_spill] sm:$0xff] }
 0x5a5   : > { %7302 = vmatprep.subr.mxu1 %v21526_v20  ;;  %7232 = vmatpush1.msra.mxu0 %v21527_v5  ;;  %v19133_v10 = vpop.eup %11918  ;;  %11944 = vtanh.f32 %v19056_v2  ;;  %v21531_v20 = vld [vmem:[#allocation79_spill] sm:$0xff]  ;;  %v5982_v5 = vpop.f32.mrf.mxu0 }
 0x5a6   : > { %7303 = vmatpush1.msra.mxu1 %v21528_v31  ;;  %7233 = vmatprep.subr.mxu0 %v21529_v27  ;;  %v19140_v32 = vpop.eup %11920  ;;  %11946 = vtanh.f32 %v5968_v54  ;;  %v19148_v31 = vpop.f32.mrf.mxu1 }
 0x5a7   : > { %7304 = vmatprep.subr.mxu1 %v21530_v39  ;;  %7234 = vmatpush1.msra.mxu0 %v21531_v20  ;;  %v19144_v47 = vpop.eup %11922  ;;  %11948 = vtanh.f32 %v5970_v18  ;;  %v5986_v39 = vpop.f32.mrf.mxu0 }
 0x5a8   : > { %7305 = vmatpush1.msra.mxu1 %v21532_v43  ;;  %7251 = vmatprep.subr.mxu0 %v18975_v17  ;;  %v19150_v2 = vpop.eup %11924  ;;  %11950 = vtanh.f32 %v5974_v3  ;;  %v6195_v43 = vpop.f32.mrf.mxu1  ;;  %v21535_v3 = vld [vmem:[#allocation22_spill] sm:$0xff] }
 0x5a9   : > { %7322 = vmatprep.subr.mxu1 %v18982_v42  ;;  %7252 = vmatpush2.msra.mxu0 %v18961_v14  ;;  %v19154_v27 = vpop.eup %11926  ;;  %11952 = vtanh.f32 %v5976_v53  ;;  %v5988_v42 = vpop.f32.mrf.mxu0  ;;  %v21536_v53 = vld [vmem:[#allocation55_spill] sm:$0xff] }
 0x5aa   : > { %7323 = vmatpush2.msra.mxu1 %v18968_v21  ;;  %7253 = vmatprep.subr.mxu0 %v18952_v62  ;;  %v19158_v17 = vpop.eup %11928  ;;  %11954 = vtanh.f32 %v5980_v57  ;;  %v6197_v21 = vpop.f32.mrf.mxu1  ;;  %v21537_v57 = vld [vmem:[#allocation72_spill] sm:$0xff] }
 0x5ab   : > { %7324 = vmatprep.subr.mxu1 %v18956_v11  ;;  %7254 = vmatpush2.msra.mxu0 %v18940_v50  ;;  %v19162_v54 = vpop.eup %11930  ;;  %11956 = vtanh.f32 %v5982_v5  ;;  %v5992_v62 = vpop.f32.mrf.mxu0  ;;  %v21539_v5 = vld [vmem:[#allocation19_spill] sm:$0xff] }
 0x5ac   : > { %7325 = vmatpush2.msra.mxu1 %v18947_v22  ;;  %7255 = vmatprep.subr.mxu0 %v18923_v63  ;;  %v19166_v14 = vpop.eup %11932  ;;  %11958 = vtanh.f32 %v5986_v39  ;;  %v6201_v50 = vpop.f32.mrf.mxu1  ;;  %v21540_v39 = vld [vmem:[#allocation52_spill] sm:$0xff] }
 0x5ad   : > { %7326 = vmatprep.subr.mxu1 %v18928_v6  ;;  %7256 = vmatpush2.msra.mxu0 %v18911_v40  ;;  %v19170_v11 = vpop.eup %11934  ;;  %11960 = vtanh.f32 %v5988_v42  ;;  %v5994_v63 = vpop.f32.mrf.mxu0  ;;  %v21533_v40 = vld [vmem:[#allocation83_spill] sm:$0xff] }
 0x5ae   : > { %7327 = vmatpush2.msra.mxu1 %v18920_v56  ;;  %7257 = vmatprep.subr.mxu0 %v18900_v8  ;;  %v19174_v22 = vpop.eup %11936  ;;  %11962 = vtanh.f32 %v5992_v62  ;;  %v6203_v56 = vpop.f32.mrf.mxu1  ;;  %v21534_v8 = vld [vmem:[#allocation102_spill] sm:$0xff] }
 0x5af   : > { %7328 = vmatprep.subr.mxu1 %v18905_v44  ;;  %7258 = vmatpush2.msra.mxu0 %v18889_v12  ;;  %v19178_v6 = vpop.eup %11938  ;;  %11964 = vtanh.f32 %v5994_v63  ;;  %v19186_v44 = vpop.f32.mrf.mxu0  ;;  %v21541_v63 = vld [vmem:[#allocation23_spill] sm:$0xff] }
 0x5b0   : > { %7329 = vmatpush2.msra.mxu1 %v18895_v61  ;;  %7259 = vmatprep.subr.mxu0 %v21533_v40  ;;  %v19182_v18 = vpop.eup %11940  ;;  %11966 = vtanh.f32 %v6203_v56  ;;  %v19192_v61 = vpop.f32.mrf.mxu1  ;;  %v21542_v40 = vld [vmem:[#allocation42_spill] sm:$0xff] }
 0x5b1   : > { %7330 = vmatprep.subr.mxu1 %v21534_v8  ;;  %7260 = vmatpush2.msra.mxu0 %v21535_v3  ;;  %v19188_v12 = vpop.eup %11942  ;;  %11968 = vtanh.f32 %v6201_v50  ;;  %21538 = vst [vmem:[#allocation98_spill] sm:$0xff] %v19192_v61  ;;  %v19198_v42 = vpop.f32.mrf.mxu0  ;;  %v21544_v8 = vld [vmem:[#allocation34_spill] sm:$0xff]  ;;  %v21545_v3 = vld [vmem:[#allocation41_spill] sm:$0xff] }
 0x5b2   : > { %7331 = vmatpush2.msra.mxu1 %v21536_v53  ;;  %7261 = vmatprep.subr.mxu0 %v21537_v57  ;;  %v19194_v20 = vpop.eup %11944  ;;  %11970 = vtanh.f32 %v6197_v21  ;;  %v19204_v56 = vpop.f32.mrf.mxu1  ;;  %v21546_v57 = vld [vmem:[#allocation85_spill] sm:$0xff] }
 0x5b3   : > { %7332 = vmatprep.subr.mxu1 %v21539_v5  ;;  %7262 = vmatpush2.msra.mxu0 %v21540_v39  ;;  %v19200_v62 = vpop.eup %11946  ;;  %11972 = vtanh.f32 %v6195_v43  ;;  %21543 = vst [vmem:[#allocation68_spill] sm:$0xff] %v19204_v56  ;;  %v6004_v21 = vpop.f32.mrf.mxu0  ;;  %v21547_v5 = vld [vmem:[#allocation40_spill] sm:$0xff] }
 0x5b4   : > { %7333 = vmatpush2.msra.mxu1 %v21541_v63  ;;  %7263 = vmatprep.subr.mxu0 %v21542_v40  ;;  %v19206_v50 = vpop.eup %11948  ;;  %11974 = vtanh.f32 %v19148_v31  ;;  %v19216_v43 = vpop.f32.mrf.mxu1  ;;  %v21549_v63 = vld [vmem:[#allocation56_spill] sm:$0xff] }
 0x5b5   : > { %7334 = vmatprep.subr.mxu1 %v21544_v8  ;;  %7264 = vmatpush2.msra.mxu0 %v21545_v3  ;;  %v19211_v53 = vpop.eup %11950  ;;  %11976 = vtanh.f32 %v19138_v0  ;;  %21548 = vst [vmem:[#allocation100_spill] sm:$0xff] %v19216_v43  ;;  %v21550_v40 = vld [vmem:[#allocation48_spill] sm:$0xff]  ;;  %v6006_v8 = vpop.f32.mrf.mxu0 }
 0x5b6   : > { %7335 = vmatpush2.msra.mxu1 %v21546_v57  ;;  %7265 = vmatprep.subr.mxu0 %v21547_v5  ;;  %v11953_v39 = vpop.eup %11952  ;;  %11978 = vtanh.f32 %v19126_v38  ;;  %v21551_v3 = vld [vmem:[#allocation32_spill] sm:$0xff]  ;;  %v19223_v57 = vpop.f32.mrf.mxu1  ;;  %v21553_v5 = vld [vmem:[#allocation50_spill] sm:$0xff] }
 0x5b7   : > { %7336 = vmatprep.subr.mxu1 %v21549_v63  ;;  %7266 = vmatpush2.msra.mxu0 %v21550_v40  ;;  %v11955_v31 = vpop.eup %11954  ;;  %11980 = vtanh.f32 %v19114_v23  ;;  %21552 = vst [vmem:[#allocation54_spill] sm:$0xff] %v19223_v57  ;;  %v6010_v61 = vpop.f32.mrf.mxu0 }
 0x5b8   : > { %7337 = vmatpush2.msra.mxu1 %v21551_v3  ;;  %9868 = vmatprep.mubr.msk.f32.mxu0 %vm2751_vm4, %v21553_v5  ;;  %v11957_v0 = vpop.eup %11956  ;;  %11982 = vtanh.f32 %v19097_v24  ;;  %v19232_v63 = vpop.f32.mrf.mxu1 }
 0x5b9   : > { %9869 = vmatprep.mubr.msk.f32.mxu1 %vm2751_vm4, %v21553_v5  ;;  %7268 = vmatmul.mubr.f32.vlgmr.msra.gmra.mxu0 %v18935_v1  ;;  %v11959_v38 = vpop.eup %11958  ;;  %11984 = vtanh.f32 %v19085_v25  ;;  %v6012_v24 = vpop.f32.mrf.mxu0 }
 0x5ba   : > { %7339 = vmatmul.mubr.f32.vlgmr.msra.gmra.mxu1 %v18935_v1  ;;  %9870 = vmatprep.mubr.msk.f32.mxu0 %vm2751_vm4, %v21553_v5  ;;  %v11961_v23 = vpop.eup %11960  ;;  %11986 = vtanh.f32 %v19063_v15  ;;  %v19241_v3 = vpop.f32.mrf.mxu1 }
 0x5bb   : > { %9871 = vmatprep.mubr.msk.f32.mxu1 %vm2751_vm4, %v21553_v5  ;;  %v11963_v40 = vpop.eup %11962  ;;  %11988 = vtanh.f32 %v19049_v60  ;;  %v6016_v56 = vpop.f32.mrf.mxu0 }
 0x5bc   : > { %v11965_v25 = vpop.eup %11964  ;;  %11990 = vtanh.f32 %v19025_v55  ;;  %v19245_v43 = vpop.f32.mrf.mxu1 }
 0x5bd   : > { %v11967_v1 = vpop.eup %11966  ;;  %11992 = vtanh.f32 %v19011_v29  ;;  %7345 = vmatprep.subr.mxu0 %v11965_v25  ;;  %v6018_v5 = vpop.f32.mrf.mxu0 }
 0x5be   : > { %v11969_v15 = vpop.eup %11968  ;;  %11994 = vtanh.f32 %v18987_v45  ;;  %7416 = vmatprep.subr.mxu1 %v11967_v1  ;;  %7346 = vmatpush1.msra.mxu0 %v11963_v40  ;;  %v19249_v60 = vpop.f32.mrf.mxu1 }
 0x5bf   : > { %v11971_v57 = vpop.eup %11970  ;;  %11996 = vtanh.f32 %v18973_v41  ;;  %7417 = vmatpush1.msra.mxu1 %v11969_v15  ;;  %7347 = vmatprep.subr.mxu0 %v11961_v23  ;;  %v6022_v29 = vpop.f32.mrf.mxu0 }
 0x5c0   : > { %v11973_v55 = vpop.eup %11972  ;;  %11998 = vtanh.f32 %v19186_v44  ;;  %7418 = vmatprep.subr.mxu1 %v11971_v57  ;;  %7348 = vmatpush1.msra.mxu0 %v11959_v38  ;;  %v19253_v45 = vpop.f32.mrf.mxu1 }
 0x5c1   : > { %v11975_v25 = vpop.eup %11974  ;;  %12000 = vtanh.f32 %v19198_v42  ;;  %7419 = vmatpush1.msra.mxu1 %v11973_v55  ;;  %7349 = vmatprep.subr.mxu0 %v11957_v0  ;;  %v6024_v41 = vpop.f32.mrf.mxu0 }
 0x5c2   : > { %v11977_v1 = vpop.eup %11976  ;;  %12002 = vtanh.f32 %v6004_v21  ;;  %7420 = vmatprep.subr.mxu1 %v11975_v25  ;;  %7350 = vmatpush1.msra.mxu0 %v11955_v31  ;;  %v19255_v23 = vpop.f32.mrf.mxu1 }
 0x5c3   : > { %v11979_v40 = vpop.eup %11978  ;;  %12004 = vtanh.f32 %v6006_v8  ;;  %7421 = vmatpush1.msra.mxu1 %v11977_v1  ;;  %7351 = vmatprep.subr.mxu0 %v11953_v39  ;;  %v6028_v57 = vpop.f32.mrf.mxu0 }
 0x5c4   : > { %v11981_v44 = vpop.eup %11980  ;;  %12006 = vtanh.f32 %v6010_v61  ;;  %7422 = vmatprep.subr.mxu1 %v11979_v40  ;;  %7352 = vmatpush1.msra.mxu0 %v19211_v53  ;;  %v19258_v0 = vpop.f32.mrf.mxu1 }
 0x5c5   : > { %v11983_v42 = vpop.eup %11982  ;;  %12008 = vtanh.f32 %v6012_v24  ;;  %7423 = vmatpush1.msra.mxu1 %v11981_v44  ;;  %7353 = vmatprep.subr.mxu0 %v19206_v50  ;;  %v6030_v8 = vpop.f32.mrf.mxu0 }
 0x5c6   : > { %v11985_v21 = vpop.eup %11984  ;;  %12010 = vtanh.f32 %v6016_v56  ;;  %7424 = vmatprep.subr.mxu1 %v11983_v42  ;;  %7354 = vmatpush1.msra.mxu0 %v19200_v62  ;;  %v19262_v61 = vpop.f32.mrf.mxu1 }
 0x5c7   : > { %v11987_v39 = vpop.eup %11986  ;;  %12012 = vtanh.f32 %v6018_v5  ;;  %7425 = vmatpush1.msra.mxu1 %v11985_v21  ;;  %7355 = vmatprep.subr.mxu0 %v19194_v20  ;;  %v6034_v31 = vpop.f32.mrf.mxu0 }
 0x5c8   : > { %v11989_v53 = vpop.eup %11988  ;;  %12014 = vtanh.f32 %v6022_v29  ;;  %7426 = vmatprep.subr.mxu1 %v11987_v39  ;;  %7356 = vmatpush1.msra.mxu0 %v19188_v12  ;;  %v6243_v56 = vpop.f32.mrf.mxu1 }
 0x5c9   : > { %v11991_v50 = vpop.eup %11990  ;;  %12016 = vtanh.f32 %v6024_v41  ;;  %7427 = vmatpush1.msra.mxu1 %v11989_v53  ;;  %7357 = vmatprep.subr.mxu0 %v19182_v18  ;;  %v6036_v5 = vpop.f32.mrf.mxu0 }
 0x5ca   : > { %v11993_v62 = vpop.eup %11992  ;;  %12018 = vtanh.f32 %v6028_v57  ;;  %7428 = vmatprep.subr.mxu1 %v11991_v50  ;;  %7358 = vmatpush1.msra.mxu0 %v19178_v6  ;;  %v6245_v20 = vpop.f32.mrf.mxu1 }
 0x5cb   : > { %v11995_v38 = vpop.eup %11994  ;;  %12020 = vtanh.f32 %v6030_v8  ;;  %7429 = vmatpush1.msra.mxu1 %v11993_v62  ;;  %7359 = vmatprep.subr.mxu0 %v19174_v22  ;;  %v6040_v12 = vpop.f32.mrf.mxu0 }
 0x5cc   : > { %v11997_v24 = vpop.eup %11996  ;;  %12022 = vtanh.f32 %v6034_v31  ;;  %7430 = vmatprep.subr.mxu1 %v11995_v38  ;;  %7360 = vmatpush1.msra.mxu0 %v19170_v11  ;;  %v6249_v18 = vpop.f32.mrf.mxu1 }
 0x5cd   : > { %v19270_v15 = vpop.eup %11998  ;;  %12024 = vtanh.f32 %v6036_v5  ;;  %7431 = vmatpush1.msra.mxu1 %v11997_v24  ;;  %7361 = vmatprep.subr.mxu0 %v19162_v54  ;;  %v6042_v55 = vpop.f32.mrf.mxu0  ;;  %v21561_v24 = vld [vmem:[#allocation99_spill] sm:$0xff] }
 0x5ce   : > { %v19273_v6 = vpop.eup %12000  ;;  %12026 = vtanh.f32 %v6040_v12  ;;  %7432 = vmatprep.subr.mxu1 %v19166_v14  ;;  %7362 = vmatpush1.msra.mxu0 %v19154_v27  ;;  %v6251_v29 = vpop.f32.mrf.mxu1 }
 0x5cf   : > { %v19277_v22 = vpop.eup %12002  ;;  %12028 = vtanh.f32 %v6042_v55  ;;  %7433 = vmatpush1.msra.mxu1 %v19158_v17  ;;  %7363 = vmatprep.subr.mxu0 %v19144_v47  ;;  %v19284_v54 = vpop.f32.mrf.mxu0 }
 0x5d0   : > { %v19281_v11 = vpop.eup %12004  ;;  %12030 = vtanh.f32 %v6251_v29  ;;  %7434 = vmatprep.subr.mxu1 %v19150_v2  ;;  %7364 = vmatpush1.msra.mxu0 %v19133_v10  ;;  %v19289_v27 = vpop.f32.mrf.mxu1  ;;  %v21563_v29 = vld [vmem:[#allocation7_spill] sm:$0xff] }
 0x5d1   : > { %v19287_v14 = vpop.eup %12006  ;;  %12032 = vtanh.f32 %v6249_v18  ;;  %7435 = vmatpush1.msra.mxu1 %v19140_v32  ;;  %7365 = vmatprep.subr.mxu0 %v19121_v9  ;;  %v19296_v47 = vpop.f32.mrf.mxu0  ;;  %v21562_v18 = vld [vmem:[#allocation50_spill] sm:$0xff] }
 0x5d2   : > { %v19293_v17 = vpop.eup %12008  ;;  %12034 = vtanh.f32 %v6245_v20  ;;  %7436 = vmatprep.subr.mxu1 %v19128_v16  ;;  %7366 = vmatpush1.msra.mxu0 %v19109_v13  ;;  %v19301_v10 = vpop.f32.mrf.mxu1 }
 0x5d3   : > { %v19299_v2 = vpop.eup %12010  ;;  %12036 = vtanh.f32 %v6243_v56  ;;  %7437 = vmatpush1.msra.mxu1 %v19116_v52  ;;  %7367 = vmatprep.subr.mxu0 %v19099_v7  ;;  %v21556_v52 = vld [vmem:[#allocation103_spill] sm:$0xff] }
 0x5d4   : > { %v19305_v32 = vpop.eup %12012  ;;  %12038 = vtanh.f32 %v19262_v61  ;;  %7438 = vmatprep.subr.mxu1 %v19104_v37  ;;  %7368 = vmatpush1.msra.mxu0 %v19087_v19  ;;  %v19316_v7 = vpop.f32.mrf.mxu0 }
 0x5d5   : > { %v19310_v9 = vpop.eup %12014  ;;  %12040 = vtanh.f32 %v19258_v0  ;;  %7439 = vmatpush1.msra.mxu1 %v19092_v28  ;;  %7369 = vmatprep.subr.mxu0 %v19075_v48  ;;  %v19321_v19 = vpop.f32.mrf.mxu1 }
 0x5d6   : > { %v12017_v13 = vpop.eup %12016  ;;  %12042 = vtanh.f32 %v19255_v23  ;;  %7440 = vmatprep.subr.mxu1 %v19080_v34  ;;  %7370 = vmatpush1.msra.mxu0 %v19065_v59  ;;  %v19326_v48 = vpop.f32.mrf.mxu0 }
 0x5d7   : > { %v12019_v37 = vpop.eup %12018  ;;  %12044 = vtanh.f32 %v19253_v45  ;;  %7441 = vmatpush1.msra.mxu1 %v19070_v36  ;;  %7371 = vmatprep.subr.mxu0 %v19051_v30  ;;  %v19331_v59 = vpop.f32.mrf.mxu1 }
 0x5d8   : > { %v12021_v28 = vpop.eup %12020  ;;  %12046 = vtanh.f32 %v19249_v60  ;;  %7442 = vmatprep.subr.mxu1 %v19058_v51  ;;  %7372 = vmatpush1.msra.mxu0 %v19037_v35  ;;  %v21554_v51 = vld [vmem:[#allocation54_spill] sm:$0xff] }
 0x5d9   : > { %v12023_v34 = vpop.eup %12022  ;;  %12048 = vtanh.f32 %v19245_v43  ;;  %7443 = vmatpush1.msra.mxu1 %v19044_v58  ;;  %7373 = vmatprep.subr.mxu0 %v19027_v33  ;;  %v21555_v33 = vld [vmem:[#allocation101_spill] sm:$0xff]  ;;  %v21558_v43 = vld [vmem:[#allocation28_spill] sm:$0xff]  ;;  %v21560_v60 = vld [vmem:[#allocation98_spill] sm:$0xff] }
 0x5da   : > { %v12025_v36 = vpop.eup %12024  ;;  %12050 = vtanh.f32 %v19241_v3  ;;  %7444 = vmatprep.subr.mxu1 %v19032_v46  ;;  %7374 = vmatpush1.msra.mxu0 %v19013_v26  ;;  %v19342_v58 = vpop.f32.mrf.mxu0  ;;  %v21557_v46 = vld [vmem:[#allocation100_spill] sm:$0xff] }
 0x5db   : > { %v12027_v30 = vpop.eup %12026  ;;  %12052 = vtanh.f32 %v19232_v63  ;;  %7445 = vmatpush1.msra.mxu1 %v19020_v4  ;;  %7375 = vmatprep.subr.mxu0 %v18999_v49  ;;  %v19347_v26 = vpop.f32.mrf.mxu1  ;;  %v21559_v63 = vld [vmem:[#allocation68_spill] sm:$0xff] }
 0x5dc   : > { %v12029_v35 = vpop.eup %12028  ;;  %12054 = vtanh.f32 %v21554_v51  ;;  %7446 = vmatprep.subr.mxu1 %v21555_v33  ;;  %7376 = vmatpush1.msra.mxu0 %v21556_v52  ;;  %v19351_v49 = vpop.f32.mrf.mxu0 }
 0x5dd   : > { %v12031_v16 = vpop.eup %12030  ;;  %12056 = vtanh.f32 %v21557_v46  ;;  %7447 = vmatpush1.msra.mxu1 %v21558_v43  ;;  %7393 = vmatprep.subr.mxu0 %v12029_v35  ;;  %v19354_v25 = vpop.f32.mrf.mxu1 }
 0x5de   : > { %v12033_v4 = vpop.eup %12032  ;;  %12058 = vtanh.f32 %v21559_v63  ;;  %7464 = vmatprep.subr.mxu1 %v12031_v16  ;;  %7394 = vmatpush2.msra.mxu0 %v12027_v30 }
 0x5df   : > { %v12035_v3 = vpop.eup %12034  ;;  %12060 = vtanh.f32 %v21560_v60  ;;  %7465 = vmatpush2.msra.mxu1 %v12033_v4  ;;  %7395 = vmatprep.subr.mxu0 %v12025_v36 }
 0x5e0   : > { %v12037_v45 = vpop.eup %12036  ;;  %7466 = vmatprep.subr.mxu1 %v12035_v3  ;;  %7396 = vmatpush2.msra.mxu0 %v12023_v34  ;;  %v19356_v40 = vpop.f32.mrf.mxu0  ;;  %12062 = vrcp.f32 %v21563_v29 }
 0x5e1   : > { %v12039_v1 = vpop.eup %12038  ;;  %7467 = vmatpush2.msra.mxu1 %v12037_v45  ;;  %7397 = vmatprep.subr.mxu0 %v12021_v28  ;;  %v19358_v44 = vpop.f32.mrf.mxu1 }
 0x5e2   : > { %v12041_v41 = vpop.eup %12040  ;;  %7468 = vmatprep.subr.mxu1 %v12039_v1  ;;  %7398 = vmatpush2.msra.mxu0 %v12019_v37  ;;  %v19360_v42 = vpop.f32.mrf.mxu0 }
 0x5e3   : > { %v12043_v23 = vpop.eup %12042  ;;  %7469 = vmatpush2.msra.mxu1 %v12041_v41  ;;  %7399 = vmatprep.subr.mxu0 %v12017_v13  ;;  %v19363_v21 = vpop.f32.mrf.mxu1 }
 0x5e4   : > { %v12045_v57 = vpop.eup %12044  ;;  %7470 = vmatprep.subr.mxu1 %v12043_v23  ;;  %7400 = vmatpush2.msra.mxu0 %v19310_v9 }
 0x5e5   : > { %v12047_v0 = vpop.eup %12046  ;;  %7471 = vmatpush2.msra.mxu1 %v12045_v57  ;;  %7401 = vmatprep.subr.mxu0 %v19305_v32 }
 0x5e6   : > { %v12049_v8 = vpop.eup %12048  ;;  %7472 = vmatprep.subr.mxu1 %v12047_v0  ;;  %7402 = vmatpush2.msra.mxu0 %v19299_v2  ;;  %v6344_v53 = vpop.f32.mrf.mxu0 }
 0x5e7   : > { %v12051_v39 = vpop.eup %12050  ;;  %7473 = vmatpush2.msra.mxu1 %v12049_v8  ;;  %7403 = vmatprep.subr.mxu0 %v19293_v17  ;;  %v6553_v50 = vpop.f32.mrf.mxu1 }
 0x5e8   : > { %v12053_v61 = vpop.eup %12052  ;;  %7474 = vmatprep.subr.mxu1 %v12051_v39  ;;  %7404 = vmatpush2.msra.mxu0 %v19287_v14  ;;  %v6346_v62 = vpop.f32.mrf.mxu0 }
 0x5e9   : > { %v12055_v31 = vpop.eup %12054  ;;  %7475 = vmatpush2.msra.mxu1 %v12053_v61  ;;  %7405 = vmatprep.subr.mxu0 %v19281_v11  ;;  %v6555_v38 = vpop.f32.mrf.mxu1  ;;  %v21564_v11 = vld [vmem:[#allocation8_spill] sm:$0xff] }
 0x5ea   : > { %v12057_v56 = vpop.eup %12056  ;;  %7476 = vmatprep.subr.mxu1 %v12055_v31  ;;  %7406 = vmatpush2.msra.mxu0 %v19277_v22  ;;  %12064 = vrcp.f32 %v21564_v11 }
 0x5eb   : > { %v12059_v5 = vpop.eup %12058  ;;  %7477 = vmatpush2.msra.mxu1 %v12057_v56  ;;  %7407 = vmatprep.subr.mxu0 %v19273_v6  ;;  %12066 = vtanh.f32 %v19284_v54 }
 0x5ec   : > { %v12061_v20 = vpop.eup %12060  ;;  %7478 = vmatprep.subr.mxu1 %v12059_v5  ;;  %7408 = vmatpush2.msra.mxu0 %v19270_v15  ;;  %v6350_v12 = vpop.f32.mrf.mxu0  ;;  %12068 = vtanh.f32 %v19289_v27 }
 0x5ed   : > { %7479 = vmatpush2.msra.mxu1 %v12061_v20  ;;  %7410 = vmatmul.mubr.f32.vlgmr.msra.gmra.mxu0 %v21561_v24  ;;  %v6559_v55 = vpop.f32.mrf.mxu1  ;;  %12070 = vtanh.f32 %v19296_v47 }
 0x5ee   : > { %7481 = vmatmul.mubr.f32.vlgmr.msra.gmra.mxu1 %v21561_v24  ;;  %9872 = vmatprep.mubr.msk.f32.mxu0 %vm2751_vm4, %v21562_v18  ;;  %v6352_v22 = vpop.f32.mrf.mxu0  ;;  %12072 = vtanh.f32 %v19301_v10  ;;  %v19392_v10 = vpop.eup %12062 }
 0x5ef   : > { %9873 = vmatprep.mubr.msk.f32.mxu1 %vm2751_vm4, %v21562_v18  ;;  %v6561_v6 = vpop.f32.mrf.mxu1  ;;  %12074 = vtanh.f32 %v19316_v7 }
 0x5f0   : > { %12076 = vtanh.f32 %v19321_v19 }
 0x5f1   : > { %12078 = vtanh.f32 %v19326_v48 }
 0x5f2   : > { %12080 = vtanh.f32 %v19331_v59 }
 0x5f3   : > { %12082 = vtanh.f32 %v19342_v58 }
 0x5f4   : > { %v6356_v15 = vpop.f32.mrf.mxu0  ;;  %v6565_v14 = vpop.f32.mrf.mxu1  ;;  %12084 = vtanh.f32 %v19347_v26 }
 0x5f5   : > { %12086 = vtanh.f32 %v19351_v49 }
 0x5f6   : > { %v6358_v17 = vpop.f32.mrf.mxu0  ;;  %v6567_v2 = vpop.f32.mrf.mxu1  ;;  %12088 = vtanh.f32 %v19354_v25 }
 0x5f7   : > { %v19395_v9 = vpop.eup %12064  ;;  %12090 = vtanh.f32 %v19356_v40 }
 0x5f8   : > { %21565 = vst [vmem:[#allocation27_spill] sm:$0xff] %v19395_v9  ;;  %v19398_v13 = vpop.eup %12066  ;;  %12092 = vtanh.f32 %v19358_v44 }
 0x5f9   : > { %21566 = vst [vmem:[#allocation17_spill] sm:$0xff] %v19398_v13  ;;  %v19401_v37 = vpop.eup %12068  ;;  %12094 = vtanh.f32 %v19360_v42 }
 0x5fa   : > { %21567 = vst [vmem:[#allocation46_spill] sm:$0xff] %v19401_v37  ;;  %v19404_v28 = vpop.eup %12070  ;;  %12096 = vtanh.f32 %v19363_v21 }
 0x5fb   : > { %v6362_v32 = vpop.f32.mrf.mxu0  ;;  %v6571_v54 = vpop.f32.mrf.mxu1  ;;  %21568 = vst [vmem:[#allocation24_spill] sm:$0xff] %v19404_v28  ;;  %12098 = vtanh.f32 %v6344_v53 }
 0x5fc   : > { %v19407_v34 = vpop.eup %12072  ;;  %12100 = vtanh.f32 %v6553_v50 }
 0x5fd   : > { %v6364_v27 = vpop.f32.mrf.mxu0  ;;  %v6573_v47 = vpop.f32.mrf.mxu1  ;;  %21569 = vst [vmem:[#allocation43_spill] sm:$0xff] %v19407_v34  ;;  %12102 = vtanh.f32 %v6346_v62 }
 0x5fe   : > { %v19409_v36 = vpop.eup %12074  ;;  %12104 = vtanh.f32 %v6555_v38 }
 0x5ff   : > { %v19411_v30 = vpop.eup %12076  ;;  %12106 = vtanh.f32 %v6350_v12 }
 0x600   : > { %21570 = vst [vmem:[#allocation44_spill] sm:$0xff] %v19411_v30  ;;  %v19413_v35 = vpop.eup %12078  ;;  %12108 = vtanh.f32 %v6559_v55 }
 0x601   : > { %v6368_v7 = vpop.f32.mrf.mxu0  ;;  %v19415_v58 = vpop.eup %12080  ;;  %12110 = vtanh.f32 %v6352_v22 }
 0x602   : > { %v6577_v19 = vpop.f32.mrf.mxu1  ;;  %v19417_v52 = vpop.eup %12082  ;;  %12112 = vtanh.f32 %v6561_v6 }
 0x603   : > { %v6370_v48 = vpop.f32.mrf.mxu0  ;;  %v19419_v46 = vpop.eup %12084  ;;  %12114 = vtanh.f32 %v6356_v15 }
 0x604   : > { %v6579_v59 = vpop.f32.mrf.mxu1  ;;  %v19421_v43 = vpop.eup %12086  ;;  %12116 = vtanh.f32 %v6565_v14 }
 0x605   : > { %v19423_v4 = vpop.eup %12088  ;;  %12118 = vtanh.f32 %v6358_v17 }
 0x606   : > { %v19425_v63 = vpop.eup %12090  ;;  %12120 = vtanh.f32 %v6567_v2 }
 0x607   : > { %v6374_v51 = vpop.f32.mrf.mxu0  ;;  %v19427_v3 = vpop.eup %12092  ;;  %12122 = vtanh.f32 %v6362_v32 }
 0x608   : > { %v6583_v33 = vpop.f32.mrf.mxu1  ;;  %v19431_v25 = vpop.eup %12094  ;;  %12124 = vtanh.f32 %v6571_v54 }
 0x609   : > { %v6376_v16 = vpop.f32.mrf.mxu0  ;;  %v19433_v1 = vpop.eup %12096  ;;  %12126 = vtanh.f32 %v6364_v27 }
 0x60a   : > { %v6585_v26 = vpop.f32.mrf.mxu1  ;;  %v19437_v40 = vpop.eup %12098  ;;  %12128 = vtanh.f32 %v6573_v47 }
 0x60b   : > { %v19439_v23 = vpop.eup %12100  ;;  %12130 = vtanh.f32 %v6368_v7 }
 0x60c   : > { %v19441_v44 = vpop.eup %12102  ;;  %12132 = vtanh.f32 %v6577_v19 }
 0x60d   : > { %v6380_v49 = vpop.f32.mrf.mxu0  ;;  %v19443_v42 = vpop.eup %12104  ;;  %12134 = vtanh.f32 %v6370_v48 }
 0x60e   : > { %v19429_v60 = vpop.f32.mrf.mxu1  ;;  %v19447_v21 = vpop.eup %12106  ;;  %12136 = vtanh.f32 %v6579_v59 }
 0x60f   : > { %v6382_v45 = vpop.f32.mrf.mxu0  ;;  %v19449_v39 = vpop.eup %12108  ;;  %12138 = vtanh.f32 %v6374_v51 }
 0x610   : > { %v19435_v41 = vpop.f32.mrf.mxu1  ;;  %v19453_v53 = vpop.eup %12110  ;;  %12140 = vtanh.f32 %v6583_v33 }
 0x611   : > { %v19455_v31 = vpop.eup %12112  ;;  %12142 = vtanh.f32 %v6376_v16 }
 0x612   : > { %v19457_v56 = vpop.eup %12114  ;;  %12144 = vtanh.f32 %v6585_v26 }
 0x613   : > { %v6386_v57 = vpop.f32.mrf.mxu0  ;;  %v19461_v5 = vpop.eup %12116  ;;  %12146 = vtanh.f32 %v6380_v49 }
 0x614   : > { %v19445_v0 = vpop.f32.mrf.mxu1  ;;  %v19463_v20 = vpop.eup %12118  ;;  %12148 = vtanh.f32 %v6382_v45 }
 0x615   : > { %v6388_v8 = vpop.f32.mrf.mxu0  ;;  %v19465_v12 = vpop.eup %12120  ;;  %12150 = vtanh.f32 %v6386_v57 }
 0x616   : > { %v19451_v61 = vpop.f32.mrf.mxu1  ;;  %v19467_v55 = vpop.eup %12122  ;;  %12152 = vtanh.f32 %v6388_v8 }
 0x617   : > { %v19469_v29 = vpop.eup %12124 }
 0x618   : > { %v6392_v50 = vpop.f32.mrf.mxu0  ;;  %v19471_v11 = vpop.eup %12126 }
 0x619   : > { %v19459_v62 = vpop.f32.mrf.mxu1  ;;  %v19473_v14 = vpop.eup %12128  ;;  %12154 = vtanh.f32 %v6392_v50 }
 0x61a   : > { %v6394_v38 = vpop.f32.mrf.mxu0  ;;  %v19475_v2 = vpop.eup %12130 }
 0x61b   : > { %v6603_v24 = vpop.f32.mrf.mxu1  ;;  %12156 = vtanh.f32 %v6394_v38  ;;  %v19477_v54 = vpop.eup %12132 }
 0x61c   : > { %v6398_v18 = vpop.f32.mrf.mxu0  ;;  %v19479_v47 = vpop.eup %12134 }
 0x61d   : > { %v6607_v22 = vpop.f32.mrf.mxu1  ;;  %12158 = vtanh.f32 %v6398_v18  ;;  %v19481_v19 = vpop.eup %12136 }
 0x61e   : > { %v6400_v6 = vpop.f32.mrf.mxu0  ;;  %v19483_v59 = vpop.eup %12138 }
 0x61f   : > { %v6609_v15 = vpop.f32.mrf.mxu1  ;;  %12160 = vtanh.f32 %v6400_v6  ;;  %v19485_v33 = vpop.eup %12140 }
 0x620   : > { %v6404_v17 = vpop.f32.mrf.mxu0  ;;  %v19487_v26 = vpop.eup %12142 }
 0x621   : > { %v6613_v32 = vpop.f32.mrf.mxu1  ;;  %12162 = vtanh.f32 %v6404_v17  ;;  %v19489_v45 = vpop.eup %12144 }
 0x622   : > { %v6406_v27 = vpop.f32.mrf.mxu0  ;;  %v19491_v8 = vpop.eup %12146 }
 0x623   : > { %v6615_v7 = vpop.f32.mrf.mxu1  ;;  %12164 = vtanh.f32 %v6406_v27  ;;  %v19495_v38 = vpop.eup %12148 }
 0x624   : > { %v6410_v48 = vpop.f32.mrf.mxu0  ;;  %v19497_v6 = vpop.eup %12150 }
 0x625   : > { %v6619_v51 = vpop.f32.mrf.mxu1  ;;  %12166 = vtanh.f32 %v6410_v48  ;;  %v19501_v27 = vpop.eup %12152 }
 0x626   : > { %v6412_v16 = vpop.f32.mrf.mxu0 }
 0x627   : > { %12168 = vtanh.f32 %v6412_v16  ;;  %v6621_v49 = vpop.f32.mrf.mxu1  ;;  %v12155_v16 = vpop.eup %12154 }
 0x628   : > { %12170 = vtanh.f32 %v6621_v49  ;;  %v6416_v57 = vpop.f32.mrf.mxu0 }
 0x629   : > { %12172 = vtanh.f32 %v6619_v51  ;;  %v19493_v50 = vpop.f32.mrf.mxu1  ;;  %v12157_v51 = vpop.eup %12156 }
 0x62a   : > { %21571 = vst [vmem:[#allocation60_spill] sm:$0xff] %v19493_v50  ;;  %12174 = vtanh.f32 %v6615_v7  ;;  %v6418_v18 = vpop.f32.mrf.mxu0  ;;  %v12159_v9 = vpop.eup %12158 }
 0x62b   : > { %12176 = vtanh.f32 %v6613_v32  ;;  %v19499_v17 = vpop.f32.mrf.mxu1 }
 0x62c   : > { %21572 = vst [vmem:[#allocation36_spill] sm:$0xff] %v19499_v17  ;;  %12178 = vtanh.f32 %v6609_v15  ;;  %v6422_v48 = vpop.f32.mrf.mxu0  ;;  %v12161_v37 = vpop.eup %12160 }
 0x62d   : > { %12180 = vtanh.f32 %v6607_v22  ;;  %v19503_v49 = vpop.f32.mrf.mxu1 }
 0x62e   : > { %21573 = vst [vmem:[#allocation20_spill] sm:$0xff] %v19503_v49  ;;  %12182 = vtanh.f32 %v6603_v24  ;;  %v6424_v50 = vpop.f32.mrf.mxu0  ;;  %v12163_v17 = vpop.eup %12162 }
 0x62f   : > { %12184 = vtanh.f32 %v19459_v62  ;;  %v19506_v7 = vpop.f32.mrf.mxu1 }
 0x630   : > { %21574 = vst [vmem:[#allocation96_spill] sm:$0xff] %v19506_v7  ;;  %12186 = vtanh.f32 %v19451_v61  ;;  %v6428_v32 = vpop.f32.mrf.mxu0  ;;  %v12165_v22 = vpop.eup %12164 }
 0x631   : > { %12188 = vtanh.f32 %v19445_v0  ;;  %v19510_v15 = vpop.f32.mrf.mxu1 }
 0x632   : > { %21575 = vst [vmem:[#allocation90_spill] sm:$0xff] %v19510_v15  ;;  %12190 = vtanh.f32 %v19435_v41  ;;  %v6430_v49 = vpop.f32.mrf.mxu0  ;;  %v12167_v24 = vpop.eup %12166 }
 0x633   : > { %12192 = vtanh.f32 %v19429_v60  ;;  %v19514_v13 = vpop.f32.mrf.mxu1 }
 0x634   : > { %v12169_v62 = vpop.eup %12168  ;;  %12194 = vtanh.f32 %v6416_v57  ;;  %v6434_v34 = vpop.f32.mrf.mxu0 }
 0x635   : > { %v12171_v7 = vpop.eup %12170  ;;  %12196 = vtanh.f32 %v6418_v18  ;;  %v19516_v61 = vpop.f32.mrf.mxu1  ;;  %7487 = vmatprep.subr.mxu0 %v12169_v62 }
 0x636   : > { %v12173_v0 = vpop.eup %12172  ;;  %12198 = vtanh.f32 %v6422_v48  ;;  %7558 = vmatprep.subr.mxu1 %v12171_v7  ;;  %v6436_v28 = vpop.f32.mrf.mxu0  ;;  %7488 = vmatpush1.msra.mxu0 %v12167_v24 }
 0x637   : > { %v12175_v41 = vpop.eup %12174  ;;  %12200 = vtanh.f32 %v6424_v50  ;;  %v19518_v30 = vpop.f32.mrf.mxu1  ;;  %7559 = vmatpush1.msra.mxu1 %v12173_v0  ;;  %7489 = vmatprep.subr.mxu0 %v12165_v22 }
 0x638   : > { %v12177_v60 = vpop.eup %12176  ;;  %12202 = vtanh.f32 %v6428_v32  ;;  %7560 = vmatprep.subr.mxu1 %v12175_v41  ;;  %v6440_v57 = vpop.f32.mrf.mxu0  ;;  %7490 = vmatpush1.msra.mxu0 %v12163_v17 }
 0x639   : > { %v12179_v18 = vpop.eup %12178  ;;  %12204 = vtanh.f32 %v6430_v49  ;;  %v19520_v15 = vpop.f32.mrf.mxu1  ;;  %7561 = vmatpush1.msra.mxu1 %v12177_v60  ;;  %7491 = vmatprep.subr.mxu0 %v12161_v37 }
 0x63a   : > { %v12181_v48 = vpop.eup %12180  ;;  %12206 = vtanh.f32 %v6434_v34  ;;  %7562 = vmatprep.subr.mxu1 %v12179_v18  ;;  %v6442_v7 = vpop.f32.mrf.mxu0  ;;  %7492 = vmatpush1.msra.mxu0 %v12159_v9  ;;  %v21584_v18 = vld [vmem:[#allocation27_spill] sm:$0xff] }
 0x63b   : > { %v12183_v50 = vpop.eup %12182  ;;  %12208 = vtanh.f32 %v6436_v28  ;;  %v19522_v24 = vpop.f32.mrf.mxu1  ;;  %7563 = vmatpush1.msra.mxu1 %v12181_v48  ;;  %7493 = vmatprep.subr.mxu0 %v12157_v51 }
 0x63c   : > { %v12185_v32 = vpop.eup %12184  ;;  %12210 = vtanh.f32 %v6440_v57  ;;  %7564 = vmatprep.subr.mxu1 %v12183_v50  ;;  %v6446_v17 = vpop.f32.mrf.mxu0  ;;  %7494 = vmatpush1.msra.mxu0 %v12155_v16 }
 0x63d   : > { %v12187_v49 = vpop.eup %12186  ;;  %12212 = vtanh.f32 %v6442_v7  ;;  %v19524_v22 = vpop.f32.mrf.mxu1  ;;  %7565 = vmatpush1.msra.mxu1 %v12185_v32  ;;  %7495 = vmatprep.subr.mxu0 %v19501_v27  ;;  %v21585_v7 = vld [vmem:[#allocation36_spill] sm:$0xff]  ;;  %v19625_v32 = vld [vmem:[%s12703_s19] sm:$0x77] }
 0x63e   : > { %v12189_v37 = vpop.eup %12188  ;;  %12214 = vtanh.f32 %v6446_v17  ;;  %7566 = vmatprep.subr.mxu1 %v12187_v49  ;;  %v6448_v9 = vpop.f32.mrf.mxu0  ;;  %7496 = vmatpush1.msra.mxu0 %v19497_v6  ;;  %v19628_v17 = vsub.f32 0.0, %v19625_v32 }
 0x63f   : > { %v12191_v28 = vpop.eup %12190  ;;  %12216 = vtanh.f32 %v6448_v9  ;;  %v6657_v34 = vpop.f32.mrf.mxu1  ;;  %7567 = vmatpush1.msra.mxu1 %v12189_v37  ;;  %7497 = vmatprep.subr.mxu0 %v19495_v38 }
 0x640   : > { %v12193_v16 = vpop.eup %12192  ;;  %12218 = vtanh.f32 %v6657_v34  ;;  %7568 = vmatprep.subr.mxu1 %v12191_v28  ;;  %v6452_v51 = vpop.f32.mrf.mxu0  ;;  %7498 = vmatpush1.msra.mxu0 %v19491_v8 }
 0x641   : > { %v19530_v62 = vpop.eup %12194  ;;  %12220 = vtanh.f32 %v6452_v51  ;;  %v6661_v27 = vpop.f32.mrf.mxu1  ;;  %7569 = vmatpush1.msra.mxu1 %v12193_v16  ;;  %7499 = vmatprep.subr.mxu0 %v19487_v26 }
 0x642   : > { %v19533_v6 = vpop.eup %12196  ;;  %12222 = vtanh.f32 %v6661_v27  ;;  %7570 = vmatprep.subr.mxu1 %v19489_v45  ;;  %v6454_v0 = vpop.f32.mrf.mxu0  ;;  %7500 = vmatpush1.msra.mxu0 %v19483_v59 }
 0x643   : > { %v19537_v38 = vpop.eup %12198  ;;  %12224 = vtanh.f32 %v6454_v0  ;;  %v6663_v41 = vpop.f32.mrf.mxu1  ;;  %7571 = vmatpush1.msra.mxu1 %v19485_v33  ;;  %7501 = vmatprep.subr.mxu0 %v19479_v47 }
 0x644   : > { %v19541_v8 = vpop.eup %12200  ;;  %12226 = vtanh.f32 %v6663_v41  ;;  %7572 = vmatprep.subr.mxu1 %v19481_v19  ;;  %v6458_v26 = vpop.f32.mrf.mxu0  ;;  %7502 = vmatpush1.msra.mxu0 %v19475_v2 }
 0x645   : > { %v19545_v45 = vpop.eup %12202  ;;  %12228 = vtanh.f32 %v6458_v26  ;;  %v6667_v59 = vpop.f32.mrf.mxu1  ;;  %7573 = vmatpush1.msra.mxu1 %v19477_v54  ;;  %7503 = vmatprep.subr.mxu0 %v19471_v11 }
 0x646   : > { %v19551_v33 = vpop.eup %12204  ;;  %12230 = vtanh.f32 %v6667_v59  ;;  %7574 = vmatprep.subr.mxu1 %v19473_v14  ;;  %v6460_v47 = vpop.f32.mrf.mxu0  ;;  %7504 = vmatpush1.msra.mxu0 %v19467_v55  ;;  %v19650_v59 = vld [vmem:[%s12703_s19 + $0x8] sm:$0x77] }
 0x647   : > { %v19555_v19 = vpop.eup %12206  ;;  %12232 = vtanh.f32 %v6460_v47  ;;  %v6669_v2 = vpop.f32.mrf.mxu1  ;;  %7575 = vmatpush1.msra.mxu1 %v19469_v29  ;;  %7505 = vmatprep.subr.mxu0 %v19463_v20  ;;  %v21581_v29 = vld [vmem:[#allocation17_spill] sm:$0xff]  ;;  %v19653_v47 = vsub.f32 0.0, %v19650_v59 }
 0x648   : > { %v19559_v60 = vpop.eup %12208  ;;  %12234 = vtanh.f32 %v6669_v2  ;;  %7576 = vmatprep.subr.mxu1 %v19465_v12  ;;  %7506 = vmatpush1.msra.mxu0 %v19457_v56  ;;  %v7127_v11 = vpop.f32.mrf.mxu0  ;;  %v7997_v12 = vlaneseq }
 0x649   : > { %v19563_v14 = vpop.eup %12210  ;;  %7577 = vmatpush1.msra.mxu1 %v19461_v5  ;;  %7507 = vmatprep.subr.mxu0 %v19453_v53  ;;  %12236 = vtanh.f32 %v7127_v11  ;;  %v7198_v55 = vpop.f32.mrf.mxu1 }
 0x64a   : > { %v19567_v54 = vpop.eup %12212  ;;  %7578 = vmatprep.subr.mxu1 %v19455_v31  ;;  %7508 = vmatpush1.msra.mxu0 %v19447_v21  ;;  %12238 = vtanh.f32 %v7198_v55  ;;  %v7129_v20 = vpop.f32.mrf.mxu0  ;;  %v19582_v21 = vstv %s19547_s27 }
 0x64b   : > { %v19571_v56 = vpop.eup %12214  ;;  %7579 = vmatpush1.msra.mxu1 %v19449_v39  ;;  %7509 = vmatprep.subr.mxu0 %v19441_v44  ;;  %12240 = vtanh.f32 %v7129_v20  ;;  %v7200_v53 = vpop.f32.mrf.mxu1  ;;  %v19620_v48 = vmul.f32 %v21584_v18, %v19582_v21 }
 0x64c   : > { %v19575_v5 = vpop.eup %12216  ;;  %7580 = vmatprep.subr.mxu1 %v19443_v42  ;;  %7510 = vmatpush1.msra.mxu0 %v19437_v40  ;;  %12242 = vtanh.f32 %v7200_v53  ;;  %v7998_v42 = vshrl.u32 %v7997_v12, 7 }
 0x64d   : > { %v19579_v31 = vpop.eup %12218  ;;  %12244 = vtanh.f32 %v19524_v22  ;;  %7581 = vmatpush1.msra.mxu1 %v19439_v23  ;;  %7511 = vmatprep.subr.mxu0 %v19431_v25  ;;  %v363_v23 = vmul.f32 %v19392_v10, %v19582_v21 }
 0x64e   : > { %v12221_v44 = vpop.eup %12220  ;;  %12246 = vtanh.f32 %v19522_v24  ;;  %7582 = vmatprep.subr.mxu1 %v19433_v1  ;;  %7512 = vmatpush1.msra.mxu0 %v19425_v63  ;;  %v19598_v25 = vsub.s32 0, %v7998_v42  ;;  %v21586_v24 = vld [vmem:[#allocation60_spill] sm:$0xff]  ;;  %v19630_v22 = vsub.s32 1, %v7998_v42  ;;  %v19632_v37 = vsub.s32 5, %v7998_v42 }
 0x64f   : > { %v12223_v40 = vpop.eup %12222  ;;  %12248 = vtanh.f32 %v19520_v15  ;;  %7583 = vmatpush1.msra.mxu1 %v19427_v3  ;;  %7513 = vmatprep.subr.mxu0 %v19421_v43  ;;  %v19603_v43 = vsub.s32 4, %v7998_v42  ;;  %v21582_v15 = vld [vmem:[#allocation20_spill] sm:$0xff]  ;;  %v19634_v9 = vsub.s32 2, %v7998_v42  ;;  %v19640_v27 = vsub.s32 6, %v7998_v42 }
 0x650   : > { %v12225_v39 = vpop.eup %12224  ;;  %12250 = vtanh.f32 %v19518_v30  ;;  %7584 = vmatprep.subr.mxu1 %v19423_v4  ;;  %7514 = vmatpush1.msra.mxu0 %v19417_v52  ;;  %v21576_v30 = vld [vmem:[#allocation90_spill] sm:$0xff]  ;;  %v21577_v52 = vld [vmem:[#allocation44_spill] sm:$0xff]  ;;  %v8908_v2 = vrot.slane %v19620_v48, %v19598_v25 }
 0x651   : > { %v12227_v63 = vpop.eup %12226  ;;  %12252 = vtanh.f32 %v19516_v61  ;;  %7585 = vmatpush1.msra.mxu1 %v19419_v46  ;;  %7515 = vmatprep.subr.mxu0 %v19413_v35  ;;  %v21578_v4 = vld [vmem:[#allocation24_spill] sm:$0xff]  ;;  %v21580_v35 = vld [vmem:[#allocation43_spill] sm:$0xff]  ;;  %v8904_v61 = vrot.slane %v363_v23, %v19603_v43  ;;  %v8912_v11 = vrot.slane %v19620_v48, %v19603_v43 }
 0x652   : > { %v12229_v3 = vpop.eup %12228  ;;  %12254 = vtanh.f32 %v19514_v13  ;;  %7586 = vmatprep.subr.mxu1 %v19415_v58  ;;  %7516 = vmatpush1.msra.mxu0 %v19409_v36  ;;  %v21579_v46 = vld [vmem:[#allocation96_spill] sm:$0xff]  ;;  %v8900_v13 = vrot.slane %v363_v23, %v19598_v25  ;;  %v21583_v36 = vld [vmem:[#allocation46_spill] sm:$0xff] }
 0x653   : > { %v12231_v10 = vpop.eup %12230  ;;  %12256 = vtanh.f32 %v21576_v30  ;;  %7587 = vmatpush1.msra.mxu1 %v21577_v52  ;;  %7517 = vmatprep.subr.mxu0 %v21578_v4  ;;  %v19643_v0 = vrot.slane %v8904_v61, %v19598_v25 }
 0x654   : > { %v12233_v1 = vpop.eup %12232  ;;  %12258 = vtanh.f32 %v21579_v46  ;;  %7588 = vmatprep.subr.mxu1 %v21580_v35  ;;  %7518 = vmatpush1.msra.mxu0 %v21581_v29  ;;  %v19637_v28 = vrot.slane %v8900_v13, %v19598_v25 }
 0x655   : > { %v12235_v58 = vpop.eup %12234  ;;  %12260 = vtanh.f32 %v21582_v15  ;;  %7589 = vmatpush1.msra.mxu1 %v21583_v36  ;;  %7535 = vmatprep.subr.mxu0 %v12233_v1 }
 0x656   : > { %v12237_v57 = vpop.eup %12236  ;;  %12262 = vtanh.f32 %v21585_v7  ;;  %7606 = vmatprep.subr.mxu1 %v12235_v58  ;;  %7536 = vmatpush2.msra.mxu0 %v12229_v3 }
 0x657   : > { %v12239_v50 = vpop.eup %12238  ;;  %12264 = vtanh.f32 %v21586_v24  ;;  %7607 = vmatpush2.msra.mxu1 %v12231_v10  ;;  %7537 = vmatprep.subr.mxu0 %v12225_v39 }
 0x658   : > { %v12241_v49 = vpop.eup %12240  ;;  %7608 = vmatprep.subr.mxu1 %v12227_v63  ;;  %7538 = vmatpush2.msra.mxu0 %v12221_v44 }
 0x659   : > { %v12243_v34 = vpop.eup %12242  ;;  %7609 = vmatpush2.msra.mxu1 %v12223_v40  ;;  %7539 = vmatprep.subr.mxu0 %v19575_v5  ;;  %v7661_v16 = vcombine.low %v12237_v57, %v12241_v49  ;;  %v7773_v51 = vcombine.high %v12237_v57, %v12241_v49 }
 0x65a   : > { %v12245_v41 = vpop.eup %12244  ;;  %7610 = vmatprep.subr.mxu1 %v19579_v31  ;;  %7540 = vmatpush2.msra.mxu0 %v19571_v56  ;;  %v19647_v26 = vcombine.low %v12239_v50, %v12243_v34  ;;  %v19665_v40 = vcombine.high %v12239_v50, %v12243_v34 }
 0x65b   : > { %v12247_v55 = vpop.eup %12246  ;;  %7611 = vmatpush2.msra.mxu1 %v12245_v41  ;;  %7541 = vmatprep.subr.mxu0 %v19567_v54  ;;  %v7669_v20 = vrot.slane %v7661_v16, 7  ;;  %v7741_v12 = vrot.slane %v7661_v16, 5  ;;  %v7781_v56 = vrot.slane %v7773_v51, 6  ;;  %v19661_v53 = vmul.f32 %v19628_v17, %v7661_v16 }
 0x65c   : > { %v12249_v5 = vpop.eup %12248  ;;  %7612 = vmatprep.subr.mxu1 %v12247_v55  ;;  %7542 = vmatpush2.msra.mxu0 %v19563_v14  ;;  %v7821_v31 = vrot.slane %v7661_v16, 6  ;;  %v7901_v44 = vrot.slane %v7773_v51, 7  ;;  %v7941_v42 = vmul.f32 %v19625_v32, %v7773_v51  ;;  %v7743_v15 = vrot.slane %v19647_v26, 5 }
 0x65d   : > { %v12251_v39 = vpop.eup %12250  ;;  %7613 = vmatpush2.msra.mxu1 %v12249_v5  ;;  %7543 = vmatprep.subr.mxu0 %v19559_v60  ;;  %v7685_v54 = vmul.f32 %v19625_v32, %v7669_v20  ;;  %v7742_v23 = vrot.slane %v7741_v12, 4  ;;  %v19670_v63 = vmul.f32 %v7781_v56, %v19628_v17  ;;  %v8264_v14 = vrot.slane %v19661_v53, %v19598_v25  ;;  %v12547_v12 = vld [vmem:[%s20300_s5] sm:$0x3f] }
 0x65e   : > { %v12253_v3 = vpop.eup %12252  ;;  %7614 = vmatprep.subr.mxu1 %v12251_v39  ;;  %7544 = vmatpush2.msra.mxu0 %v19555_v19  ;;  %v7822_v10 = vrot.slane %v7821_v31, 4  ;;  %v19676_v30 = vmul.f32 %v7901_v44, %v19628_v17  ;;  %v9890_v52 = vrot.slane %v7941_v42, 9  ;;  %v8268_v60 = vrot.slane %v19661_v53, %v19603_v43 }
 0x65f   : > { %v12255_v4 = vpop.eup %12254  ;;  %7615 = vmatpush2.msra.mxu1 %v12253_v3  ;;  %7545 = vmatprep.subr.mxu0 %v19551_v33  ;;  %v9874_v1 = vrot.slane %v7685_v54, 9  ;;  %v19682_v46 = vmul.f32 %v7742_v23, %v19628_v17  ;;  %v7853_v19 = vmul.f32 %v19625_v32, %v7742_v23  ;;  %v8176_v35 = vrot.slane %v19670_v63, %v19634_v9 }
 0x660   : > { %v12257_v29 = vpop.eup %12256  ;;  %7616 = vmatprep.subr.mxu1 %v12255_v4  ;;  %7546 = vmatpush2.msra.mxu0 %v19545_v45  ;;  %v7845_v13 = vmul.f32 %v19625_v32, %v7822_v10  ;;  %v19690_v58 = vmul.f32 %v7822_v10, %v19628_v17  ;;  %v7981_v33 = vadd.f32 %v9890_v52, %v7941_v42  ;;  %v7670_v32 = vrot.slane %v19647_v26, 7 }
 0x661   : > { %v12259_v36 = vpop.eup %12258  ;;  %7617 = vmatpush2.msra.mxu1 %v12257_v29  ;;  %7547 = vmatprep.subr.mxu0 %v19541_v8  ;;  %v7725_v61 = vadd.f32 %v9874_v1, %v7685_v54  ;;  %v9882_v57 = vrot.slane %v7853_v19, 10  ;;  %v8088_v18 = vrot.slane %v19682_v46, %v19630_v22  ;;  %v8092_v45 = vrot.slane %v19682_v46, %v19632_v37 }
 0x662   : > { %v12261_v7 = vpop.eup %12260  ;;  %7618 = vmatprep.subr.mxu1 %v12259_v36  ;;  %7548 = vmatpush2.msra.mxu0 %v19537_v38  ;;  %v8180_v50 = vrot.slane %v19670_v63, %v19640_v27  ;;  %v8440_v8 = vrot.slane %v19676_v30, %v19634_v9  ;;  %v8444_v24 = vrot.slane %v19676_v30, %v19640_v27  ;;  %v7744_v16 = vrot.slane %v7743_v15, 4 }
 0x663   : > { %v12263_v17 = vpop.eup %12262  ;;  %7619 = vmatpush2.msra.mxu1 %v12261_v7  ;;  %7549 = vmatprep.subr.mxu0 %v19533_v6  ;;  %v7893_v49 = vadd.f32 %v9882_v57, %v7845_v13  ;;  %v8000_v34 = vrot.slane %v7725_v61, %v19630_v22  ;;  %v8004_v38 = vrot.slane %v7725_v61, %v19632_v37  ;;  %v7782_v20 = vrot.slane %v19665_v40, 6 }
 0x664   : > { %v12265_v51 = vpop.eup %12264  ;;  %7620 = vmatprep.subr.mxu1 %v12263_v17  ;;  %7550 = vmatpush2.msra.mxu0 %v19530_v62  ;;  %v8520_v41 = vrot.slane %v19682_v46, %v19598_v25  ;;  %v8524_v55 = vrot.slane %v19682_v46, %v19603_v43  ;;  %v8608_v6 = vrot.slane %v19690_v58, %v19630_v22  ;;  %v7823_v31 = vrot.slane %v19647_v26, 6 }
 0x665   : > { %7621 = vmatpush2.msra.mxu1 %v12265_v51  ;;  %7552 = vmatmul.mubr.f32.vlgmr.msra.gmra.mxu0 %v12547_v12  ;;  %v8352_v62 = vrot.slane %v7893_v49, %v19598_v25  ;;  %v8356_v56 = vrot.slane %v7893_v49, %v19603_v43  ;;  %v8612_v5 = vrot.slane %v19690_v58, %v19632_v37  ;;  %v7902_v10 = vrot.slane %v19665_v40, 7 }
 0x666   : > { %7623 = vmatmul.mubr.f32.vlgmr.msra.gmra.mxu1 %v12547_v12  ;;  %v8696_v44 = vrot.slane %v7981_v33, %v19598_v25  ;;  %v8700_v42 = vrot.slane %v7981_v33, %v19603_v43  ;;  %v8773_v39 = vsel %vm614_vm0, %v8000_v34, %v8088_v18  ;;  %v8774_v54 = vsel %vm614_vm0, %v8004_v38, %v8092_v45 }
 0x667   : > { %v8790_v23 = vsel %vm8789_vm5, %v8773_v39, %v8176_v35  ;;  %v8791_v63 = vsel %vm8789_vm5, %v8774_v54, %v8180_v50  ;;  %v7686_v3 = vmul.f32 %v19650_v59, %v7670_v32  ;;  %v19749_v29 = vmul.f32 %v7744_v16, %v19653_v47  ;;  %v21587_v32 = vld [vmem:[#allocation9_spill] sm:$0xff] }
 0x668   : > { %v8806_v30 = vsel %vm483_vm1, %v8790_v23, %v8264_v14  ;;  %v8807_v52 = vsel %vm483_vm1, %v8791_v63, %v8268_v60  ;;  %v9057_v4 = vmul.f32 %v19637_v28, %v8696_v44  ;;  %v9058_v1 = vmul.f32 %v19643_v0, %v8700_v42 }
 0x669   : > { %v8823_v46 = vsel %vm8822_vm6, %v8806_v30, %v8352_v62  ;;  %v8824_v19 = vsel %vm8822_vm6, %v8807_v52, %v8356_v56  ;;  %v9875_v35 = vrot.slane %v7686_v3, 9  ;;  %v7798_v53 = vmul.f32 %v7782_v20, %v19653_v47 }
 0x66a   : > { %v8840_v13 = vsel %vm8839_vm7, %v8823_v46, %v8440_v8  ;;  %v8841_v14 = vsel %vm8839_vm7, %v8824_v19, %v8444_v24  ;;  %9089 = vst [vmem:[%s19754_s9 + $0x80] sm:$0x1] %v9057_v4  ;;  %9090 = vst [vmem:[%s19754_s9 + $0x88] sm:$0x1] %v9058_v1  ;;  %v7824_v60 = vrot.slane %v7823_v31, 4  ;;  %v7854_v36 = vmul.f32 %v19650_v59, %v7744_v16  ;;  %v21588_v1 = vld [vmem:[#allocation10_spill] sm:$0xff] }
 0x66b   : > { %v8856_v58 = vsel %vm500_vm2, %v8840_v13, %v8520_v41  ;;  %v8857_v33 = vsel %vm500_vm2, %v8841_v14, %v8524_v55  ;;  %v7726_v15 = vadd.f32 %v9875_v35, %v7686_v3  ;;  %v7814_v18 = vmul.f32 %v19653_v47, %v19647_v26 }
 0x66c   : > { %v8873_v61 = vsel %vm8872_vm8, %v8856_v58, %v8608_v6  ;;  %v8874_v57 = vsel %vm8872_vm8, %v8857_v33, %v8612_v5  ;;  %v7846_v45 = vmul.f32 %v19650_v59, %v7824_v60  ;;  %v9883_v8 = vrot.slane %v7854_v36, 10 }
 0x66d   : > { %v9041_v7 = vmul.f32 %v19637_v28, %v8873_v61  ;;  %v9042_v50 = vmul.f32 %v19643_v0, %v8874_v57  ;;  %v7918_v24 = vmul.f32 %v7902_v10, %v19653_v47  ;;  %12266 = vrcp.f32 %v21587_v32 }
 0x66e   : > { %v7942_v17 = vmul.f32 %v19650_v59, %v19665_v40  ;;  %v8008_v49 = vrot.slane %v7726_v15, %v19630_v22  ;;  %v8988_v26 = vrot.slane %v8908_v2, %v19598_v25  ;;  %v7894_v28 = vadd.f32 %v9883_v8, %v7846_v45 }
 0x66f   : > { %9073 = vst [vmem:[%s19754_s9] sm:$0xff] %v9041_v7  ;;  %9074 = vst [vmem:[%s19754_s9 + $0x8] sm:$0xff] %v9042_v50  ;;  %v8012_v0 = vrot.slane %v7726_v15, %v19632_v37  ;;  %v8096_v34 = vrot.slane %v19749_v29, %v19630_v22  ;;  %v8100_v38 = vrot.slane %v19749_v29, %v19632_v37  ;;  %12268 = vrcp.f32 %v21588_v1 }
 0x670   : > { %v9891_v16 = vrot.slane %v7942_v17, 9  ;;  %v8184_v59 = vrot.slane %v7798_v53, %v19634_v9  ;;  %v8188_v40 = vrot.slane %v7798_v53, %v19640_v27  ;;  %v8992_v2 = vrot.slane %v8912_v11, %v19598_v25 }
 0x671   : > { %v7926_v51 = vmul.f32 %v7824_v60, %v19653_v47  ;;  %v8272_v41 = vrot.slane %v7814_v18, %v19598_v25  ;;  %v8276_v55 = vrot.slane %v7814_v18, %v19603_v43  ;;  %v8448_v6 = vrot.slane %v7918_v24, %v19634_v9 }
 0x672   : > { %v7982_v20 = vadd.f32 %v9891_v16, %v7942_v17  ;;  %v8360_v12 = vrot.slane %v7894_v28, %v19598_v25  ;;  %v8364_v62 = vrot.slane %v7894_v28, %v19603_v43  ;;  %v8452_v56 = vrot.slane %v7918_v24, %v19640_v27  ;;  %v21589_v17 = vld [vmem:[#allocation11_spill] sm:$0xff] }
 0x673   : > { %v8528_v5 = vrot.slane %v19749_v29, %v19598_v25  ;;  %v8532_v48 = vrot.slane %v19749_v29, %v19603_v43  ;;  %v8775_v47 = vsel %vm614_vm0, %v8008_v49, %v8096_v34  ;;  %v8776_v11 = vsel %vm614_vm0, %v8012_v0, %v8100_v38  ;;  %v12548_v49 = vld [vmem:[%s12703_s19 + $0x10] sm:$0x77] }
 0x674   : > { %v8704_v31 = vrot.slane %v7982_v20, %v19598_v25  ;;  %v8708_v44 = vrot.slane %v7982_v20, %v19603_v43  ;;  %v8792_v42 = vsel %vm8789_vm5, %v8775_v47, %v8184_v59  ;;  %v8793_v39 = vsel %vm8789_vm5, %v8776_v11, %v8188_v40  ;;  %v19840_v59 = vld [vmem:[%s12703_s19 + $0x18] sm:$0x77] }
 0x675   : > { %v8616_v54 = vrot.slane %v7926_v51, %v19630_v22  ;;  %v8620_v23 = vrot.slane %v7926_v51, %v19632_v37  ;;  %v8808_v63 = vsel %vm483_vm1, %v8792_v42, %v8272_v41  ;;  %v8809_v3 = vsel %vm483_vm1, %v8793_v39, %v8276_v55 }
 0x676   : > { %v8825_v10 = vsel %vm8822_vm6, %v8808_v63, %v8360_v12  ;;  %v8826_v30 = vsel %vm8822_vm6, %v8809_v3, %v8364_v62  ;;  %v9059_v52 = vmul.f32 %v8988_v26, %v8704_v31  ;;  %v9060_v4 = vmul.f32 %v8992_v2, %v8708_v44 }
 0x677   : > { %v8842_v46 = vsel %vm8839_vm7, %v8825_v10, %v8448_v6  ;;  %v8843_v19 = vsel %vm8839_vm7, %v8826_v30, %v8452_v56  ;;  %v19843_v40 = vsub.f32 0.0, %v19840_v59 }
 0x678   : > { %v8858_v35 = vsel %vm500_vm2, %v8842_v46, %v8528_v5  ;;  %v8859_v29 = vsel %vm500_vm2, %v8843_v19, %v8532_v48  ;;  %9091 = vst [vmem:[%s19754_s9 + $0x90] sm:$0x1] %v9059_v52  ;;  %9092 = vst [vmem:[%s19754_s9 + $0x98] sm:$0x1] %v9060_v4 }
 0x679   : > { %v8875_v13 = vsel %vm8872_vm8, %v8858_v35, %v8616_v54  ;;  %v8876_v14 = vsel %vm8872_vm8, %v8859_v29, %v8620_v23  ;;  %v7269_v53 = vpop.f32.mrf.mxu0 }
 0x67a   : > { %v9043_v60 = vmul.f32 %v8988_v26, %v8875_v13  ;;  %v9044_v58 = vmul.f32 %v8992_v2, %v8876_v14  ;;  %12270 = vtanh.f32 %v7269_v53  ;;  %v7340_v33 = vpop.f32.mrf.mxu1  ;;  %v12267_v15 = vpop.eup %12266  ;;  %v7735_v26 = vsub.f32 0.0, %v12548_v49 }
 0x67b   : > { %12272 = vtanh.f32 %v7340_v33  ;;  %v7271_v36 = vpop.f32.mrf.mxu0  ;;  %v365_v57 = vmul.f32 %v12267_v15, %v19582_v21 }
 0x67c   : > { %9075 = vst [vmem:[%s19754_s9 + $0x10] sm:$0xff] %v9043_v60  ;;  %9076 = vst [vmem:[%s19754_s9 + $0x18] sm:$0xff] %v9044_v58  ;;  %12274 = vtanh.f32 %v7271_v36  ;;  %v7342_v61 = vpop.f32.mrf.mxu1  ;;  %v12269_v18 = vpop.eup %12268 }
 0x67d   : > { %12276 = vtanh.f32 %v7342_v61  ;;  %v8916_v45 = vrot.slane %v365_v57, %v19598_v25  ;;  %v8920_v7 = vrot.slane %v365_v57, %v19603_v43  ;;  %v19829_v8 = vmul.f32 %v12269_v18, %v19582_v21 }
 0x67e   : > { %12278 = vrcp.f32 %v21589_v17 }
 0x67f   : > { %v19834_v28 = vrot.slane %v8916_v45, %v19598_v25  ;;  %v19837_v16 = vrot.slane %v8920_v7, %v19598_v25  ;;  %v8924_v41 = vrot.slane %v19829_v8, %v19598_v25  ;;  %v8928_v55 = vrot.slane %v19829_v8, %v19603_v43 }
 0x687   : > { %v12271_v50 = vpop.eup %12270 }
 0x688   : > { %v12273_v24 = vpop.eup %12272 }
 0x689   : > { %v12275_v32 = vpop.eup %12274 }
 0x68a   : > { %v12277_v0 = vpop.eup %12276  ;;  %v7663_v34 = vcombine.low %v12271_v50, %v12275_v32  ;;  %v7775_v38 = vcombine.high %v12271_v50, %v12275_v32 }
 0x68b   : > { %v19845_v2 = vcombine.low %v12273_v24, %v12277_v0  ;;  %v19847_v51 = vcombine.high %v12273_v24, %v12277_v0  ;;  %v19871_v24 = vpop.eup %12278 }
 0x68c   : > { %v7671_v6 = vrot.slane %v7663_v34, 7  ;;  %v7745_v20 = vrot.slane %v7663_v34, 5  ;;  %v7783_v12 = vrot.slane %v7775_v38, 6  ;;  %v7815_v62 = vmul.f32 %v7735_v26, %v7663_v34 }
 0x68d   : > { %v7825_v56 = vrot.slane %v7663_v34, 6  ;;  %v7903_v5 = vrot.slane %v7775_v38, 7  ;;  %v7943_v48 = vmul.f32 %v12548_v49, %v7775_v38  ;;  %v7672_v47 = vrot.slane %v19845_v2, 7 }
 0x68e   : > { %v7687_v11 = vmul.f32 %v12548_v49, %v7671_v6  ;;  %v7746_v31 = vrot.slane %v7745_v20, 4  ;;  %v7799_v44 = vmul.f32 %v7783_v12, %v7735_v26  ;;  %v8280_v42 = vrot.slane %v7815_v62, %v19598_v25 }
 0x68f   : > { %v7826_v39 = vrot.slane %v7825_v56, 4  ;;  %v7919_v54 = vmul.f32 %v7903_v5, %v7735_v26  ;;  %v9892_v23 = vrot.slane %v7943_v48, 9  ;;  %v8284_v63 = vrot.slane %v7815_v62, %v19603_v43 }
 0x690   : > { %v9876_v3 = vrot.slane %v7687_v11, 9  ;;  %v7767_v10 = vmul.f32 %v7746_v31, %v7735_v26  ;;  %v7855_v30 = vmul.f32 %v12548_v49, %v7746_v31  ;;  %v8192_v52 = vrot.slane %v7799_v44, %v19634_v9 }
 0x691   : > { %v7847_v4 = vmul.f32 %v12548_v49, %v7826_v39  ;;  %v7927_v1 = vmul.f32 %v7826_v39, %v7735_v26  ;;  %v7983_v46 = vadd.f32 %v9892_v23, %v7943_v48  ;;  %v8196_v19 = vrot.slane %v7799_v44, %v19640_v27 }
 0x692   : > { %v7727_v35 = vadd.f32 %v9876_v3, %v7687_v11  ;;  %v9884_v29 = vrot.slane %v7855_v30, 10  ;;  %v8104_v13 = vrot.slane %v7767_v10, %v19630_v22  ;;  %v8108_v14 = vrot.slane %v7767_v10, %v19632_v37 }
 0x693   : > { %v8456_v53 = vrot.slane %v7919_v54, %v19634_v9  ;;  %v8460_v60 = vrot.slane %v7919_v54, %v19640_v27  ;;  %v8536_v58 = vrot.slane %v7767_v10, %v19598_v25  ;;  %v8540_v33 = vrot.slane %v7767_v10, %v19603_v43 }
 0x694   : > { %v7895_v15 = vadd.f32 %v9884_v29, %v7847_v4  ;;  %v8016_v36 = vrot.slane %v7727_v35, %v19630_v22  ;;  %v8020_v61 = vrot.slane %v7727_v35, %v19632_v37  ;;  %v8624_v57 = vrot.slane %v7927_v1, %v19630_v22 }
 0x695   : > { %v8628_v18 = vrot.slane %v7927_v1, %v19632_v37  ;;  %v8712_v45 = vrot.slane %v7983_v46, %v19598_v25  ;;  %v8716_v7 = vrot.slane %v7983_v46, %v19603_v43  ;;  %v7688_v50 = vmul.f32 %v19840_v59, %v7672_v47 }
 0x696   : > { %v8368_v32 = vrot.slane %v7895_v15, %v19598_v25  ;;  %v8372_v17 = vrot.slane %v7895_v15, %v19603_v43  ;;  %v8777_v49 = vsel %vm614_vm0, %v8016_v36, %v8104_v13  ;;  %v8778_v26 = vsel %vm614_vm0, %v8020_v61, %v8108_v14 }
 0x697   : > { %v8794_v0 = vsel %vm8789_vm5, %v8777_v49, %v8192_v52  ;;  %v8795_v34 = vsel %vm8789_vm5, %v8778_v26, %v8196_v19  ;;  %v9061_v38 = vmul.f32 %v19834_v28, %v8712_v45  ;;  %v9062_v6 = vmul.f32 %v19837_v16, %v8716_v7 }
 0x698   : > { %v8810_v20 = vsel %vm483_vm1, %v8794_v0, %v8280_v42  ;;  %v8811_v12 = vsel %vm483_vm1, %v8795_v34, %v8284_v63  ;;  %v9877_v62 = vrot.slane %v7688_v50, 9  ;;  %v7747_v56 = vrot.slane %v19845_v2, 5 }
 0x699   : > { %v8827_v5 = vsel %vm8822_vm6, %v8810_v20, %v8368_v32  ;;  %v8828_v48 = vsel %vm8822_vm6, %v8811_v12, %v8372_v17  ;;  %9093 = vst [vmem:[%s19754_s9 + $0xa0] sm:$0x1] %v9061_v38  ;;  %9094 = vst [vmem:[%s19754_s9 + $0xa8] sm:$0x1] %v9062_v6  ;;  %v7784_v47 = vrot.slane %v19847_v51, 6  ;;  %v7816_v11 = vmul.f32 %v19843_v40, %v19845_v2 }
 0x69a   : > { %v8844_v31 = vsel %vm8839_vm7, %v8827_v5, %v8456_v53  ;;  %v8845_v44 = vsel %vm8839_vm7, %v8828_v48, %v8460_v60  ;;  %v7728_v42 = vadd.f32 %v9877_v62, %v7688_v50  ;;  %v7748_v39 = vrot.slane %v7747_v56, 4 }
 0x69b   : > { %v8860_v54 = vsel %vm500_vm2, %v8844_v31, %v8536_v58  ;;  %v8861_v23 = vsel %vm500_vm2, %v8845_v44, %v8540_v33  ;;  %v7800_v63 = vmul.f32 %v7784_v47, %v19843_v40  ;;  %v7827_v3 = vrot.slane %v19845_v2, 6 }
 0x69c   : > { %v8877_v10 = vsel %vm8872_vm8, %v8860_v54, %v8624_v57  ;;  %v8878_v30 = vsel %vm8872_vm8, %v8861_v23, %v8628_v18  ;;  %v7768_v52 = vmul.f32 %v7748_v39, %v19843_v40  ;;  %v7856_v4 = vmul.f32 %v19840_v59, %v7748_v39 }
 0x69d   : > { %v9045_v1 = vmul.f32 %v19834_v28, %v8877_v10  ;;  %v9046_v46 = vmul.f32 %v19837_v16, %v8878_v30  ;;  %v7828_v19 = vrot.slane %v7827_v3, 4  ;;  %v7904_v35 = vrot.slane %v19847_v51, 7 }
 0x69e   : > { %v9885_v29 = vrot.slane %v7856_v4, 10  ;;  %v7944_v13 = vmul.f32 %v19840_v59, %v19847_v51  ;;  %v9004_v2 = vrot.slane %v8924_v41, %v19598_v25  ;;  %v9008_v14 = vrot.slane %v8928_v55, %v19598_v25 }
 0x69f   : > { %9077 = vst [vmem:[%s19754_s9 + $0x20] sm:$0xff] %v9045_v1  ;;  %9078 = vst [vmem:[%s19754_s9 + $0x28] sm:$0xff] %v9046_v46  ;;  %v7848_v28 = vmul.f32 %v19840_v59, %v7828_v19  ;;  %v7920_v16 = vmul.f32 %v7904_v35, %v19843_v40  ;;  %v8024_v53 = vrot.slane %v7728_v42, %v19630_v22 }
 0x6a0   : > { %v8028_v51 = vrot.slane %v7728_v42, %v19632_v37  ;;  %v7928_v60 = vmul.f32 %v7828_v19, %v19843_v40  ;;  %v9893_v58 = vrot.slane %v7944_v13, 9  ;;  %v8112_v41 = vrot.slane %v7768_v52, %v19630_v22 }
 0x6a1   : > { %v8116_v33 = vrot.slane %v7768_v52, %v19632_v37  ;;  %v7896_v15 = vadd.f32 %v9885_v29, %v7848_v28  ;;  %v8200_v8 = vrot.slane %v7800_v63, %v19634_v9  ;;  %v8204_v55 = vrot.slane %v7800_v63, %v19640_v27  ;;  %v21590_v63 = vld [vmem:[#allocation12_spill] sm:$0xff] }
 0x6a2   : > { %v8288_v59 = vrot.slane %v7816_v11, %v19598_v25  ;;  %v7984_v36 = vadd.f32 %v9893_v58, %v7944_v13  ;;  %v8292_v61 = vrot.slane %v7816_v11, %v19603_v43  ;;  %v8464_v57 = vrot.slane %v7920_v16, %v19634_v9  ;;  %v19971_v58 = vld [vmem:[%s12703_s19 + $0x28] sm:$0x77] }
 0x6a3   : > { %v8468_v18 = vrot.slane %v7920_v16, %v19640_v27  ;;  %v8376_v40 = vrot.slane %v7896_v15, %v19598_v25  ;;  %v8380_v45 = vrot.slane %v7896_v15, %v19603_v43  ;;  %v8544_v7 = vrot.slane %v7768_v52, %v19598_v25 }
 0x6a4   : > { %v8548_v50 = vrot.slane %v7768_v52, %v19603_v43  ;;  %v8720_v32 = vrot.slane %v7984_v36, %v19598_v25  ;;  %v8724_v17 = vrot.slane %v7984_v36, %v19603_v43  ;;  %v8779_v49 = vsel %vm614_vm0, %v8024_v53, %v8112_v41 }
 0x6a5   : > { %v8780_v26 = vsel %vm614_vm0, %v8028_v51, %v8116_v33  ;;  %v8632_v0 = vrot.slane %v7928_v60, %v19630_v22  ;;  %v8636_v34 = vrot.slane %v7928_v60, %v19632_v37  ;;  %v8796_v38 = vsel %vm8789_vm5, %v8779_v49, %v8200_v8 }
 0x6a6   : > { %v8797_v6 = vsel %vm8789_vm5, %v8780_v26, %v8204_v55  ;;  %v8812_v20 = vsel %vm483_vm1, %v8796_v38, %v8288_v59  ;;  %v9063_v62 = vmul.f32 %v9004_v2, %v8720_v32  ;;  %v9064_v56 = vmul.f32 %v9008_v14, %v8724_v17 }
 0x6a7   : > { %v8813_v12 = vsel %vm483_vm1, %v8797_v6, %v8292_v61  ;;  %v8829_v5 = vsel %vm8822_vm6, %v8812_v20, %v8376_v40  ;;  %12280 = vrcp.f32 %v21590_v63  ;;  %v367_v4 = vmul.f32 %v19871_v24, %v19582_v21 }
 0x6a8   : > { %v8830_v48 = vsel %vm8822_vm6, %v8813_v12, %v8380_v45  ;;  %v8846_v47 = vsel %vm8839_vm7, %v8829_v5, %v8464_v57  ;;  %9095 = vst [vmem:[%s19754_s9 + $0xb0] sm:$0x1] %v9063_v62  ;;  %9096 = vst [vmem:[%s19754_s9 + $0xb8] sm:$0x1] %v9064_v56  ;;  %v19974_v41 = vsub.f32 0.0, %v19971_v58 }
 0x6a9   : > { %v8847_v11 = vsel %vm8839_vm7, %v8830_v48, %v8468_v18  ;;  %v8862_v31 = vsel %vm500_vm2, %v8846_v47, %v8544_v7  ;;  %v8932_v46 = vrot.slane %v367_v4, %v19598_v25  ;;  %v8936_v19 = vrot.slane %v367_v4, %v19603_v43 }
 0x6aa   : > { %v8863_v44 = vsel %vm500_vm2, %v8847_v11, %v8548_v50  ;;  %v8879_v42 = vsel %vm8872_vm8, %v8862_v31, %v8632_v0 }
 0x6ab   : > { %v8880_v39 = vsel %vm8872_vm8, %v8863_v44, %v8636_v34  ;;  %v9047_v54 = vmul.f32 %v9004_v2, %v8879_v42  ;;  %v19965_v16 = vrot.slane %v8932_v46, %v19598_v25  ;;  %v19968_v24 = vrot.slane %v8936_v19, %v19598_v25 }
 0x6ac   : > { %v9048_v23 = vmul.f32 %v9008_v14, %v8880_v39  ;;  %v12550_v14 = vld [vmem:[%s12703_s19 + $0x20] sm:$0x77] }
 0x6ad   : > { %9079 = vst [vmem:[%s19754_s9 + $0x30] sm:$0xff] %v9047_v54  ;;  %v7411_v3 = vpop.f32.mrf.mxu0  ;;  %v7737_v28 = vsub.f32 0.0, %v12550_v14 }
 0x6ae   : > { %9080 = vst [vmem:[%s19754_s9 + $0x38] sm:$0xff] %v9048_v23  ;;  %12282 = vtanh.f32 %v7411_v3  ;;  %v7482_v10 = vpop.f32.mrf.mxu1 }
 0x6af   : > { %12284 = vtanh.f32 %v7482_v10  ;;  %v7413_v30 = vpop.f32.mrf.mxu0 }
 0x6b0   : > { %12286 = vtanh.f32 %v7413_v30  ;;  %v7484_v52 = vpop.f32.mrf.mxu1 }
 0x6b1   : > { %12288 = vtanh.f32 %v7484_v52 }
 0x6b4   : > { %v12281_v1 = vpop.eup %12280 }
 0x6b5   : > { %v19961_v29 = vmul.f32 %v12281_v1, %v19582_v21 }
 0x6b7   : > { %v8940_v8 = vrot.slane %v19961_v29, %v19598_v25  ;;  %v8944_v55 = vrot.slane %v19961_v29, %v19603_v43 }
 0x6bb   : > { %v12283_v35 = vpop.eup %12282 }
 0x6bc   : > { %v12285_v13 = vpop.eup %12284 }
 0x6bd   : > { %v12287_v2 = vpop.eup %12286 }
 0x6be   : > { %v12289_v53 = vpop.eup %12288  ;;  %v7665_v51 = vcombine.low %v12283_v35, %v12287_v2  ;;  %v7777_v60 = vcombine.high %v12283_v35, %v12287_v2 }
 0x6bf   : > { %v19976_v33 = vcombine.low %v12285_v13, %v12289_v53  ;;  %v19978_v15 = vcombine.high %v12285_v13, %v12289_v53 }
 0x6c0   : > { %v7673_v59 = vrot.slane %v7665_v51, 7  ;;  %v7749_v36 = vrot.slane %v7665_v51, 5  ;;  %v7785_v61 = vrot.slane %v7777_v60, 6  ;;  %v7817_v57 = vmul.f32 %v7737_v28, %v7665_v51 }
 0x6c1   : > { %v7829_v18 = vrot.slane %v7665_v51, 6  ;;  %v7905_v40 = vrot.slane %v7777_v60, 7  ;;  %v7945_v45 = vmul.f32 %v12550_v14, %v7777_v60  ;;  %v7674_v7 = vrot.slane %v19976_v33, 7 }
 0x6c2   : > { %v7689_v50 = vmul.f32 %v12550_v14, %v7673_v59  ;;  %v7750_v32 = vrot.slane %v7749_v36, 4  ;;  %v7801_v17 = vmul.f32 %v7785_v61, %v7737_v28  ;;  %v8296_v49 = vrot.slane %v7817_v57, %v19598_v25 }
 0x6c3   : > { %v7830_v26 = vrot.slane %v7829_v18, 4  ;;  %v7921_v0 = vmul.f32 %v7905_v40, %v7737_v28  ;;  %v9894_v34 = vrot.slane %v7945_v45, 9  ;;  %v8300_v38 = vrot.slane %v7817_v57, %v19603_v43 }
 0x6c4   : > { %v9878_v6 = vrot.slane %v7689_v50, 9  ;;  %v7769_v20 = vmul.f32 %v7750_v32, %v7737_v28  ;;  %v7857_v12 = vmul.f32 %v12550_v14, %v7750_v32  ;;  %v8208_v62 = vrot.slane %v7801_v17, %v19634_v9 }
 0x6c5   : > { %v7849_v56 = vmul.f32 %v12550_v14, %v7830_v26  ;;  %v7929_v5 = vmul.f32 %v7830_v26, %v7737_v28  ;;  %v7985_v48 = vadd.f32 %v9894_v34, %v7945_v45  ;;  %v8212_v47 = vrot.slane %v7801_v17, %v19640_v27 }
 0x6c6   : > { %v7729_v11 = vadd.f32 %v9878_v6, %v7689_v50  ;;  %v9886_v31 = vrot.slane %v7857_v12, 10  ;;  %v8120_v44 = vrot.slane %v7769_v20, %v19630_v22  ;;  %v8124_v42 = vrot.slane %v7769_v20, %v19632_v37 }
 0x6c7   : > { %v8472_v39 = vrot.slane %v7921_v0, %v19634_v9  ;;  %v8476_v54 = vrot.slane %v7921_v0, %v19640_v27  ;;  %v8552_v23 = vrot.slane %v7769_v20, %v19598_v25  ;;  %v8556_v63 = vrot.slane %v7769_v20, %v19603_v43 }
 0x6c8   : > { %v7897_v3 = vadd.f32 %v9886_v31, %v7849_v56  ;;  %v8032_v10 = vrot.slane %v7729_v11, %v19630_v22  ;;  %v8036_v30 = vrot.slane %v7729_v11, %v19632_v37  ;;  %v8640_v52 = vrot.slane %v7929_v5, %v19630_v22 }
 0x6c9   : > { %v8644_v4 = vrot.slane %v7929_v5, %v19632_v37  ;;  %v8728_v1 = vrot.slane %v7985_v48, %v19598_v25  ;;  %v8732_v46 = vrot.slane %v7985_v48, %v19603_v43  ;;  %v7690_v19 = vmul.f32 %v19971_v58, %v7674_v7 }
 0x6ca   : > { %v8384_v35 = vrot.slane %v7897_v3, %v19598_v25  ;;  %v8388_v13 = vrot.slane %v7897_v3, %v19603_v43  ;;  %v8781_v2 = vsel %vm614_vm0, %v8032_v10, %v8120_v44  ;;  %v8782_v14 = vsel %vm614_vm0, %v8036_v30, %v8124_v42 }
 0x6cb   : > { %v8798_v28 = vsel %vm8789_vm5, %v8781_v2, %v8208_v62  ;;  %v8799_v53 = vsel %vm8789_vm5, %v8782_v14, %v8212_v47  ;;  %v9065_v51 = vmul.f32 %v19965_v16, %v8728_v1  ;;  %v9066_v60 = vmul.f32 %v19968_v24, %v8732_v46 }
 0x6cc   : > { %v8814_v59 = vsel %vm483_vm1, %v8798_v28, %v8296_v49  ;;  %v8815_v36 = vsel %vm483_vm1, %v8799_v53, %v8300_v38  ;;  %v9879_v61 = vrot.slane %v7690_v19, 9  ;;  %v7751_v57 = vrot.slane %v19976_v33, 5 }
 0x6cd   : > { %v8831_v18 = vsel %vm8822_vm6, %v8814_v59, %v8384_v35  ;;  %v8832_v40 = vsel %vm8822_vm6, %v8815_v36, %v8388_v13  ;;  %9097 = vst [vmem:[%s19754_s9 + $0xc0] sm:$0x1] %v9065_v51  ;;  %9098 = vst [vmem:[%s19754_s9 + $0xc8] sm:$0x1] %v9066_v60  ;;  %v7786_v45 = vrot.slane %v19978_v15, 6  ;;  %v7818_v7 = vmul.f32 %v19974_v41, %v19976_v33 }
 0x6ce   : > { %v8848_v50 = vsel %vm8839_vm7, %v8831_v18, %v8472_v39  ;;  %v8849_v32 = vsel %vm8839_vm7, %v8832_v40, %v8476_v54  ;;  %v7730_v17 = vadd.f32 %v9879_v61, %v7690_v19  ;;  %v7752_v49 = vrot.slane %v7751_v57, 4 }
 0x6cf   : > { %v8864_v26 = vsel %vm500_vm2, %v8848_v50, %v8552_v23  ;;  %v8865_v0 = vsel %vm500_vm2, %v8849_v32, %v8556_v63  ;;  %v7802_v34 = vmul.f32 %v7786_v45, %v19974_v41  ;;  %v7831_v38 = vrot.slane %v19976_v33, 6 }
 0x6d0   : > { %v8881_v6 = vsel %vm8872_vm8, %v8864_v26, %v8640_v52  ;;  %v8882_v20 = vsel %vm8872_vm8, %v8865_v0, %v8644_v4  ;;  %v7770_v12 = vmul.f32 %v7752_v49, %v19974_v41  ;;  %v7858_v62 = vmul.f32 %v19971_v58, %v7752_v49  ;;  %v21591_v0 = vld [vmem:[#allocation13_spill] sm:$0xff] }
 0x6d1   : > { %v9049_v56 = vmul.f32 %v19965_v16, %v8881_v6  ;;  %v9050_v5 = vmul.f32 %v19968_v24, %v8882_v20  ;;  %v7832_v48 = vrot.slane %v7831_v38, 4  ;;  %v7906_v47 = vrot.slane %v19978_v15, 7 }
 0x6d2   : > { %v9887_v11 = vrot.slane %v7858_v62, 10  ;;  %v7946_v31 = vmul.f32 %v19971_v58, %v19978_v15  ;;  %v9020_v33 = vrot.slane %v8940_v8, %v19598_v25  ;;  %v9024_v44 = vrot.slane %v8944_v55, %v19598_v25 }
 0x6d3   : > { %9081 = vst [vmem:[%s19754_s9 + $0x40] sm:$0xff] %v9049_v56  ;;  %9082 = vst [vmem:[%s19754_s9 + $0x48] sm:$0xff] %v9050_v5  ;;  %v7850_v16 = vmul.f32 %v19971_v58, %v7832_v48  ;;  %v7922_v24 = vmul.f32 %v7906_v47, %v19974_v41  ;;  %v8040_v42 = vrot.slane %v7730_v17, %v19630_v22  ;;  %12290 = vrcp.f32 %v21591_v0 }
 0x6d4   : > { %v8044_v15 = vrot.slane %v7730_v17, %v19632_v37  ;;  %v7930_v39 = vmul.f32 %v7832_v48, %v19974_v41  ;;  %v9895_v54 = vrot.slane %v7946_v31, 9  ;;  %v8128_v8 = vrot.slane %v7770_v12, %v19630_v22 }
 0x6d5   : > { %v8132_v23 = vrot.slane %v7770_v12, %v19632_v37  ;;  %v7898_v63 = vadd.f32 %v9887_v11, %v7850_v16  ;;  %v8216_v29 = vrot.slane %v7802_v34, %v19634_v9  ;;  %v8220_v55 = vrot.slane %v7802_v34, %v19640_v27  ;;  %v21592_v34 = vld [vmem:[#allocation14_spill] sm:$0xff] }
 0x6d6   : > { %v8304_v58 = vrot.slane %v7818_v7, %v19598_v25  ;;  %v7986_v3 = vadd.f32 %v9895_v54, %v7946_v31  ;;  %v8308_v10 = vrot.slane %v7818_v7, %v19603_v43  ;;  %v8480_v30 = vrot.slane %v7922_v24, %v19634_v9  ;;  %v20094_v54 = vld [vmem:[%s12703_s19 + $0x38] sm:$0x77] }
 0x6d7   : > { %v8484_v52 = vrot.slane %v7922_v24, %v19640_v27  ;;  %v8392_v41 = vrot.slane %v7898_v63, %v19598_v25  ;;  %v8396_v4 = vrot.slane %v7898_v63, %v19603_v43  ;;  %v8560_v1 = vrot.slane %v7770_v12, %v19598_v25 }
 0x6d8   : > { %v8564_v46 = vrot.slane %v7770_v12, %v19603_v43  ;;  %v8736_v19 = vrot.slane %v7986_v3, %v19598_v25  ;;  %v8740_v35 = vrot.slane %v7986_v3, %v19603_v43  ;;  %v8783_v13 = vsel %vm614_vm0, %v8040_v42, %v8128_v8 }
 0x6d9   : > { %v8784_v2 = vsel %vm614_vm0, %v8044_v15, %v8132_v23  ;;  %v8648_v14 = vrot.slane %v7930_v39, %v19630_v22  ;;  %v8652_v28 = vrot.slane %v7930_v39, %v19632_v37  ;;  %v8800_v53 = vsel %vm8789_vm5, %v8783_v13, %v8216_v29 }
 0x6da   : > { %v8801_v51 = vsel %vm8789_vm5, %v8784_v2, %v8220_v55  ;;  %v8816_v60 = vsel %vm483_vm1, %v8800_v53, %v8304_v58  ;;  %v9067_v36 = vmul.f32 %v9020_v33, %v8736_v19  ;;  %v9068_v61 = vmul.f32 %v9024_v44, %v8740_v35 }
 0x6db   : > { %v8817_v59 = vsel %vm483_vm1, %v8801_v51, %v8308_v10  ;;  %v8833_v57 = vsel %vm8822_vm6, %v8816_v60, %v8392_v41  ;;  %12292 = vrcp.f32 %v21592_v34  ;;  %v20097_v8 = vsub.f32 0.0, %v20094_v54 }
 0x6dc   : > { %v8834_v18 = vsel %vm8822_vm6, %v8817_v59, %v8396_v4  ;;  %v8850_v40 = vsel %vm8839_vm7, %v8833_v57, %v8480_v30  ;;  %9099 = vst [vmem:[%s19754_s9 + $0xd0] sm:$0x1] %v9067_v36  ;;  %9100 = vst [vmem:[%s19754_s9 + $0xd8] sm:$0x1] %v9068_v61 }
 0x6dd   : > { %v8851_v45 = vsel %vm8839_vm7, %v8834_v18, %v8484_v52  ;;  %v8866_v7 = vsel %vm500_vm2, %v8850_v40, %v8560_v1 }
 0x6de   : > { %v8867_v50 = vsel %vm500_vm2, %v8851_v45, %v8564_v46  ;;  %v8883_v32 = vsel %vm8872_vm8, %v8866_v7, %v8648_v14 }
 0x6df   : > { %v8884_v17 = vsel %vm8872_vm8, %v8867_v50, %v8652_v28  ;;  %v9051_v49 = vmul.f32 %v9020_v33, %v8883_v32 }
 0x6e0   : > { %v9052_v26 = vmul.f32 %v9024_v44, %v8884_v17  ;;  %v12291_v62 = vpop.eup %12290  ;;  %v12552_v44 = vld [vmem:[%s12703_s19 + $0x30] sm:$0x77]  ;;  %s9903_s19 = sshll.u32 (%p12675_p4), %s12663_s0, 7 }
 0x6e1   : > { %9083 = vst [vmem:[%s19754_s9 + $0x50] sm:$0xff] %v9051_v49  ;;  %v369_v56 = vmul.f32 %v12291_v62, %v19582_v21  ;;  %v7739_v16 = vsub.f32 0.0, %v12552_v44  ;;  %s20222_s12 = scalar_lea.vmem (%p12675_p4), %s20301_s6, %s9903_s19 }
 0x6e2   : > { %9084 = vst [vmem:[%s19754_s9 + $0x58] sm:$0xff] %v9052_v26 }
 0x6e3   : > { %v8948_v47 = vrot.slane %v369_v56, %v19598_v25  ;;  %v8952_v11 = vrot.slane %v369_v56, %v19603_v43 }
 0x6e5   : > { %v20100_v23 = vrot.slane %v8948_v47, %v19598_v25  ;;  %v20103_v63 = vrot.slane %v8952_v11, %v19598_v25 }
 0x6e8   : > { %v12293_v5 = vpop.eup %12292 }
 0x6e9   : > { %v20090_v31 = vmul.f32 %v12293_v5, %v19582_v21 }
 0x6eb   : > { %v8956_v29 = vrot.slane %v20090_v31, %v19598_v25  ;;  %v8960_v4 = vrot.slane %v20090_v31, %v19603_v43 }
 0x725   : > { %v7553_v38 = vpop.f32.mrf.mxu0 }
 0x726   : > { %12294 = vtanh.f32 %v7553_v38  ;;  %v7624_v6 = vpop.f32.mrf.mxu1 }
 0x727   : > { %12296 = vtanh.f32 %v7624_v6  ;;  %v7555_v20 = vpop.f32.mrf.mxu0 }
 0x728   : > { %12298 = vtanh.f32 %v7555_v20  ;;  %v7626_v12 = vpop.f32.mrf.mxu1 }
 0x729   : > { %12300 = vtanh.f32 %v7626_v12 }
 0x733   : > { %v12295_v48 = vpop.eup %12294 }
 0x734   : > { %v12297_v33 = vpop.eup %12296 }
 0x735   : > { %v12299_v24 = vpop.eup %12298 }
 0x736   : > { %v12301_v42 = vpop.eup %12300  ;;  %v7667_v15 = vcombine.low %v12295_v48, %v12299_v24  ;;  %v7779_v39 = vcombine.high %v12295_v48, %v12299_v24 }
 0x737   : > { %v20105_v21 = vcombine.low %v12297_v33, %v12301_v42  ;;  %v20111_v35 = vcombine.high %v12297_v33, %v12301_v42 }
 0x738   : > { %v7675_v55 = vrot.slane %v7667_v15, 7  ;;  %v7753_v58 = vrot.slane %v7667_v15, 5  ;;  %v7787_v3 = vrot.slane %v7779_v39, 6  ;;  %v7819_v10 = vmul.f32 %v7739_v16, %v7667_v15 }
 0x739   : > { %v7833_v30 = vrot.slane %v7667_v15, 6  ;;  %v7907_v52 = vrot.slane %v7779_v39, 7  ;;  %v7947_v41 = vmul.f32 %v12552_v44, %v7779_v39  ;;  %v7676_v28 = vrot.slane %v20105_v21, 7 }
 0x73a   : > { %v7691_v1 = vmul.f32 %v12552_v44, %v7675_v55  ;;  %v7754_v46 = vrot.slane %v7753_v58, 4  ;;  %v7803_v19 = vmul.f32 %v7787_v3, %v7739_v16  ;;  %v8312_v59 = vrot.slane %v7819_v10, %v19598_v25 }
 0x73b   : > { %v7834_v13 = vrot.slane %v7833_v30, 4  ;;  %v7923_v2 = vmul.f32 %v7907_v52, %v7739_v16  ;;  %v9896_v14 = vrot.slane %v7947_v41, 9  ;;  %v8316_v18 = vrot.slane %v7819_v10, %v19603_v43 }
 0x73c   : > { %v9880_v53 = vrot.slane %v7691_v1, 9  ;;  %v7771_v51 = vmul.f32 %v7754_v46, %v7739_v16  ;;  %v7859_v60 = vmul.f32 %v12552_v44, %v7754_v46  ;;  %v8224_v57 = vrot.slane %v7803_v19, %v19634_v9 }
 0x73d   : > { %v7851_v36 = vmul.f32 %v12552_v44, %v7834_v13  ;;  %v7987_v61 = vadd.f32 %v9896_v14, %v7947_v41  ;;  %v7931_v7 = vmul.f32 %v7834_v13, %v7739_v16  ;;  %v8228_v50 = vrot.slane %v7803_v19, %v19640_v27 }
 0x73e   : > { %v7731_v40 = vadd.f32 %v9880_v53, %v7691_v1  ;;  %v9888_v45 = vrot.slane %v7859_v60, 10  ;;  %v8136_v32 = vrot.slane %v7771_v51, %v19630_v22  ;;  %v8140_v17 = vrot.slane %v7771_v51, %v19632_v37 }
 0x73f   : > { %v8488_v49 = vrot.slane %v7923_v2, %v19634_v9  ;;  %v8492_v26 = vrot.slane %v7923_v2, %v19640_v27  ;;  %v8568_v6 = vrot.slane %v7771_v51, %v19598_v25  ;;  %v8572_v20 = vrot.slane %v7771_v51, %v19603_v43 }
 0x740   : > { %v7899_v0 = vadd.f32 %v9888_v45, %v7851_v36  ;;  %v8048_v34 = vrot.slane %v7731_v40, %v19630_v22  ;;  %v8052_v38 = vrot.slane %v7731_v40, %v19632_v37  ;;  %v8744_v12 = vrot.slane %v7987_v61, %v19598_v25 }
 0x741   : > { %v8748_v62 = vrot.slane %v7987_v61, %v19603_v43  ;;  %v7692_v56 = vmul.f32 %v20094_v54, %v7676_v28  ;;  %v7755_v55 = vrot.slane %v20105_v21, 5  ;;  %v8656_v58 = vrot.slane %v7931_v7, %v19630_v22 }
 0x742   : > { %v8400_v5 = vrot.slane %v7899_v0, %v19598_v25  ;;  %v8404_v48 = vrot.slane %v7899_v0, %v19603_v43  ;;  %v8785_v47 = vsel %vm614_vm0, %v8048_v34, %v8136_v32  ;;  %v8786_v11 = vsel %vm614_vm0, %v8052_v38, %v8140_v17 }
 0x743   : > { %v8802_v33 = vsel %vm8789_vm5, %v8785_v47, %v8224_v57  ;;  %v8803_v44 = vsel %vm8789_vm5, %v8786_v11, %v8228_v50  ;;  %v9069_v16 = vmul.f32 %v20100_v23, %v8744_v12  ;;  %v9070_v24 = vmul.f32 %v20103_v63, %v8748_v62 }
 0x744   : > { %v8818_v42 = vsel %vm483_vm1, %v8802_v33, %v8312_v59  ;;  %v8819_v15 = vsel %vm483_vm1, %v8803_v44, %v8316_v18  ;;  %v9881_v39 = vrot.slane %v7692_v56, 9  ;;  %v8660_v3 = vrot.slane %v7931_v7, %v19632_v37 }
 0x745   : > { %v8835_v10 = vsel %vm8822_vm6, %v8818_v42, %v8400_v5  ;;  %v8836_v30 = vsel %vm8822_vm6, %v8819_v15, %v8404_v48  ;;  %9101 = vst [vmem:[%s19754_s9 + $0xe0] sm:$0x1] %v9069_v16  ;;  %9102 = vst [vmem:[%s19754_s9 + $0xe8] sm:$0x1] %v9070_v24  ;;  %v7756_v1 = vrot.slane %v7755_v55, 4  ;;  %v7788_v46 = vrot.slane %v20111_v35, 6 }
 0x746   : > { %v8852_v52 = vsel %vm8839_vm7, %v8835_v10, %v8488_v49  ;;  %v8853_v41 = vsel %vm8839_vm7, %v8836_v30, %v8492_v26  ;;  %v7732_v2 = vadd.f32 %v9881_v39, %v7692_v56  ;;  %v7835_v14 = vrot.slane %v20105_v21, 6 }
 0x747   : > { %v8868_v19 = vsel %vm500_vm2, %v8852_v52, %v8568_v6  ;;  %v8869_v13 = vsel %vm500_vm2, %v8853_v41, %v8572_v20  ;;  %v7772_v51 = vmul.f32 %v7756_v1, %v20097_v8  ;;  %v7860_v60 = vmul.f32 %v20094_v54, %v7756_v1  ;;  %v9131_v1 = vld [vmem:[%s19754_s9 + $0x10] sm:$0xff] (%p12675_p4) }
 0x748   : > { %v8885_v28 = vsel %vm8872_vm8, %v8868_v19, %v8656_v58  ;;  %v8886_v53 = vsel %vm8872_vm8, %v8869_v13, %v8660_v3  ;;  %v7836_v61 = vrot.slane %v7835_v14, 4  ;;  %v7908_v57 = vrot.slane %v20111_v35, 7  ;;  %v9135_v19 = vld [vmem:[%s19754_s9 + $0x20] sm:$0xff] (%p12675_p4)  ;;  %v9137_v13 = vld [vmem:[%s19754_s9 + $0x28] sm:$0xff] (%p12675_p4)  ;;  %9132 = vst [vmem:[%s20222_s12 + $0x10] sm:$0xff] (%p12675_p4), %v9131_v1  ;;  %v9141_v14 = vld [vmem:[%s19754_s9 + $0x38] sm:$0xff] (%p12675_p4) }
 0x749   : > { %v9053_v59 = vmul.f32 %v20100_v23, %v8885_v28  ;;  %v9054_v36 = vmul.f32 %v20103_v63, %v8886_v53  ;;  %v7804_v18 = vmul.f32 %v7788_v46, %v20097_v8  ;;  %v9889_v40 = vrot.slane %v7860_v60, 10  ;;  %v9133_v46 = vld [vmem:[%s19754_s9 + $0x18] sm:$0xff] (%p12675_p4)  ;;  %9136 = vst [vmem:[%s20222_s12 + $0x20] sm:$0xff] (%p12675_p4), %v9135_v19  ;;  %9138 = vst [vmem:[%s20222_s12 + $0x28] sm:$0xff] (%p12675_p4), %v9137_v13  ;;  %v9143_v28 = vld [vmem:[%s19754_s9 + $0x40] sm:$0xff] (%p12675_p4) }
 0x74a   : > { %v7948_v45 = vmul.f32 %v20094_v54, %v20111_v35  ;;  %v7820_v7 = vmul.f32 %v20097_v8, %v20105_v21  ;;  %v7852_v50 = vmul.f32 %v20094_v54, %v7836_v61  ;;  %v9036_v23 = vrot.slane %v8956_v29, %v19598_v25  ;;  %9134 = vst [vmem:[%s20222_s12 + $0x18] sm:$0xff] (%p12675_p4), %v9133_v46  ;;  %v9145_v53 = vld [vmem:[%s19754_s9 + $0x48] sm:$0xff] (%p12675_p4)  ;;  %v9149_v60 = vld [vmem:[%s19754_s9 + $0x58] sm:$0xff] (%p12675_p4) }
 0x74b   : > { %9085 = vst [vmem:[%s19754_s9 + $0x60] sm:$0xff] %v9053_v59  ;;  %9086 = vst [vmem:[%s19754_s9 + $0x68] sm:$0xff] %v9054_v36  ;;  %v8056_v32 = vrot.slane %v7732_v2, %v19630_v22  ;;  %v8060_v17 = vrot.slane %v7732_v2, %v19632_v37  ;;  %v9040_v35 = vrot.slane %v8960_v4, %v19598_v25  ;;  %v9139_v2 = vld [vmem:[%s19754_s9 + $0x30] sm:$0xff] (%p12675_p4) }
 0x74c   : > { %v9897_v63 = vrot.slane %v7948_v45, 9  ;;  %v7900_v49 = vadd.f32 %v9889_v40, %v7852_v50  ;;  %v7924_v21 = vmul.f32 %v7908_v57, %v20097_v8  ;;  %v7932_v54 = vmul.f32 %v7836_v61, %v20097_v8  ;;  %9140 = vst [vmem:[%s20222_s12 + $0x30] sm:$0xff] (%p12675_p4), %v9139_v2  ;;  %9142 = vst [vmem:[%s20222_s12 + $0x38] sm:$0xff] (%p12675_p4), %v9141_v14  ;;  %v9161_v40 = vld [vmem:[%s19754_s9 + $0x88] sm:$0xff] (%p12675_p4)  ;;  %v9167_v50 = vld [vmem:[%s19754_s9 + $0xa0] sm:$0xff] (%p12675_p4) }
 0x74d   : > { %v8144_v26 = vrot.slane %v7772_v51, %v19630_v22  ;;  %v8148_v29 = vrot.slane %v7772_v51, %v19632_v37  ;;  %v8232_v34 = vrot.slane %v7804_v18, %v19634_v9  ;;  %v8236_v38 = vrot.slane %v7804_v18, %v19640_v27  ;;  %9144 = vst [vmem:[%s20222_s12 + $0x40] sm:$0xff] (%p12675_p4), %v9143_v28  ;;  %v9159_v18 = vld [vmem:[%s19754_s9 + $0x80] sm:$0xff] (%p12675_p4) }
 0x74e   : > { %v7988_v0 = vadd.f32 %v9897_v63, %v7948_v45  ;;  %v8320_v6 = vrot.slane %v7820_v7, %v19598_v25  ;;  %v8324_v20 = vrot.slane %v7820_v7, %v19603_v43  ;;  %v8408_v31 = vrot.slane %v7900_v49, %v19598_v25  ;;  %9146 = vst [vmem:[%s20222_s12 + $0x48] sm:$0xff] (%p12675_p4), %v9145_v53  ;;  %v9163_v45 = vld [vmem:[%s19754_s9 + $0x90] sm:$0xff] (%p12675_p4)  ;;  %v9165_v7 = vld [vmem:[%s19754_s9 + $0x98] sm:$0xff] (%p12675_p4) }
 0x74f   : > { %v8412_v4 = vrot.slane %v7900_v49, %v19603_v43  ;;  %v8787_v62 = vsel %vm614_vm0, %v8056_v32, %v8144_v26  ;;  %v8788_v56 = vsel %vm614_vm0, %v8060_v17, %v8148_v29  ;;  %v8496_v5 = vrot.slane %v7924_v21, %v19634_v9  ;;  %9150 = vst [vmem:[%s20222_s12 + $0x58] sm:$0xff] (%p12675_p4), %v9149_v60  ;;  %v9171_v63 = vld [vmem:[%s19754_s9 + $0xb0] sm:$0xff] (%p12675_p4)  ;;  %v9173_v32 = vld [vmem:[%s19754_s9 + $0xb8] sm:$0xff] (%p12675_p4)  ;;  %v9175_v17 = vld [vmem:[%s19754_s9 + $0xc0] sm:$0xff] (%p12675_p4) }
 0x750   : > { %v8752_v12 = vrot.slane %v7988_v0, %v19598_v25  ;;  %v8756_v8 = vrot.slane %v7988_v0, %v19603_v43  ;;  %v8500_v48 = vrot.slane %v7924_v21, %v19640_v27  ;;  %v8804_v47 = vsel %vm8789_vm5, %v8787_v62, %v8232_v34  ;;  %9160 = vst [vmem:[%s20222_s12 + $0x100] sm:$0xff] (%p12675_p4), %v9159_v18  ;;  %v9179_v49 = vld [vmem:[%s19754_s9 + $0xd0] sm:$0xff] (%p12675_p4)  ;;  %v9181_v21 = vld [vmem:[%s19754_s9 + $0xd8] sm:$0xff] (%p12675_p4)  ;;  %v9185_v26 = vld [vmem:[%s19754_s9 + $0xe8] sm:$0xff] (%p12675_p4) }
 0x751   : > { %v8805_v11 = vsel %vm8789_vm5, %v8788_v56, %v8236_v38  ;;  %v8820_v33 = vsel %vm483_vm1, %v8804_v47, %v8320_v6  ;;  %v8576_v42 = vrot.slane %v7772_v51, %v19598_v25  ;;  %v8580_v15 = vrot.slane %v7772_v51, %v19603_v43  ;;  %v9147_v51 = vld [vmem:[%s19754_s9 + $0x50] sm:$0xff] (%p12675_p4)  ;;  %9162 = vst [vmem:[%s20222_s12 + $0x108] sm:$0xff] (%p12675_p4), %v9161_v40 }
 0x752   : > { %v8821_v44 = vsel %vm483_vm1, %v8805_v11, %v8324_v20  ;;  %v9071_v16 = vmul.f32 %v9036_v23, %v8752_v12  ;;  %v9072_v24 = vmul.f32 %v9040_v35, %v8756_v8  ;;  %v8837_v9 = vsel %vm8822_vm6, %v8820_v33, %v8408_v31  ;;  %9148 = vst [vmem:[%s20222_s12 + $0x50] sm:$0xff] (%p12675_p4), %v9147_v51  ;;  %v9151_v59 = vld [vmem:[%s19754_s9 + $0x60] sm:$0xff] (%p12675_p4)  ;;  %v9153_v36 = vld [vmem:[%s19754_s9 + $0x68] sm:$0xff] (%p12675_p4) }
 0x753   : > { %v8838_v27 = vsel %vm8822_vm6, %v8821_v44, %v8412_v4  ;;  %v8664_v39 = vrot.slane %v7932_v54, %v19630_v22  ;;  %v8668_v55 = vrot.slane %v7932_v54, %v19632_v37  ;;  %v8854_v58 = vsel %vm8839_vm7, %v8837_v9, %v8496_v5  ;;  %v9127_v22 = vld [vmem:[%s19754_s9] sm:$0xff] (%p12675_p4)  ;;  %v9129_v37 = vld [vmem:[%s19754_s9 + $0x8] sm:$0xff] (%p12675_p4)  ;;  %9152 = vst [vmem:[%s20222_s12 + $0x60] sm:$0xff] (%p12675_p4), %v9151_v59 }
 0x754   : > { %v8855_v3 = vsel %vm8839_vm7, %v8838_v27, %v8500_v48  ;;  %9103 = vst [vmem:[%s19754_s9 + $0xf0] sm:$0x1] %v9071_v16  ;;  %9104 = vst [vmem:[%s19754_s9 + $0xf8] sm:$0x1] %v9072_v24  ;;  %v8870_v25 = vsel %vm500_vm2, %v8854_v58, %v8576_v42  ;;  %v9183_v54 = vld [vmem:[%s19754_s9 + $0xe0] sm:$0xff] (%p12675_p4) }
 0x755   : > { %v8871_v10 = vsel %vm500_vm2, %v8855_v3, %v8580_v15  ;;  %v8887_v43 = vsel %vm8872_vm8, %v8870_v25, %v8664_v39  ;;  %9111 = sbr.rel (!%p12675_p4) target bundleno = 1890 (0x762), region = 52  ;;  %9128 = vst [vmem:[%s20222_s12] sm:$0xff] (%p12675_p4), %v9127_v22  ;;  %9130 = vst [vmem:[%s20222_s12 + $0x8] sm:$0xff] (%p12675_p4), %v9129_v37 }
 0x756   : > { %v8888_v30 = vsel %vm8872_vm8, %v8871_v10, %v8668_v55  ;;  %v9055_v52 = vmul.f32 %v9036_v23, %v8887_v43  ;;  %9154 = vst [vmem:[%s20222_s12 + $0x68] sm:$0xff] (%p12675_p4), %v9153_v36  ;;  %9164 = vst [vmem:[%s20222_s12 + $0x110] sm:$0xff] (%p12675_p4), %v9163_v45  ;;  %v9169_v23 = vld [vmem:[%s19754_s9 + $0xa8] sm:$0xff] (%p12675_p4) }
 0x757   : > { %v9056_v41 = vmul.f32 %v9040_v35, %v8888_v30  ;;  %9166 = vst [vmem:[%s20222_s12 + $0x118] sm:$0xff] (%p12675_p4), %v9165_v7  ;;  %9168 = vst [vmem:[%s20222_s12 + $0x120] sm:$0xff] (%p12675_p4), %v9167_v50  ;;  %v9177_v35 = vld [vmem:[%s19754_s9 + $0xc8] sm:$0xff] (%p12675_p4) }
 0x758   : > { %9087 = vst [vmem:[%s19754_s9 + $0x70] sm:$0xff] %v9055_v52  ;;  %9170 = vst [vmem:[%s20222_s12 + $0x128] sm:$0xff] (%p12675_p4), %v9169_v23 }
 0x759   : > { %9088 = vst [vmem:[%s19754_s9 + $0x78] sm:$0xff] %v9056_v41  ;;  %9172 = vst [vmem:[%s20222_s12 + $0x130] sm:$0xff] (%p12675_p4), %v9171_v63 }
 0x75a   : > { %9174 = vst [vmem:[%s20222_s12 + $0x138] sm:$0xff] %v9173_v32  ;;  %9176 = vst [vmem:[%s20222_s12 + $0x140] sm:$0xff] %v9175_v17 }
 0x75b   : > { %9178 = vst [vmem:[%s20222_s12 + $0x148] sm:$0xff] %v9177_v35  ;;  %9180 = vst [vmem:[%s20222_s12 + $0x150] sm:$0xff] %v9179_v49  ;;  %v9187_v0 = vld [vmem:[%s19754_s9 + $0xf0] sm:$0xff]  ;;  %v9189_v29 = vld [vmem:[%s19754_s9 + $0xf8] sm:$0xff] }
 0x75c   : > { %9182 = vst [vmem:[%s20222_s12 + $0x158] sm:$0xff] %v9181_v21  ;;  %9184 = vst [vmem:[%s20222_s12 + $0x160] sm:$0xff] %v9183_v54 }
 0x75d   : > { %9186 = vst [vmem:[%s20222_s12 + $0x168] sm:$0xff] %v9185_v26  ;;  %9188 = vst [vmem:[%s20222_s12 + $0x170] sm:$0xff] %v9187_v0 }
 0x75e   : > { %9190 = vst [vmem:[%s20222_s12 + $0x178] sm:$0xff] %v9189_v29 }
 0x75f   : > { %v9155_v61 = vld [vmem:[%s19754_s9 + $0x70] sm:$0xff] }
 0x760   : > { %9156 = vst [vmem:[%s20222_s12 + $0x70] sm:$0xff] %v9155_v61  ;;  %v9157_v57 = vld [vmem:[%s19754_s9 + $0x78] sm:$0xff] }
 0x761   : > { %9158 = vst [vmem:[%s20222_s12 + $0x78] sm:$0xff] %v9157_v57 }
 0x762 PF: > { %p15_p4 = scmp.ge.s32.totalorder %s12665_s26, 4   ;;  %s21593_s23 = smov %s12602_s24 }
 0x763   : > { %s21594_s24 = smov %s12673_s29  ;;  %s21595_s25 = smov %s12665_s26 }
 0x764   :  { %17 = sbr.rel (!%p15_p4) target bundleno = 4 (0x4), region = 102 }
 0x769   :  { %9206 = vsyncpa [#allocation4], 1 }
 0x76a   :  { %9208 = vsyncpa [#allocation4 + $0x1], 1 }

</bundles_post_ra>
